<compile_context>
chip_gen: v5e
topology: v5e:2x2
jax: 0.10.0
libtpu: 0.0.40
codegen_flags: <defaults>
</compile_context>

<pallas_src>
import jax
import jax.numpy as jnp
from jax.experimental import pallas as pl
from jax.experimental.pallas import tpu as pltpu

_VMEM = pl.BlockSpec(memory_space=pltpu.MemorySpace.VMEM)

AUX_FEATURES = 9
SPEC_LEN = 52


def _elu(y):
    # ELU(alpha=1.0), overflow-safe.
    return jnp.where(y > 0, y, jnp.exp(jnp.minimum(y, 0.0)) - 1.0)


# ------------------------- parameter initialization ------------------------

class _KeyGen:
    def __init__(self, seed):
        self._key = jax.random.PRNGKey(seed)

    def __call__(self):
        self._key, sub = jax.random.split(self._key)
        return sub


def _bn_affine(kg, c):
    gamma = jax.random.uniform(kg(), (c,), minval=0.5, maxval=1.5)
    beta = 0.1 * jax.random.normal(kg(), (c,))
    mean = 0.1 * jax.random.normal(kg(), (c,))
    var = jax.random.uniform(kg(), (c,), minval=0.5, maxval=1.5)
    scale = gamma / jnp.sqrt(var + 1e-5)
    shift = beta - mean * scale
    return scale, shift


def _pack_bss(b, scale, shift):
    # rows: [bias, bn_scale, bn_shift] -> (3, C); kernel slices single rows.
    return jnp.stack([b, scale, shift], axis=0).astype(jnp.float32)


def init_conv_block(kg, c_in, c_out, k):
    w = 0.1 * jax.random.normal(kg(), (c_out, c_in, k))     # PyTorch conv layout
    b = 0.1 * jax.random.normal(kg(), (c_out,))
    scale, shift = _bn_affine(kg, c_out)
    if c_in == 1:
        w_k = jnp.transpose(w[:, 0, :], (1, 0))              # (k, c_out)
    else:
        w_k = jnp.transpose(w, (2, 1, 0))                    # (k, c_in, c_out)
    return dict(w=w_k.astype(jnp.float32), bss=_pack_bss(b, scale, shift))


def init_resmlp(kg, in_features, out_features, hidden):
    blocks, prev = [], in_features
    for h in hidden:
        w = 0.1 * jax.random.normal(kg(), (prev, h))
        b = 0.1 * jax.random.normal(kg(), (h,))
        scale, shift = _bn_affine(kg, h)
        blocks.append(dict(w=w.astype(jnp.float32), bss=_pack_bss(b, scale, shift)))
        prev = h
    w_out = 0.1 * jax.random.normal(kg(), (prev, out_features))
    b_out = 0.1 * jax.random.normal(kg(), (out_features,))
    return dict(blocks=blocks, w_out=w_out.astype(jnp.float32),
                b_out=b_out.reshape(1, -1).astype(jnp.float32))


def init_multi_input_embedding(seed=0, out_features=64):
    kg = _KeyGen(seed)
    cnn = [init_conv_block(kg, 1, 256, 3),
           init_conv_block(kg, 256, 128, 5),
           init_conv_block(kg, 128, 64, 7)]
    spec = init_resmlp(kg, SPEC_LEN, 128, [64] * 1 + [32] * 3 + [64] * 1)
    aux = init_resmlp(kg, AUX_FEATURES, 8, [16] * 1 + [8] * 2)
    emb = init_resmlp(kg, 128 + 8, out_features, [256] * 1 + [128] * 2 + [64] * 5)

    # Split the first fusion Linear:  cat(z0+z2, z1) @ W + b
    #   == z0 @ W[:128] + z2 @ W[:128] + z1 @ W[128:] + b.
    # Also fold torch's channel-major CNN flatten (feature index = c*2 + l)
    # directly into the weight rows: w_cnn0 = rows c*2+0, w_cnn1 = rows c*2+1,
    # so the kernel never needs a transpose / interleave of the conv output.
    first = emb['blocks'][0]
    W1 = first['w']                                           # (136, 256)
    emb_first = dict(w_z2=W1[:128, :],
                     w_cnn0=W1[0:128:2, :],
                     w_cnn1=W1[1:128:2, :],
                     w_aux=W1[128:, :],
                     bss=first['bss'])
    emb = dict(first=emb_first, blocks=emb['blocks'][1:],
               w_out=emb['w_out'], b_out=emb['b_out'])
    return dict(cnn=cnn, spec=spec, aux=aux, emb=emb)


# ------------------------------ fused kernel --------------------------------

def _build_kernel(B, conv_plan, conv_geo, spec_plan, auxmlp_plan, embf_plan,
                  emb_plan, x2d_i, xT_i, xaux_i):
    def kernel(*refs):
        out_ref = refs[-1]

        def linear_block(h, blk):
            w = refs[blk['w']][...]
            bss = refs[blk['bss']]
            y = jnp.dot(h, w, preferred_element_type=jnp.float32) + bss[0:1, :]
            y = _elu(y)
            y = y * bss[1:2, :] + bss[2:3, :]                 # BN (inference affine)
            if blk['res']:
                y = y + h
            return y

        def resmlp(h, plan):
            for blk in plan['blocks']:
                h = linear_block(h, blk)
            return (jnp.dot(h, refs[plan['w_out']][...],
                            preferred_element_type=jnp.float32)
                    + refs[plan['b_out']][...])

        # ---- spectrum & aux embeddings (batched 2-D, VMEM resident) ----
        z2 = resmlp(refs[x2d_i][...], spec_plan)              # (B, 128)
        z1 = resmlp(refs[xaux_i][...], auxmlp_plan)           # (B, 8)

        # ---- CNN embedding ----
        xT = refs[xT_i][...]                                  # (52, B)
        xms = xT - jnp.mean(xT, axis=0, keepdims=True)        # MeanSubtractionLayer

        # MaxPool1d(2,2) as 0/1 even/odd row-selector matmuls.
        def pool_sel(l_out):
            l2 = l_out // 2
            r = jax.lax.broadcasted_iota(jnp.int32, (l2, l_out), 0)
            c = jax.lax.broadcasted_iota(jnp.int32, (l2, l_out), 1)
            even = (c == 2 * r).astype(jnp.float32)
            odd = (c == 2 * r + 1).astype(jnp.float32)
            return even, odd

        sels = [pool_sel(l_out) for (l_out, _) in conv_geo]   # hoisted out of batch loop

        def maxpool_bn(y, sel, bss):
            even, odd = sel
            p = jnp.maximum(jnp.dot(even, y, preferred_element_type=jnp.float32),
                            jnp.dot(odd, y, preferred_element_type=jnp.float32))
            return p * bss[1:2, :] + bss[2:3, :]              # BN (inference affine)

        cnn_rows = []
        for b in range(B):
            h = xms[:, b:b + 1]                               # (52, 1) per-sample column
            for ci, blk in enumerate(conv_plan):
                l_out, _ = conv_geo[ci]
                w = refs[blk['w']]
                bss = refs[blk['bss']]
                if blk['cin1']:                               # Conv1d(1 -> C): broadcast form
                    acc = h[0:l_out, :] * w[0:1, :]
                    for kk in range(1, blk['k']):
                        acc = acc + h[kk:kk + l_out, :] * w[kk:kk + 1, :]
                else:                                         # Conv1d as k shifted matmuls
                    acc = jnp.dot(h[0:l_out, :], w[0],
                                  preferred_element_type=jnp.float32)
                    for kk in range(1, blk['k']):
                        acc = acc + jnp.dot(h[kk:kk + l_out, :], w[kk],
                                            preferred_element_type=jnp.float32)
                y = _elu(acc + bss[0:1, :])                   # conv bias + ELU
                h = maxpool_bn(y, sels[ci], bss)              # MaxPool(2,2) + BatchNorm
            # h is (2, 64): last conv output, channels-last.  torch's
            # channel-major flatten lives in the split fusion weights.
            row = (jnp.dot(h[0:1, :], refs[embf_plan['w_cnn0']][...],
                           preferred_element_type=jnp.float32)
                   + jnp.dot(h[1:2, :], refs[embf_plan['w_cnn1']][...],
                             preferred_element_type=jnp.float32))
            cnn_rows.append(row)                              # (1, 256)
        z0w = jnp.concatenate(cnn_rows, axis=0)               # (B, 256) == z0 @ W1[:128]

        # ---- fusion ResMLP (first block fused with the concat) ----
        bss1 = refs[embf_plan['bss']]
        pre = (z0w
               + jnp.dot(z2, refs[embf_plan['w_z2']][...],
                         preferred_element_type=jnp.float32)
               + jnp.dot(z1, refs[embf_plan['w_aux']][...],
                         preferred_element_type=jnp.float32)
               + bss1[0:1, :])
        hfuse = _elu(pre) * bss1[1:2, :] + bss1[2:3, :]       # 136 != 256 -> no residual
        out_ref[...] = resmlp(hfuse, emb_plan)                # (B, out_features)

    return kernel


# ------------------------------ forward pass --------------------------------

def multi_input_embedding_forward(params, x, x_prime):
    """x: (B, 1, 52) (NCL, single channel);  x_prime: (B, >=9)."""
    B = x.shape[0]
    x2d = x.reshape(B, -1).astype(jnp.float32)                # nn.Flatten (C=1)
    xT = jnp.transpose(x2d)                                   # (52, B) column view for CNN
    x_aux = x_prime[:, :AUX_FEATURES].astype(jnp.float32)     # (B, 9)

    args = []

    def add(a):
        args.append(a)
        return len(args) - 1

    x2d_i, xT_i, xaux_i = add(x2d), add(xT), add(x_aux)

    conv_plan, conv_geo, L = [], [], x2d.shape[1]
    for p in params['cnn']:
        k = p['w'].shape[0]
        conv_plan.append(dict(w=add(p['w']), bss=add(p['bss']),
                              k=k, cin1=(p['w'].ndim == 2)))
        l_out = L - k + 1
        conv_geo.append((l_out, l_out // 2))
        L = l_out // 2

    def add_mlp(mp):
        blocks = [dict(w=add(b['w']), bss=add(b['bss']),
                       res=(b['w'].shape[0] == b['w'].shape[1]))
                  for b in mp['blocks']]
        return dict(blocks=blocks, w_out=add(mp['w_out']), b_out=add(mp['b_out']))

    spec_plan = add_mlp(params['spec'])
    auxmlp_plan = add_mlp(params['aux'])

    ef = params['emb']['first']
    embf_plan = dict(w_z2=add(ef['w_z2']), w_cnn0=add(ef['w_cnn0']),
                     w_cnn1=add(ef['w_cnn1']), w_aux=add(ef['w_aux']),
                     bss=add(ef['bss']))
    emb_plan = dict(blocks=[dict(w=add(b['w']), bss=add(b['bss']),
                                 res=(b['w'].shape[0] == b['w'].shape[1]))
                            for b in params['emb']['blocks']],
                    w_out=add(params['emb']['w_out']),
                    b_out=add(params['emb']['b_out']))

    out_features = params['emb']['w_out'].shape[1]
    kernel = _build_kernel(B, conv_plan, conv_geo, spec_plan, auxmlp_plan,
                           embf_plan, emb_plan, x2d_i, xT_i, xaux_i)

    return pl.pallas_call(
        kernel,
        out_shape=jax.ShapeDtypeStruct((B, out_features), jnp.float32),
        in_specs=[_VMEM] * len(args),
        out_specs=_VMEM,
    )(*args)


# --------------------------------- main -------------------------------------

if __name__ == "__main__":
    key = jax.random.PRNGKey(0)
    kx, kp = jax.random.split(key)
    B = 2
    x = jax.random.normal(kx, (B, 1, SPEC_LEN), dtype=jnp.float32)      # spectrum signal
    x_prime = jax.random.normal(kp, (B, 12), dtype=jnp.float32)         # aux (first 9 used)

    params = init_multi_input_embedding(seed=0, out_features=64)
    fwd = jax.jit(multi_input_embedding_forward)
    out = jax.block_until_ready(fwd(params, x, x_prime))

    assert out.shape == (B, 64), out.shape
    assert bool(jnp.all(jnp.isfinite(out)))
    print("KERNEL_OK")
</pallas_src>

<mosaic_0001>
module attributes {stable_mosaic.version = 11 : i64} {
  func.func @kernel(%arg0: memref<2x52xf32, #tpu.memory_space<vmem>>, %arg1: memref<52x2xf32, #tpu.memory_space<vmem>>, %arg2: memref<2x9xf32, #tpu.memory_space<vmem>>, %arg3: memref<3x256xf32, #tpu.memory_space<vmem>>, %arg4: memref<3x256xf32, #tpu.memory_space<vmem>>, %arg5: memref<5x256x128xf32, #tpu.memory_space<vmem>>, %arg6: memref<3x128xf32, #tpu.memory_space<vmem>>, %arg7: memref<7x128x64xf32, #tpu.memory_space<vmem>>, %arg8: memref<3x64xf32, #tpu.memory_space<vmem>>, %arg9: memref<52x64xf32, #tpu.memory_space<vmem>>, %arg10: memref<3x64xf32, #tpu.memory_space<vmem>>, %arg11: memref<64x32xf32, #tpu.memory_space<vmem>>, %arg12: memref<3x32xf32, #tpu.memory_space<vmem>>, %arg13: memref<32x32xf32, #tpu.memory_space<vmem>>, %arg14: memref<3x32xf32, #tpu.memory_space<vmem>>, %arg15: memref<32x32xf32, #tpu.memory_space<vmem>>, %arg16: memref<3x32xf32, #tpu.memory_space<vmem>>, %arg17: memref<32x64xf32, #tpu.memory_space<vmem>>, %arg18: memref<3x64xf32, #tpu.memory_space<vmem>>, %arg19: memref<64x128xf32, #tpu.memory_space<vmem>>, %arg20: memref<1x128xf32, #tpu.memory_space<vmem>>, %arg21: memref<9x16xf32, #tpu.memory_space<vmem>>, %arg22: memref<3x16xf32, #tpu.memory_space<vmem>>, %arg23: memref<16x8xf32, #tpu.memory_space<vmem>>, %arg24: memref<3x8xf32, #tpu.memory_space<vmem>>, %arg25: memref<8x8xf32, #tpu.memory_space<vmem>>, %arg26: memref<3x8xf32, #tpu.memory_space<vmem>>, %arg27: memref<8x8xf32, #tpu.memory_space<vmem>>, %arg28: memref<1x8xf32, #tpu.memory_space<vmem>>, %arg29: memref<128x256xf32, #tpu.memory_space<vmem>>, %arg30: memref<64x256xf32, #tpu.memory_space<vmem>>, %arg31: memref<64x256xf32, #tpu.memory_space<vmem>>, %arg32: memref<8x256xf32, #tpu.memory_space<vmem>>, %arg33: memref<3x256xf32, #tpu.memory_space<vmem>>, %arg34: memref<256x128xf32, #tpu.memory_space<vmem>>, %arg35: memref<3x128xf32, #tpu.memory_space<vmem>>, %arg36: memref<128x128xf32, #tpu.memory_space<vmem>>, %arg37: memref<3x128xf32, #tpu.memory_space<vmem>>, %arg38: memref<128x64xf32, #tpu.memory_space<vmem>>, %arg39: memref<3x64xf32, #tpu.memory_space<vmem>>, %arg40: memref<64x64xf32, #tpu.memory_space<vmem>>, %arg41: memref<3x64xf32, #tpu.memory_space<vmem>>, %arg42: memref<64x64xf32, #tpu.memory_space<vmem>>, %arg43: memref<3x64xf32, #tpu.memory_space<vmem>>, %arg44: memref<64x64xf32, #tpu.memory_space<vmem>>, %arg45: memref<3x64xf32, #tpu.memory_space<vmem>>, %arg46: memref<64x64xf32, #tpu.memory_space<vmem>>, %arg47: memref<3x64xf32, #tpu.memory_space<vmem>>, %arg48: memref<64x64xf32, #tpu.memory_space<vmem>>, %arg49: memref<1x64xf32, #tpu.memory_space<vmem>>, %arg50: memref<2x64xf32, #tpu.memory_space<vmem>>) attributes {dimension_semantics = [], scalar_prefetch = 0 : i64, scratch_operands = 0 : i64, tpu.core_type = #tpu.core_type<tc>} {
    %c0 = arith.constant 0 : index
    %c0_0 = arith.constant 0 : index
    %0 = vector.load %arg0[%c0, %c0_0] : memref<2x52xf32, #tpu.memory_space<vmem>>, vector<2x52xf32>
    %c0_1 = arith.constant 0 : index
    %c0_2 = arith.constant 0 : index
    %1 = vector.load %arg9[%c0_1, %c0_2] : memref<52x64xf32, #tpu.memory_space<vmem>>, vector<52x64xf32>
    %cst = arith.constant dense<0.000000e+00> : vector<2x64xf32>
    %2 = tpu.matmul %0, %1, %cst {dimension_numbers = #tpu.dot_dimension_numbers<[1], [0], [0], [1], [0, 0, 1, 1], [], []>} : vector<2x52xf32>, vector<52x64xf32>, vector<2x64xf32> -> vector<2x64xf32>
    %c0_3 = arith.constant 0 : index
    %c0_4 = arith.constant 0 : index
    %3 = vector.load %arg10[%c0_3, %c0_4] : memref<3x64xf32, #tpu.memory_space<vmem>>, vector<1x64xf32>
    %4 = vector.broadcast %3 : vector<1x64xf32> to vector<2x64xf32>
    %5 = arith.addf %2, %4 : vector<2x64xf32>
    %cst_5 = arith.constant 0.000000e+00 : f32
    %6 = vector.broadcast %cst_5 : f32 to vector<2x64xf32>
    %7 = arith.cmpf ogt, %5, %6 : vector<2x64xf32>
    %cst_6 = arith.constant 0.000000e+00 : f32
    %8 = vector.broadcast %cst_6 : f32 to vector<2x64xf32>
    %9 = arith.minimumf %5, %8 : vector<2x64xf32>
    %10 = math.exp %9 : vector<2x64xf32>
    %cst_7 = arith.constant 1.000000e+00 : f32
    %11 = vector.broadcast %cst_7 : f32 to vector<2x64xf32>
    %12 = arith.subf %10, %11 : vector<2x64xf32>
    %13 = arith.select %7, %5, %12 : vector<2x64xi1>, vector<2x64xf32>
    %c1 = arith.constant 1 : index
    %c0_8 = arith.constant 0 : index
    %14 = vector.load %arg10[%c1, %c0_8] : memref<3x64xf32, #tpu.memory_space<vmem>>, vector<1x64xf32>
    %15 = vector.broadcast %14 : vector<1x64xf32> to vector<2x64xf32>
    %16 = arith.mulf %13, %15 : vector<2x64xf32>
    %c2 = arith.constant 2 : index
    %c0_9 = arith.constant 0 : index
    %17 = vector.load %arg10[%c2, %c0_9] : memref<3x64xf32, #tpu.memory_space<vmem>>, vector<1x64xf32>
    %18 = vector.broadcast %17 : vector<1x64xf32> to vector<2x64xf32>
    %19 = arith.addf %16, %18 : vector<2x64xf32>
    %c0_10 = arith.constant 0 : index
    %c0_11 = arith.constant 0 : index
    %20 = vector.load %arg11[%c0_10, %c0_11] : memref<64x32xf32, #tpu.memory_space<vmem>>, vector<64x32xf32>
    %cst_12 = arith.constant dense<0.000000e+00> : vector<2x32xf32>
    %21 = tpu.matmul %19, %20, %cst_12 {dimension_numbers = #tpu.dot_dimension_numbers<[1], [0], [0], [1], [0, 0, 1, 1], [], []>} : vector<2x64xf32>, vector<64x32xf32>, vector<2x32xf32> -> vector<2x32xf32>
    %c0_13 = arith.constant 0 : index
    %c0_14 = arith.constant 0 : index
    %22 = vector.load %arg12[%c0_13, %c0_14] : memref<3x32xf32, #tpu.memory_space<vmem>>, vector<1x32xf32>
    %23 = vector.broadcast %22 : vector<1x32xf32> to vector<2x32xf32>
    %24 = arith.addf %21, %23 : vector<2x32xf32>
    %cst_15 = arith.constant 0.000000e+00 : f32
    %25 = vector.broadcast %cst_15 : f32 to vector<2x32xf32>
    %26 = arith.cmpf ogt, %24, %25 : vector<2x32xf32>
    %cst_16 = arith.constant 0.000000e+00 : f32
    %27 = vector.broadcast %cst_16 : f32 to vector<2x32xf32>
    %28 = arith.minimumf %24, %27 : vector<2x32xf32>
    %29 = math.exp %28 : vector<2x32xf32>
    %cst_17 = arith.constant 1.000000e+00 : f32
    %30 = vector.broadcast %cst_17 : f32 to vector<2x32xf32>
    %31 = arith.subf %29, %30 : vector<2x32xf32>
    %32 = arith.select %26, %24, %31 : vector<2x32xi1>, vector<2x32xf32>
    %c1_18 = arith.constant 1 : index
    %c0_19 = arith.constant 0 : index
    %33 = vector.load %arg12[%c1_18, %c0_19] : memref<3x32xf32, #tpu.memory_space<vmem>>, vector<1x32xf32>
    %34 = vector.broadcast %33 : vector<1x32xf32> to vector<2x32xf32>
    %35 = arith.mulf %32, %34 : vector<2x32xf32>
    %c2_20 = arith.constant 2 : index
    %c0_21 = arith.constant 0 : index
    %36 = vector.load %arg12[%c2_20, %c0_21] : memref<3x32xf32, #tpu.memory_space<vmem>>, vector<1x32xf32>
    %37 = vector.broadcast %36 : vector<1x32xf32> to vector<2x32xf32>
    %38 = arith.addf %35, %37 : vector<2x32xf32>
    %c0_22 = arith.constant 0 : index
    %c0_23 = arith.constant 0 : index
    %39 = vector.load %arg13[%c0_22, %c0_23] : memref<32x32xf32, #tpu.memory_space<vmem>>, vector<32x32xf32>
    %cst_24 = arith.constant dense<0.000000e+00> : vector<2x32xf32>
    %40 = tpu.matmul %38, %39, %cst_24 {dimension_numbers = #tpu.dot_dimension_numbers<[1], [0], [0], [1], [0, 0, 1, 1], [], []>} : vector<2x32xf32>, vector<32x32xf32>, vector<2x32xf32> -> vector<2x32xf32>
    %c0_25 = arith.constant 0 : index
    %c0_26 = arith.constant 0 : index
    %41 = vector.load %arg14[%c0_25, %c0_26] : memref<3x32xf32, #tpu.memory_space<vmem>>, vector<1x32xf32>
    %42 = vector.broadcast %41 : vector<1x32xf32> to vector<2x32xf32>
    %43 = arith.addf %40, %42 : vector<2x32xf32>
    %cst_27 = arith.constant 0.000000e+00 : f32
    %44 = vector.broadcast %cst_27 : f32 to vector<2x32xf32>
    %45 = arith.cmpf ogt, %43, %44 : vector<2x32xf32>
    %cst_28 = arith.constant 0.000000e+00 : f32
    %46 = vector.broadcast %cst_28 : f32 to vector<2x32xf32>
    %47 = arith.minimumf %43, %46 : vector<2x32xf32>
    %48 = math.exp %47 : vector<2x32xf32>
    %cst_29 = arith.constant 1.000000e+00 : f32
    %49 = vector.broadcast %cst_29 : f32 to vector<2x32xf32>
    %50 = arith.subf %48, %49 : vector<2x32xf32>
    %51 = arith.select %45, %43, %50 : vector<2x32xi1>, vector<2x32xf32>
    %c1_30 = arith.constant 1 : index
    %c0_31 = arith.constant 0 : index
    %52 = vector.load %arg14[%c1_30, %c0_31] : memref<3x32xf32, #tpu.memory_space<vmem>>, vector<1x32xf32>
    %53 = vector.broadcast %52 : vector<1x32xf32> to vector<2x32xf32>
    %54 = arith.mulf %51, %53 : vector<2x32xf32>
    %c2_32 = arith.constant 2 : index
    %c0_33 = arith.constant 0 : index
    %55 = vector.load %arg14[%c2_32, %c0_33] : memref<3x32xf32, #tpu.memory_space<vmem>>, vector<1x32xf32>
    %56 = vector.broadcast %55 : vector<1x32xf32> to vector<2x32xf32>
    %57 = arith.addf %54, %56 : vector<2x32xf32>
    %58 = arith.addf %57, %38 : vector<2x32xf32>
    %c0_34 = arith.constant 0 : index
    %c0_35 = arith.constant 0 : index
    %59 = vector.load %arg15[%c0_34, %c0_35] : memref<32x32xf32, #tpu.memory_space<vmem>>, vector<32x32xf32>
    %cst_36 = arith.constant dense<0.000000e+00> : vector<2x32xf32>
    %60 = tpu.matmul %58, %59, %cst_36 {dimension_numbers = #tpu.dot_dimension_numbers<[1], [0], [0], [1], [0, 0, 1, 1], [], []>} : vector<2x32xf32>, vector<32x32xf32>, vector<2x32xf32> -> vector<2x32xf32>
    %c0_37 = arith.constant 0 : index
    %c0_38 = arith.constant 0 : index
    %61 = vector.load %arg16[%c0_37, %c0_38] : memref<3x32xf32, #tpu.memory_space<vmem>>, vector<1x32xf32>
    %62 = vector.broadcast %61 : vector<1x32xf32> to vector<2x32xf32>
    %63 = arith.addf %60, %62 : vector<2x32xf32>
    %cst_39 = arith.constant 0.000000e+00 : f32
    %64 = vector.broadcast %cst_39 : f32 to vector<2x32xf32>
    %65 = arith.cmpf ogt, %63, %64 : vector<2x32xf32>
    %cst_40 = arith.constant 0.000000e+00 : f32
    %66 = vector.broadcast %cst_40 : f32 to vector<2x32xf32>
    %67 = arith.minimumf %63, %66 : vector<2x32xf32>
    %68 = math.exp %67 : vector<2x32xf32>
    %cst_41 = arith.constant 1.000000e+00 : f32
    %69 = vector.broadcast %cst_41 : f32 to vector<2x32xf32>
    %70 = arith.subf %68, %69 : vector<2x32xf32>
    %71 = arith.select %65, %63, %70 : vector<2x32xi1>, vector<2x32xf32>
    %c1_42 = arith.constant 1 : index
    %c0_43 = arith.constant 0 : index
    %72 = vector.load %arg16[%c1_42, %c0_43] : memref<3x32xf32, #tpu.memory_space<vmem>>, vector<1x32xf32>
    %73 = vector.broadcast %72 : vector<1x32xf32> to vector<2x32xf32>
    %74 = arith.mulf %71, %73 : vector<2x32xf32>
    %c2_44 = arith.constant 2 : index
    %c0_45 = arith.constant 0 : index
    %75 = vector.load %arg16[%c2_44, %c0_45] : memref<3x32xf32, #tpu.memory_space<vmem>>, vector<1x32xf32>
    %76 = vector.broadcast %75 : vector<1x32xf32> to vector<2x32xf32>
    %77 = arith.addf %74, %76 : vector<2x32xf32>
    %78 = arith.addf %77, %58 : vector<2x32xf32>
    %c0_46 = arith.constant 0 : index
    %c0_47 = arith.constant 0 : index
    %79 = vector.load %arg17[%c0_46, %c0_47] : memref<32x64xf32, #tpu.memory_space<vmem>>, vector<32x64xf32>
    %cst_48 = arith.constant dense<0.000000e+00> : vector<2x64xf32>
    %80 = tpu.matmul %78, %79, %cst_48 {dimension_numbers = #tpu.dot_dimension_numbers<[1], [0], [0], [1], [0, 0, 1, 1], [], []>} : vector<2x32xf32>, vector<32x64xf32>, vector<2x64xf32> -> vector<2x64xf32>
    %c0_49 = arith.constant 0 : index
    %c0_50 = arith.constant 0 : index
    %81 = vector.load %arg18[%c0_49, %c0_50] : memref<3x64xf32, #tpu.memory_space<vmem>>, vector<1x64xf32>
    %82 = vector.broadcast %81 : vector<1x64xf32> to vector<2x64xf32>
    %83 = arith.addf %80, %82 : vector<2x64xf32>
    %cst_51 = arith.constant 0.000000e+00 : f32
    %84 = vector.broadcast %cst_51 : f32 to vector<2x64xf32>
    %85 = arith.cmpf ogt, %83, %84 : vector<2x64xf32>
    %cst_52 = arith.constant 0.000000e+00 : f32
    %86 = vector.broadcast %cst_52 : f32 to vector<2x64xf32>
    %87 = arith.minimumf %83, %86 : vector<2x64xf32>
    %88 = math.exp %87 : vector<2x64xf32>
    %cst_53 = arith.constant 1.000000e+00 : f32
    %89 = vector.broadcast %cst_53 : f32 to vector<2x64xf32>
    %90 = arith.subf %88, %89 : vector<2x64xf32>
    %91 = arith.select %85, %83, %90 : vector<2x64xi1>, vector<2x64xf32>
    %c1_54 = arith.constant 1 : index
    %c0_55 = arith.constant 0 : index
    %92 = vector.load %arg18[%c1_54, %c0_55] : memref<3x64xf32, #tpu.memory_space<vmem>>, vector<1x64xf32>
    %93 = vector.broadcast %92 : vector<1x64xf32> to vector<2x64xf32>
    %94 = arith.mulf %91, %93 : vector<2x64xf32>
    %c2_56 = arith.constant 2 : index
    %c0_57 = arith.constant 0 : index
    %95 = vector.load %arg18[%c2_56, %c0_57] : memref<3x64xf32, #tpu.memory_space<vmem>>, vector<1x64xf32>
    %96 = vector.broadcast %95 : vector<1x64xf32> to vector<2x64xf32>
    %97 = arith.addf %94, %96 : vector<2x64xf32>
    %c0_58 = arith.constant 0 : index
    %c0_59 = arith.constant 0 : index
    %98 = vector.load %arg19[%c0_58, %c0_59] : memref<64x128xf32, #tpu.memory_space<vmem>>, vector<64x128xf32>
    %cst_60 = arith.constant dense<0.000000e+00> : vector<2x128xf32>
    %99 = tpu.matmul %97, %98, %cst_60 {dimension_numbers = #tpu.dot_dimension_numbers<[1], [0], [0], [1], [0, 0, 1, 1], [], []>} : vector<2x64xf32>, vector<64x128xf32>, vector<2x128xf32> -> vector<2x128xf32>
    %c0_61 = arith.constant 0 : index
    %c0_62 = arith.constant 0 : index
    %100 = vector.load %arg20[%c0_61, %c0_62] : memref<1x128xf32, #tpu.memory_space<vmem>>, vector<1x128xf32>
    %101 = vector.broadcast %100 : vector<1x128xf32> to vector<2x128xf32>
    %102 = arith.addf %99, %101 : vector<2x128xf32>
    %c0_63 = arith.constant 0 : index
    %c0_64 = arith.constant 0 : index
    %103 = vector.load %arg2[%c0_63, %c0_64] : memref<2x9xf32, #tpu.memory_space<vmem>>, vector<2x9xf32>
    %c0_65 = arith.constant 0 : index
    %c0_66 = arith.constant 0 : index
    %104 = vector.load %arg21[%c0_65, %c0_66] : memref<9x16xf32, #tpu.memory_space<vmem>>, vector<9x16xf32>
    %cst_67 = arith.constant dense<0.000000e+00> : vector<2x16xf32>
    %105 = tpu.matmul %103, %104, %cst_67 {dimension_numbers = #tpu.dot_dimension_numbers<[1], [0], [0], [1], [0, 0, 1, 1], [], []>} : vector<2x9xf32>, vector<9x16xf32>, vector<2x16xf32> -> vector<2x16xf32>
    %c0_68 = arith.constant 0 : index
    %c0_69 = arith.constant 0 : index
    %106 = vector.load %arg22[%c0_68, %c0_69] : memref<3x16xf32, #tpu.memory_space<vmem>>, vector<1x16xf32>
    %107 = vector.broadcast %106 : vector<1x16xf32> to vector<2x16xf32>
    %108 = arith.addf %105, %107 : vector<2x16xf32>
    %cst_70 = arith.constant 0.000000e+00 : f32
    %109 = vector.broadcast %cst_70 : f32 to vector<2x16xf32>
    %110 = arith.cmpf ogt, %108, %109 : vector<2x16xf32>
    %cst_71 = arith.constant 0.000000e+00 : f32
    %111 = vector.broadcast %cst_71 : f32 to vector<2x16xf32>
    %112 = arith.minimumf %108, %111 : vector<2x16xf32>
    %113 = math.exp %112 : vector<2x16xf32>
    %cst_72 = arith.constant 1.000000e+00 : f32
    %114 = vector.broadcast %cst_72 : f32 to vector<2x16xf32>
    %115 = arith.subf %113, %114 : vector<2x16xf32>
    %116 = arith.select %110, %108, %115 : vector<2x16xi1>, vector<2x16xf32>
    %c1_73 = arith.constant 1 : index
    %c0_74 = arith.constant 0 : index
    %117 = vector.load %arg22[%c1_73, %c0_74] : memref<3x16xf32, #tpu.memory_space<vmem>>, vector<1x16xf32>
    %118 = vector.broadcast %117 : vector<1x16xf32> to vector<2x16xf32>
    %119 = arith.mulf %116, %118 : vector<2x16xf32>
    %c2_75 = arith.constant 2 : index
    %c0_76 = arith.constant 0 : index
    %120 = vector.load %arg22[%c2_75, %c0_76] : memref<3x16xf32, #tpu.memory_space<vmem>>, vector<1x16xf32>
    %121 = vector.broadcast %120 : vector<1x16xf32> to vector<2x16xf32>
    %122 = arith.addf %119, %121 : vector<2x16xf32>
    %c0_77 = arith.constant 0 : index
    %c0_78 = arith.constant 0 : index
    %123 = vector.load %arg23[%c0_77, %c0_78] : memref<16x8xf32, #tpu.memory_space<vmem>>, vector<16x8xf32>
    %cst_79 = arith.constant dense<0.000000e+00> : vector<2x8xf32>
    %124 = tpu.matmul %122, %123, %cst_79 {dimension_numbers = #tpu.dot_dimension_numbers<[1], [0], [0], [1], [0, 0, 1, 1], [], []>} : vector<2x16xf32>, vector<16x8xf32>, vector<2x8xf32> -> vector<2x8xf32>
    %c0_80 = arith.constant 0 : index
    %c0_81 = arith.constant 0 : index
    %125 = vector.load %arg24[%c0_80, %c0_81] : memref<3x8xf32, #tpu.memory_space<vmem>>, vector<1x8xf32>
    %126 = vector.broadcast %125 : vector<1x8xf32> to vector<2x8xf32>
    %127 = arith.addf %124, %126 : vector<2x8xf32>
    %cst_82 = arith.constant 0.000000e+00 : f32
    %128 = vector.broadcast %cst_82 : f32 to vector<2x8xf32>
    %129 = arith.cmpf ogt, %127, %128 : vector<2x8xf32>
    %cst_83 = arith.constant 0.000000e+00 : f32
    %130 = vector.broadcast %cst_83 : f32 to vector<2x8xf32>
    %131 = arith.minimumf %127, %130 : vector<2x8xf32>
    %132 = math.exp %131 : vector<2x8xf32>
    %cst_84 = arith.constant 1.000000e+00 : f32
    %133 = vector.broadcast %cst_84 : f32 to vector<2x8xf32>
    %134 = arith.subf %132, %133 : vector<2x8xf32>
    %135 = arith.select %129, %127, %134 : vector<2x8xi1>, vector<2x8xf32>
    %c1_85 = arith.constant 1 : index
    %c0_86 = arith.constant 0 : index
    %136 = vector.load %arg24[%c1_85, %c0_86] : memref<3x8xf32, #tpu.memory_space<vmem>>, vector<1x8xf32>
    %137 = vector.broadcast %136 : vector<1x8xf32> to vector<2x8xf32>
    %138 = arith.mulf %135, %137 : vector<2x8xf32>
    %c2_87 = arith.constant 2 : index
    %c0_88 = arith.constant 0 : index
    %139 = vector.load %arg24[%c2_87, %c0_88] : memref<3x8xf32, #tpu.memory_space<vmem>>, vector<1x8xf32>
    %140 = vector.broadcast %139 : vector<1x8xf32> to vector<2x8xf32>
    %141 = arith.addf %138, %140 : vector<2x8xf32>
    %c0_89 = arith.constant 0 : index
    %c0_90 = arith.constant 0 : index
    %142 = vector.load %arg25[%c0_89, %c0_90] : memref<8x8xf32, #tpu.memory_space<vmem>>, vector<8x8xf32>
    %cst_91 = arith.constant dense<0.000000e+00> : vector<2x8xf32>
    %143 = tpu.matmul %141, %142, %cst_91 {dimension_numbers = #tpu.dot_dimension_numbers<[1], [0], [0], [1], [0, 0, 1, 1], [], []>} : vector<2x8xf32>, vector<8x8xf32>, vector<2x8xf32> -> vector<2x8xf32>
    %c0_92 = arith.constant 0 : index
    %c0_93 = arith.constant 0 : index
    %144 = vector.load %arg26[%c0_92, %c0_93] : memref<3x8xf32, #tpu.memory_space<vmem>>, vector<1x8xf32>
    %145 = vector.broadcast %144 : vector<1x8xf32> to vector<2x8xf32>
    %146 = arith.addf %143, %145 : vector<2x8xf32>
    %cst_94 = arith.constant 0.000000e+00 : f32
    %147 = vector.broadcast %cst_94 : f32 to vector<2x8xf32>
    %148 = arith.cmpf ogt, %146, %147 : vector<2x8xf32>
    %cst_95 = arith.constant 0.000000e+00 : f32
    %149 = vector.broadcast %cst_95 : f32 to vector<2x8xf32>
    %150 = arith.minimumf %146, %149 : vector<2x8xf32>
    %151 = math.exp %150 : vector<2x8xf32>
    %cst_96 = arith.constant 1.000000e+00 : f32
    %152 = vector.broadcast %cst_96 : f32 to vector<2x8xf32>
    %153 = arith.subf %151, %152 : vector<2x8xf32>
    %154 = arith.select %148, %146, %153 : vector<2x8xi1>, vector<2x8xf32>
    %c1_97 = arith.constant 1 : index
    %c0_98 = arith.constant 0 : index
    %155 = vector.load %arg26[%c1_97, %c0_98] : memref<3x8xf32, #tpu.memory_space<vmem>>, vector<1x8xf32>
    %156 = vector.broadcast %155 : vector<1x8xf32> to vector<2x8xf32>
    %157 = arith.mulf %154, %156 : vector<2x8xf32>
    %c2_99 = arith.constant 2 : index
    %c0_100 = arith.constant 0 : index
    %158 = vector.load %arg26[%c2_99, %c0_100] : memref<3x8xf32, #tpu.memory_space<vmem>>, vector<1x8xf32>
    %159 = vector.broadcast %158 : vector<1x8xf32> to vector<2x8xf32>
    %160 = arith.addf %157, %159 : vector<2x8xf32>
    %161 = arith.addf %160, %141 : vector<2x8xf32>
    %c0_101 = arith.constant 0 : index
    %c0_102 = arith.constant 0 : index
    %162 = vector.load %arg27[%c0_101, %c0_102] : memref<8x8xf32, #tpu.memory_space<vmem>>, vector<8x8xf32>
    %cst_103 = arith.constant dense<0.000000e+00> : vector<2x8xf32>
    %163 = tpu.matmul %161, %162, %cst_103 {dimension_numbers = #tpu.dot_dimension_numbers<[1], [0], [0], [1], [0, 0, 1, 1], [], []>} : vector<2x8xf32>, vector<8x8xf32>, vector<2x8xf32> -> vector<2x8xf32>
    %c0_104 = arith.constant 0 : index
    %c0_105 = arith.constant 0 : index
    %164 = vector.load %arg28[%c0_104, %c0_105] : memref<1x8xf32, #tpu.memory_space<vmem>>, vector<1x8xf32>
    %165 = vector.broadcast %164 : vector<1x8xf32> to vector<2x8xf32>
    %166 = arith.addf %163, %165 : vector<2x8xf32>
    %c0_106 = arith.constant 0 : index
    %c0_107 = arith.constant 0 : index
    %167 = vector.load %arg1[%c0_106, %c0_107] : memref<52x2xf32, #tpu.memory_space<vmem>>, vector<52x2xf32>
    %cst_108 = arith.constant dense<0.000000e+00> : vector<2xf32>
    %168 = vector.multi_reduction <add>, %167, %cst_108 [0] : vector<52x2xf32> to vector<2xf32>
    %169 = vector.shape_cast %168 : vector<2xf32> to vector<1x2xf32>
    %cst_109 = arith.constant 5.200000e+01 : f32
    %170 = vector.broadcast %cst_109 : f32 to vector<1x2xf32>
    %171 = arith.divf %169, %170 : vector<1x2xf32>
    %172 = vector.broadcast %171 : vector<1x2xf32> to vector<52x2xf32>
    %173 = arith.subf %167, %172 : vector<52x2xf32>
    %174 = tpu.iota {dimensions = array<i32: 0>} : vector<25x50xi32>
    %175 = tpu.iota {dimensions = array<i32: 1>} : vector<25x50xi32>
    %c2_i32 = arith.constant 2 : i32
    %176 = vector.broadcast %c2_i32 : i32 to vector<25x50xi32>
    %177 = arith.muli %176, %174 : vector<25x50xi32>
    %178 = arith.cmpi eq, %175, %177 : vector<25x50xi32>
    %179 = arith.extui %178 : vector<25x50xi1> to vector<25x50xi32>
    %180 = arith.sitofp %179 : vector<25x50xi32> to vector<25x50xf32>
    %c2_i32_110 = arith.constant 2 : i32
    %181 = vector.broadcast %c2_i32_110 : i32 to vector<25x50xi32>
    %182 = arith.muli %181, %174 : vector<25x50xi32>
    %c1_i32 = arith.constant 1 : i32
    %183 = vector.broadcast %c1_i32 : i32 to vector<25x50xi32>
    %184 = arith.addi %182, %183 : vector<25x50xi32>
    %185 = arith.cmpi eq, %175, %184 : vector<25x50xi32>
    %186 = arith.extui %185 : vector<25x50xi1> to vector<25x50xi32>
    %187 = arith.sitofp %186 : vector<25x50xi32> to vector<25x50xf32>
    %188 = tpu.iota {dimensions = array<i32: 0>} : vector<10x21xi32>
    %189 = tpu.iota {dimensions = array<i32: 1>} : vector<10x21xi32>
    %c2_i32_111 = arith.constant 2 : i32
    %190 = vector.broadcast %c2_i32_111 : i32 to vector<10x21xi32>
    %191 = arith.muli %190, %188 : vector<10x21xi32>
    %192 = arith.cmpi eq, %189, %191 : vector<10x21xi32>
    %193 = arith.extui %192 : vector<10x21xi1> to vector<10x21xi32>
    %194 = arith.sitofp %193 : vector<10x21xi32> to vector<10x21xf32>
    %c2_i32_112 = arith.constant 2 : i32
    %195 = vector.broadcast %c2_i32_112 : i32 to vector<10x21xi32>
    %196 = arith.muli %195, %188 : vector<10x21xi32>
    %c1_i32_113 = arith.constant 1 : i32
    %197 = vector.broadcast %c1_i32_113 : i32 to vector<10x21xi32>
    %198 = arith.addi %196, %197 : vector<10x21xi32>
    %199 = arith.cmpi eq, %189, %198 : vector<10x21xi32>
    %200 = arith.extui %199 : vector<10x21xi1> to vector<10x21xi32>
    %201 = arith.sitofp %200 : vector<10x21xi32> to vector<10x21xf32>
    %202 = tpu.iota {dimensions = array<i32: 0>} : vector<2x4xi32>
    %203 = tpu.iota {dimensions = array<i32: 1>} : vector<2x4xi32>
    %c2_i32_114 = arith.constant 2 : i32
    %204 = vector.broadcast %c2_i32_114 : i32 to vector<2x4xi32>
    %205 = arith.muli %204, %202 : vector<2x4xi32>
    %206 = arith.cmpi eq, %203, %205 : vector<2x4xi32>
    %207 = arith.extui %206 : vector<2x4xi1> to vector<2x4xi32>
    %208 = arith.sitofp %207 : vector<2x4xi32> to vector<2x4xf32>
    %c2_i32_115 = arith.constant 2 : i32
    %209 = vector.broadcast %c2_i32_115 : i32 to vector<2x4xi32>
    %210 = arith.muli %209, %202 : vector<2x4xi32>
    %c1_i32_116 = arith.constant 1 : i32
    %211 = vector.broadcast %c1_i32_116 : i32 to vector<2x4xi32>
    %212 = arith.addi %210, %211 : vector<2x4xi32>
    %213 = arith.cmpi eq, %203, %212 : vector<2x4xi32>
    %214 = arith.extui %213 : vector<2x4xi1> to vector<2x4xi32>
    %215 = arith.sitofp %214 : vector<2x4xi32> to vector<2x4xf32>
    %216 = vector.extract_strided_slice %173 {offsets = [0, 0], sizes = [52, 1], strides = [1, 1]} : vector<52x2xf32> to vector<52x1xf32>
    %217 = vector.extract_strided_slice %216 {offsets = [0, 0], sizes = [50, 1], strides = [1, 1]} : vector<52x1xf32> to vector<50x1xf32>
    %c0_117 = arith.constant 0 : index
    %c0_118 = arith.constant 0 : index
    %218 = vector.load %arg3[%c0_117, %c0_118] : memref<3x256xf32, #tpu.memory_space<vmem>>, vector<1x256xf32>
    %219 = vector.broadcast %217 : vector<50x1xf32> to vector<50x256xf32>
    %220 = vector.broadcast %218 : vector<1x256xf32> to vector<50x256xf32>
    %221 = arith.mulf %219, %220 : vector<50x256xf32>
    %222 = vector.extract_strided_slice %216 {offsets = [1, 0], sizes = [50, 1], strides = [1, 1]} : vector<52x1xf32> to vector<50x1xf32>
    %c1_119 = arith.constant 1 : index
    %c0_120 = arith.constant 0 : index
    %223 = vector.load %arg3[%c1_119, %c0_120] : memref<3x256xf32, #tpu.memory_space<vmem>>, vector<1x256xf32>
    %224 = vector.broadcast %222 : vector<50x1xf32> to vector<50x256xf32>
    %225 = vector.broadcast %223 : vector<1x256xf32> to vector<50x256xf32>
    %226 = arith.mulf %224, %225 : vector<50x256xf32>
    %227 = arith.addf %221, %226 : vector<50x256xf32>
    %228 = vector.extract_strided_slice %216 {offsets = [2, 0], sizes = [50, 1], strides = [1, 1]} : vector<52x1xf32> to vector<50x1xf32>
    %c2_121 = arith.constant 2 : index
    %c0_122 = arith.constant 0 : index
    %229 = vector.load %arg3[%c2_121, %c0_122] : memref<3x256xf32, #tpu.memory_space<vmem>>, vector<1x256xf32>
    %230 = vector.broadcast %228 : vector<50x1xf32> to vector<50x256xf32>
    %231 = vector.broadcast %229 : vector<1x256xf32> to vector<50x256xf32>
    %232 = arith.mulf %230, %231 : vector<50x256xf32>
    %233 = arith.addf %227, %232 : vector<50x256xf32>
    %c0_123 = arith.constant 0 : index
    %c0_124 = arith.constant 0 : index
    %234 = vector.load %arg4[%c0_123, %c0_124] : memref<3x256xf32, #tpu.memory_space<vmem>>, vector<1x256xf32>
    %235 = vector.broadcast %234 : vector<1x256xf32> to vector<50x256xf32>
    %236 = arith.addf %233, %235 : vector<50x256xf32>
    %cst_125 = arith.constant 0.000000e+00 : f32
    %237 = vector.broadcast %cst_125 : f32 to vector<50x256xf32>
    %238 = arith.cmpf ogt, %236, %237 : vector<50x256xf32>
    %cst_126 = arith.constant 0.000000e+00 : f32
    %239 = vector.broadcast %cst_126 : f32 to vector<50x256xf32>
    %240 = arith.minimumf %236, %239 : vector<50x256xf32>
    %241 = math.exp %240 : vector<50x256xf32>
    %cst_127 = arith.constant 1.000000e+00 : f32
    %242 = vector.broadcast %cst_127 : f32 to vector<50x256xf32>
    %243 = arith.subf %241, %242 : vector<50x256xf32>
    %244 = arith.select %238, %236, %243 : vector<50x256xi1>, vector<50x256xf32>
    %cst_128 = arith.constant dense<0.000000e+00> : vector<25x256xf32>
    %245 = tpu.matmul %180, %244, %cst_128 {dimension_numbers = #tpu.dot_dimension_numbers<[1], [0], [0], [1], [0, 0, 1, 1], [], []>} : vector<25x50xf32>, vector<50x256xf32>, vector<25x256xf32> -> vector<25x256xf32>
    %cst_129 = arith.constant dense<0.000000e+00> : vector<25x256xf32>
    %246 = tpu.matmul %187, %244, %cst_129 {dimension_numbers = #tpu.dot_dimension_numbers<[1], [0], [0], [1], [0, 0, 1, 1], [], []>} : vector<25x50xf32>, vector<50x256xf32>, vector<25x256xf32> -> vector<25x256xf32>
    %247 = arith.maximumf %245, %246 : vector<25x256xf32>
    %c1_130 = arith.constant 1 : index
    %c0_131 = arith.constant 0 : index
    %248 = vector.load %arg4[%c1_130, %c0_131] : memref<3x256xf32, #tpu.memory_space<vmem>>, vector<1x256xf32>
    %249 = vector.broadcast %248 : vector<1x256xf32> to vector<25x256xf32>
    %250 = arith.mulf %247, %249 : vector<25x256xf32>
    %c2_132 = arith.constant 2 : index
    %c0_133 = arith.constant 0 : index
    %251 = vector.load %arg4[%c2_132, %c0_133] : memref<3x256xf32, #tpu.memory_space<vmem>>, vector<1x256xf32>
    %252 = vector.broadcast %251 : vector<1x256xf32> to vector<25x256xf32>
    %253 = arith.addf %250, %252 : vector<25x256xf32>
    %254 = vector.extract_strided_slice %253 {offsets = [0, 0], sizes = [21, 256], strides = [1, 1]} : vector<25x256xf32> to vector<21x256xf32>
    %c0_134 = arith.constant 0 : index
    %c0_135 = arith.constant 0 : index
    %c0_136 = arith.constant 0 : index
    %255 = vector.load %arg5[%c0_134, %c0_135, %c0_136] : memref<5x256x128xf32, #tpu.memory_space<vmem>>, vector<1x256x128xf32>
    %256 = vector.shape_cast %255 : vector<1x256x128xf32> to vector<256x128xf32>
    %cst_137 = arith.constant dense<0.000000e+00> : vector<21x128xf32>
    %257 = tpu.matmul %254, %256, %cst_137 {dimension_numbers = #tpu.dot_dimension_numbers<[1], [0], [0], [1], [0, 0, 1, 1], [], []>} : vector<21x256xf32>, vector<256x128xf32>, vector<21x128xf32> -> vector<21x128xf32>
    %258 = vector.extract_strided_slice %253 {offsets = [1, 0], sizes = [21, 256], strides = [1, 1]} : vector<25x256xf32> to vector<21x256xf32>
    %c1_138 = arith.constant 1 : index
    %c0_139 = arith.constant 0 : index
    %c0_140 = arith.constant 0 : index
    %259 = vector.load %arg5[%c1_138, %c0_139, %c0_140] : memref<5x256x128xf32, #tpu.memory_space<vmem>>, vector<1x256x128xf32>
    %260 = vector.shape_cast %259 : vector<1x256x128xf32> to vector<256x128xf32>
    %cst_141 = arith.constant dense<0.000000e+00> : vector<21x128xf32>
    %261 = tpu.matmul %258, %260, %cst_141 {dimension_numbers = #tpu.dot_dimension_numbers<[1], [0], [0], [1], [0, 0, 1, 1], [], []>} : vector<21x256xf32>, vector<256x128xf32>, vector<21x128xf32> -> vector<21x128xf32>
    %262 = arith.addf %257, %261 : vector<21x128xf32>
    %263 = vector.extract_strided_slice %253 {offsets = [2, 0], sizes = [21, 256], strides = [1, 1]} : vector<25x256xf32> to vector<21x256xf32>
    %c2_142 = arith.constant 2 : index
    %c0_143 = arith.constant 0 : index
    %c0_144 = arith.constant 0 : index
    %264 = vector.load %arg5[%c2_142, %c0_143, %c0_144] : memref<5x256x128xf32, #tpu.memory_space<vmem>>, vector<1x256x128xf32>
    %265 = vector.shape_cast %264 : vector<1x256x128xf32> to vector<256x128xf32>
    %cst_145 = arith.constant dense<0.000000e+00> : vector<21x128xf32>
    %266 = tpu.matmul %263, %265, %cst_145 {dimension_numbers = #tpu.dot_dimension_numbers<[1], [0], [0], [1], [0, 0, 1, 1], [], []>} : vector<21x256xf32>, vector<256x128xf32>, vector<21x128xf32> -> vector<21x128xf32>
    %267 = arith.addf %262, %266 : vector<21x128xf32>
    %268 = vector.extract_strided_slice %253 {offsets = [3, 0], sizes = [21, 256], strides = [1, 1]} : vector<25x256xf32> to vector<21x256xf32>
    %c3 = arith.constant 3 : index
    %c0_146 = arith.constant 0 : index
    %c0_147 = arith.constant 0 : index
    %269 = vector.load %arg5[%c3, %c0_146, %c0_147] : memref<5x256x128xf32, #tpu.memory_space<vmem>>, vector<1x256x128xf32>
    %270 = vector.shape_cast %269 : vector<1x256x128xf32> to vector<256x128xf32>
    %cst_148 = arith.constant dense<0.000000e+00> : vector<21x128xf32>
    %271 = tpu.matmul %268, %270, %cst_148 {dimension_numbers = #tpu.dot_dimension_numbers<[1], [0], [0], [1], [0, 0, 1, 1], [], []>} : vector<21x256xf32>, vector<256x128xf32>, vector<21x128xf32> -> vector<21x128xf32>
    %272 = arith.addf %267, %271 : vector<21x128xf32>
    %273 = vector.extract_strided_slice %253 {offsets = [4, 0], sizes = [21, 256], strides = [1, 1]} : vector<25x256xf32> to vector<21x256xf32>
    %c4 = arith.constant 4 : index
    %c0_149 = arith.constant 0 : index
    %c0_150 = arith.constant 0 : index
    %274 = vector.load %arg5[%c4, %c0_149, %c0_150] : memref<5x256x128xf32, #tpu.memory_space<vmem>>, vector<1x256x128xf32>
    %275 = vector.shape_cast %274 : vector<1x256x128xf32> to vector<256x128xf32>
    %cst_151 = arith.constant dense<0.000000e+00> : vector<21x128xf32>
    %276 = tpu.matmul %273, %275, %cst_151 {dimension_numbers = #tpu.dot_dimension_numbers<[1], [0], [0], [1], [0, 0, 1, 1], [], []>} : vector<21x256xf32>, vector<256x128xf32>, vector<21x128xf32> -> vector<21x128xf32>
    %277 = arith.addf %272, %276 : vector<21x128xf32>
    %c0_152 = arith.constant 0 : index
    %c0_153 = arith.constant 0 : index
    %278 = vector.load %arg6[%c0_152, %c0_153] : memref<3x128xf32, #tpu.memory_space<vmem>>, vector<1x128xf32>
    %279 = vector.broadcast %278 : vector<1x128xf32> to vector<21x128xf32>
    %280 = arith.addf %277, %279 : vector<21x128xf32>
    %cst_154 = arith.constant 0.000000e+00 : f32
    %281 = vector.broadcast %cst_154 : f32 to vector<21x128xf32>
    %282 = arith.cmpf ogt, %280, %281 : vector<21x128xf32>
    %cst_155 = arith.constant 0.000000e+00 : f32
    %283 = vector.broadcast %cst_155 : f32 to vector<21x128xf32>
    %284 = arith.minimumf %280, %283 : vector<21x128xf32>
    %285 = math.exp %284 : vector<21x128xf32>
    %cst_156 = arith.constant 1.000000e+00 : f32
    %286 = vector.broadcast %cst_156 : f32 to vector<21x128xf32>
    %287 = arith.subf %285, %286 : vector<21x128xf32>
    %288 = arith.select %282, %280, %287 : vector<21x128xi1>, vector<21x128xf32>
    %cst_157 = arith.constant dense<0.000000e+00> : vector<10x128xf32>
    %289 = tpu.matmul %194, %288, %cst_157 {dimension_numbers = #tpu.dot_dimension_numbers<[1], [0], [0], [1], [0, 0, 1, 1], [], []>} : vector<10x21xf32>, vector<21x128xf32>, vector<10x128xf32> -> vector<10x128xf32>
    %cst_158 = arith.constant dense<0.000000e+00> : vector<10x128xf32>
    %290 = tpu.matmul %201, %288, %cst_158 {dimension_numbers = #tpu.dot_dimension_numbers<[1], [0], [0], [1], [0, 0, 1, 1], [], []>} : vector<10x21xf32>, vector<21x128xf32>, vector<10x128xf32> -> vector<10x128xf32>
    %291 = arith.maximumf %289, %290 : vector<10x128xf32>
    %c1_159 = arith.constant 1 : index
    %c0_160 = arith.constant 0 : index
    %292 = vector.load %arg6[%c1_159, %c0_160] : memref<3x128xf32, #tpu.memory_space<vmem>>, vector<1x128xf32>
    %293 = vector.broadcast %292 : vector<1x128xf32> to vector<10x128xf32>
    %294 = arith.mulf %291, %293 : vector<10x128xf32>
    %c2_161 = arith.constant 2 : index
    %c0_162 = arith.constant 0 : index
    %295 = vector.load %arg6[%c2_161, %c0_162] : memref<3x128xf32, #tpu.memory_space<vmem>>, vector<1x128xf32>
    %296 = vector.broadcast %295 : vector<1x128xf32> to vector<10x128xf32>
    %297 = arith.addf %294, %296 : vector<10x128xf32>
    %298 = vector.extract_strided_slice %297 {offsets = [0, 0], sizes = [4, 128], strides = [1, 1]} : vector<10x128xf32> to vector<4x128xf32>
    %c0_163 = arith.constant 0 : index
    %c0_164 = arith.constant 0 : index
    %c0_165 = arith.constant 0 : index
    %299 = vector.load %arg7[%c0_163, %c0_164, %c0_165] : memref<7x128x64xf32, #tpu.memory_space<vmem>>, vector<1x128x64xf32>
    %300 = vector.shape_cast %299 : vector<1x128x64xf32> to vector<128x64xf32>
    %cst_166 = arith.constant dense<0.000000e+00> : vector<4x64xf32>
    %301 = tpu.matmul %298, %300, %cst_166 {dimension_numbers = #tpu.dot_dimension_numbers<[1], [0], [0], [1], [0, 0, 1, 1], [], []>} : vector<4x128xf32>, vector<128x64xf32>, vector<4x64xf32> -> vector<4x64xf32>
    %302 = vector.extract_strided_slice %297 {offsets = [1, 0], sizes = [4, 128], strides = [1, 1]} : vector<10x128xf32> to vector<4x128xf32>
    %c1_167 = arith.constant 1 : index
    %c0_168 = arith.constant 0 : index
    %c0_169 = arith.constant 0 : index
    %303 = vector.load %arg7[%c1_167, %c0_168, %c0_169] : memref<7x128x64xf32, #tpu.memory_space<vmem>>, vector<1x128x64xf32>
    %304 = vector.shape_cast %303 : vector<1x128x64xf32> to vector<128x64xf32>
    %cst_170 = arith.constant dense<0.000000e+00> : vector<4x64xf32>
    %305 = tpu.matmul %302, %304, %cst_170 {dimension_numbers = #tpu.dot_dimension_numbers<[1], [0], [0], [1], [0, 0, 1, 1], [], []>} : vector<4x128xf32>, vector<128x64xf32>, vector<4x64xf32> -> vector<4x64xf32>
    %306 = arith.addf %301, %305 : vector<4x64xf32>
    %307 = vector.extract_strided_slice %297 {offsets = [2, 0], sizes = [4, 128], strides = [1, 1]} : vector<10x128xf32> to vector<4x128xf32>
    %c2_171 = arith.constant 2 : index
    %c0_172 = arith.constant 0 : index
    %c0_173 = arith.constant 0 : index
    %308 = vector.load %arg7[%c2_171, %c0_172, %c0_173] : memref<7x128x64xf32, #tpu.memory_space<vmem>>, vector<1x128x64xf32>
    %309 = vector.shape_cast %308 : vector<1x128x64xf32> to vector<128x64xf32>
    %cst_174 = arith.constant dense<0.000000e+00> : vector<4x64xf32>
    %310 = tpu.matmul %307, %309, %cst_174 {dimension_numbers = #tpu.dot_dimension_numbers<[1], [0], [0], [1], [0, 0, 1, 1], [], []>} : vector<4x128xf32>, vector<128x64xf32>, vector<4x64xf32> -> vector<4x64xf32>
    %311 = arith.addf %306, %310 : vector<4x64xf32>
    %312 = vector.extract_strided_slice %297 {offsets = [3, 0], sizes = [4, 128], strides = [1, 1]} : vector<10x128xf32> to vector<4x128xf32>
    %c3_175 = arith.constant 3 : index
    %c0_176 = arith.constant 0 : index
    %c0_177 = arith.constant 0 : index
    %313 = vector.load %arg7[%c3_175, %c0_176, %c0_177] : memref<7x128x64xf32, #tpu.memory_space<vmem>>, vector<1x128x64xf32>
    %314 = vector.shape_cast %313 : vector<1x128x64xf32> to vector<128x64xf32>
    %cst_178 = arith.constant dense<0.000000e+00> : vector<4x64xf32>
    %315 = tpu.matmul %312, %314, %cst_178 {dimension_numbers = #tpu.dot_dimension_numbers<[1], [0], [0], [1], [0, 0, 1, 1], [], []>} : vector<4x128xf32>, vector<128x64xf32>, vector<4x64xf32> -> vector<4x64xf32>
    %316 = arith.addf %311, %315 : vector<4x64xf32>
    %317 = vector.extract_strided_slice %297 {offsets = [4, 0], sizes = [4, 128], strides = [1, 1]} : vector<10x128xf32> to vector<4x128xf32>
    %c4_179 = arith.constant 4 : index
    %c0_180 = arith.constant 0 : index
    %c0_181 = arith.constant 0 : index
    %318 = vector.load %arg7[%c4_179, %c0_180, %c0_181] : memref<7x128x64xf32, #tpu.memory_space<vmem>>, vector<1x128x64xf32>
    %319 = vector.shape_cast %318 : vector<1x128x64xf32> to vector<128x64xf32>
    %cst_182 = arith.constant dense<0.000000e+00> : vector<4x64xf32>
    %320 = tpu.matmul %317, %319, %cst_182 {dimension_numbers = #tpu.dot_dimension_numbers<[1], [0], [0], [1], [0, 0, 1, 1], [], []>} : vector<4x128xf32>, vector<128x64xf32>, vector<4x64xf32> -> vector<4x64xf32>
    %321 = arith.addf %316, %320 : vector<4x64xf32>
    %322 = vector.extract_strided_slice %297 {offsets = [5, 0], sizes = [4, 128], strides = [1, 1]} : vector<10x128xf32> to vector<4x128xf32>
    %c5 = arith.constant 5 : index
    %c0_183 = arith.constant 0 : index
    %c0_184 = arith.constant 0 : index
    %323 = vector.load %arg7[%c5, %c0_183, %c0_184] : memref<7x128x64xf32, #tpu.memory_space<vmem>>, vector<1x128x64xf32>
    %324 = vector.shape_cast %323 : vector<1x128x64xf32> to vector<128x64xf32>
    %cst_185 = arith.constant dense<0.000000e+00> : vector<4x64xf32>
    %325 = tpu.matmul %322, %324, %cst_185 {dimension_numbers = #tpu.dot_dimension_numbers<[1], [0], [0], [1], [0, 0, 1, 1], [], []>} : vector<4x128xf32>, vector<128x64xf32>, vector<4x64xf32> -> vector<4x64xf32>
    %326 = arith.addf %321, %325 : vector<4x64xf32>
    %327 = vector.extract_strided_slice %297 {offsets = [6, 0], sizes = [4, 128], strides = [1, 1]} : vector<10x128xf32> to vector<4x128xf32>
    %c6 = arith.constant 6 : index
    %c0_186 = arith.constant 0 : index
    %c0_187 = arith.constant 0 : index
    %328 = vector.load %arg7[%c6, %c0_186, %c0_187] : memref<7x128x64xf32, #tpu.memory_space<vmem>>, vector<1x128x64xf32>
    %329 = vector.shape_cast %328 : vector<1x128x64xf32> to vector<128x64xf32>
    %cst_188 = arith.constant dense<0.000000e+00> : vector<4x64xf32>
    %330 = tpu.matmul %327, %329, %cst_188 {dimension_numbers = #tpu.dot_dimension_numbers<[1], [0], [0], [1], [0, 0, 1, 1], [], []>} : vector<4x128xf32>, vector<128x64xf32>, vector<4x64xf32> -> vector<4x64xf32>
    %331 = arith.addf %326, %330 : vector<4x64xf32>
    %c0_189 = arith.constant 0 : index
    %c0_190 = arith.constant 0 : index
    %332 = vector.load %arg8[%c0_189, %c0_190] : memref<3x64xf32, #tpu.memory_space<vmem>>, vector<1x64xf32>
    %333 = vector.broadcast %332 : vector<1x64xf32> to vector<4x64xf32>
    %334 = arith.addf %331, %333 : vector<4x64xf32>
    %cst_191 = arith.constant 0.000000e+00 : f32
    %335 = vector.broadcast %cst_191 : f32 to vector<4x64xf32>
    %336 = arith.cmpf ogt, %334, %335 : vector<4x64xf32>
    %cst_192 = arith.constant 0.000000e+00 : f32
    %337 = vector.broadcast %cst_192 : f32 to vector<4x64xf32>
    %338 = arith.minimumf %334, %337 : vector<4x64xf32>
    %339 = math.exp %338 : vector<4x64xf32>
    %cst_193 = arith.constant 1.000000e+00 : f32
    %340 = vector.broadcast %cst_193 : f32 to vector<4x64xf32>
    %341 = arith.subf %339, %340 : vector<4x64xf32>
    %342 = arith.select %336, %334, %341 : vector<4x64xi1>, vector<4x64xf32>
    %cst_194 = arith.constant dense<0.000000e+00> : vector<2x64xf32>
    %343 = tpu.matmul %208, %342, %cst_194 {dimension_numbers = #tpu.dot_dimension_numbers<[1], [0], [0], [1], [0, 0, 1, 1], [], []>} : vector<2x4xf32>, vector<4x64xf32>, vector<2x64xf32> -> vector<2x64xf32>
    %cst_195 = arith.constant dense<0.000000e+00> : vector<2x64xf32>
    %344 = tpu.matmul %215, %342, %cst_195 {dimension_numbers = #tpu.dot_dimension_numbers<[1], [0], [0], [1], [0, 0, 1, 1], [], []>} : vector<2x4xf32>, vector<4x64xf32>, vector<2x64xf32> -> vector<2x64xf32>
    %345 = arith.maximumf %343, %344 : vector<2x64xf32>
    %c1_196 = arith.constant 1 : index
    %c0_197 = arith.constant 0 : index
    %346 = vector.load %arg8[%c1_196, %c0_197] : memref<3x64xf32, #tpu.memory_space<vmem>>, vector<1x64xf32>
    %347 = vector.broadcast %346 : vector<1x64xf32> to vector<2x64xf32>
    %348 = arith.mulf %345, %347 : vector<2x64xf32>
    %c2_198 = arith.constant 2 : index
    %c0_199 = arith.constant 0 : index
    %349 = vector.load %arg8[%c2_198, %c0_199] : memref<3x64xf32, #tpu.memory_space<vmem>>, vector<1x64xf32>
    %350 = vector.broadcast %349 : vector<1x64xf32> to vector<2x64xf32>
    %351 = arith.addf %348, %350 : vector<2x64xf32>
    %352 = vector.extract_strided_slice %351 {offsets = [0, 0], sizes = [1, 64], strides = [1, 1]} : vector<2x64xf32> to vector<1x64xf32>
    %c0_200 = arith.constant 0 : index
    %c0_201 = arith.constant 0 : index
    %353 = vector.load %arg30[%c0_200, %c0_201] : memref<64x256xf32, #tpu.memory_space<vmem>>, vector<64x256xf32>
    %cst_202 = arith.constant dense<0.000000e+00> : vector<1x256xf32>
    %354 = tpu.matmul %352, %353, %cst_202 {dimension_numbers = #tpu.dot_dimension_numbers<[1], [0], [0], [1], [0, 0, 1, 1], [], []>} : vector<1x64xf32>, vector<64x256xf32>, vector<1x256xf32> -> vector<1x256xf32>
    %355 = vector.extract_strided_slice %351 {offsets = [1, 0], sizes = [1, 64], strides = [1, 1]} : vector<2x64xf32> to vector<1x64xf32>
    %c0_203 = arith.constant 0 : index
    %c0_204 = arith.constant 0 : index
    %356 = vector.load %arg31[%c0_203, %c0_204] : memref<64x256xf32, #tpu.memory_space<vmem>>, vector<64x256xf32>
    %cst_205 = arith.constant dense<0.000000e+00> : vector<1x256xf32>
    %357 = tpu.matmul %355, %356, %cst_205 {dimension_numbers = #tpu.dot_dimension_numbers<[1], [0], [0], [1], [0, 0, 1, 1], [], []>} : vector<1x64xf32>, vector<64x256xf32>, vector<1x256xf32> -> vector<1x256xf32>
    %358 = arith.addf %354, %357 : vector<1x256xf32>
    %359 = vector.extract_strided_slice %173 {offsets = [0, 1], sizes = [52, 1], strides = [1, 1]} : vector<52x2xf32> to vector<52x1xf32>
    %360 = vector.extract_strided_slice %359 {offsets = [0, 0], sizes = [50, 1], strides = [1, 1]} : vector<52x1xf32> to vector<50x1xf32>
    %c0_206 = arith.constant 0 : index
    %c0_207 = arith.constant 0 : index
    %361 = vector.load %arg3[%c0_206, %c0_207] : memref<3x256xf32, #tpu.memory_space<vmem>>, vector<1x256xf32>
    %362 = vector.broadcast %360 : vector<50x1xf32> to vector<50x256xf32>
    %363 = vector.broadcast %361 : vector<1x256xf32> to vector<50x256xf32>
    %364 = arith.mulf %362, %363 : vector<50x256xf32>
    %365 = vector.extract_strided_slice %359 {offsets = [1, 0], sizes = [50, 1], strides = [1, 1]} : vector<52x1xf32> to vector<50x1xf32>
    %c1_208 = arith.constant 1 : index
    %c0_209 = arith.constant 0 : index
    %366 = vector.load %arg3[%c1_208, %c0_209] : memref<3x256xf32, #tpu.memory_space<vmem>>, vector<1x256xf32>
    %367 = vector.broadcast %365 : vector<50x1xf32> to vector<50x256xf32>
    %368 = vector.broadcast %366 : vector<1x256xf32> to vector<50x256xf32>
    %369 = arith.mulf %367, %368 : vector<50x256xf32>
    %370 = arith.addf %364, %369 : vector<50x256xf32>
    %371 = vector.extract_strided_slice %359 {offsets = [2, 0], sizes = [50, 1], strides = [1, 1]} : vector<52x1xf32> to vector<50x1xf32>
    %c2_210 = arith.constant 2 : index
    %c0_211 = arith.constant 0 : index
    %372 = vector.load %arg3[%c2_210, %c0_211] : memref<3x256xf32, #tpu.memory_space<vmem>>, vector<1x256xf32>
    %373 = vector.broadcast %371 : vector<50x1xf32> to vector<50x256xf32>
    %374 = vector.broadcast %372 : vector<1x256xf32> to vector<50x256xf32>
    %375 = arith.mulf %373, %374 : vector<50x256xf32>
    %376 = arith.addf %370, %375 : vector<50x256xf32>
    %c0_212 = arith.constant 0 : index
    %c0_213 = arith.constant 0 : index
    %377 = vector.load %arg4[%c0_212, %c0_213] : memref<3x256xf32, #tpu.memory_space<vmem>>, vector<1x256xf32>
    %378 = vector.broadcast %377 : vector<1x256xf32> to vector<50x256xf32>
    %379 = arith.addf %376, %378 : vector<50x256xf32>
    %cst_214 = arith.constant 0.000000e+00 : f32
    %380 = vector.broadcast %cst_214 : f32 to vector<50x256xf32>
    %381 = arith.cmpf ogt, %379, %380 : vector<50x256xf32>
    %cst_215 = arith.constant 0.000000e+00 : f32
    %382 = vector.broadcast %cst_215 : f32 to vector<50x256xf32>
    %383 = arith.minimumf %379, %382 : vector<50x256xf32>
    %384 = math.exp %383 : vector<50x256xf32>
    %cst_216 = arith.constant 1.000000e+00 : f32
    %385 = vector.broadcast %cst_216 : f32 to vector<50x256xf32>
    %386 = arith.subf %384, %385 : vector<50x256xf32>
    %387 = arith.select %381, %379, %386 : vector<50x256xi1>, vector<50x256xf32>
    %cst_217 = arith.constant dense<0.000000e+00> : vector<25x256xf32>
    %388 = tpu.matmul %180, %387, %cst_217 {dimension_numbers = #tpu.dot_dimension_numbers<[1], [0], [0], [1], [0, 0, 1, 1], [], []>} : vector<25x50xf32>, vector<50x256xf32>, vector<25x256xf32> -> vector<25x256xf32>
    %cst_218 = arith.constant dense<0.000000e+00> : vector<25x256xf32>
    %389 = tpu.matmul %187, %387, %cst_218 {dimension_numbers = #tpu.dot_dimension_numbers<[1], [0], [0], [1], [0, 0, 1, 1], [], []>} : vector<25x50xf32>, vector<50x256xf32>, vector<25x256xf32> -> vector<25x256xf32>
    %390 = arith.maximumf %388, %389 : vector<25x256xf32>
    %c1_219 = arith.constant 1 : index
    %c0_220 = arith.constant 0 : index
    %391 = vector.load %arg4[%c1_219, %c0_220] : memref<3x256xf32, #tpu.memory_space<vmem>>, vector<1x256xf32>
    %392 = vector.broadcast %391 : vector<1x256xf32> to vector<25x256xf32>
    %393 = arith.mulf %390, %392 : vector<25x256xf32>
    %c2_221 = arith.constant 2 : index
    %c0_222 = arith.constant 0 : index
    %394 = vector.load %arg4[%c2_221, %c0_222] : memref<3x256xf32, #tpu.memory_space<vmem>>, vector<1x256xf32>
    %395 = vector.broadcast %394 : vector<1x256xf32> to vector<25x256xf32>
    %396 = arith.addf %393, %395 : vector<25x256xf32>
    %397 = vector.extract_strided_slice %396 {offsets = [0, 0], sizes = [21, 256], strides = [1, 1]} : vector<25x256xf32> to vector<21x256xf32>
    %c0_223 = arith.constant 0 : index
    %c0_224 = arith.constant 0 : index
    %c0_225 = arith.constant 0 : index
    %398 = vector.load %arg5[%c0_223, %c0_224, %c0_225] : memref<5x256x128xf32, #tpu.memory_space<vmem>>, vector<1x256x128xf32>
    %399 = vector.shape_cast %398 : vector<1x256x128xf32> to vector<256x128xf32>
    %cst_226 = arith.constant dense<0.000000e+00> : vector<21x128xf32>
    %400 = tpu.matmul %397, %399, %cst_226 {dimension_numbers = #tpu.dot_dimension_numbers<[1], [0], [0], [1], [0, 0, 1, 1], [], []>} : vector<21x256xf32>, vector<256x128xf32>, vector<21x128xf32> -> vector<21x128xf32>
    %401 = vector.extract_strided_slice %396 {offsets = [1, 0], sizes = [21, 256], strides = [1, 1]} : vector<25x256xf32> to vector<21x256xf32>
    %c1_227 = arith.constant 1 : index
    %c0_228 = arith.constant 0 : index
    %c0_229 = arith.constant 0 : index
    %402 = vector.load %arg5[%c1_227, %c0_228, %c0_229] : memref<5x256x128xf32, #tpu.memory_space<vmem>>, vector<1x256x128xf32>
    %403 = vector.shape_cast %402 : vector<1x256x128xf32> to vector<256x128xf32>
    %cst_230 = arith.constant dense<0.000000e+00> : vector<21x128xf32>
    %404 = tpu.matmul %401, %403, %cst_230 {dimension_numbers = #tpu.dot_dimension_numbers<[1], [0], [0], [1], [0, 0, 1, 1], [], []>} : vector<21x256xf32>, vector<256x128xf32>, vector<21x128xf32> -> vector<21x128xf32>
    %405 = arith.addf %400, %404 : vector<21x128xf32>
    %406 = vector.extract_strided_slice %396 {offsets = [2, 0], sizes = [21, 256], strides = [1, 1]} : vector<25x256xf32> to vector<21x256xf32>
    %c2_231 = arith.constant 2 : index
    %c0_232 = arith.constant 0 : index
    %c0_233 = arith.constant 0 : index
    %407 = vector.load %arg5[%c2_231, %c0_232, %c0_233] : memref<5x256x128xf32, #tpu.memory_space<vmem>>, vector<1x256x128xf32>
    %408 = vector.shape_cast %407 : vector<1x256x128xf32> to vector<256x128xf32>
    %cst_234 = arith.constant dense<0.000000e+00> : vector<21x128xf32>
    %409 = tpu.matmul %406, %408, %cst_234 {dimension_numbers = #tpu.dot_dimension_numbers<[1], [0], [0], [1], [0, 0, 1, 1], [], []>} : vector<21x256xf32>, vector<256x128xf32>, vector<21x128xf32> -> vector<21x128xf32>
    %410 = arith.addf %405, %409 : vector<21x128xf32>
    %411 = vector.extract_strided_slice %396 {offsets = [3, 0], sizes = [21, 256], strides = [1, 1]} : vector<25x256xf32> to vector<21x256xf32>
    %c3_235 = arith.constant 3 : index
    %c0_236 = arith.constant 0 : index
    %c0_237 = arith.constant 0 : index
    %412 = vector.load %arg5[%c3_235, %c0_236, %c0_237] : memref<5x256x128xf32, #tpu.memory_space<vmem>>, vector<1x256x128xf32>
    %413 = vector.shape_cast %412 : vector<1x256x128xf32> to vector<256x128xf32>
    %cst_238 = arith.constant dense<0.000000e+00> : vector<21x128xf32>
    %414 = tpu.matmul %411, %413, %cst_238 {dimension_numbers = #tpu.dot_dimension_numbers<[1], [0], [0], [1], [0, 0, 1, 1], [], []>} : vector<21x256xf32>, vector<256x128xf32>, vector<21x128xf32> -> vector<21x128xf32>
    %415 = arith.addf %410, %414 : vector<21x128xf32>
    %416 = vector.extract_strided_slice %396 {offsets = [4, 0], sizes = [21, 256], strides = [1, 1]} : vector<25x256xf32> to vector<21x256xf32>
    %c4_239 = arith.constant 4 : index
    %c0_240 = arith.constant 0 : index
    %c0_241 = arith.constant 0 : index
    %417 = vector.load %arg5[%c4_239, %c0_240, %c0_241] : memref<5x256x128xf32, #tpu.memory_space<vmem>>, vector<1x256x128xf32>
    %418 = vector.shape_cast %417 : vector<1x256x128xf32> to vector<256x128xf32>
    %cst_242 = arith.constant dense<0.000000e+00> : vector<21x128xf32>
    %419 = tpu.matmul %416, %418, %cst_242 {dimension_numbers = #tpu.dot_dimension_numbers<[1], [0], [0], [1], [0, 0, 1, 1], [], []>} : vector<21x256xf32>, vector<256x128xf32>, vector<21x128xf32> -> vector<21x128xf32>
    %420 = arith.addf %415, %419 : vector<21x128xf32>
    %c0_243 = arith.constant 0 : index
    %c0_244 = arith.constant 0 : index
    %421 = vector.load %arg6[%c0_243, %c0_244] : memref<3x128xf32, #tpu.memory_space<vmem>>, vector<1x128xf32>
    %422 = vector.broadcast %421 : vector<1x128xf32> to vector<21x128xf32>
    %423 = arith.addf %420, %422 : vector<21x128xf32>
    %cst_245 = arith.constant 0.000000e+00 : f32
    %424 = vector.broadcast %cst_245 : f32 to vector<21x128xf32>
    %425 = arith.cmpf ogt, %423, %424 : vector<21x128xf32>
    %cst_246 = arith.constant 0.000000e+00 : f32
    %426 = vector.broadcast %cst_246 : f32 to vector<21x128xf32>
    %427 = arith.minimumf %423, %426 : vector<21x128xf32>
    %428 = math.exp %427 : vector<21x128xf32>
    %cst_247 = arith.constant 1.000000e+00 : f32
    %429 = vector.broadcast %cst_247 : f32 to vector<21x128xf32>
    %430 = arith.subf %428, %429 : vector<21x128xf32>
    %431 = arith.select %425, %423, %430 : vector<21x128xi1>, vector<21x128xf32>
    %cst_248 = arith.constant dense<0.000000e+00> : vector<10x128xf32>
    %432 = tpu.matmul %194, %431, %cst_248 {dimension_numbers = #tpu.dot_dimension_numbers<[1], [0], [0], [1], [0, 0, 1, 1], [], []>} : vector<10x21xf32>, vector<21x128xf32>, vector<10x128xf32> -> vector<10x128xf32>
    %cst_249 = arith.constant dense<0.000000e+00> : vector<10x128xf32>
    %433 = tpu.matmul %201, %431, %cst_249 {dimension_numbers = #tpu.dot_dimension_numbers<[1], [0], [0], [1], [0, 0, 1, 1], [], []>} : vector<10x21xf32>, vector<21x128xf32>, vector<10x128xf32> -> vector<10x128xf32>
    %434 = arith.maximumf %432, %433 : vector<10x128xf32>
    %c1_250 = arith.constant 1 : index
    %c0_251 = arith.constant 0 : index
    %435 = vector.load %arg6[%c1_250, %c0_251] : memref<3x128xf32, #tpu.memory_space<vmem>>, vector<1x128xf32>
    %436 = vector.broadcast %435 : vector<1x128xf32> to vector<10x128xf32>
    %437 = arith.mulf %434, %436 : vector<10x128xf32>
    %c2_252 = arith.constant 2 : index
    %c0_253 = arith.constant 0 : index
    %438 = vector.load %arg6[%c2_252, %c0_253] : memref<3x128xf32, #tpu.memory_space<vmem>>, vector<1x128xf32>
    %439 = vector.broadcast %438 : vector<1x128xf32> to vector<10x128xf32>
    %440 = arith.addf %437, %439 : vector<10x128xf32>
    %441 = vector.extract_strided_slice %440 {offsets = [0, 0], sizes = [4, 128], strides = [1, 1]} : vector<10x128xf32> to vector<4x128xf32>
    %c0_254 = arith.constant 0 : index
    %c0_255 = arith.constant 0 : index
    %c0_256 = arith.constant 0 : index
    %442 = vector.load %arg7[%c0_254, %c0_255, %c0_256] : memref<7x128x64xf32, #tpu.memory_space<vmem>>, vector<1x128x64xf32>
    %443 = vector.shape_cast %442 : vector<1x128x64xf32> to vector<128x64xf32>
    %cst_257 = arith.constant dense<0.000000e+00> : vector<4x64xf32>
    %444 = tpu.matmul %441, %443, %cst_257 {dimension_numbers = #tpu.dot_dimension_numbers<[1], [0], [0], [1], [0, 0, 1, 1], [], []>} : vector<4x128xf32>, vector<128x64xf32>, vector<4x64xf32> -> vector<4x64xf32>
    %445 = vector.extract_strided_slice %440 {offsets = [1, 0], sizes = [4, 128], strides = [1, 1]} : vector<10x128xf32> to vector<4x128xf32>
    %c1_258 = arith.constant 1 : index
    %c0_259 = arith.constant 0 : index
    %c0_260 = arith.constant 0 : index
    %446 = vector.load %arg7[%c1_258, %c0_259, %c0_260] : memref<7x128x64xf32, #tpu.memory_space<vmem>>, vector<1x128x64xf32>
    %447 = vector.shape_cast %446 : vector<1x128x64xf32> to vector<128x64xf32>
    %cst_261 = arith.constant dense<0.000000e+00> : vector<4x64xf32>
    %448 = tpu.matmul %445, %447, %cst_261 {dimension_numbers = #tpu.dot_dimension_numbers<[1], [0], [0], [1], [0, 0, 1, 1], [], []>} : vector<4x128xf32>, vector<128x64xf32>, vector<4x64xf32> -> vector<4x64xf32>
    %449 = arith.addf %444, %448 : vector<4x64xf32>
    %450 = vector.extract_strided_slice %440 {offsets = [2, 0], sizes = [4, 128], strides = [1, 1]} : vector<10x128xf32> to vector<4x128xf32>
    %c2_262 = arith.constant 2 : index
    %c0_263 = arith.constant 0 : index
    %c0_264 = arith.constant 0 : index
    %451 = vector.load %arg7[%c2_262, %c0_263, %c0_264] : memref<7x128x64xf32, #tpu.memory_space<vmem>>, vector<1x128x64xf32>
    %452 = vector.shape_cast %451 : vector<1x128x64xf32> to vector<128x64xf32>
    %cst_265 = arith.constant dense<0.000000e+00> : vector<4x64xf32>
    %453 = tpu.matmul %450, %452, %cst_265 {dimension_numbers = #tpu.dot_dimension_numbers<[1], [0], [0], [1], [0, 0, 1, 1], [], []>} : vector<4x128xf32>, vector<128x64xf32>, vector<4x64xf32> -> vector<4x64xf32>
    %454 = arith.addf %449, %453 : vector<4x64xf32>
    %455 = vector.extract_strided_slice %440 {offsets = [3, 0], sizes = [4, 128], strides = [1, 1]} : vector<10x128xf32> to vector<4x128xf32>
    %c3_266 = arith.constant 3 : index
    %c0_267 = arith.constant 0 : index
    %c0_268 = arith.constant 0 : index
    %456 = vector.load %arg7[%c3_266, %c0_267, %c0_268] : memref<7x128x64xf32, #tpu.memory_space<vmem>>, vector<1x128x64xf32>
    %457 = vector.shape_cast %456 : vector<1x128x64xf32> to vector<128x64xf32>
    %cst_269 = arith.constant dense<0.000000e+00> : vector<4x64xf32>
    %458 = tpu.matmul %455, %457, %cst_269 {dimension_numbers = #tpu.dot_dimension_numbers<[1], [0], [0], [1], [0, 0, 1, 1], [], []>} : vector<4x128xf32>, vector<128x64xf32>, vector<4x64xf32> -> vector<4x64xf32>
    %459 = arith.addf %454, %458 : vector<4x64xf32>
    %460 = vector.extract_strided_slice %440 {offsets = [4, 0], sizes = [4, 128], strides = [1, 1]} : vector<10x128xf32> to vector<4x128xf32>
    %c4_270 = arith.constant 4 : index
    %c0_271 = arith.constant 0 : index
    %c0_272 = arith.constant 0 : index
    %461 = vector.load %arg7[%c4_270, %c0_271, %c0_272] : memref<7x128x64xf32, #tpu.memory_space<vmem>>, vector<1x128x64xf32>
    %462 = vector.shape_cast %461 : vector<1x128x64xf32> to vector<128x64xf32>
    %cst_273 = arith.constant dense<0.000000e+00> : vector<4x64xf32>
    %463 = tpu.matmul %460, %462, %cst_273 {dimension_numbers = #tpu.dot_dimension_numbers<[1], [0], [0], [1], [0, 0, 1, 1], [], []>} : vector<4x128xf32>, vector<128x64xf32>, vector<4x64xf32> -> vector<4x64xf32>
    %464 = arith.addf %459, %463 : vector<4x64xf32>
    %465 = vector.extract_strided_slice %440 {offsets = [5, 0], sizes = [4, 128], strides = [1, 1]} : vector<10x128xf32> to vector<4x128xf32>
    %c5_274 = arith.constant 5 : index
    %c0_275 = arith.constant 0 : index
    %c0_276 = arith.constant 0 : index
    %466 = vector.load %arg7[%c5_274, %c0_275, %c0_276] : memref<7x128x64xf32, #tpu.memory_space<vmem>>, vector<1x128x64xf32>
    %467 = vector.shape_cast %466 : vector<1x128x64xf32> to vector<128x64xf32>
    %cst_277 = arith.constant dense<0.000000e+00> : vector<4x64xf32>
    %468 = tpu.matmul %465, %467, %cst_277 {dimension_numbers = #tpu.dot_dimension_numbers<[1], [0], [0], [1], [0, 0, 1, 1], [], []>} : vector<4x128xf32>, vector<128x64xf32>, vector<4x64xf32> -> vector<4x64xf32>
    %469 = arith.addf %464, %468 : vector<4x64xf32>
    %470 = vector.extract_strided_slice %440 {offsets = [6, 0], sizes = [4, 128], strides = [1, 1]} : vector<10x128xf32> to vector<4x128xf32>
    %c6_278 = arith.constant 6 : index
    %c0_279 = arith.constant 0 : index
    %c0_280 = arith.constant 0 : index
    %471 = vector.load %arg7[%c6_278, %c0_279, %c0_280] : memref<7x128x64xf32, #tpu.memory_space<vmem>>, vector<1x128x64xf32>
    %472 = vector.shape_cast %471 : vector<1x128x64xf32> to vector<128x64xf32>
    %cst_281 = arith.constant dense<0.000000e+00> : vector<4x64xf32>
    %473 = tpu.matmul %470, %472, %cst_281 {dimension_numbers = #tpu.dot_dimension_numbers<[1], [0], [0], [1], [0, 0, 1, 1], [], []>} : vector<4x128xf32>, vector<128x64xf32>, vector<4x64xf32> -> vector<4x64xf32>
    %474 = arith.addf %469, %473 : vector<4x64xf32>
    %c0_282 = arith.constant 0 : index
    %c0_283 = arith.constant 0 : index
    %475 = vector.load %arg8[%c0_282, %c0_283] : memref<3x64xf32, #tpu.memory_space<vmem>>, vector<1x64xf32>
    %476 = vector.broadcast %475 : vector<1x64xf32> to vector<4x64xf32>
    %477 = arith.addf %474, %476 : vector<4x64xf32>
    %cst_284 = arith.constant 0.000000e+00 : f32
    %478 = vector.broadcast %cst_284 : f32 to vector<4x64xf32>
    %479 = arith.cmpf ogt, %477, %478 : vector<4x64xf32>
    %cst_285 = arith.constant 0.000000e+00 : f32
    %480 = vector.broadcast %cst_285 : f32 to vector<4x64xf32>
    %481 = arith.minimumf %477, %480 : vector<4x64xf32>
    %482 = math.exp %481 : vector<4x64xf32>
    %cst_286 = arith.constant 1.000000e+00 : f32
    %483 = vector.broadcast %cst_286 : f32 to vector<4x64xf32>
    %484 = arith.subf %482, %483 : vector<4x64xf32>
    %485 = arith.select %479, %477, %484 : vector<4x64xi1>, vector<4x64xf32>
    %cst_287 = arith.constant dense<0.000000e+00> : vector<2x64xf32>
    %486 = tpu.matmul %208, %485, %cst_287 {dimension_numbers = #tpu.dot_dimension_numbers<[1], [0], [0], [1], [0, 0, 1, 1], [], []>} : vector<2x4xf32>, vector<4x64xf32>, vector<2x64xf32> -> vector<2x64xf32>
    %cst_288 = arith.constant dense<0.000000e+00> : vector<2x64xf32>
    %487 = tpu.matmul %215, %485, %cst_288 {dimension_numbers = #tpu.dot_dimension_numbers<[1], [0], [0], [1], [0, 0, 1, 1], [], []>} : vector<2x4xf32>, vector<4x64xf32>, vector<2x64xf32> -> vector<2x64xf32>
    %488 = arith.maximumf %486, %487 : vector<2x64xf32>
    %c1_289 = arith.constant 1 : index
    %c0_290 = arith.constant 0 : index
    %489 = vector.load %arg8[%c1_289, %c0_290] : memref<3x64xf32, #tpu.memory_space<vmem>>, vector<1x64xf32>
    %490 = vector.broadcast %489 : vector<1x64xf32> to vector<2x64xf32>
    %491 = arith.mulf %488, %490 : vector<2x64xf32>
    %c2_291 = arith.constant 2 : index
    %c0_292 = arith.constant 0 : index
    %492 = vector.load %arg8[%c2_291, %c0_292] : memref<3x64xf32, #tpu.memory_space<vmem>>, vector<1x64xf32>
    %493 = vector.broadcast %492 : vector<1x64xf32> to vector<2x64xf32>
    %494 = arith.addf %491, %493 : vector<2x64xf32>
    %495 = vector.extract_strided_slice %494 {offsets = [0, 0], sizes = [1, 64], strides = [1, 1]} : vector<2x64xf32> to vector<1x64xf32>
    %c0_293 = arith.constant 0 : index
    %c0_294 = arith.constant 0 : index
    %496 = vector.load %arg30[%c0_293, %c0_294] : memref<64x256xf32, #tpu.memory_space<vmem>>, vector<64x256xf32>
    %cst_295 = arith.constant dense<0.000000e+00> : vector<1x256xf32>
    %497 = tpu.matmul %495, %496, %cst_295 {dimension_numbers = #tpu.dot_dimension_numbers<[1], [0], [0], [1], [0, 0, 1, 1], [], []>} : vector<1x64xf32>, vector<64x256xf32>, vector<1x256xf32> -> vector<1x256xf32>
    %498 = vector.extract_strided_slice %494 {offsets = [1, 0], sizes = [1, 64], strides = [1, 1]} : vector<2x64xf32> to vector<1x64xf32>
    %c0_296 = arith.constant 0 : index
    %c0_297 = arith.constant 0 : index
    %499 = vector.load %arg31[%c0_296, %c0_297] : memref<64x256xf32, #tpu.memory_space<vmem>>, vector<64x256xf32>
    %cst_298 = arith.constant dense<0.000000e+00> : vector<1x256xf32>
    %500 = tpu.matmul %498, %499, %cst_298 {dimension_numbers = #tpu.dot_dimension_numbers<[1], [0], [0], [1], [0, 0, 1, 1], [], []>} : vector<1x64xf32>, vector<64x256xf32>, vector<1x256xf32> -> vector<1x256xf32>
    %501 = arith.addf %497, %500 : vector<1x256xf32>
    %502 = tpu.concatenate %358, %501 in 0 : vector<1x256xf32>, vector<1x256xf32> -> vector<2x256xf32>
    %c0_299 = arith.constant 0 : index
    %c0_300 = arith.constant 0 : index
    %503 = vector.load %arg29[%c0_299, %c0_300] : memref<128x256xf32, #tpu.memory_space<vmem>>, vector<128x256xf32>
    %cst_301 = arith.constant dense<0.000000e+00> : vector<2x256xf32>
    %504 = tpu.matmul %102, %503, %cst_301 {dimension_numbers = #tpu.dot_dimension_numbers<[1], [0], [0], [1], [0, 0, 1, 1], [], []>} : vector<2x128xf32>, vector<128x256xf32>, vector<2x256xf32> -> vector<2x256xf32>
    %505 = arith.addf %502, %504 : vector<2x256xf32>
    %c0_302 = arith.constant 0 : index
    %c0_303 = arith.constant 0 : index
    %506 = vector.load %arg32[%c0_302, %c0_303] : memref<8x256xf32, #tpu.memory_space<vmem>>, vector<8x256xf32>
    %cst_304 = arith.constant dense<0.000000e+00> : vector<2x256xf32>
    %507 = tpu.matmul %166, %506, %cst_304 {dimension_numbers = #tpu.dot_dimension_numbers<[1], [0], [0], [1], [0, 0, 1, 1], [], []>} : vector<2x8xf32>, vector<8x256xf32>, vector<2x256xf32> -> vector<2x256xf32>
    %508 = arith.addf %505, %507 : vector<2x256xf32>
    %c0_305 = arith.constant 0 : index
    %c0_306 = arith.constant 0 : index
    %509 = vector.load %arg33[%c0_305, %c0_306] : memref<3x256xf32, #tpu.memory_space<vmem>>, vector<1x256xf32>
    %510 = vector.broadcast %509 : vector<1x256xf32> to vector<2x256xf32>
    %511 = arith.addf %508, %510 : vector<2x256xf32>
    %cst_307 = arith.constant 0.000000e+00 : f32
    %512 = vector.broadcast %cst_307 : f32 to vector<2x256xf32>
    %513 = arith.cmpf ogt, %511, %512 : vector<2x256xf32>
    %cst_308 = arith.constant 0.000000e+00 : f32
    %514 = vector.broadcast %cst_308 : f32 to vector<2x256xf32>
    %515 = arith.minimumf %511, %514 : vector<2x256xf32>
    %516 = math.exp %515 : vector<2x256xf32>
    %cst_309 = arith.constant 1.000000e+00 : f32
    %517 = vector.broadcast %cst_309 : f32 to vector<2x256xf32>
    %518 = arith.subf %516, %517 : vector<2x256xf32>
    %519 = arith.select %513, %511, %518 : vector<2x256xi1>, vector<2x256xf32>
    %c1_310 = arith.constant 1 : index
    %c0_311 = arith.constant 0 : index
    %520 = vector.load %arg33[%c1_310, %c0_311] : memref<3x256xf32, #tpu.memory_space<vmem>>, vector<1x256xf32>
    %521 = vector.broadcast %520 : vector<1x256xf32> to vector<2x256xf32>
    %522 = arith.mulf %519, %521 : vector<2x256xf32>
    %c2_312 = arith.constant 2 : index
    %c0_313 = arith.constant 0 : index
    %523 = vector.load %arg33[%c2_312, %c0_313] : memref<3x256xf32, #tpu.memory_space<vmem>>, vector<1x256xf32>
    %524 = vector.broadcast %523 : vector<1x256xf32> to vector<2x256xf32>
    %525 = arith.addf %522, %524 : vector<2x256xf32>
    %c0_314 = arith.constant 0 : index
    %c0_315 = arith.constant 0 : index
    %526 = vector.load %arg34[%c0_314, %c0_315] : memref<256x128xf32, #tpu.memory_space<vmem>>, vector<256x128xf32>
    %cst_316 = arith.constant dense<0.000000e+00> : vector<2x128xf32>
    %527 = tpu.matmul %525, %526, %cst_316 {dimension_numbers = #tpu.dot_dimension_numbers<[1], [0], [0], [1], [0, 0, 1, 1], [], []>} : vector<2x256xf32>, vector<256x128xf32>, vector<2x128xf32> -> vector<2x128xf32>
    %c0_317 = arith.constant 0 : index
    %c0_318 = arith.constant 0 : index
    %528 = vector.load %arg35[%c0_317, %c0_318] : memref<3x128xf32, #tpu.memory_space<vmem>>, vector<1x128xf32>
    %529 = vector.broadcast %528 : vector<1x128xf32> to vector<2x128xf32>
    %530 = arith.addf %527, %529 : vector<2x128xf32>
    %cst_319 = arith.constant 0.000000e+00 : f32
    %531 = vector.broadcast %cst_319 : f32 to vector<2x128xf32>
    %532 = arith.cmpf ogt, %530, %531 : vector<2x128xf32>
    %cst_320 = arith.constant 0.000000e+00 : f32
    %533 = vector.broadcast %cst_320 : f32 to vector<2x128xf32>
    %534 = arith.minimumf %530, %533 : vector<2x128xf32>
    %535 = math.exp %534 : vector<2x128xf32>
    %cst_321 = arith.constant 1.000000e+00 : f32
    %536 = vector.broadcast %cst_321 : f32 to vector<2x128xf32>
    %537 = arith.subf %535, %536 : vector<2x128xf32>
    %538 = arith.select %532, %530, %537 : vector<2x128xi1>, vector<2x128xf32>
    %c1_322 = arith.constant 1 : index
    %c0_323 = arith.constant 0 : index
    %539 = vector.load %arg35[%c1_322, %c0_323] : memref<3x128xf32, #tpu.memory_space<vmem>>, vector<1x128xf32>
    %540 = vector.broadcast %539 : vector<1x128xf32> to vector<2x128xf32>
    %541 = arith.mulf %538, %540 : vector<2x128xf32>
    %c2_324 = arith.constant 2 : index
    %c0_325 = arith.constant 0 : index
    %542 = vector.load %arg35[%c2_324, %c0_325] : memref<3x128xf32, #tpu.memory_space<vmem>>, vector<1x128xf32>
    %543 = vector.broadcast %542 : vector<1x128xf32> to vector<2x128xf32>
    %544 = arith.addf %541, %543 : vector<2x128xf32>
    %c0_326 = arith.constant 0 : index
    %c0_327 = arith.constant 0 : index
    %545 = vector.load %arg36[%c0_326, %c0_327] : memref<128x128xf32, #tpu.memory_space<vmem>>, vector<128x128xf32>
    %cst_328 = arith.constant dense<0.000000e+00> : vector<2x128xf32>
    %546 = tpu.matmul %544, %545, %cst_328 {dimension_numbers = #tpu.dot_dimension_numbers<[1], [0], [0], [1], [0, 0, 1, 1], [], []>} : vector<2x128xf32>, vector<128x128xf32>, vector<2x128xf32> -> vector<2x128xf32>
    %c0_329 = arith.constant 0 : index
    %c0_330 = arith.constant 0 : index
    %547 = vector.load %arg37[%c0_329, %c0_330] : memref<3x128xf32, #tpu.memory_space<vmem>>, vector<1x128xf32>
    %548 = vector.broadcast %547 : vector<1x128xf32> to vector<2x128xf32>
    %549 = arith.addf %546, %548 : vector<2x128xf32>
    %cst_331 = arith.constant 0.000000e+00 : f32
    %550 = vector.broadcast %cst_331 : f32 to vector<2x128xf32>
    %551 = arith.cmpf ogt, %549, %550 : vector<2x128xf32>
    %cst_332 = arith.constant 0.000000e+00 : f32
    %552 = vector.broadcast %cst_332 : f32 to vector<2x128xf32>
    %553 = arith.minimumf %549, %552 : vector<2x128xf32>
    %554 = math.exp %553 : vector<2x128xf32>
    %cst_333 = arith.constant 1.000000e+00 : f32
    %555 = vector.broadcast %cst_333 : f32 to vector<2x128xf32>
    %556 = arith.subf %554, %555 : vector<2x128xf32>
    %557 = arith.select %551, %549, %556 : vector<2x128xi1>, vector<2x128xf32>
    %c1_334 = arith.constant 1 : index
    %c0_335 = arith.constant 0 : index
    %558 = vector.load %arg37[%c1_334, %c0_335] : memref<3x128xf32, #tpu.memory_space<vmem>>, vector<1x128xf32>
    %559 = vector.broadcast %558 : vector<1x128xf32> to vector<2x128xf32>
    %560 = arith.mulf %557, %559 : vector<2x128xf32>
    %c2_336 = arith.constant 2 : index
    %c0_337 = arith.constant 0 : index
    %561 = vector.load %arg37[%c2_336, %c0_337] : memref<3x128xf32, #tpu.memory_space<vmem>>, vector<1x128xf32>
    %562 = vector.broadcast %561 : vector<1x128xf32> to vector<2x128xf32>
    %563 = arith.addf %560, %562 : vector<2x128xf32>
    %564 = arith.addf %563, %544 : vector<2x128xf32>
    %c0_338 = arith.constant 0 : index
    %c0_339 = arith.constant 0 : index
    %565 = vector.load %arg38[%c0_338, %c0_339] : memref<128x64xf32, #tpu.memory_space<vmem>>, vector<128x64xf32>
    %cst_340 = arith.constant dense<0.000000e+00> : vector<2x64xf32>
    %566 = tpu.matmul %564, %565, %cst_340 {dimension_numbers = #tpu.dot_dimension_numbers<[1], [0], [0], [1], [0, 0, 1, 1], [], []>} : vector<2x128xf32>, vector<128x64xf32>, vector<2x64xf32> -> vector<2x64xf32>
    %c0_341 = arith.constant 0 : index
    %c0_342 = arith.constant 0 : index
    %567 = vector.load %arg39[%c0_341, %c0_342] : memref<3x64xf32, #tpu.memory_space<vmem>>, vector<1x64xf32>
    %568 = vector.broadcast %567 : vector<1x64xf32> to vector<2x64xf32>
    %569 = arith.addf %566, %568 : vector<2x64xf32>
    %cst_343 = arith.constant 0.000000e+00 : f32
    %570 = vector.broadcast %cst_343 : f32 to vector<2x64xf32>
    %571 = arith.cmpf ogt, %569, %570 : vector<2x64xf32>
    %cst_344 = arith.constant 0.000000e+00 : f32
    %572 = vector.broadcast %cst_344 : f32 to vector<2x64xf32>
    %573 = arith.minimumf %569, %572 : vector<2x64xf32>
    %574 = math.exp %573 : vector<2x64xf32>
    %cst_345 = arith.constant 1.000000e+00 : f32
    %575 = vector.broadcast %cst_345 : f32 to vector<2x64xf32>
    %576 = arith.subf %574, %575 : vector<2x64xf32>
    %577 = arith.select %571, %569, %576 : vector<2x64xi1>, vector<2x64xf32>
    %c1_346 = arith.constant 1 : index
    %c0_347 = arith.constant 0 : index
    %578 = vector.load %arg39[%c1_346, %c0_347] : memref<3x64xf32, #tpu.memory_space<vmem>>, vector<1x64xf32>
    %579 = vector.broadcast %578 : vector<1x64xf32> to vector<2x64xf32>
    %580 = arith.mulf %577, %579 : vector<2x64xf32>
    %c2_348 = arith.constant 2 : index
    %c0_349 = arith.constant 0 : index
    %581 = vector.load %arg39[%c2_348, %c0_349] : memref<3x64xf32, #tpu.memory_space<vmem>>, vector<1x64xf32>
    %582 = vector.broadcast %581 : vector<1x64xf32> to vector<2x64xf32>
    %583 = arith.addf %580, %582 : vector<2x64xf32>
    %c0_350 = arith.constant 0 : index
    %c0_351 = arith.constant 0 : index
    %584 = vector.load %arg40[%c0_350, %c0_351] : memref<64x64xf32, #tpu.memory_space<vmem>>, vector<64x64xf32>
    %cst_352 = arith.constant dense<0.000000e+00> : vector<2x64xf32>
    %585 = tpu.matmul %583, %584, %cst_352 {dimension_numbers = #tpu.dot_dimension_numbers<[1], [0], [0], [1], [0, 0, 1, 1], [], []>} : vector<2x64xf32>, vector<64x64xf32>, vector<2x64xf32> -> vector<2x64xf32>
    %c0_353 = arith.constant 0 : index
    %c0_354 = arith.constant 0 : index
    %586 = vector.load %arg41[%c0_353, %c0_354] : memref<3x64xf32, #tpu.memory_space<vmem>>, vector<1x64xf32>
    %587 = vector.broadcast %586 : vector<1x64xf32> to vector<2x64xf32>
    %588 = arith.addf %585, %587 : vector<2x64xf32>
    %cst_355 = arith.constant 0.000000e+00 : f32
    %589 = vector.broadcast %cst_355 : f32 to vector<2x64xf32>
    %590 = arith.cmpf ogt, %588, %589 : vector<2x64xf32>
    %cst_356 = arith.constant 0.000000e+00 : f32
    %591 = vector.broadcast %cst_356 : f32 to vector<2x64xf32>
    %592 = arith.minimumf %588, %591 : vector<2x64xf32>
    %593 = math.exp %592 : vector<2x64xf32>
    %cst_357 = arith.constant 1.000000e+00 : f32
    %594 = vector.broadcast %cst_357 : f32 to vector<2x64xf32>
    %595 = arith.subf %593, %594 : vector<2x64xf32>
    %596 = arith.select %590, %588, %595 : vector<2x64xi1>, vector<2x64xf32>
    %c1_358 = arith.constant 1 : index
    %c0_359 = arith.constant 0 : index
    %597 = vector.load %arg41[%c1_358, %c0_359] : memref<3x64xf32, #tpu.memory_space<vmem>>, vector<1x64xf32>
    %598 = vector.broadcast %597 : vector<1x64xf32> to vector<2x64xf32>
    %599 = arith.mulf %596, %598 : vector<2x64xf32>
    %c2_360 = arith.constant 2 : index
    %c0_361 = arith.constant 0 : index
    %600 = vector.load %arg41[%c2_360, %c0_361] : memref<3x64xf32, #tpu.memory_space<vmem>>, vector<1x64xf32>
    %601 = vector.broadcast %600 : vector<1x64xf32> to vector<2x64xf32>
    %602 = arith.addf %599, %601 : vector<2x64xf32>
    %603 = arith.addf %602, %583 : vector<2x64xf32>
    %c0_362 = arith.constant 0 : index
    %c0_363 = arith.constant 0 : index
    %604 = vector.load %arg42[%c0_362, %c0_363] : memref<64x64xf32, #tpu.memory_space<vmem>>, vector<64x64xf32>
    %cst_364 = arith.constant dense<0.000000e+00> : vector<2x64xf32>
    %605 = tpu.matmul %603, %604, %cst_364 {dimension_numbers = #tpu.dot_dimension_numbers<[1], [0], [0], [1], [0, 0, 1, 1], [], []>} : vector<2x64xf32>, vector<64x64xf32>, vector<2x64xf32> -> vector<2x64xf32>
    %c0_365 = arith.constant 0 : index
    %c0_366 = arith.constant 0 : index
    %606 = vector.load %arg43[%c0_365, %c0_366] : memref<3x64xf32, #tpu.memory_space<vmem>>, vector<1x64xf32>
    %607 = vector.broadcast %606 : vector<1x64xf32> to vector<2x64xf32>
    %608 = arith.addf %605, %607 : vector<2x64xf32>
    %cst_367 = arith.constant 0.000000e+00 : f32
    %609 = vector.broadcast %cst_367 : f32 to vector<2x64xf32>
    %610 = arith.cmpf ogt, %608, %609 : vector<2x64xf32>
    %cst_368 = arith.constant 0.000000e+00 : f32
    %611 = vector.broadcast %cst_368 : f32 to vector<2x64xf32>
    %612 = arith.minimumf %608, %611 : vector<2x64xf32>
    %613 = math.exp %612 : vector<2x64xf32>
    %cst_369 = arith.constant 1.000000e+00 : f32
    %614 = vector.broadcast %cst_369 : f32 to vector<2x64xf32>
    %615 = arith.subf %613, %614 : vector<2x64xf32>
    %616 = arith.select %610, %608, %615 : vector<2x64xi1>, vector<2x64xf32>
    %c1_370 = arith.constant 1 : index
    %c0_371 = arith.constant 0 : index
    %617 = vector.load %arg43[%c1_370, %c0_371] : memref<3x64xf32, #tpu.memory_space<vmem>>, vector<1x64xf32>
    %618 = vector.broadcast %617 : vector<1x64xf32> to vector<2x64xf32>
    %619 = arith.mulf %616, %618 : vector<2x64xf32>
    %c2_372 = arith.constant 2 : index
    %c0_373 = arith.constant 0 : index
    %620 = vector.load %arg43[%c2_372, %c0_373] : memref<3x64xf32, #tpu.memory_space<vmem>>, vector<1x64xf32>
    %621 = vector.broadcast %620 : vector<1x64xf32> to vector<2x64xf32>
    %622 = arith.addf %619, %621 : vector<2x64xf32>
    %623 = arith.addf %622, %603 : vector<2x64xf32>
    %c0_374 = arith.constant 0 : index
    %c0_375 = arith.constant 0 : index
    %624 = vector.load %arg44[%c0_374, %c0_375] : memref<64x64xf32, #tpu.memory_space<vmem>>, vector<64x64xf32>
    %cst_376 = arith.constant dense<0.000000e+00> : vector<2x64xf32>
    %625 = tpu.matmul %623, %624, %cst_376 {dimension_numbers = #tpu.dot_dimension_numbers<[1], [0], [0], [1], [0, 0, 1, 1], [], []>} : vector<2x64xf32>, vector<64x64xf32>, vector<2x64xf32> -> vector<2x64xf32>
    %c0_377 = arith.constant 0 : index
    %c0_378 = arith.constant 0 : index
    %626 = vector.load %arg45[%c0_377, %c0_378] : memref<3x64xf32, #tpu.memory_space<vmem>>, vector<1x64xf32>
    %627 = vector.broadcast %626 : vector<1x64xf32> to vector<2x64xf32>
    %628 = arith.addf %625, %627 : vector<2x64xf32>
    %cst_379 = arith.constant 0.000000e+00 : f32
    %629 = vector.broadcast %cst_379 : f32 to vector<2x64xf32>
    %630 = arith.cmpf ogt, %628, %629 : vector<2x64xf32>
    %cst_380 = arith.constant 0.000000e+00 : f32
    %631 = vector.broadcast %cst_380 : f32 to vector<2x64xf32>
    %632 = arith.minimumf %628, %631 : vector<2x64xf32>
    %633 = math.exp %632 : vector<2x64xf32>
    %cst_381 = arith.constant 1.000000e+00 : f32
    %634 = vector.broadcast %cst_381 : f32 to vector<2x64xf32>
    %635 = arith.subf %633, %634 : vector<2x64xf32>
    %636 = arith.select %630, %628, %635 : vector<2x64xi1>, vector<2x64xf32>
    %c1_382 = arith.constant 1 : index
    %c0_383 = arith.constant 0 : index
    %637 = vector.load %arg45[%c1_382, %c0_383] : memref<3x64xf32, #tpu.memory_space<vmem>>, vector<1x64xf32>
    %638 = vector.broadcast %637 : vector<1x64xf32> to vector<2x64xf32>
    %639 = arith.mulf %636, %638 : vector<2x64xf32>
    %c2_384 = arith.constant 2 : index
    %c0_385 = arith.constant 0 : index
    %640 = vector.load %arg45[%c2_384, %c0_385] : memref<3x64xf32, #tpu.memory_space<vmem>>, vector<1x64xf32>
    %641 = vector.broadcast %640 : vector<1x64xf32> to vector<2x64xf32>
    %642 = arith.addf %639, %641 : vector<2x64xf32>
    %643 = arith.addf %642, %623 : vector<2x64xf32>
    %c0_386 = arith.constant 0 : index
    %c0_387 = arith.constant 0 : index
    %644 = vector.load %arg46[%c0_386, %c0_387] : memref<64x64xf32, #tpu.memory_space<vmem>>, vector<64x64xf32>
    %cst_388 = arith.constant dense<0.000000e+00> : vector<2x64xf32>
    %645 = tpu.matmul %643, %644, %cst_388 {dimension_numbers = #tpu.dot_dimension_numbers<[1], [0], [0], [1], [0, 0, 1, 1], [], []>} : vector<2x64xf32>, vector<64x64xf32>, vector<2x64xf32> -> vector<2x64xf32>
    %c0_389 = arith.constant 0 : index
    %c0_390 = arith.constant 0 : index
    %646 = vector.load %arg47[%c0_389, %c0_390] : memref<3x64xf32, #tpu.memory_space<vmem>>, vector<1x64xf32>
    %647 = vector.broadcast %646 : vector<1x64xf32> to vector<2x64xf32>
    %648 = arith.addf %645, %647 : vector<2x64xf32>
    %cst_391 = arith.constant 0.000000e+00 : f32
    %649 = vector.broadcast %cst_391 : f32 to vector<2x64xf32>
    %650 = arith.cmpf ogt, %648, %649 : vector<2x64xf32>
    %cst_392 = arith.constant 0.000000e+00 : f32
    %651 = vector.broadcast %cst_392 : f32 to vector<2x64xf32>
    %652 = arith.minimumf %648, %651 : vector<2x64xf32>
    %653 = math.exp %652 : vector<2x64xf32>
    %cst_393 = arith.constant 1.000000e+00 : f32
    %654 = vector.broadcast %cst_393 : f32 to vector<2x64xf32>
    %655 = arith.subf %653, %654 : vector<2x64xf32>
    %656 = arith.select %650, %648, %655 : vector<2x64xi1>, vector<2x64xf32>
    %c1_394 = arith.constant 1 : index
    %c0_395 = arith.constant 0 : index
    %657 = vector.load %arg47[%c1_394, %c0_395] : memref<3x64xf32, #tpu.memory_space<vmem>>, vector<1x64xf32>
    %658 = vector.broadcast %657 : vector<1x64xf32> to vector<2x64xf32>
    %659 = arith.mulf %656, %658 : vector<2x64xf32>
    %c2_396 = arith.constant 2 : index
    %c0_397 = arith.constant 0 : index
    %660 = vector.load %arg47[%c2_396, %c0_397] : memref<3x64xf32, #tpu.memory_space<vmem>>, vector<1x64xf32>
    %661 = vector.broadcast %660 : vector<1x64xf32> to vector<2x64xf32>
    %662 = arith.addf %659, %661 : vector<2x64xf32>
    %663 = arith.addf %662, %643 : vector<2x64xf32>
    %c0_398 = arith.constant 0 : index
    %c0_399 = arith.constant 0 : index
    %664 = vector.load %arg48[%c0_398, %c0_399] : memref<64x64xf32, #tpu.memory_space<vmem>>, vector<64x64xf32>
    %cst_400 = arith.constant dense<0.000000e+00> : vector<2x64xf32>
    %665 = tpu.matmul %663, %664, %cst_400 {dimension_numbers = #tpu.dot_dimension_numbers<[1], [0], [0], [1], [0, 0, 1, 1], [], []>} : vector<2x64xf32>, vector<64x64xf32>, vector<2x64xf32> -> vector<2x64xf32>
    %c0_401 = arith.constant 0 : index
    %c0_402 = arith.constant 0 : index
    %666 = vector.load %arg49[%c0_401, %c0_402] : memref<1x64xf32, #tpu.memory_space<vmem>>, vector<1x64xf32>
    %667 = vector.broadcast %666 : vector<1x64xf32> to vector<2x64xf32>
    %668 = arith.addf %665, %667 : vector<2x64xf32>
    %c0_403 = arith.constant 0 : index
    %c0_404 = arith.constant 0 : index
    %669 = vector.load %arg50[%c0_403, %c0_404] : memref<2x64xf32, #tpu.memory_space<vmem>>, vector<2x64xf32>
    tpu.vector_store %arg50[%c0_403, %c0_404], %668 {strides = array<i32>} : memref<2x64xf32, #tpu.memory_space<vmem>>, vector<2x64xf32>,
    return
  }
}

</mosaic_0001>

<bundles_post_ra>
// kernel: multi_input_embedding_forward.1
= control target key start
LH: loop header
LB: loop body
LE: loop exit
PB: predicated region body
PF: predicated region fallthrough
CT: control target
= control target key end

     0   :  { %s6428_s6 = smov 1   ;;  %s6429_s10 = smov 2   ;;  %s8648_s0 = inlined_call_operand.smem [shape: u32[51], index: -1, kind: input, shape index: {}] }
   0x1   :  { %s6529_s5 = sld [smem:[%s8648_s0]]   ;;  %s6430_s14 = smov 3  }
   0x2   :  { %s6534_s9 = sld [smem:[%s8648_s0 + %s6428_s6]]   ;;  %s6431_s18 = smov 4  }
   0x3   :  { %s6539_s13 = sld [smem:[%s8648_s0 + %s6429_s10]]   ;;  %s6432_s22 = smov 5  }
   0x4   :  { %s6544_s17 = sld [smem:[%s8648_s0 + %s6430_s14]]   ;;  %s6433_s26 = smov 6  }
   0x5   :  { %s6549_s21 = sld [smem:[%s8648_s0 + %s6431_s18]]   ;;  %s6434_s30 = smov 7  }
   0x6   :  { %s6554_s25 = sld [smem:[%s8648_s0 + %s6432_s22]]   ;;  %s6435_s4 = smov 8  }
   0x7   :  { %8688 = sst [smem:[#allocation75_spill]] %s6529_s5  ;;  %s6436_s10 = smov 9  }
   0x8   :  { %8689 = sst [smem:[#allocation76_spill]] %s6534_s9  ;;  %s6437_s15 = smov 10  }
   0x9   :  { %8690 = sst [smem:[#allocation77_spill]] %s6539_s13  ;;  %s6438_s20 = smov 11  }
   0xa   :  { %s6559_s29 = sld [smem:[%s8648_s0 + %s6433_s26]]   ;;  %s6439_s26 = smov 12  }
   0xb   :  { %8691 = sst [smem:[#allocation78_spill]] %s6549_s21  ;;  %s6440_s1 = smov 13  }
   0xc   :  { %8692 = sst [smem:[#allocation79_spill]] %s6554_s25  ;;  %s6441_s7 = smov 14  }
   0xd   :  { %s6564_s3 = sld [smem:[%s8648_s0 + %s6434_s30]]   ;;  %s6443_s22 = smov 16  }
   0xe   :  { %s6569_s8 = sld [smem:[%s8648_s0 + %s6435_s4]]   ;;  %s6444_s28 = smov 17  }
   0xf   :  { %s6574_s14 = sld [smem:[%s8648_s0 + %s6436_s10]]  }
  0x10   :  { %s6579_s19 = sld [smem:[%s8648_s0 + %s6437_s15]]   ;;  %s6442_s15 = smov 15  }
  0x11   :  { %s6584_s24 = sld [smem:[%s8648_s0 + %s6438_s20]]  }
  0x12   :  { %s6589_s30 = sld [smem:[%s8648_s0 + %s6439_s26]]  }
  0x13   :  { %8693 = sst [smem:[#allocation80_spill]] %s6564_s3 }
  0x14   :  { %8694 = sst [smem:[#allocation81_spill]] %s6569_s8 }
  0x15   :  { %s6594_s6 = sld [smem:[%s8648_s0 + %s6440_s1]]  }
  0x16   :  { %8695 = sst [smem:[#allocation82_spill]] %s6579_s19 }
  0x17   :  { %8696 = sst [smem:[#allocation83_spill]] %s6584_s24 }
  0x18   :  { %8697 = sst [smem:[#allocation84_spill]] %s6589_s30 }
  0x19   :  { %s6599_s12 = sld [smem:[%s8648_s0 + %s6441_s7]]   ;;  %s6445_s7 = smov 18  }
  0x1a   :  { %s6604_s20 = sld [smem:[%s8648_s0 + %s6442_s15]]   ;;  %s6446_s15 = smov 19  }
  0x1b   :  { %8698 = sst [smem:[#allocation85_spill]] %s6594_s6 }
  0x1c   :  { %s6609_s27 = sld [smem:[%s8648_s0 + %s6443_s22]]   ;;  %s6447_s22 = smov 20  }
  0x1d   :  { %s6614_s4 = sld [smem:[%s8648_s0 + %s6444_s28]]   ;;  %s6448_s28 = smov 21  }
  0x1e   :  { %s6619_s3 = sld [smem:[%s8648_s0 + %s6445_s7]]   ;;  %s6449_s7 = smov 22  }
  0x1f   :  { %8699 = sst [smem:[#allocation86_spill]] %s6599_s12 }
  0x20   :  { %8700 = sst [smem:[#allocation87_spill]] %s6604_s20 }
  0x21   :  { %s6624_s25 = sld [smem:[%s8648_s0 + %s6446_s15]]   ;;  %s6450_s15 = smov 23  }
  0x22   :  { %8701 = sst [smem:[#allocation88_spill]] %s6609_s27 }
  0x23   :  { %s6629_s9 = sld [smem:[%s8648_s0 + %s6447_s22]]   ;;  %s6451_s22 = smov 24  }
  0x24   :  { %8702 = sst [smem:[#allocation89_spill]] %s6619_s3 }
  0x25   :  { %s6634_s27 = sld [smem:[%s8648_s0 + %s6448_s28]]   ;;  %s6452_s28 = smov 25  }
  0x26   :  { %s6639_s3 = sld [smem:[%s8648_s0 + %s6449_s7]]   ;;  %s6453_s7 = smov 26  }
  0x27   :  { %8703 = sst [smem:[#allocation90_spill]] %s6624_s25 }
  0x28   :  { %s6644_s25 = sld [smem:[%s8648_s0 + %s6450_s15]]   ;;  %s6454_s15 = smov 27  }
  0x29   :  { %8704 = sst [smem:[#allocation91_spill]] %s6629_s9 }
  0x2a   :  { %s6649_s9 = sld [smem:[%s8648_s0 + %s6451_s22]]   ;;  %s6455_s22 = smov 28  }
  0x2b   :  { %8705 = sst [smem:[#allocation92_spill]] %s6634_s27 }
  0x2c   :  { %s6654_s12 = sld [smem:[%s8648_s0 + %s6452_s28]]   ;;  %s6456_s28 = smov 29  }
  0x2d   :  { %s6659_s30 = sld [smem:[%s8648_s0 + %s6453_s7]]   ;;  %s6457_s7 = smov 30  }
  0x2e   :  { %8706 = sst [smem:[#allocation93_spill]] %s6644_s25 }
  0x2f   :  { %s6664_s25 = sld [smem:[%s8648_s0 + %s6454_s15]]   ;;  %s6458_s15 = smov 31  }
  0x30   :  { %8707 = sst [smem:[#allocation94_spill]] %s6649_s9 }
  0x31   :  { %s6669_s6 = sld [smem:[%s8648_s0 + %s6455_s22]]   ;;  %s6459_s22 = smov 32  }
  0x32   :  { %s6674_s19 = sld [smem:[%s8648_s0 + %s6456_s28]]   ;;  %s6460_s28 = smov 33  }
  0x33   :  { %8708 = sst [smem:[#allocation95_spill]] %s6659_s30 }
  0x34   :  { %s6679_s24 = sld [smem:[%s8648_s0 + %s6457_s7]]   ;;  %s6461_s7 = smov 34  }
  0x35   :  { %s6684_s5 = sld [smem:[%s8648_s0 + %s6458_s15]]   ;;  %s6462_s15 = smov 35  }
  0x36   :  { %s6699_s30 = sld [smem:[%s8648_s0 + %s6461_s7]]   ;;  %s6465_s7 = smov 38  }
  0x37   :  { %8709 = sst [smem:[#allocation96_spill]] %s6669_s6 }
  0x38   :  { %8710 = sst [smem:[#allocation97_spill]] %s6674_s19 }
  0x39   :  { %s6689_s6 = sld [smem:[%s8648_s0 + %s6459_s22]]   ;;  %s6463_s22 = smov 36  }
  0x3a   :  { %s6694_s19 = sld [smem:[%s8648_s0 + %s6460_s28]]   ;;  %s6464_s28 = smov 37  }
  0x3b   :  { %8711 = sst [smem:[#allocation98_spill]] %s6684_s5 }
  0x3c   :  { %s6704_s5 = sld [smem:[%s8648_s0 + %s6462_s15]]   ;;  %s6466_s15 = smov 39  }
  0x3d   :  { %s6709_s9 = sld [smem:[%s8648_s0 + %s6463_s22]]   ;;  %s6467_s22 = smov 40  }
  0x3e   :  { %s6719_s27 = sld [smem:[%s8648_s0 + %s6465_s7]]   ;;  %s6469_s7 = smov 42  }
  0x3f   :  { %s6729_s20 = sld [smem:[%s8648_s0 + %s6467_s22]]   ;;  %s6471_s22 = smov 44  }
  0x40   :  { %8712 = sst [smem:[#allocation99_spill]] %s6694_s19 }
  0x41   :  { %s6714_s19 = sld [smem:[%s8648_s0 + %s6464_s28]]   ;;  %s6468_s28 = smov 41  }
  0x42   :  { %8713 = sst [smem:[#allocation100_spill]] %s6704_s5 }
  0x43   :  { %s6724_s5 = sld [smem:[%s8648_s0 + %s6466_s15]]   ;;  %s6470_s15 = smov 43  }
  0x44   :  { %8715 = sst [smem:[#allocation102_spill]] %s6719_s27 }
  0x45   :  { %8716 = sst [smem:[#allocation103_spill]] %s6729_s20 }
  0x46   :  { %s6739_s27 = sld [smem:[%s8648_s0 + %s6469_s7]]   ;;  %s6473_s7 = smov 46  }
  0x47   :  { %8714 = sst [smem:[#allocation101_spill]] %s6714_s19 }
  0x48   :  { %s6734_s19 = sld [smem:[%s8648_s0 + %s6468_s28]]   ;;  %s6472_s28 = smov 45  }
  0x49   :  { %s6744_s8 = sld [smem:[%s8648_s0 + %s6470_s15]]   ;;  %s6474_s15 = smov 47  }
  0x4a   :  { %s6749_s20 = sld [smem:[%s8648_s0 + %s6471_s22]]   ;;  %s6475_s22 = smov 48  }
  0x4b   :  { %s6754_s21 = sld [smem:[%s8648_s0 + %s6472_s28]]   ;;  %s6476_s28 = smov 49  }
  0x4c   :  { %8717 = sst [smem:[#allocation104_spill]] %s6739_s27 }
  0x4d   :  { %s6759_s27 = sld [smem:[%s8648_s0 + %s6473_s7]]   ;;  %s6477_s7 = smov 50  }
  0x4e   :  { %s6764_s13 = sld [smem:[%s8648_s0 + %s6474_s15]]  }
  0x50   :  { %8718 = sst [smem:[#allocation105_spill]] %s6749_s20 }
  0x51   :  { %8719 = sst [smem:[#allocation106_spill]] %s6754_s21 }
  0x52   :  { %s6769_s20 = sld [smem:[%s8648_s0 + %s6475_s22]]  }
  0x53   :  { %8720 = sst [smem:[#allocation107_spill]] %s6759_s27 }
  0x54   :  { %s6774_s21 = sld [smem:[%s8648_s0 + %s6476_s28]]  }
  0x55   :  { %s6779_s27 = sld [smem:[%s8648_s0 + %s6477_s7]]  }
  0x56   :  { %106 = vsyncpa [#allocation3], 0 }
  0x57   :  { %107 = vsyncpa [#allocation6], 0 }
  0x58   :  { %108 = vsyncpa [#allocation9], 0 }
  0x59   :  { %109 = vsyncpa [#allocation12], 0 }
  0x5a   :  { %110 = vsyncpa [#allocation15], 0 }
  0x5b   :  { %111 = vsyncpa [#allocation18], 0 }
  0x5c   :  { %112 = vsyncpa [#allocation21], 0 }
  0x5d   :  { %113 = vsyncpa [#allocation24], 0 }
  0x5e   :  { %114 = vsyncpa [#allocation27], 0 }
  0x5f   :  { %115 = vsyncpa [#allocation30], 0 }
  0x60   :  { %116 = vsyncpa [#allocation33], 0 }
  0x61   :  { %117 = vsyncpa [#allocation36], 0 }
  0x62   :  { %118 = vsyncpa [#allocation39], 0 }
  0x63   :  { %119 = vsyncpa [#allocation42], 0 }
  0x64   :  { %120 = vsyncpa [#allocation45], 0 }
  0x65   :  { %121 = vsyncpa [#allocation48], 0 }
  0x66   :  { %122 = vsyncpa [#allocation51], 0 }
  0x67   :  { %123 = vsyncpa [#allocation54], 0  ;;  %s145_s0 = sshll.u32 %s6544_s17, 4  ;;  %s146_s0 = int_to_ptr.hbm [resolvable:$true] %s145_s0 }
  0x68   :  { %124 = vsyncpa [#allocation4], 0  ;;  %s6478_s15 = smov [#allocation5]   ;;  %s169_s18 = sshll.u32 %s6559_s29, 4  ;;  %s170_s18 = int_to_ptr.hbm [resolvable:$true] %s169_s18 }
  0x69   :  { %s147_s16 = sshll.u32 %s6478_s15, 4  ;;  %s5550_s22 = sshra.s32 %s146_s0, 4  ;;  %s148_s16 = int_to_ptr.vmem [resolvable:$true] %s147_s16  ;;  %s5551_s22 = int_to_ptr.hbm [resolvable:$true] %s5550_s22 }
  0x6a   :  { %s5552_s23 = scalar_lea.hbm %s5551_s22, 8  ;;  %s5554_s26 = scalar_lea.hbm %s6544_s17, 8 }
  0x6b   :  { %p5553_p0 = scmp.ne.s32.totalorder %s5551_s22, %s5552_s23  ;;  %p5555_p1 = scmp.lt.s32.totalorder %s5551_s22, %s6544_s17 }
  0x6c   :  { %p5556_p2 = scmp.lt.s32.totalorder %s5554_s26, %s5552_s23 }
  0x6e   :  { %p5557_p3 = por %p5556_p2, %p5555_p1 }
  0x70   :  { %p5558_p4 = pnand %p5557_p3, %p5553_p0 }
  0x72   :  { %5561 = shalt.err (!%p5558_p4)
}
  0x73   :  { %150 = dma.hbm_to_vmem [thread:$0]  %s146_s0, 128, %s148_s16, [#allocation6]  }
  0x74   :  { %s6479_s28 = smov [#allocation8]   ;;  %s192_s2 = sshll.u32 %s6574_s14, 4  ;;  %s6786_s2 = int_to_ptr.hbm [resolvable:$true] %s192_s2 }
  0x75   :  { %s171_s1 = sshll.u32 %s6479_s28, 4  ;;  %s5574_s7 = sshra.s32 %s170_s18, 4  ;;  %s172_s1 = int_to_ptr.vmem [resolvable:$true] %s171_s1  ;;  %s5575_s7 = int_to_ptr.hbm [resolvable:$true] %s5574_s7 }
  0x76   :  { %s5576_s10 = scalar_lea.hbm %s5575_s7, 4  ;;  %s5578_s17 = scalar_lea.hbm %s6559_s29, 4 }
  0x77   :  { %p5577_p5 = scmp.ne.s32.totalorder %s5575_s7, %s5576_s10  ;;  %p5579_p6 = scmp.lt.s32.totalorder %s5575_s7, %s6559_s29 }
  0x78   :  { %p5580_p7 = scmp.lt.s32.totalorder %s5578_s17, %s5576_s10 }
  0x7a   :  { %p5581_p8 = por %p5580_p7, %p5579_p6 }
  0x7c   :  { %p5582_p9 = pnand %p5581_p8, %p5577_p5 }
  0x7e   :  { %5585 = shalt.err (!%p5582_p9)
}
  0x7f   :  { %174 = dma.hbm_to_vmem [thread:$0]  %s170_s18, 64, %s172_s1, [#allocation9]  }
  0x80   :  { %s6480_s11 = smov [#allocation11]   ;;  %s230_s15 = sshll.u32 %s6614_s4, 4  ;;  %s231_s15 = int_to_ptr.hbm [resolvable:$true] %s230_s15 }
  0x81   :  { %s194_s0 = sshll.u32 %s6480_s11, 4  ;;  %s5598_s16 = sshra.s32 %s6786_s2, 4  ;;  %s195_s0 = int_to_ptr.vmem [resolvable:$true] %s194_s0  ;;  %s5599_s16 = int_to_ptr.hbm [resolvable:$true] %s5598_s16 }
  0x82   :  { %s5600_s22 = scalar_lea.hbm %s5599_s16, 56  ;;  %s5602_s23 = scalar_lea.hbm %s6574_s14, 56 }
  0x83   :  { %p5601_p10 = scmp.ne.s32.totalorder %s5599_s16, %s5600_s22  ;;  %p5603_p11 = scmp.lt.s32.totalorder %s5599_s16, %s6574_s14 }
  0x84   :  { %p5604_p12 = scmp.lt.s32.totalorder %s5602_s23, %s5600_s22 }
  0x86   :  { %p5605_p13 = por %p5604_p12, %p5603_p11 }
  0x88   :  { %p5606_p0 = pnand %p5605_p13, %p5601_p10 }
  0x8a   :  { %5609 = shalt.err (!%p5606_p0)
}
  0x8b   :  { %s6481_s29 = smov 128   ;;  %s6482_s18 = smov 8  }
  0x8c   :  { %200 = dma.hbm_to_vmem [thread:$0]  %s6786_s2, 896, %s195_s0, [#allocation12], %s6481_s29, %s6481_s29, %s6482_s18  }
  0x8d   :  { %s6483_s26 = smov [#allocation14]   ;;  %s263_s1 = sshll.u32 %s6639_s3, 4  ;;  %s264_s1 = int_to_ptr.hbm [resolvable:$true] %s263_s1 }
  0x8e   :  { %s232_s28 = sshll.u32 %s6483_s26, 4  ;;  %s5622_s14 = sshra.s32 %s231_s15, 4  ;;  %s233_s28 = int_to_ptr.vmem [resolvable:$true] %s232_s28  ;;  %s5623_s14 = int_to_ptr.hbm [resolvable:$true] %s5622_s14 }
  0x8f   :  { %s5624_s7 = scalar_lea.hbm %s5623_s14, 32  ;;  %s5626_s10 = scalar_lea.hbm %s6614_s4, 32 }
  0x90   :  { %p5625_p1 = scmp.ne.s32.totalorder %s5623_s14, %s5624_s7  ;;  %p5627_p2 = scmp.lt.s32.totalorder %s5623_s14, %s6614_s4 }
  0x91   :  { %p5628_p3 = scmp.lt.s32.totalorder %s5626_s10, %s5624_s7 }
  0x93   :  { %p5629_p4 = por %p5628_p3, %p5627_p2 }
  0x95   :  { %p5630_p5 = pnand %p5629_p4, %p5625_p1 }
  0x97   :  { %5633 = shalt.err (!%p5630_p5)
}
  0x98   :  { %238 = dma.hbm_to_vmem [thread:$0]  %s231_s15, 512, %s233_s28, [#allocation15], %s6481_s29, %s6481_s29, %s6482_s18  }
  0x99   :  { %s287_s2 = sshll.u32 %s6654_s12, 4  ;;  %s6484_s17 = smov [#allocation17]   ;;  %s288_s2 = int_to_ptr.hbm [resolvable:$true] %s287_s2 }
  0x9a   :  { %s265_s11 = sshll.u32 %s6484_s17, 4  ;;  %s5646_s0 = sshra.s32 %s264_s1, 4  ;;  %s266_s11 = int_to_ptr.vmem [resolvable:$true] %s265_s11  ;;  %s5647_s0 = int_to_ptr.hbm [resolvable:$true] %s5646_s0 }
  0x9b   :  { %s5648_s16 = scalar_lea.hbm %s5647_s0, 4  ;;  %s5650_s4 = scalar_lea.hbm %s6639_s3, 4 }
  0x9c   :  { %p5649_p6 = scmp.ne.s32.totalorder %s5647_s0, %s5648_s16  ;;  %p5651_p7 = scmp.lt.s32.totalorder %s5647_s0, %s6639_s3 }
  0x9d   :  { %p5652_p8 = scmp.lt.s32.totalorder %s5650_s4, %s5648_s16 }
  0x9f   :  { %p5653_p9 = por %p5652_p8, %p5651_p7 }
  0xa1   :  { %p5654_p10 = pnand %p5653_p9, %p5649_p6 }
  0xa3   :  { %5657 = shalt.err (!%p5654_p10)
}
  0xa4   :  { %268 = dma.hbm_to_vmem [thread:$0]  %s264_s1, 64, %s266_s11, [#allocation18]  }
  0xa5   :  { %s6485_s15 = smov [#allocation20]   ;;  %s309_s23 = sshll.u32 %s6664_s25, 4  ;;  %s310_s23 = int_to_ptr.hbm [resolvable:$true] %s309_s23 }
  0xa6   :  { %s289_s22 = sshll.u32 %s6485_s15, 4  ;;  %s5670_s26 = sshra.s32 %s288_s2, 4  ;;  %s290_s22 = int_to_ptr.vmem [resolvable:$true] %s289_s22  ;;  %s5671_s26 = int_to_ptr.hbm [resolvable:$true] %s5670_s26 }
  0xa7   :  { %s5672_s28 = scalar_lea.hbm %s5671_s26, 8  ;;  %s5674_s14 = scalar_lea.hbm %s6654_s12, 8 }
  0xa8   :  { %p5673_p11 = scmp.ne.s32.totalorder %s5671_s26, %s5672_s28  ;;  %p5675_p12 = scmp.lt.s32.totalorder %s5671_s26, %s6654_s12 }
  0xa9   :  { %p5676_p13 = scmp.lt.s32.totalorder %s5674_s14, %s5672_s28 }
  0xab   :  { %p5677_p0 = por %p5676_p13, %p5675_p12 }
  0xad   :  { %p5678_p1 = pnand %p5677_p0, %p5673_p11 }
  0xaf   :  { %5681 = shalt.err (!%p5678_p1)
}
  0xb0   :  { %292 = dma.hbm_to_vmem [thread:$0]  %s288_s2, 128, %s290_s22, [#allocation21]  }
  0xb1   :  { %s332_s3 = sshll.u32 %s6679_s24, 4  ;;  %s6486_s1 = smov [#allocation23]   ;;  %s6811_s3 = int_to_ptr.hbm [resolvable:$true] %s332_s3 }
  0xb2   :  { %s311_s7 = sshll.u32 %s6486_s1, 4  ;;  %s5694_s10 = sshra.s32 %s310_s23, 4  ;;  %s312_s7 = int_to_ptr.vmem [resolvable:$true] %s311_s7  ;;  %s5695_s10 = int_to_ptr.hbm [resolvable:$true] %s5694_s10 }
  0xb3   :  { %s5696_s17 = scalar_lea.hbm %s5695_s10, 8  ;;  %s5698_s11 = scalar_lea.hbm %s6664_s25, 8 }
  0xb4   :  { %p5697_p2 = scmp.ne.s32.totalorder %s5695_s10, %s5696_s17  ;;  %p5699_p3 = scmp.lt.s32.totalorder %s5695_s10, %s6664_s25 }
  0xb5   :  { %p5700_p4 = scmp.lt.s32.totalorder %s5698_s11, %s5696_s17 }
  0xb7   :  { %p5701_p5 = por %p5700_p4, %p5699_p3 }
  0xb9   :  { %p5702_p6 = pnand %p5701_p5, %p5697_p2 }
  0xbb   :  { %5705 = shalt.err (!%p5702_p6)
}
  0xbc   :  { %314 = dma.hbm_to_vmem [thread:$0]  %s310_s23, 128, %s312_s7, [#allocation24]  }
  0xbd   :  { %s6487_s12 = smov [#allocation26]   ;;  %s5718_s0 = sshra.s32 %s6811_s3, 4  ;;  %s5719_s0 = int_to_ptr.hbm [resolvable:$true] %s5718_s0 }
  0xbe   :  { %s334_s2 = sshll.u32 %s6487_s12, 4  ;;  %s5720_s16 = scalar_lea.hbm %s5719_s0, 128  ;;  %s335_s2 = int_to_ptr.vmem [resolvable:$true] %s334_s2 }
  0xbf   :  { %p5721_p7 = scmp.ne.s32.totalorder %s5719_s0, %s5720_s16  ;;  %s5722_s4 = scalar_lea.hbm %s6679_s24, 128 }
  0xc0   :  { %p5723_p8 = scmp.lt.s32.totalorder %s5719_s0, %s6679_s24  ;;  %p5724_p9 = scmp.lt.s32.totalorder %s5722_s4, %s5720_s16 }
  0xc2   :  { %p5725_p10 = por %p5724_p9, %p5723_p8 }
  0xc4   :  { %p5726_p11 = pnand %p5725_p10, %p5721_p7 }
  0xc6   :  { %5729 = shalt.err (!%p5726_p11)
}
  0xc7   :  { %s6488_s25 = smov 256   ;;  %s6489_s15 = smov 16  }
  0xc8   :  { %340 = dma.hbm_to_vmem [thread:$0]  %s6811_s3, 2048, %s335_s2, [#allocation27], %s6488_s25, %s6488_s25, %s6489_s15  }
  0xc9   :  { %s359_s22 = sshll.u32 %s6689_s6, 4  ;;  %s6490_s23 = smov [#allocation29]   ;;  %s360_s22 = int_to_ptr.hbm [resolvable:$true] %s359_s22 }
  0xca   :  { %s361_s26 = sshll.u32 %s6490_s23, 4  ;;  %s380_s24 = sshll.u32 %s6699_s30, 4  ;;  %s362_s26 = int_to_ptr.vmem [resolvable:$true] %s361_s26  ;;  %s381_s24 = int_to_ptr.hbm [resolvable:$true] %s380_s24 }
  0xcb   :  { %s5742_s28 = sshra.s32 %s360_s22, 4  ;;  %s5746_s1 = scalar_lea.hbm %s6689_s6, 16  ;;  %s5743_s28 = int_to_ptr.hbm [resolvable:$true] %s5742_s28 }
  0xcc   :  { %s5744_s14 = scalar_lea.hbm %s5743_s28, 16  ;;  %p5747_p13 = scmp.lt.s32.totalorder %s5743_s28, %s6689_s6 }
  0xcd   :  { %p5745_p12 = scmp.ne.s32.totalorder %s5743_s28, %s5744_s14  ;;  %p5748_p0 = scmp.lt.s32.totalorder %s5746_s1, %s5744_s14 }
  0xcf   :  { %p5749_p1 = por %p5748_p0, %p5747_p13 }
  0xd1   :  { %p5750_p2 = pnand %p5749_p1, %p5745_p12 }
  0xd3   :  { %5753 = shalt.err (!%p5750_p2)
}
  0xd4   :  { %364 = dma.hbm_to_vmem [thread:$0]  %s360_s22, 256, %s362_s26, [#allocation30]  }
  0xd5   :  { %s6491_s3 = smov [#allocation32]   ;;  %s404_s10 = sshll.u32 %s6709_s9, 4  ;;  %s6827_s10 = int_to_ptr.hbm [resolvable:$true] %s404_s10 }
  0xd6   :  { %s382_s7 = sshll.u32 %s6491_s3, 4  ;;  %s5766_s17 = sshra.s32 %s381_s24, 4  ;;  %s383_s7 = int_to_ptr.vmem [resolvable:$true] %s382_s7  ;;  %s5767_s17 = int_to_ptr.hbm [resolvable:$true] %s5766_s17 }
  0xd7   :  { %s5768_s11 = scalar_lea.hbm %s5767_s17, 256  ;;  %s5770_s6 = scalar_lea.hbm %s6699_s30, 256 }
  0xd8   :  { %p5769_p3 = scmp.ne.s32.totalorder %s5767_s17, %s5768_s11  ;;  %p5771_p4 = scmp.lt.s32.totalorder %s5767_s17, %s6699_s30 }
  0xd9   :  { %p5772_p5 = scmp.lt.s32.totalorder %s5770_s6, %s5768_s11 }
  0xdb   :  { %p5773_p6 = por %p5772_p5, %p5771_p4 }
  0xdd   :  { %p5774_p7 = pnand %p5773_p6, %p5769_p3 }
  0xdf   :  { %5777 = shalt.err (!%p5774_p7)
}
  0xe0   :  { %388 = dma.hbm_to_vmem [thread:$0]  %s381_s24, 4096, %s383_s7, [#allocation33], %s6481_s29, %s6481_s29, %s6482_s18  }
  0xe1   :  { %s431_s12 = sshll.u32 %s6724_s5, 4  ;;  %s6492_s2 = smov [#allocation35]   ;;  %s432_s12 = int_to_ptr.hbm [resolvable:$true] %s431_s12 }
  0xe2   :  { %s406_s0 = sshll.u32 %s6492_s2, 4  ;;  %s5790_s16 = sshra.s32 %s6827_s10, 4  ;;  %s407_s0 = int_to_ptr.vmem [resolvable:$true] %s406_s0  ;;  %s5791_s16 = int_to_ptr.hbm [resolvable:$true] %s5790_s16 }
  0xe3   :  { %s5792_s30 = scalar_lea.hbm %s5791_s16, 128  ;;  %s5794_s4 = scalar_lea.hbm %s6709_s9, 128 }
  0xe4   :  { %p5793_p8 = scmp.ne.s32.totalorder %s5791_s16, %s5792_s30  ;;  %p5795_p9 = scmp.lt.s32.totalorder %s5791_s16, %s6709_s9 }
  0xe5   :  { %p5796_p10 = scmp.lt.s32.totalorder %s5794_s4, %s5792_s30 }
  0xe7   :  { %p5797_p11 = por %p5796_p10, %p5795_p9 }
  0xe9   :  { %p5798_p12 = pnand %p5797_p11, %p5793_p8 }
  0xeb   :  { %5801 = shalt.err (!%p5798_p12)
}
  0xec   :  { %412 = dma.hbm_to_vmem [thread:$0]  %s6827_s10, 2048, %s407_s0, [#allocation36], %s6481_s29, %s6481_s29, %s6482_s18  }
  0xed   :  { %s6493_s22 = smov [#allocation38]   ;;  %s455_s26 = sshll.u32 %s6734_s19, 4  ;;  %s456_s26 = int_to_ptr.hbm [resolvable:$true] %s455_s26 }
  0xee   :  { %s433_s23 = sshll.u32 %s6493_s22, 4  ;;  %s5814_s24 = sshra.s32 %s432_s12, 4  ;;  %s434_s23 = int_to_ptr.vmem [resolvable:$true] %s433_s23  ;;  %s5815_s24 = int_to_ptr.hbm [resolvable:$true] %s5814_s24 }
  0xef   :  { %s5816_s9 = scalar_lea.hbm %s5815_s24, 4  ;;  %s5818_s28 = scalar_lea.hbm %s6724_s5, 4 }
  0xf0   :  { %p5817_p13 = scmp.ne.s32.totalorder %s5815_s24, %s5816_s9  ;;  %p5819_p0 = scmp.lt.s32.totalorder %s5815_s24, %s6724_s5 }
  0xf1   :  { %p5820_p1 = scmp.lt.s32.totalorder %s5818_s28, %s5816_s9 }
  0xf3   :  { %p5821_p2 = por %p5820_p1, %p5819_p0 }
  0xf5   :  { %p5822_p3 = pnand %p5821_p2, %p5817_p13 }
  0xf7   :  { %5825 = shalt.err (!%p5822_p3)
}
  0xf8   :  { %436 = dma.hbm_to_vmem [thread:$0]  %s432_s12, 64, %s434_s23, [#allocation39]  }
  0xf9   :  { %s479_s14 = sshll.u32 %s6744_s8, 4  ;;  %s6494_s1 = smov [#allocation41]   ;;  %s480_s14 = int_to_ptr.hbm [resolvable:$true] %s479_s14 }
  0xfa   :  { %s457_s3 = sshll.u32 %s6494_s1, 4  ;;  %s5838_s7 = sshra.s32 %s456_s26, 4  ;;  %s458_s3 = int_to_ptr.vmem [resolvable:$true] %s457_s3  ;;  %s5839_s7 = int_to_ptr.hbm [resolvable:$true] %s5838_s7 }
  0xfb   :  { %s5840_s10 = scalar_lea.hbm %s5839_s7, 4  ;;  %s5842_s17 = scalar_lea.hbm %s6734_s19, 4 }
  0xfc   :  { %p5841_p4 = scmp.ne.s32.totalorder %s5839_s7, %s5840_s10  ;;  %p5843_p5 = scmp.lt.s32.totalorder %s5839_s7, %s6734_s19 }
  0xfd   :  { %p5844_p6 = scmp.lt.s32.totalorder %s5842_s17, %s5840_s10 }
  0xff   :  { %p5845_p7 = por %p5844_p6, %p5843_p5 }
 0x101   :  { %p5846_p8 = pnand %p5845_p7, %p5841_p4 }
 0x103   :  { %5849 = shalt.err (!%p5846_p8)
}
 0x104   :  { %460 = dma.hbm_to_vmem [thread:$0]  %s456_s26, 64, %s458_s3, [#allocation42]  }
 0x105   :  { %s8721_s5 = sld [smem:[#allocation106_spill]]  ;;  %s6495_s11 = smov [#allocation44]  }
 0x106   :  { %s481_s6 = sshll.u32 %s6495_s11, 4  ;;  %s5862_s2 = sshra.s32 %s480_s14, 4  ;;  %s482_s6 = int_to_ptr.vmem [resolvable:$true] %s481_s6  ;;  %s5863_s2 = int_to_ptr.hbm [resolvable:$true] %s5862_s2 }
 0x107   :  { %s5864_s0 = scalar_lea.hbm %s5863_s2, 4  ;;  %s5866_s16 = scalar_lea.hbm %s6744_s8, 4 }
 0x108   :  { %p5865_p9 = scmp.ne.s32.totalorder %s5863_s2, %s5864_s0  ;;  %p5867_p10 = scmp.lt.s32.totalorder %s5863_s2, %s6744_s8 }
 0x109   :  { %p5868_p11 = scmp.lt.s32.totalorder %s5866_s16, %s5864_s0 }
 0x10b   :  { %s503_s12 = sshll.u32 %s8721_s5, 4  ;;  %p5869_p12 = por %p5868_p11, %p5867_p10  ;;  %s504_s12 = int_to_ptr.hbm [resolvable:$true] %s503_s12 }
 0x10d   :  { %p5870_p13 = pnand %p5869_p12, %p5865_p9 }
 0x10f   :  { %5873 = shalt.err (!%p5870_p13)
}
 0x110   :  { %484 = dma.hbm_to_vmem [thread:$0]  %s480_s14, 64, %s482_s6, [#allocation45]  }
 0x111   :  { %s527_s19 = sshll.u32 %s6764_s13, 4  ;;  %s6496_s30 = smov [#allocation47]   ;;  %s528_s19 = int_to_ptr.hbm [resolvable:$true] %s527_s19 }
 0x112   :  { %s505_s4 = sshll.u32 %s6496_s30, 4  ;;  %s5886_s22 = sshra.s32 %s504_s12, 4  ;;  %s506_s4 = int_to_ptr.vmem [resolvable:$true] %s505_s4  ;;  %s5887_s22 = int_to_ptr.hbm [resolvable:$true] %s5886_s22 }
 0x113   :  { %s5888_s23 = scalar_lea.hbm %s5887_s22, 4  ;;  %s5890_s26 = scalar_lea.hbm %s8721_s5, 4 }
 0x114   :  { %p5889_p0 = scmp.ne.s32.totalorder %s5887_s22, %s5888_s23  ;;  %p5891_p1 = scmp.lt.s32.totalorder %s5887_s22, %s8721_s5 }
 0x115   :  { %p5892_p2 = scmp.lt.s32.totalorder %s5890_s26, %s5888_s23 }
 0x117   :  { %p5893_p3 = por %p5892_p2, %p5891_p1 }
 0x119   :  { %p5894_p4 = pnand %p5893_p3, %p5889_p0 }
 0x11b   :  { %5897 = shalt.err (!%p5894_p4)
}
 0x11c   :  { %508 = dma.hbm_to_vmem [thread:$0]  %s504_s12, 64, %s506_s4, [#allocation48]  }
 0x11d   :  { %s8722_s8 = sld [smem:[#allocation77_spill]]  ;;  %s6497_s24 = smov [#allocation50]  }
 0x11e   :  { %s529_s9 = sshll.u32 %s6497_s24, 4  ;;  %s5910_s14 = sshra.s32 %s528_s19, 4  ;;  %s530_s9 = int_to_ptr.vmem [resolvable:$true] %s529_s9  ;;  %s5911_s14 = int_to_ptr.hbm [resolvable:$true] %s5910_s14 }
 0x11f   :  { %s5912_s1 = scalar_lea.hbm %s5911_s14, 4  ;;  %s5914_s3 = scalar_lea.hbm %s6764_s13, 4 }
 0x120   :  { %p5913_p5 = scmp.ne.s32.totalorder %s5911_s14, %s5912_s1  ;;  %p5915_p6 = scmp.lt.s32.totalorder %s5911_s14, %s6764_s13 }
 0x121   :  { %p5916_p7 = scmp.lt.s32.totalorder %s5914_s3, %s5912_s1 }
 0x123   :  { %s134_s28 = sshll.u32 %s8722_s8, 4  ;;  %p5917_p8 = por %p5916_p7, %p5915_p6  ;;  %s135_s28 = int_to_ptr.hbm [resolvable:$true] %s134_s28 }
 0x125   :  { %p5918_p9 = pnand %p5917_p8, %p5913_p5 }
 0x127   :  { %5921 = shalt.err (!%p5918_p9)
}
 0x128   :  { %532 = dma.hbm_to_vmem [thread:$0]  %s528_s19, 64, %s530_s9, [#allocation51]  }
 0x129   :  { %s8723_s7 = sld [smem:[#allocation78_spill]]  ;;  %s6498_s17 = smov [#allocation2]  }
 0x12a   :  { %s136_s5 = sshll.u32 %s6498_s17, 4  ;;  %s5934_s11 = sshra.s32 %s135_s28, 4  ;;  %s137_s5 = int_to_ptr.vmem [resolvable:$true] %s136_s5  ;;  %s5935_s11 = int_to_ptr.hbm [resolvable:$true] %s5934_s11 }
 0x12b   :  { %s5936_s6 = scalar_lea.hbm %s5935_s11, 2  ;;  %s5938_s12 = scalar_lea.hbm %s8722_s8, 2 }
 0x12c   :  { %p5937_p10 = scmp.ne.s32.totalorder %s5935_s11, %s5936_s6  ;;  %p5939_p11 = scmp.lt.s32.totalorder %s5935_s11, %s8722_s8 }
 0x12d   :  { %p5940_p12 = scmp.lt.s32.totalorder %s5938_s12, %s5936_s6 }
 0x12f   :  { %s156_s10 = sshll.u32 %s8723_s7, 4  ;;  %p5941_p13 = por %p5940_p12, %p5939_p11  ;;  %s157_s10 = int_to_ptr.hbm [resolvable:$true] %s156_s10 }
 0x131   :  { %p5942_p0 = pnand %p5941_p13, %p5937_p10 }
 0x133   :  { %5945 = shalt.err (!%p5942_p0)
}
 0x134   :  { %139 = dma.hbm_to_vmem [thread:$0]  %s135_s28, 32, %s137_s5, [#allocation3]  }
 0x135   :  { %s8724_s13 = sld [smem:[#allocation81_spill]]  ;;  %s6499_s2 = smov [#allocation7]  }
 0x136   :  { %s158_s0 = sshll.u32 %s6499_s2, 4  ;;  %s5958_s19 = sshra.s32 %s157_s10, 4  ;;  %s159_s0 = int_to_ptr.vmem [resolvable:$true] %s158_s0  ;;  %s5959_s19 = int_to_ptr.hbm [resolvable:$true] %s5958_s19 }
 0x137   :  { %s5960_s30 = scalar_lea.hbm %s5959_s19, 8  ;;  %s5962_s4 = scalar_lea.hbm %s8723_s7, 8 }
 0x138   :  { %p5961_p1 = scmp.ne.s32.totalorder %s5959_s19, %s5960_s30  ;;  %p5963_p2 = scmp.lt.s32.totalorder %s5959_s19, %s8723_s7 }
 0x139   :  { %p5964_p3 = scmp.lt.s32.totalorder %s5962_s4, %s5960_s30 }
 0x13b   :  { %s182_s16 = sshll.u32 %s8724_s13, 4  ;;  %p5965_p4 = por %p5964_p3, %p5963_p2  ;;  %s183_s16 = int_to_ptr.hbm [resolvable:$true] %s182_s16 }
 0x13d   :  { %p5966_p5 = pnand %p5965_p4, %p5961_p1 }
 0x13f   :  { %5969 = shalt.err (!%p5966_p5)
}
 0x140   :  { %161 = dma.hbm_to_vmem [thread:$0]  %s157_s10, 128, %s159_s0, [#allocation6]  }
 0x141   :  { %s8725_s22 = sld [smem:[#allocation87_spill]]  ;;  %s6500_s26 = smov [#allocation10]  }
 0x142   :  { %s184_s8 = sshll.u32 %s6500_s26, 4  ;;  %s5982_s24 = sshra.s32 %s183_s16, 4  ;;  %s185_s8 = int_to_ptr.vmem [resolvable:$true] %s184_s8  ;;  %s5983_s24 = int_to_ptr.hbm [resolvable:$true] %s5982_s24 }
 0x143   :  { %s5984_s9 = scalar_lea.hbm %s5983_s24, 4  ;;  %s5986_s28 = scalar_lea.hbm %s8724_s13, 4 }
 0x144   :  { %p5985_p6 = scmp.ne.s32.totalorder %s5983_s24, %s5984_s9  ;;  %p5987_p7 = scmp.lt.s32.totalorder %s5983_s24, %s8724_s13 }
 0x145   :  { %p5988_p8 = scmp.lt.s32.totalorder %s5986_s28, %s5984_s9 }
 0x147   :  { %s215_s23 = sshll.u32 %s8725_s22, 4  ;;  %p5989_p9 = por %p5988_p8, %p5987_p7  ;;  %s6864_s23 = int_to_ptr.hbm [resolvable:$true] %s215_s23 }
 0x149   :  { %p5990_p10 = pnand %p5989_p9, %p5985_p6 }
 0x14b   :  { %5993 = shalt.err (!%p5990_p10)
}
 0x14c   :  { %187 = dma.hbm_to_vmem [thread:$0]  %s183_s16, 64, %s185_s8, [#allocation9]  }
 0x14d   :  { %s8726_s14 = sld [smem:[#allocation92_spill]]  ;;  %s6501_s1 = smov [#allocation13]  }
 0x14e   :  { %s217_s3 = sshll.u32 %s6501_s1, 4  ;;  %s6006_s10 = sshra.s32 %s6864_s23, 4  ;;  %s218_s3 = int_to_ptr.vmem [resolvable:$true] %s217_s3  ;;  %s6007_s10 = int_to_ptr.hbm [resolvable:$true] %s6006_s10 }
 0x14f   :  { %s6008_s17 = scalar_lea.hbm %s6007_s10, 32  ;;  %s6010_s5 = scalar_lea.hbm %s8725_s22, 32 }
 0x150   :  { %p6009_p11 = scmp.ne.s32.totalorder %s6007_s10, %s6008_s17  ;;  %p6011_p12 = scmp.lt.s32.totalorder %s6007_s10, %s8725_s22 }
 0x151   :  { %p6012_p13 = scmp.lt.s32.totalorder %s6010_s5, %s6008_s17 }
 0x153   :  { %s249_s7 = sshll.u32 %s8726_s14, 4  ;;  %p6013_p0 = por %p6012_p13, %p6011_p12  ;;  %s6869_s7 = int_to_ptr.hbm [resolvable:$true] %s249_s7 }
 0x155   :  { %p6014_p1 = pnand %p6013_p0, %p6009_p11 }
 0x157   :  { %6017 = shalt.err (!%p6014_p1)
}
 0x158   :  { %s8727_s11 = sld [smem:[#allocation94_spill]]  ;;  %s6502_s12 = smov [#allocation16]  }
 0x159   :  { %223 = dma.hbm_to_vmem [thread:$0]  %s6864_s23, 512, %s218_s3, [#allocation12], %s6481_s29, %s6481_s29, %s6482_s18  }
 0x15a   :  { %s251_s13 = sshll.u32 %s6502_s12, 4  ;;  %s6030_s2 = sshra.s32 %s6869_s7, 4  ;;  %s252_s13 = int_to_ptr.vmem [resolvable:$true] %s251_s13  ;;  %s6031_s2 = int_to_ptr.hbm [resolvable:$true] %s6030_s2 }
 0x15b   :  { %s6032_s0 = scalar_lea.hbm %s6031_s2, 16  ;;  %s6034_s16 = scalar_lea.hbm %s8726_s14, 16 }
 0x15c   :  { %p6033_p2 = scmp.ne.s32.totalorder %s6031_s2, %s6032_s0  ;;  %p6035_p3 = scmp.lt.s32.totalorder %s6031_s2, %s8726_s14 }
 0x15d   :  { %p6036_p4 = scmp.lt.s32.totalorder %s6034_s16, %s6032_s0 }
 0x15e   :  { %s276_s6 = sshll.u32 %s8727_s11, 4  ;;  %s277_s6 = int_to_ptr.hbm [resolvable:$true] %s276_s6 }
 0x15f   :  { %p6037_p5 = por %p6036_p4, %p6035_p3 }
 0x161   :  { %p6038_p6 = pnand %p6037_p5, %p6033_p2 }
 0x163   :  { %6041 = shalt.err (!%p6038_p6)
}
 0x164   :  { %s8728_s19 = sld [smem:[#allocation95_spill]]  ;;  %s6503_s30 = smov [#allocation19]  }
 0x165   :  { %257 = dma.hbm_to_vmem [thread:$0]  %s6869_s7, 256, %s252_s13, [#allocation15], %s6481_s29, %s6481_s29, %s6482_s18  }
 0x166   :  { %s278_s4 = sshll.u32 %s6503_s30, 4  ;;  %s6054_s23 = sshra.s32 %s277_s6, 4  ;;  %s279_s4 = int_to_ptr.vmem [resolvable:$true] %s278_s4  ;;  %s6055_s23 = int_to_ptr.hbm [resolvable:$true] %s6054_s23 }
 0x167   :  { %s6056_s26 = scalar_lea.hbm %s6055_s23, 4  ;;  %s6058_s8 = scalar_lea.hbm %s8727_s11, 4 }
 0x168   :  { %p6057_p7 = scmp.ne.s32.totalorder %s6055_s23, %s6056_s26  ;;  %p6059_p8 = scmp.lt.s32.totalorder %s6055_s23, %s8727_s11 }
 0x169   :  { %p6060_p9 = scmp.lt.s32.totalorder %s6058_s8, %s6056_s26 }
 0x16a   :  { %s298_s22 = sshll.u32 %s8728_s19, 4  ;;  %s299_s22 = int_to_ptr.hbm [resolvable:$true] %s298_s22 }
 0x16b   :  { %p6061_p10 = por %p6060_p9, %p6059_p8 }
 0x16d   :  { %p6062_p11 = pnand %p6061_p10, %p6057_p7 }
 0x16f   :  { %6065 = shalt.err (!%p6062_p11)
}
 0x170   :  { %281 = dma.hbm_to_vmem [thread:$0]  %s277_s6, 64, %s279_s4, [#allocation18]  }
 0x171   :  { %s8729_s24 = sld [smem:[#allocation96_spill]]  ;;  %s6504_s28 = smov [#allocation22]  }
 0x172   :  { %s300_s14 = sshll.u32 %s6504_s28, 4  ;;  %s6078_s1 = sshra.s32 %s299_s22, 4  ;;  %s301_s14 = int_to_ptr.vmem [resolvable:$true] %s300_s14  ;;  %s6079_s1 = int_to_ptr.hbm [resolvable:$true] %s6078_s1 }
 0x173   :  { %s6080_s3 = scalar_lea.hbm %s6079_s1, 4  ;;  %s6082_s7 = scalar_lea.hbm %s8728_s19, 4 }
 0x174   :  { %p6081_p12 = scmp.ne.s32.totalorder %s6079_s1, %s6080_s3  ;;  %p6083_p13 = scmp.lt.s32.totalorder %s6079_s1, %s8728_s19 }
 0x175   :  { %p6084_p0 = scmp.lt.s32.totalorder %s6082_s7, %s6080_s3 }
 0x177   :  { %s320_s9 = sshll.u32 %s8729_s24, 4  ;;  %p6085_p1 = por %p6084_p0, %p6083_p13  ;;  %s321_s9 = int_to_ptr.hbm [resolvable:$true] %s320_s9 }
 0x179   :  { %p6086_p2 = pnand %p6085_p1, %p6081_p12 }
 0x17b   :  { %6089 = shalt.err (!%p6086_p2)
}
 0x17c   :  { %303 = dma.hbm_to_vmem [thread:$0]  %s299_s22, 64, %s301_s14, [#allocation21]  }
 0x17d   :  { %s8730_s10 = sld [smem:[#allocation98_spill]]  ;;  %s6505_s17 = smov [#allocation25]  }
 0x17e   :  { %s322_s5 = sshll.u32 %s6505_s17, 4  ;;  %s6102_s6 = sshra.s32 %s321_s9, 4  ;;  %s323_s5 = int_to_ptr.vmem [resolvable:$true] %s322_s5  ;;  %s6103_s6 = int_to_ptr.hbm [resolvable:$true] %s6102_s6 }
 0x17f   :  { %s6104_s12 = scalar_lea.hbm %s6103_s6, 1  ;;  %s6106_s13 = scalar_lea.hbm %s8729_s24, 1 }
 0x180   :  { %p6105_p3 = scmp.ne.s32.totalorder %s6103_s6, %s6104_s12  ;;  %p6107_p4 = scmp.lt.s32.totalorder %s6103_s6, %s8729_s24 }
 0x181   :  { %p6108_p5 = scmp.lt.s32.totalorder %s6106_s13, %s6104_s12 }
 0x183   :  { %s345_s11 = sshll.u32 %s8730_s10, 4  ;;  %p6109_p6 = por %p6108_p5, %p6107_p4  ;;  %s6893_s11 = int_to_ptr.hbm [resolvable:$true] %s345_s11 }
 0x185   :  { %p6110_p7 = pnand %p6109_p6, %p6105_p3 }
 0x187   :  { %6113 = shalt.err (!%p6110_p7)
}
 0x188   :  { %325 = dma.hbm_to_vmem [thread:$0]  %s321_s9, 16, %s323_s5, [#allocation24]  }
 0x189   :  { %s8731_s2 = sld [smem:[#allocation99_spill]]  ;;  %s6506_s16 = smov [#allocation28]  }
 0x18a   :  { %s347_s19 = sshll.u32 %s6506_s16, 4  ;;  %s6126_s30 = sshra.s32 %s6893_s11, 4  ;;  %s348_s19 = int_to_ptr.vmem [resolvable:$true] %s347_s19  ;;  %s6127_s30 = int_to_ptr.hbm [resolvable:$true] %s6126_s30 }
 0x18b   :  { %s6128_s4 = scalar_lea.hbm %s6127_s30, 128  ;;  %s6130_s22 = scalar_lea.hbm %s8730_s10, 128 }
 0x18c   :  { %p6129_p8 = scmp.ne.s32.totalorder %s6127_s30, %s6128_s4  ;;  %p6131_p9 = scmp.lt.s32.totalorder %s6127_s30, %s8730_s10 }
 0x18d   :  { %p6132_p10 = scmp.lt.s32.totalorder %s6130_s22, %s6128_s4 }
 0x18f   :  { %s370_s0 = sshll.u32 %s8731_s2, 4  ;;  %p6133_p11 = por %p6132_p10, %p6131_p9  ;;  %s371_s0 = int_to_ptr.hbm [resolvable:$true] %s370_s0 }
 0x191   :  { %p6134_p12 = pnand %p6133_p11, %p6129_p8 }
 0x193   :  { %6137 = shalt.err (!%p6134_p12)
}
 0x194   :  { %s8732_s23 = sld [smem:[#allocation100_spill]]  ;;  %s6507_s26 = smov [#allocation31]  }
 0x195   :  { %353 = dma.hbm_to_vmem [thread:$0]  %s6893_s11, 2048, %s348_s19, [#allocation27], %s6488_s25, %s6488_s25, %s6489_s15  }
 0x196   :  { %s372_s8 = sshll.u32 %s6507_s26, 4  ;;  %s6150_s9 = sshra.s32 %s371_s0, 4  ;;  %s373_s8 = int_to_ptr.vmem [resolvable:$true] %s372_s8  ;;  %s6151_s9 = int_to_ptr.hbm [resolvable:$true] %s6150_s9 }
 0x197   :  { %s6152_s28 = scalar_lea.hbm %s6151_s9, 8  ;;  %s6154_s14 = scalar_lea.hbm %s8731_s2, 8 }
 0x198   :  { %p6153_p13 = scmp.ne.s32.totalorder %s6151_s9, %s6152_s28  ;;  %p6155_p0 = scmp.lt.s32.totalorder %s6151_s9, %s8731_s2 }
 0x199   :  { %p6156_p1 = scmp.lt.s32.totalorder %s6154_s14, %s6152_s28 }
 0x19a   :  { %s394_s24 = sshll.u32 %s8732_s23, 4  ;;  %s395_s24 = int_to_ptr.hbm [resolvable:$true] %s394_s24 }
 0x19b   :  { %p6157_p2 = por %p6156_p1, %p6155_p0 }
 0x19d   :  { %p6158_p3 = pnand %p6157_p2, %p6153_p13 }
 0x19f   :  { %6161 = shalt.err (!%p6158_p3)
}
 0x1a0   :  { %375 = dma.hbm_to_vmem [thread:$0]  %s371_s0, 128, %s373_s8, [#allocation30]  }
 0x1a1   :  { %s8733_s1 = sld [smem:[#allocation101_spill]]  ;;  %s6508_s15 = smov [#allocation34]  }
 0x1a2   :  { %s396_s3 = sshll.u32 %s6508_s15, 4  ;;  %s6174_s7 = sshra.s32 %s395_s24, 4  ;;  %s397_s3 = int_to_ptr.vmem [resolvable:$true] %s396_s3  ;;  %s6175_s7 = int_to_ptr.hbm [resolvable:$true] %s6174_s7 }
 0x1a3   :  { %s6176_s10 = scalar_lea.hbm %s6175_s7, 4  ;;  %s6178_s17 = scalar_lea.hbm %s8732_s23, 4 }
 0x1a4   :  { %p6177_p4 = scmp.ne.s32.totalorder %s6175_s7, %s6176_s10  ;;  %p6179_p5 = scmp.lt.s32.totalorder %s6175_s7, %s8732_s23 }
 0x1a5   :  { %p6180_p6 = scmp.lt.s32.totalorder %s6178_s17, %s6176_s10 }
 0x1a7   :  { %s418_s25 = sshll.u32 %s8733_s1, 4  ;;  %p6181_p7 = por %p6180_p6, %p6179_p5  ;;  %s419_s25 = int_to_ptr.hbm [resolvable:$true] %s418_s25 }
 0x1a9   :  { %p6182_p8 = pnand %p6181_p7, %p6177_p4 }
 0x1ab   :  { %6185 = shalt.err (!%p6182_p8)
}
 0x1ac   :  { %399 = dma.hbm_to_vmem [thread:$0]  %s395_s24, 64, %s397_s3, [#allocation33]  }
 0x1ad   :  { %s8734_s5 = sld [smem:[#allocation103_spill]]  ;;  %s6509_s11 = smov [#allocation37]  }
 0x1ae   :  { %s420_s6 = sshll.u32 %s6509_s11, 4  ;;  %s6198_s13 = sshra.s32 %s419_s25, 4  ;;  %s421_s6 = int_to_ptr.vmem [resolvable:$true] %s420_s6  ;;  %s6199_s13 = int_to_ptr.hbm [resolvable:$true] %s6198_s13 }
 0x1af   :  { %s6200_s2 = scalar_lea.hbm %s6199_s13, 4  ;;  %s6202_s0 = scalar_lea.hbm %s8733_s1, 4 }
 0x1b0   :  { %p6201_p9 = scmp.ne.s32.totalorder %s6199_s13, %s6200_s2  ;;  %p6203_p10 = scmp.lt.s32.totalorder %s6199_s13, %s8733_s1 }
 0x1b1   :  { %p6204_p11 = scmp.lt.s32.totalorder %s6202_s0, %s6200_s2 }
 0x1b3   :  { %s441_s12 = sshll.u32 %s8734_s5, 4  ;;  %p6205_p12 = por %p6204_p11, %p6203_p10  ;;  %s6912_s12 = int_to_ptr.hbm [resolvable:$true] %s441_s12 }
 0x1b5   :  { %p6206_p13 = pnand %p6205_p12, %p6201_p9 }
 0x1b7   :  { %6209 = shalt.err (!%p6206_p13)
}
 0x1b8   :  { %423 = dma.hbm_to_vmem [thread:$0]  %s419_s25, 64, %s421_s6, [#allocation36]  }
 0x1b9   :  { %s8735_s16 = sld [smem:[#allocation104_spill]]  ;;  %s6510_s30 = smov [#allocation40]  }
 0x1ba   :  { %s443_s4 = sshll.u32 %s6510_s30, 4  ;;  %s6222_s22 = sshra.s32 %s6912_s12, 4  ;;  %s444_s4 = int_to_ptr.vmem [resolvable:$true] %s443_s4  ;;  %s6223_s22 = int_to_ptr.hbm [resolvable:$true] %s6222_s22 }
 0x1bb   :  { %s6224_s23 = scalar_lea.hbm %s6223_s22, 64  ;;  %s6226_s26 = scalar_lea.hbm %s8734_s5, 64 }
 0x1bc   :  { %p6225_p0 = scmp.ne.s32.totalorder %s6223_s22, %s6224_s23  ;;  %p6227_p1 = scmp.lt.s32.totalorder %s6223_s22, %s8734_s5 }
 0x1bd   :  { %p6228_p2 = scmp.lt.s32.totalorder %s6226_s26, %s6224_s23 }
 0x1bf   :  { %s465_s19 = sshll.u32 %s8735_s16, 4  ;;  %p6229_p3 = por %p6228_p2, %p6227_p1  ;;  %s6917_s19 = int_to_ptr.hbm [resolvable:$true] %s465_s19 }
 0x1c1   :  { %p6230_p4 = pnand %p6229_p3, %p6225_p0 }
 0x1c3   :  { %6233 = shalt.err (!%p6230_p4)
}
 0x1c4   :  { %s8736_s8 = sld [smem:[#allocation105_spill]]  ;;  %s6511_s24 = smov [#allocation43]  }
 0x1c5   :  { %449 = dma.hbm_to_vmem [thread:$0]  %s6912_s12, 1024, %s444_s4, [#allocation39], %s6481_s29, %s6481_s29, %s6482_s18  }
 0x1c6   :  { %s467_s9 = sshll.u32 %s6511_s24, 4  ;;  %s6246_s14 = sshra.s32 %s6917_s19, 4  ;;  %s468_s9 = int_to_ptr.vmem [resolvable:$true] %s467_s9  ;;  %s6247_s14 = int_to_ptr.hbm [resolvable:$true] %s6246_s14 }
 0x1c7   :  { %s6248_s1 = scalar_lea.hbm %s6247_s14, 64  ;;  %s6250_s25 = scalar_lea.hbm %s8735_s16, 64 }
 0x1c8   :  { %p6249_p5 = scmp.ne.s32.totalorder %s6247_s14, %s6248_s1  ;;  %p6251_p6 = scmp.lt.s32.totalorder %s6247_s14, %s8735_s16 }
 0x1c9   :  { %p6252_p7 = scmp.lt.s32.totalorder %s6250_s25, %s6248_s1 }
 0x1ca   :  { %s489_s28 = sshll.u32 %s8736_s8, 4  ;;  %s6927_s28 = int_to_ptr.hbm [resolvable:$true] %s489_s28 }
 0x1cb   :  { %p6253_p8 = por %p6252_p7, %p6251_p6 }
 0x1cd   :  { %p6254_p9 = pnand %p6253_p8, %p6249_p5 }
 0x1cf   :  { %6257 = shalt.err (!%p6254_p9)
}
 0x1d0   :  { %s8737_s15 = sld [smem:[#allocation107_spill]]  ;;  %s6512_s7 = smov [#allocation46]  }
 0x1d1   :  { %473 = dma.hbm_to_vmem [thread:$0]  %s6917_s19, 1024, %s468_s9, [#allocation42], %s6481_s29, %s6481_s29, %s6482_s18  }
 0x1d2   :  { %s491_s10 = sshll.u32 %s6512_s7, 4  ;;  %s6270_s17 = sshra.s32 %s6927_s28, 4  ;;  %s492_s10 = int_to_ptr.vmem [resolvable:$true] %s491_s10  ;;  %s6271_s17 = int_to_ptr.hbm [resolvable:$true] %s6270_s17 }
 0x1d3   :  { %s6272_s5 = scalar_lea.hbm %s6271_s17, 64  ;;  %s6274_s11 = scalar_lea.hbm %s8736_s8, 64 }
 0x1d4   :  { %p6273_p10 = scmp.ne.s32.totalorder %s6271_s17, %s6272_s5  ;;  %p6275_p11 = scmp.lt.s32.totalorder %s6271_s17, %s8736_s8 }
 0x1d5   :  { %p6276_p12 = scmp.lt.s32.totalorder %s6274_s11, %s6272_s5 }
 0x1d6   :  { %s513_s3 = sshll.u32 %s8737_s15, 4  ;;  %s6937_s3 = int_to_ptr.hbm [resolvable:$true] %s513_s3 }
 0x1d7   :  { %p6277_p13 = por %p6276_p12, %p6275_p11 }
 0x1d9   :  { %p6278_p0 = pnand %p6277_p13, %p6273_p10 }
 0x1db   :  { %6281 = shalt.err (!%p6278_p0)
}
 0x1dc   :  { %497 = dma.hbm_to_vmem [thread:$0]  %s6927_s28, 1024, %s492_s10, [#allocation45], %s6481_s29, %s6481_s29, %s6482_s18  }
 0x1dd   :  { %s6513_s6 = smov [#allocation49]   ;;  %s537_s13 = sshll.u32 %s6769_s20, 4  ;;  %s6947_s13 = int_to_ptr.hbm [resolvable:$true] %s537_s13 }
 0x1de   :  { %s515_s12 = sshll.u32 %s6513_s6, 4  ;;  %s6294_s2 = sshra.s32 %s6937_s3, 4  ;;  %s516_s12 = int_to_ptr.vmem [resolvable:$true] %s515_s12  ;;  %s6295_s2 = int_to_ptr.hbm [resolvable:$true] %s6294_s2 }
 0x1df   :  { %s6296_s0 = scalar_lea.hbm %s6295_s2, 64  ;;  %s6298_s16 = scalar_lea.hbm %s8737_s15, 64 }
 0x1e0   :  { %p6297_p1 = scmp.ne.s32.totalorder %s6295_s2, %s6296_s0  ;;  %p6299_p2 = scmp.lt.s32.totalorder %s6295_s2, %s8737_s15 }
 0x1e1   :  { %p6300_p3 = scmp.lt.s32.totalorder %s6298_s16, %s6296_s0 }
 0x1e3   :  { %p6301_p4 = por %p6300_p3, %p6299_p2 }
 0x1e5   :  { %p6302_p5 = pnand %p6301_p4, %p6297_p1 }
 0x1e7   :  { %6305 = shalt.err (!%p6302_p5)
}
 0x1e8   :  { %521 = dma.hbm_to_vmem [thread:$0]  %s6937_s3, 1024, %s516_s12, [#allocation48], %s6481_s29, %s6481_s29, %s6482_s18  }
 0x1e9   :  { %s551_s19 = sshll.u32 %s6774_s21, 4  ;;  %s6514_s30 = smov [#allocation52]   ;;  %s552_s19 = int_to_ptr.hbm [resolvable:$true] %s551_s19 }
 0x1ea   :  { %s539_s4 = sshll.u32 %s6514_s30, 4  ;;  %s6318_s22 = sshra.s32 %s6947_s13, 4  ;;  %s540_s4 = int_to_ptr.vmem [resolvable:$true] %s539_s4  ;;  %s6319_s22 = int_to_ptr.hbm [resolvable:$true] %s6318_s22 }
 0x1eb   :  { %s6320_s23 = scalar_lea.hbm %s6319_s22, 64  ;;  %s6322_s26 = scalar_lea.hbm %s6769_s20, 64 }
 0x1ec   :  { %p6321_p6 = scmp.ne.s32.totalorder %s6319_s22, %s6320_s23  ;;  %p6323_p7 = scmp.lt.s32.totalorder %s6319_s22, %s6769_s20 }
 0x1ed   :  { %p6324_p8 = scmp.lt.s32.totalorder %s6322_s26, %s6320_s23 }
 0x1ef   :  { %p6325_p9 = por %p6324_p8, %p6323_p7 }
 0x1f1   :  { %p6326_p10 = pnand %p6325_p9, %p6321_p6 }
 0x1f3   :  { %6329 = shalt.err (!%p6326_p10)
}
 0x1f4   :  { %545 = dma.hbm_to_vmem [thread:$0]  %s6947_s13, 1024, %s540_s4, [#allocation51], %s6481_s29, %s6481_s29, %s6482_s18  }
 0x1f5   :  { %s6515_s8 = smov [#allocation53]   ;;  %s6342_s9 = sshra.s32 %s552_s19, 4  ;;  %s6343_s9 = int_to_ptr.hbm [resolvable:$true] %s6342_s9 }
 0x1f6   :  { %s553_s24 = sshll.u32 %s6515_s8, 4  ;;  %s6344_s28 = scalar_lea.hbm %s6343_s9, 1  ;;  %s554_s24 = int_to_ptr.vmem [resolvable:$true] %s553_s24 }
 0x1f7   :  { %p6345_p11 = scmp.ne.s32.totalorder %s6343_s9, %s6344_s28  ;;  %s6346_s14 = scalar_lea.hbm %s6774_s21, 1 }
 0x1f8   :  { %p6347_p12 = scmp.lt.s32.totalorder %s6343_s9, %s6774_s21  ;;  %p6348_p13 = scmp.lt.s32.totalorder %s6346_s14, %s6344_s28 }
 0x1fa   :  { %p6349_p0 = por %p6348_p13, %p6347_p12 }
 0x1fc   :  { %p6350_p1 = pnand %p6349_p0, %p6345_p11 }
 0x1fe   :  { %6353 = shalt.err (!%p6350_p1)
}
 0x1ff   :  { %556 = dma.hbm_to_vmem [thread:$0]  %s552_s19, 16, %s554_s24, [#allocation54]  }
 0x200   :  { %6390 = dma.done.wait [#allocation3], 32  }
 0x201   :  { %6391 = vsyncadd [#allocation3], 4294967264 }
 0x202   :  { %6392 = dma.done.wait [#allocation6], 256  }
 0x203   :  { %6393 = vsyncadd [#allocation6], 4294967040 }
 0x204   :  { %6394 = dma.done.wait [#allocation9], 128  }
 0x205   :  { %6395 = vsyncadd [#allocation9], 4294967168 }
 0x206   :  { %6396 = dma.done.wait [#allocation12], 1408  }
 0x207   :  { %6397 = vsyncadd [#allocation12], 4294965888 }
 0x208   :  { %6398 = dma.done.wait [#allocation15], 768  }
 0x209   :  { %6399 = vsyncadd [#allocation15], 4294966528 }
 0x20a   :  { %6400 = dma.done.wait [#allocation18], 128  }
 0x20b   :  { %6401 = vsyncadd [#allocation18], 4294967168 }
 0x20c   :  { %6402 = dma.done.wait [#allocation21], 192  }
 0x20d   :  { %6403 = vsyncadd [#allocation21], 4294967104 }
 0x20e   :  { %6404 = dma.done.wait [#allocation24], 144  }
 0x20f   :  { %6405 = vsyncadd [#allocation24], 4294967152 }
 0x210   :  { %6406 = dma.done.wait [#allocation27], 4096  }
 0x211   :  { %6407 = vsyncadd [#allocation27], 4294963200 }
 0x212   :  { %6408 = dma.done.wait [#allocation30], 384  }
 0x213   :  { %6409 = vsyncadd [#allocation30], 4294966912 }
 0x214   :  { %6410 = dma.done.wait [#allocation33], 4160  }
 0x215   :  { %6411 = vsyncadd [#allocation33], 4294963136 }
 0x216   :  { %6412 = dma.done.wait [#allocation36], 2112  }
 0x217   :  { %6413 = vsyncadd [#allocation36], 4294965184 }
 0x218   :  { %6414 = dma.done.wait [#allocation39], 1088  }
 0x219   :  { %6415 = vsyncadd [#allocation39], 4294966208 }
 0x21a   :  { %6416 = dma.done.wait [#allocation42], 1088  }
 0x21b   :  { %6417 = vsyncadd [#allocation42], 4294966208 }
 0x21c   :  { %6418 = dma.done.wait [#allocation45], 1088  }
 0x21d   :  { %6419 = vsyncadd [#allocation45], 4294966208 }
 0x21e   :  { %6420 = dma.done.wait [#allocation48], 1088  }
 0x21f   :  { %6421 = vsyncadd [#allocation48], 4294966208 }
 0x220   :  { %6422 = dma.done.wait [#allocation51], 1088  }
 0x221   :  { %6423 = vsyncadd [#allocation51], 4294966208 }
 0x222   :  { %6424 = dma.done.wait [#allocation54], 16  }
 0x223   :  { %6425 = vsyncadd [#allocation54], 4294967280  ;;  %s8738_s21 = sld [smem:[#allocation75_spill]]  ;;  %vm707_vm0 = vcmask 1043456   ;;  %v700_v0 = vld [vmem:[#allocation11 + $0x30] sm:$0xf] }
 0x224   :  { %v699_v1 = vld [vmem:[#allocation11 + $0x28] sm:$0xff]  ;;  %s8739_s20 = sld [smem:[#allocation83_spill]]  ;;  %4607 = vmatpush.msk.msra.mxu0 %vm707_vm0, %v700_v0  ;;  %v698_v2 = vld [vmem:[#allocation11 + $0x20] sm:$0xff]  ;;  %v697_v3 = vld [vmem:[#allocation11 + $0x18] sm:$0xff]  ;;  %vm703_vm1 = vcmask 424960   ;;  %vm753_vm3 = vcmask 523264  }
 0x225   :  { %v696_v4 = vld [vmem:[#allocation11 + $0x10] sm:$0xff]  ;;  %v695_v5 = vld [vmem:[#allocation11 + $0x8] sm:$0xff]  ;;  %v694_v6 = vld [vmem:[#allocation11] sm:$0xff]  ;;  %s8740_s29 = sld [smem:[#allocation82_spill]]  ;;  %vm795_vm5 = vcmask 261120   ;;  %vm959_vm6 = vcmask 1040384  }
 0x226   :  { %721 = vmatpush.msra.mxu0 %v699_v1  ;;  %s8741_s18 = sld [smem:[#allocation85_spill]]  ;;  %v835_v44 = vld [vmem:[#allocation13 + $0x18] sm:$0xff]  ;;  %v834_v45 = vld [vmem:[#allocation13 + $0x10] sm:$0xff]  ;;  %v833_v46 = vld [vmem:[#allocation13 + $0x8] sm:$0xff]  ;;  %vm955_vm7 = vcmask 72704   ;;  %vm1110_vm9 = vcmask 15360  }
 0x227   :  { %s8742_s1 = sld [smem:[#allocation84_spill]]  ;;  %853 = vmatpush.msra.mxu3 %v835_v44  ;;  %v832_v47 = vld [vmem:[#allocation13] sm:$0xff]  ;;  %v952_v48 = vld [vmem:[#allocation16 + $0x8] sm:$0x1]  ;;  %v950_v50 = vld [vmem:[#allocation2] sm:$0x3] }
 0x228   :  { %722 = vmatpush.msra.mxu0 %v698_v2  ;;  %s8743_s25 = sld [smem:[#allocation86_spill]]  ;;  %v951_v49 = vld [vmem:[#allocation16] sm:$0xff]  ;;  %v877_v0 = vld [vmem:[#allocation14 + $0x18] sm:$0xff]  ;;  %v876_v1 = vld [vmem:[#allocation14 + $0x10] sm:$0xff]  ;;  %vm1122_vm10 = vcmask 11264   ;;  %vm999_vm14 = vcmask 130048  }
 0x229   :  { %v693_v7 = vld [vmem:[%s8738_s21] sm:$0x3]  ;;  %854 = vmatpush.msra.mxu3 %v834_v45  ;;  %s8744_s15 = sld [smem:[#allocation93_spill]]  ;;  %s6520_s2 = smov [#allocation55]  }
 0x22a   :  { %723 = vmatpush.msra.mxu0 %v697_v3  ;;  %v750_v8 = vld [vmem:[%s8739_s20 + $0x38] sm:$0xff]  ;;  %v749_v9 = vld [vmem:[%s8739_s20 + $0x30] sm:$0xff]  ;;  %v748_v10 = vld [vmem:[%s8739_s20 + $0x28] sm:$0xff]  ;;  %s8745_s3 = sld [smem:[#allocation88_spill]]  ;;  %s4528_s0 = sshll.u32 %s6520_s2, 4  ;;  %s4529_s0 = int_to_ptr.vmem [resolvable:$true] %s4528_s0 }
 0x22b   :  { %765 = vmatpush.msra.mxu1 %v750_v8  ;;  %v747_v11 = vld [vmem:[%s8739_s20 + $0x20] sm:$0xff]  ;;  %v746_v12 = vld [vmem:[%s8739_s20 + $0x18] sm:$0xff]  ;;  %v745_v13 = vld [vmem:[%s8739_s20 + $0x10] sm:$0xff]  ;;  %855 = vmatpush.msra.mxu3 %v833_v46  ;;  %s8746_s7 = sld [smem:[#allocation76_spill]]  ;;  %s4530_s16 = sshll.u32 %s6779_s27, 4  ;;  %s4531_s16 = int_to_ptr.hbm [resolvable:$true] %s4530_s16 }
 0x22c   :  { %724 = vmatpush.msra.mxu0 %v696_v4  ;;  %v744_v14 = vld [vmem:[%s8739_s20 + $0x8] sm:$0xff]  ;;  %v743_v15 = vld [vmem:[%s8739_s20] sm:$0xff]  ;;  %v792_v28 = vld [vmem:[%s8741_s18 + $0x18] sm:$0xff]  ;;  %s8747_s10 = sld [smem:[#allocation90_spill]]  ;;  %s6378_s19 = sshra.s32 %s4531_s16, 4  ;;  %s6379_s19 = int_to_ptr.hbm [resolvable:$true] %s6378_s19 }
 0x22d   :  { %766 = vmatpush.msra.mxu1 %v749_v9  ;;  %v5078_v16 = vld [vmem:[%s8740_s29] ss:$0 sm:$0xff]  ;;  %v5079_v22 = vld [vmem:[%s8740_s29 + $0x1] ss:$0 sm:$0xff]  ;;  %v5080_v24 = vld [vmem:[%s8740_s29 + $0x2] ss:$0 sm:$0xff]  ;;  %811 = vmatpush.msra.mxu2 %v792_v28  ;;  %p6383_p3 = scmp.lt.s32.totalorder %s6379_s19, %s6779_s27 }
 0x22e   :  { %725 = vmatpush.msra.mxu0 %v695_v5  ;;  %v791_v29 = vld [vmem:[%s8741_s18 + $0x10] sm:$0xff]  ;;  %v790_v30 = vld [vmem:[%s8741_s18 + $0x8] sm:$0xff]  ;;  %v789_v31 = vld [vmem:[%s8741_s18] sm:$0xff]  ;;  %856 = vmatpush.msra.mxu3 %v832_v47  ;;  %s8748_s17 = sld [smem:[#allocation89_spill]]  ;;  %s6380_s30 = scalar_lea.hbm %s6379_s19, 2 }
 0x22f   :  { %767 = vmatpush.msra.mxu1 %v748_v10  ;;  %812 = vmatpush.msra.mxu2 %v791_v29  ;;  %v5081_v32 = vld [vmem:[%s8742_s1] ss:$0 sm:$0xff]  ;;  %v5082_v38 = vld [vmem:[%s8742_s1 + $0x1] ss:$0 sm:$0xff]  ;;  %v5083_v40 = vld [vmem:[%s8742_s1 + $0x2] ss:$0 sm:$0xff]  ;;  %p6381_p2 = scmp.ne.s32.totalorder %s6379_s19, %s6380_s30 }
 0x230   :  { %726 = vmatpush.msra.mxu0 %v694_v6  ;;  %v5084_v51 = vld [vmem:[%s8743_s25] ss:$0 sm:$0xff]  ;;  %v5085_v57 = vld [vmem:[%s8743_s25 + $0x1] ss:$0 sm:$0xff]  ;;  %v5086_v59 = vld [vmem:[%s8743_s25 + $0x2] ss:$0 sm:$0xff] }
 0x231   :  { %4608 = vmatmul.msk.f32.vlgmr.msra.gmra.mxu0 %vm703_vm1, %v693_v7  ;;  %768 = vmatpush.msra.mxu1 %v747_v11  ;;  %v875_v2 = vld [vmem:[#allocation14 + $0x8] sm:$0xff]  ;;  %v874_v3 = vld [vmem:[#allocation14] sm:$0xff]  ;;  %v996_v4 = vld [vmem:[%s8744_s15 + $0x8] sm:$0xff]  ;;  %s8751_s5 = sld [smem:[#allocation79_spill]]  ;;  %s6382_s4 = scalar_lea.hbm %s6779_s27, 2 }
 0x232   :  { %813 = vmatpush.msra.mxu2 %v790_v30  ;;  %4619 = vmatpush.msk.msrb.mxu0 %vm959_vm6, %v952_v48  ;;  %v995_v5 = vld [vmem:[%s8744_s15] sm:$0xff]  ;;  %v7005_v11 = vld [vmem:[%s8746_s7 + $0x8] sm:$0xff]  ;;  %s8757_s11 = sld [smem:[#allocation80_spill]]  ;;  %p6384_p4 = scmp.lt.s32.totalorder %s6382_s4, %s6380_s30 }
 0x233   :  { %769 = vmatpush.msra.mxu1 %v746_v12  ;;  %v5087_v6 = vld [vmem:[#allocation17] ss:$0 sm:$0xff]  ;;  %v5090_v9 = vld [vmem:[%s8745_s3] ss:$0 sm:$0xff]  ;;  %v7008_v12 = vld [vmem:[%s8746_s7 + $0x10] sm:$0xff]  ;;  %s8776_s6 = sld [smem:[#allocation97_spill]] }
 0x234   :  { %814 = vmatpush.msra.mxu2 %v789_v31  ;;  %978 = vmatpush.msrb.mxu0 %v951_v49  ;;  %v7002_v10 = vld [vmem:[%s8746_s7] sm:$0xff]  ;;  %v1109_v31 = vld [vmem:[%s8746_s7 + $0x30] sm:$0xf]  ;;  %s8777_s12 = sld [smem:[#allocation91_spill]]  ;;  %p6385_p5 = por %p6384_p4, %p6383_p3 }
 0x235   :  { %770 = vmatpush.msra.mxu1 %v745_v13  ;;  %v5092_v47 = vld [vmem:[%s8745_s3 + $0x2] ss:$0 sm:$0xff]  ;;  %s8780_s13 = sld [smem:[#allocation102_spill]] }
 0x236   :  { %895 = vmatpush.msrb.mxu2 %v877_v0  ;;  %v5089_v0 = vld [vmem:[#allocation17 + $0x2] ss:$0 sm:$0xff]  ;;  %p6386_p6 = pnand %p6385_p5, %p6381_p2 }
 0x237   :  { %771 = vmatpush.msra.mxu1 %v744_v14 }
 0x238   :  { %896 = vmatpush.msrb.mxu2 %v876_v1 }
 0x239   :  { %772 = vmatpush.msra.mxu1 %v743_v15  ;;  %4620 = vmatmul.msk.f32.vlgmr.msrb.gmra.mxu0 %vm955_vm7, %v950_v50  ;;  %v6516_v15 = vmov 0  }
 0x23a   :  { %897 = vmatpush.msrb.mxu2 %v875_v2  ;;  %5072 = vset.pattern.permute.xlu0 %v6516_v15 }
 0x23b   :  { %5073 = vset.pattern.permute.xlu1 %v6516_v15  ;;  %5074 = vset.pattern.permute.xlu2 %v6516_v15 }
 0x23c   :  { %898 = vmatpush.msrb.mxu2 %v874_v3 }
 0x2ae   :  { %v728_v17 = vpop.f32.mrf.mxu0 }
 0x2af   :  { %v729_v18 = vadd.f32 %v5078_v16, %v728_v17  ;;  %v7012_v16 = vld [vmem:[%s8746_s7 + $0x18] sm:$0xff]  ;;  %v1111_v17 = vsel %vm1110_vm9, %v7002_v10, 0.0 }
 0x2b1   :  { %v732_v19 = vmin.f32 %v729_v18, 0.0  ;;  %vm731_vm2 = vcmp.gt.f32.partialorder %v729_v18, 0.0 }
 0x2b3   :  { %v733_v20 = vmul.f32 1.442695, %v732_v19  ;;  %v1114_v19 = vsel %vm1110_vm9, %v7008_v12, 0.0 }
 0x2b5   :  { %5132 = vpow2.f32 %v733_v20 }
 0x2b6   :  { %v980_v7 = vpop.f32.mrf.mxu0 }
 0x2b7   :  { %v6998_v8 = vadd.f32 %v5087_v6, %v980_v7  ;;  %v922_v7 = vld [vmem:[%s8747_s10 + $0x38] sm:$0xff] }
 0x2b8   :  { %938 = vmatpush.msrb.mxu3 %v922_v7 }
 0x2b9   :  { %v984_v13 = vmin.f32 %v6998_v8, 0.0  ;;  %vm983_vm12 = vcmp.gt.f32.partialorder %v6998_v8, 0.0 }
 0x2bb   :  { %v5133_v21 = vpop.eup %5132  ;;  %v985_v28 = vmul.f32 1.442695, %v984_v13  ;;  %v920_v13 = vld [vmem:[%s8747_s10 + $0x28] sm:$0xff] }
 0x2bc   :  { %v4609_v23 = vadd.f32 -1.0, %v5133_v21  ;;  %v1107_v21 = vld [vmem:[%s8746_s7 + $0x20] sm:$0xff] }
 0x2bd   :  { %v1118_v29 = vsel %vm1110_vm9, %v1107_v21, 0.0 }
 0x2be   :  { %v736_v25 = vsel %vm731_vm2, %v729_v18, %v4609_v23  ;;  %v1112_v18 = vsel %vm1110_vm9, %v7005_v11, 0.0  ;;  %v1116_v23 = vsel %vm1110_vm9, %v7012_v16, 0.0  ;;  %vm1038_vm2 = vcmask 64512  }
 0x2bf   :  { %v739_v26 = vmul.f32 %v5079_v22, %v736_v25  ;;  %v1113_v22 = vadd.f32 %v1112_v18, %v1111_v17  ;;  %v1108_v25 = vld [vmem:[%s8746_s7 + $0x28] sm:$0xff]  ;;  %v915_v17 = vld [vmem:[%s8747_s10] sm:$0xff] }
 0x2c0   :  { %v1035_v18 = vld [vmem:[#allocation20] sm:$0xff] }
 0x2c1   :  { %v742_v27 = vadd.f32 %v5080_v24, %v739_v26  ;;  %v1115_v26 = vadd.f32 %v1114_v19, %v1113_v22  ;;  %v5093_v19 = vld [vmem:[%s8748_s17] ss:$0 sm:$0xff] }
 0x2c3   :  { %4610 = vmatmul.msk.f32.vlgmr.msra.gmra.mxu1 %vm753_vm3, %v742_v27  ;;  %v6517_v27 = vmov 52.0  }
 0x340   :  { %v774_v33 = vpop.f32.mrf.mxu1 }
 0x341   :  { %v775_v34 = vadd.f32 %v5081_v32, %v774_v33  ;;  %v1117_v32 = vadd.f32 %v1116_v23, %v1115_v26  ;;  %v1120_v33 = vsel %vm1110_vm9, %v1108_v25, 0.0 }
 0x343   :  { %v778_v35 = vmin.f32 %v775_v34, 0.0  ;;  %vm777_vm4 = vcmp.gt.f32.partialorder %v775_v34, 0.0 }
 0x345   :  { %v779_v36 = vmul.f32 1.442695, %v778_v35  ;;  %v1123_v35 = vsel %vm1122_vm10, %v1109_v31, 0.0 }
 0x347   :  { %5134 = vpow2.f32 %v779_v36 }
 0x34d   :  { %v5135_v37 = vpop.eup %5134 }
 0x34e   :  { %v4611_v39 = vadd.f32 -1.0, %v5135_v37 }
 0x350   :  { %v782_v41 = vsel %vm777_vm4, %v775_v34, %v4611_v39  ;;  %v1119_v34 = vadd.f32 %v1118_v29, %v1117_v32  ;;  %vm1275_vm4 = vcmask 1046528  }
 0x351   :  { %v785_v42 = vmul.f32 %v5082_v38, %v782_v41 }
 0x352   :  { %v1121_v37 = vadd.f32 %v1120_v33, %v1119_v34 }
 0x353   :  { %v788_v43 = vadd.f32 %v5083_v40, %v785_v42  ;;  %v5091_v42 = vld [vmem:[%s8745_s3 + $0x1] ss:$0 sm:$0xff] }
 0x354   :  { %v1124_v39 = vadd.f32 %v1123_v35, %v1121_v37 }
 0x355   :  { %4612 = vmatmul.msk.f32.vlgmr.msra.gmra.mxu2 %vm795_vm5, %v788_v43 }
 0x356   :  { %1017 = vmatpush.msra.mxu2 %v996_v4 }
 0x358   :  { %1018 = vmatpush.msra.mxu2 %v995_v5 }
 0x3d8   :  { %v816_v52 = vpop.f32.mrf.mxu2 }
 0x3d9   :  { %v817_v53 = vadd.f32 %v5084_v51, %v816_v52 }
 0x3db   :  { %v820_v54 = vmin.f32 %v817_v53, 0.0  ;;  %vm819_vm8 = vcmp.gt.f32.partialorder %v817_v53, 0.0 }
 0x3dd   :  { %v821_v55 = vmul.f32 1.442695, %v820_v54 }
 0x3df   :  { %5136 = vpow2.f32 %v821_v55 }
 0x3e0   :  { %5138 = vrcp.f32 %v6517_v27 }
 0x3e5   :  { %v5137_v56 = vpop.eup %5136 }
 0x3e6   :  { %v4613_v58 = vadd.f32 -1.0, %v5137_v56  ;;  %v5139_v36 = vpop.eup %5138  ;;  %v5088_v56 = vld [vmem:[#allocation17 + $0x1] ss:$0 sm:$0xff] }
 0x3e7   :  { %v1132_v38 = vmul.f32 52.0, %v5139_v36  ;;  %vm1136_vm13 = vweird.f32 %v5139_v36 }
 0x3e8   :  { %v824_v60 = vsel %vm819_vm8, %v817_v53, %v4613_v58  ;;  %vm1537_vm8 = vcmask 1041408  }
 0x3e9   :  { %v827_v61 = vmul.f32 %v5085_v57, %v824_v60  ;;  %v1133_v40 = vsub.f32 1.0, %v1132_v38  ;;  %v5097_v38 = vld [vmem:[#allocation19 + $0x2] ss:$0 sm:$0xff] }
 0x3eb   :  { %v830_v62 = vadd.f32 %v5086_v59, %v827_v61  ;;  %v1134_v45 = vmul.f32 %v5139_v36, %v1133_v40 }
 0x3ed   :  { %v6992_v63 = vadd.f32 %v830_v62, %v788_v43  ;;  %v1125_v43 = vrot.slane %v1124_v39, 4  ;;  %v1135_v53 = vadd.f32 %v5139_v36, %v1134_v45 }
 0x3ef   :  { %4614 = vmatmul.msk.f32.vlgmr.msra.gmra.mxu3 %vm795_vm5, %v6992_v63  ;;  %v1126_v48 = vadd.f32 %v1125_v43, %v1124_v39  ;;  %v1137_v60 = vsel %vm1136_vm13, %v5139_v36, %v1135_v53  ;;  %v5096_v36 = vld [vmem:[#allocation19 + $0x1] ss:$0 sm:$0xff] }
 0x3f1   :  { %v1127_v51 = vrot.slane %v1126_v48, 2 }
 0x3f3   :  { %v1128_v55 = vadd.f32 %v1127_v51, %v1126_v48 }
 0x3f5   :  { %v1129_v58 = vrot.slane %v1128_v55, 1 }
 0x3f7   :  { %v1130_v61 = vadd.f32 %v1129_v58, %v1128_v55 }
 0x3f9   :  { %v1138_v1 = vmul.f32 %v1137_v60, %v1130_v61 }
 0x3fb   :  { %v7033_v2 = vsub.f32 %v1109_v31, %v1138_v1  ;;  %v7035_v3 = vsub.f32 %v1107_v21, %v1138_v1  ;;  %v7042_v5 = vsub.f32 %v7012_v16, %v1138_v1  ;;  %v7047_v6 = vsub.f32 %v7002_v10, %v1138_v1  ;;  %v918_v10 = vld [vmem:[%s8747_s10 + $0x18] sm:$0xff]  ;;  %v917_v16 = vld [vmem:[%s8747_s10 + $0x10] sm:$0xff]  ;;  %v5098_v31 = vld [vmem:[%s8748_s17 + $0x2] ss:$0 sm:$0xff] }
 0x3fc   :  { %v7060_v15 = vsub.f32 %v7005_v11, %v1138_v1 }
 0x3fd   :  { %1218 = vperm.xlu0 %5072, %v7033_v2   ;;  %1208 = vperm.xlu1 %5073, %v7035_v3  }
 0x405   :  { %1203 = vperm.xlu1 %5073, %v7042_v5  }
 0x46f   :  { %v7072_v43 = vpop.permute.xlu0 %1218  ;;  %v7078_v45 = vpop.permute.xlu1 %1208 }
 0x472   :  { %v858_v14 = vpop.f32.mrf.mxu3 }
 0x473   :  { %v859_v20 = vadd.f32 %v5090_v9, %v858_v14  ;;  %v921_v9 = vld [vmem:[%s8747_s10 + $0x30] sm:$0xff]  ;;  %v919_v14 = vld [vmem:[%s8747_s10 + $0x20] sm:$0xff] }
 0x474   :  { %939 = vmatpush.msrb.mxu3 %v921_v9 }
 0x475   :  { %v862_v24 = vmin.f32 %v859_v20, 0.0  ;;  %vm861_vm11 = vcmp.gt.f32.partialorder %v859_v20, 0.0 }
 0x476   :  { %940 = vmatpush.msrb.mxu3 %v920_v13 }
 0x477   :  { %v863_v30 = vmul.f32 1.442695, %v862_v24  ;;  %v5095_v24 = vld [vmem:[#allocation19] ss:$0 sm:$0xff] }
 0x478   :  { %941 = vmatpush.msrb.mxu3 %v919_v14  ;;  %v7112_v14 = vld [vmem:[#allocation7] ss:$4 sm:$0x3] }
 0x479   :  { %5140 = vpow2.f32 %v863_v30 }
 0x47a   :  { %5142 = vpow2.f32 %v985_v28  ;;  %942 = vmatpush.msrb.mxu3 %v918_v10  ;;  %v5094_v28 = vld [vmem:[%s8748_s17 + $0x1] ss:$0 sm:$0xff] }
 0x47c   :  { %943 = vmatpush.msrb.mxu3 %v917_v16 }
 0x47f   :  { %v5141_v41 = vpop.eup %5140 }
 0x480   :  { %v4615_v44 = vadd.f32 -1.0, %v5141_v41  ;;  %v5143_v46 = vpop.eup %5142 }
 0x481   :  { %v4621_v52 = vadd.f32 -1.0, %v5143_v46  ;;  %v1185_v46 = vld [vmem:[#allocation5] ss:$4 sm:$0x3] }
 0x482   :  { %v866_v49 = vsel %vm861_vm11, %v859_v20, %v4615_v44  ;;  %v7080_v48 = vperm.slane %v1185_v46, 0 }
 0x483   :  { %v869_v50 = vmul.f32 %v5091_v42, %v866_v49  ;;  %v988_v59 = vsel %vm983_vm12, %v6998_v8, %v4621_v52  ;;  %v7052_v8 = vsub.f32 %v7008_v12, %v1138_v1  ;;  %v916_v12 = vld [vmem:[%s8747_s10 + $0x8] sm:$0xff]  ;;  %v1241_v42 = vld [vmem:[#allocation5 + $0x1] ss:$4 sm:$0x3] }
 0x484   :  { %v991_v62 = vmul.f32 %v5088_v56, %v988_v59  ;;  %944 = vmatpush.msrb.mxu3 %v916_v12  ;;  %v7076_v44 = vperm.slane %v1241_v42, 0  ;;  %v1238_v52 = vmul.f32 %v7080_v48, %v7072_v43  ;;  %v7094_v56 = vpop.permute.xlu1 %1203  ;;  %v1234_v10 = vmul.f32 %v7080_v48, %v7078_v45 }
 0x485   :  { %v872_v54 = vadd.f32 %v5092_v47, %v869_v50  ;;  %1198 = vperm.xlu2 %5074, %v7052_v8   ;;  %v1331_v47 = vld [vmem:[#allocation5 + $0x2] ss:$4 sm:$0x3] }
 0x486   :  { %v994_v4 = vadd.f32 %v5089_v0, %v991_v62  ;;  %945 = vmatpush.msrb.mxu3 %v915_v17  ;;  %v7082_v49 = vperm.slane %v1331_v47, 0  ;;  %v1259_v50 = vmul.f32 %v7076_v44, %v7072_v43  ;;  %v1255_v60 = vmul.f32 %v7076_v44, %v7078_v45 }
 0x487   :  { %v873_v57 = vadd.f32 %v872_v54, %v6992_v63  ;;  %v7039_v63 = vsub.f32 %v1108_v25, %v1138_v1  ;;  %v7104_v62 = vmul.f32 %v7076_v44, %v7094_v56  ;;  %v1232_v17 = vmul.f32 %v7080_v48, %v7094_v56 }
 0x488   :  { %v1298_v53 = vrot.slane %v1259_v50, 1  ;;  %v1349_v54 = vmul.f32 %v7082_v49, %v7072_v43  ;;  %v1345_v61 = vmul.f32 %v7082_v49, %v7078_v45  ;;  %v7108_v1 = vmul.f32 %v7082_v49, %v7094_v56 }
 0x489   :  { %4616 = vmatmul.msk.f32.vlgmr.msrb.gmra.mxu2 %vm795_vm5, %v873_v57  ;;  %1213 = vperm.xlu0 %5072, %v7039_v63   ;;  %v1290_v9 = vrot.slane %v1255_v60, 1  ;;  %vm1365_vm5 = vcmask 1045504   ;;  %v1286_v12 = vrot.slane %v7104_v62, 1 }
 0x48a   :  { %1057 = vmatpush.msrb.mxu2 %v1035_v18  ;;  %v1328_v58 = vadd.f32 %v1298_v53, %v1238_v52  ;;  %v1388_v59 = vrot.slane %v1349_v54, 2  ;;  %v1380_v16 = vrot.slane %v1345_v61, 2  ;;  %v1376_v18 = vrot.slane %v7108_v1, 2 }
 0x48c   :  { %v1418_v13 = vadd.f32 %v1388_v59, %v1328_v58 }
 0x48d   :  { %1193 = vperm.xlu2 %5074, %v7060_v15  }
 0x491   :  { %4622 = vmatmul.msk.f32.vlgmr.msra.gmra.mxu2 %vm999_vm14, %v994_v4  ;;  %1188 = vperm.xlu0 %5072, %v7047_v6  }
 0x4fb   :  { %v7086_v51 = vpop.permute.xlu0 %1213 }
 0x4fc   :  { %v1257_v55 = vmul.f32 %v7076_v44, %v7086_v51  ;;  %v1347_v57 = vmul.f32 %v7082_v49, %v7086_v51  ;;  %v1236_v4 = vmul.f32 %v7080_v48, %v7086_v51 }
 0x4fe   :  { %v1294_v0 = vrot.slane %v1257_v55, 1  ;;  %v1384_v7 = vrot.slane %v1347_v57, 2 }
 0x50c   :  { %v900_v20 = vpop.f32.mrf.mxu2 }
 0x50d   :  { %v901_v21 = vadd.f32 %v5093_v19, %v900_v20  ;;  %v7121_v19 = vperm.slane %v7112_v14, 0  ;;  %v1299_v20 = vsel %vm1275_vm4, %v1294_v0, %v1298_v53 }
 0x50f   :  { %v904_v22 = vmin.f32 %v901_v21, 0.0  ;;  %vm903_vm15 = vcmp.gt.f32.partialorder %v901_v21, 0.0 }
 0x511   :  { %v905_v23 = vmul.f32 1.442695, %v904_v22  ;;  %v1389_v22 = vsel %vm1365_vm5, %v1384_v7, %v1388_v59 }
 0x513   :  { %5144 = vpow2.f32 %v905_v23  ;;  %v7125_v23 = vperm.slane %v1241_v42, 1 }
 0x514   :  { %v1020_v11 = vpop.f32.mrf.mxu2 }
 0x515   :  { %v1021_v25 = vadd.f32 %v5095_v24, %v1020_v11  ;;  %v1438_v24 = vadd.f32 %v7121_v19, %v1418_v13  ;;  %v1295_v11 = vsel %vm1275_vm4, %v1290_v9, %v1294_v0  ;;  %v7162_v57 = vmul.f32 %v7125_v23, %v7078_v45  ;;  %v1189_v13 = vpop.permute.xlu0 %1188 }
 0x516   :  { %v7170_v59 = vmul.f32 %v7125_v23, %v7086_v51 }
 0x517   :  { %v1024_v26 = vmin.f32 %v1021_v25, 0.0  ;;  %vm1023_vm1 = vcmp.gt.f32.partialorder %v1021_v25, 0.0  ;;  %vm1452_vm7 = vcmp.gt.f32.partialorder %v1438_v24, 0.0 }
 0x519   :  { %v5145_v27 = vpop.eup %5144  ;;  %v1025_v29 = vmul.f32 1.442695, %v1024_v26  ;;  %v1324_v26 = vadd.f32 %v1295_v11, %v1234_v10 }
 0x51a   :  { %v4617_v30 = vadd.f32 -1.0, %v5145_v27  ;;  %v1385_v27 = vsel %vm1365_vm5, %v1380_v16, %v1384_v7 }
 0x51b   :  { %5146 = vpow2.f32 %v1025_v29  ;;  %v1466_v29 = vmin.f32 %v1438_v24, 0.0 }
 0x51c   :  { %v908_v32 = vsel %vm903_vm15, %v901_v21, %v4617_v30  ;;  %v1326_v21 = vadd.f32 %v1299_v20, %v1236_v4  ;;  %v7182_v4 = vmul.f32 %v7125_v23, %v7094_v56  ;;  %v1296_v20 = vrot.slane %v7170_v59, 1 }
 0x51d   :  { %v911_v33 = vmul.f32 %v5094_v28, %v908_v32  ;;  %v1291_v28 = vsel %vm1275_vm4, %v1286_v12, %v1290_v9  ;;  %vm1524_vm15 = vcmask 408576  }
 0x51e   :  { %v1322_v30 = vadd.f32 %v1291_v28, %v1232_v17  ;;  %v1288_v28 = vrot.slane %v7182_v4, 1 }
 0x51f   :  { %v914_v34 = vadd.f32 %v5098_v31, %v911_v33  ;;  %v1381_v31 = vsel %vm1365_vm5, %v1376_v18, %v1380_v16  ;;  %v1414_v33 = vadd.f32 %v1385_v27, %v1324_v26  ;;  %v1292_v16 = vrot.slane %v7162_v57, 1  ;;  %v1199_v26 = vpop.permute.xlu2 %1198 }
 0x521   :  { %v5147_v35 = vpop.eup %5146  ;;  %4618 = vmatmul.msk.f32.vlgmr.msrb.gmra.mxu3 %vm753_vm3, %v914_v34  ;;  %v7137_v34 = vperm.slane %v1185_v46, 1 }
 0x522   :  { %v4623_v37 = vadd.f32 -1.0, %v5147_v35  ;;  %v1492_v35 = vmul.f32 1.442695, %v1466_v29 }
 0x523   :  { %v1239_v52 = vmul.f32 %v7137_v34, %v7072_v43  ;;  %v7178_v0 = vmul.f32 %v7137_v34, %v7078_v45  ;;  %v7199_v27 = vmul.f32 %v7137_v34, %v7094_v56 }
 0x524   :  { %v1028_v39 = vsel %vm1023_vm1, %v1021_v25, %v4623_v37  ;;  %v1416_v25 = vadd.f32 %v1389_v22, %v1326_v21  ;;  %v7139_v37 = vperm.slane %v1331_v47, 1  ;;  %5148 = vpow2.f32 %v1492_v35 }
 0x525   :  { %v1031_v40 = vmul.f32 %v5096_v36, %v1028_v39  ;;  %v1412_v36 = vadd.f32 %v1381_v31, %v1322_v30  ;;  %v1251_v31 = vmul.f32 %v7076_v44, %v1199_v26  ;;  %v1341_v35 = vmul.f32 %v7082_v49, %v1199_v26 }
 0x526   :  { %v1436_v32 = vadd.f32 %v7121_v19, %v1416_v25  ;;  %v7158_v54 = vmul.f32 %v7139_v37, %v7072_v43  ;;  %v7166_v58 = vmul.f32 %v7139_v37, %v7078_v45  ;;  %v7174_v61 = vmul.f32 %v7139_v37, %v7086_v51 }
 0x527   :  { %v7070_v41 = vadd.f32 %v5097_v38, %v1031_v40  ;;  %v7143_v38 = vmul.f32 %v7125_v23, %v7072_v43  ;;  %v7146_v40 = vadd.f32 %v7121_v19, %v1414_v33  ;;  %v7149_v42 = vadd.f32 %v7121_v19, %v1412_v36 }
 0x528   :  { %v1464_v39 = vmin.f32 %v1436_v32, 0.0  ;;  %v1390_v9 = vrot.slane %v7158_v54, 2  ;;  %v1382_v17 = vrot.slane %v7166_v58, 2  ;;  %v1237_v45 = vmul.f32 %v7137_v34, %v7086_v51 }
 0x529   :  { %4624 = vmatmul.msk.f32.vlgmr.msrb.gmra.mxu2 %vm1038_vm2, %v7070_v41  ;;  %v1462_v46 = vmin.f32 %v7146_v40, 0.0  ;;  %v1460_v47 = vmin.f32 %v7149_v42, 0.0  ;;  %v1300_v53 = vrot.slane %v7143_v38, 1  ;;  %v1386_v22 = vrot.slane %v7174_v61, 2 }
 0x52a   :  { %v1488_v50 = vmul.f32 1.442695, %v1464_v39  ;;  %v5149_v43 = vpop.eup %5148  ;;  %v7195_v11 = vmul.f32 %v7139_v37, %v7094_v56  ;;  %vm1450_vm9 = vcmp.gt.f32.partialorder %v1436_v32, 0.0  ;;  %v7203_v51 = vmul.f32 %v7076_v44, %v1189_v13 }
 0x52b   :  { %v1484_v55 = vmul.f32 1.442695, %v1462_v46  ;;  %v1480_v60 = vmul.f32 1.442695, %v1460_v47  ;;  %v1329_v7 = vadd.f32 %v1300_v53, %v1239_v52  ;;  %v4647_v10 = vadd.f32 -1.0, %v5149_v43 }
 0x52c   :  { %5150 = vpow2.f32 %v1488_v50  ;;  %vm1448_vm10 = vcmp.gt.f32.partialorder %v7146_v40, 0.0  ;;  %vm1446_vm11 = vcmp.gt.f32.partialorder %v7149_v42, 0.0  ;;  %v1230_v33 = vmul.f32 %v7080_v48, %v1199_v26 }
 0x52d   :  { %5152 = vpow2.f32 %v1484_v55  ;;  %v1522_v25 = vsel %vm1452_vm7, %v1438_v24, %v4647_v10  ;;  %v7209_v24 = vmul.f32 %v7125_v23, %v1189_v13  ;;  %v1282_v50 = vrot.slane %v1251_v31, 1 }
 0x52e   :  { %5154 = vpow2.f32 %v1480_v60  ;;  %4659 = vmatpush.msk.msra.mxu3 %vm1537_vm8, %v1522_v25  ;;  %4649 = vmatpush.msk.msrb.mxu1 %vm1537_vm8, %v1522_v25  ;;  %v1378_v46 = vrot.slane %v7195_v11, 2  ;;  %v1226_v52 = vmul.f32 %v7080_v48, %v1189_v13  ;;  %v1372_v55 = vrot.slane %v1341_v35, 2 }
 0x52f   :  { %v7219_v60 = vmul.f32 %v7137_v34, %v1189_v13  ;;  %v1337_v43 = vmul.f32 %v7082_v49, %v1189_v13  ;;  %v1287_v25 = vsel %vm1275_vm4, %v1282_v50, %v1286_v12  ;;  %v1276_v31 = vrot.slane %v7203_v51, 1 }
 0x530   :  { %v7240_v35 = vmul.f32 %v7125_v23, %v1199_v26  ;;  %v1419_v62 = vadd.f32 %v1390_v9, %v1329_v7  ;;  %v7245_v12 = vperm.slane %v7112_v14, 1  ;;  %v1301_v1 = vsel %vm1275_vm4, %v1296_v20, %v1300_v53 }
 0x531   :  { %v1391_v7 = vsel %vm1365_vm5, %v1386_v22, %v1390_v9  ;;  %v1231_v53 = vmul.f32 %v7137_v34, %v1199_v26 }
 0x532   :  { %v5151_v21 = vpop.eup %5150  ;;  %v1284_v54 = vrot.slane %v7240_v35, 1  ;;  %v7270_v9 = vadd.f32 %v7245_v12, %v1419_v62  ;;  %v1297_v35 = vsel %vm1275_vm4, %v1292_v16, %v1296_v20 }
 0x533   :  { %v4645_v29 = vadd.f32 -1.0, %v5151_v21  ;;  %v5153_v30 = vpop.eup %5152 }
 0x534   :  { %v5155_v56 = vpop.eup %5154  ;;  %v4643_v39 = vadd.f32 -1.0, %v5153_v30  ;;  %v1075_v30 = vld [vmem:[#allocation23] sm:$0xff]  ;;  %vm1453_vm14 = vcmp.gt.f32.partialorder %v7270_v9, 0.0 }
 0x535   :  { %v1520_v36 = vsel %vm1450_vm9, %v1436_v32, %v4645_v29  ;;  %v4641_v47 = vadd.f32 -1.0, %v5155_v56  ;;  %v7226_v32 = vmul.f32 %v7139_v37, %v1189_v13  ;;  %v1146_v29 = vlaneseq  ;;  %1098 = vmatpush.msra.mxu0 %v1075_v30 }
 0x536   :  { %1624 = vmatpush.msra.mxu3 %v1520_v36  ;;  %1554 = vmatpush.msrb.mxu1 %v1520_v36  ;;  %v1518_v10 = vsel %vm1448_vm10, %v7146_v40, %v4643_v39  ;;  %v1279_v56 = vrot.slane %v7209_v24, 1  ;;  %v1320_v40 = vadd.f32 %v1287_v25, %v1230_v33  ;;  %v1377_v13 = vsel %vm1365_vm5, %v1372_v55, %v1376_v18 }
 0x537   :  { %v1516_v21 = vsel %vm1446_vm11, %v7149_v42, %v4641_v47  ;;  %v7253_v18 = vmul.f32 %v7139_v37, %v1199_v26  ;;  %v1194_v42 = vpop.permute.xlu2 %1193  ;;  %v1327_v33 = vadd.f32 %v1301_v1, %v1237_v45  ;;  %v1366_v36 = vrot.slane %v1337_v43, 2 }
 0x538   :  { %1625 = vmatpush.msra.mxu3 %v1518_v10  ;;  %1555 = vmatpush.msrb.mxu1 %v1518_v10  ;;  %v1410_v51 = vadd.f32 %v1377_v13, %v1320_v40  ;;  %v1249_v14 = vmul.f32 %v7076_v44, %v1194_v42  ;;  %v1369_v38 = vrot.slane %v7226_v32, 2  ;;  %v7262_v39 = vshrl.u32 %v1146_v29, 7 }
 0x539   :  { %v1228_v47 = vmul.f32 %v7080_v48, %v1194_v42  ;;  %v1339_v10 = vmul.f32 %v7082_v49, %v1194_v42  ;;  %v1417_v25 = vadd.f32 %v1391_v7, %v1327_v33  ;;  %v1374_v43 = vrot.slane %v7253_v18, 2 }
 0x53a   :  { %1626 = vmatpush.msra.mxu3 %v1516_v21  ;;  %1556 = vmatpush.msrb.mxu1 %v1516_v21  ;;  %v1430_v45 = vadd.f32 %v7121_v19, %v1410_v51  ;;  %v1277_v21 = vrot.slane %v1249_v14, 1  ;;  %v1153_v1 = vmul.u32 2, %v7262_v39  ;;  %v7283_v14 = vmul.f32 %v7125_v23, %v1194_v42 }
 0x53b   :  { %v1367_v30 = vrot.slane %v1339_v10, 2  ;;  %v7288_v10 = vadd.f32 %v7245_v12, %v1417_v25  ;;  %v7291_v59 = vmul.f32 %v7139_v37, %v1194_v42  ;;  %v1325_v25 = vadd.f32 %v1297_v35, %v7178_v0 }
 0x53c   :  { %v1458_v40 = vmin.f32 %v1430_v45, 0.0  ;;  %v1283_v13 = vsel %vm1275_vm4, %v1277_v21, %v1282_v50  ;;  %v1278_v26 = vsel %vm1275_vm4, %v1276_v31, %v1277_v21  ;;  %v1467_v31 = vmin.f32 %v7270_v9, 0.0 }
 0x53d   :  { %v1318_v62 = vadd.f32 %v1283_v13, %v1228_v47  ;;  %v1373_v33 = vsel %vm1365_vm5, %v1367_v30, %v1372_v55  ;;  %v1316_v7 = vadd.f32 %v1278_v26, %v1226_v52  ;;  %v1368_v50 = vsel %vm1365_vm5, %v1366_v36, %v1367_v30 }
 0x53e   :  { %v1476_v51 = vmul.f32 1.442695, %v1458_v40  ;;  %v1229_v47 = vmul.f32 %v7137_v34, %v1194_v42  ;;  %v7294_v55 = vand.u32 127, %v1146_v29  ;;  %v1494_v52 = vmul.f32 1.442695, %v1467_v31 }
 0x53f   :  { %v1408_v20 = vadd.f32 %v1373_v33, %v1318_v62  ;;  %v1406_v21 = vadd.f32 %v1368_v50, %v1316_v7  ;;  %v1465_v40 = vmin.f32 %v7288_v10, 0.0  ;;  %v1387_v13 = vsel %vm1365_vm5, %v1382_v17, %v1386_v22 }
 0x540   :  { %5156 = vpow2.f32 %v1476_v51  ;;  %v7311_v29 = vadd.s32 1, %v1153_v1  ;;  %v1293_v26 = vsel %vm1275_vm4, %v1288_v28, %v1292_v16  ;;  %v1280_v0 = vrot.slane %v7283_v14, 1 }
 0x541   :  { %v7298_v36 = vadd.f32 %v7121_v19, %v1408_v20  ;;  %v7301_v30 = vadd.f32 %v7121_v19, %v1406_v21  ;;  %5158 = vpow2.f32 %v1494_v52  ;;  %v1490_v42 = vmul.f32 1.442695, %v1465_v40 }
 0x542   :  { %v1370_v61 = vrot.slane %v7291_v59, 2  ;;  %vm1444_vm12 = vcmp.gt.f32.partialorder %v1430_v45, 0.0  ;;  %v1415_v51 = vadd.f32 %v1387_v13, %v1325_v25  ;;  %v1323_v62 = vadd.f32 %v1293_v26, %v7199_v27 }
 0x543   :  { %v1456_v35 = vmin.f32 %v7298_v36, 0.0  ;;  %v1454_v22 = vmin.f32 %v7301_v30, 0.0  ;;  %5160 = vpow2.f32 %v1490_v42  ;;  %v1383_v16 = vsel %vm1365_vm5, %v1378_v46, %v1382_v17 }
 0x544   :  { %v1289_v14 = vsel %vm1275_vm4, %v1284_v54, %v1288_v28  ;;  %vm1173_vm13 = vcmp.eq.s32.totalorder %v7294_v55, %v7311_v29  ;;  %v7334_v31 = vadd.f32 %v7245_v12, %v1415_v51  ;;  %v1413_v27 = vadd.f32 %v1383_v16, %v1323_v62 }
 0x545   :  { %v1472_v7 = vmul.f32 1.442695, %v1456_v35  ;;  %v1468_v57 = vmul.f32 1.442695, %v1454_v22  ;;  %v1321_v20 = vadd.f32 %v1289_v14, %v1231_v53  ;;  %v1379_v58 = vsel %vm1365_vm5, %v1374_v43, %v1378_v46 }
 0x546   :  { %v5157_v33 = vpop.eup %5156  ;;  %v1285_v4 = vsel %vm1275_vm4, %v1280_v0, %v1284_v54  ;;  %v1463_v21 = vmin.f32 %v7334_v31, 0.0  ;;  %v7346_v11 = vadd.s32 8, %v7262_v39  ;;  %v7349_v52 = vadd.f32 %v7245_v12, %v1413_v27 }
 0x547   :  { %v4639_v50 = vadd.f32 -1.0, %v5157_v33  ;;  %5162 = vpow2.f32 %v1472_v7  ;;  %v5159_v17 = vpop.eup %5158  ;;  %v1411_v46 = vadd.f32 %v1379_v58, %v1321_v20  ;;  %vm1451_vm1 = vcmp.gt.f32.partialorder %v7288_v10, 0.0 }
 0x548   :  { %5164 = vpow2.f32 %v1468_v57  ;;  %v4648_v53 = vadd.f32 -1.0, %v5159_v17  ;;  %v1319_v40 = vadd.f32 %v1285_v4, %v1229_v47  ;;  %v1375_v25 = vsel %vm1365_vm5, %v1370_v61, %v1374_v43 }
 0x549   :  { %v1514_v28 = vsel %vm1444_vm12, %v1430_v45, %v4639_v50  ;;  %v5161_v54 = vpop.eup %5160  ;;  %v1486_v45 = vmul.f32 1.442695, %v1463_v21  ;;  %vm7361_vm7 = vcmp.eq.s32.totalorder %v7294_v55, %v1153_v1  ;;  %v1461_v35 = vmin.f32 %v7349_v52, 0.0 }
 0x54a   :  { %1627 = vmatpush.msra.mxu3 %v1514_v28  ;;  %1557 = vmatpush.msrb.mxu1 %v1514_v28  ;;  %v1523_v13 = vsel %vm1453_vm14, %v7270_v9, %v4648_v53  ;;  %v4646_v42 = vadd.f32 -1.0, %v5161_v54  ;;  %vm1442_vm9 = vcmp.gt.f32.partialorder %v7298_v36, 0.0  ;;  %v7370_v18 = vadd.f32 %v7245_v12, %v1411_v46 }
 0x54b   :  { %4654 = vmatpush.msk.msra.mxu2 %vm1537_vm8, %v1523_v13  ;;  %4664 = vmatpush.msk.msrb.mxu0 %vm1537_vm8, %v1523_v13  ;;  %5166 = vpow2.f32 %v1486_v45  ;;  %v1409_v9 = vadd.f32 %v1375_v25, %v1319_v40  ;;  %v1154_v1 = vmul.u32 2, %v7346_v11  ;;  %v1482_v22 = vmul.f32 1.442695, %v1461_v35 }
 0x54c   :  { %v1521_v47 = vsel %vm1451_vm1, %v7288_v10, %v4646_v42  ;;  %v1281_v51 = vsel %vm1275_vm4, %v1279_v56, %v1280_v0  ;;  %vm1440_vm10 = vcmp.gt.f32.partialorder %v7301_v30, 0.0  ;;  %v1459_v7 = vmin.f32 %v7370_v18, 0.0 }
 0x54d   :  { %v5163_v43 = vpop.eup %5162  ;;  %1583 = vmatpush.msra.mxu2 %v1521_v47  ;;  %1653 = vmatpush.msrb.mxu0 %v1521_v47  ;;  %v1429_v57 = vadd.f32 %v7245_v12, %v1409_v9  ;;  %5168 = vpow2.f32 %v1482_v22  ;;  %v1317_v10 = vadd.f32 %v1281_v51, %v7219_v60  ;;  %v1371_v24 = vsel %vm1365_vm5, %v1369_v38, %v1370_v61  ;;  %v5100_v47 = vld [vmem:[#allocation22] ss:$0 sm:$0xff] }
 0x54e   :  { %v5165_v62 = vpop.eup %5164  ;;  %v4637_v33 = vadd.f32 -1.0, %v5163_v43  ;;  %v6518_v0 = vmov 0.0   ;;  %v1478_v50 = vmul.f32 1.442695, %v1459_v7  ;;  %v1170_v38 = vadd.s32 1, %v1154_v1 }
 0x54f   :  { %v4635_v16 = vadd.f32 -1.0, %v5165_v62  ;;  %v7393_v14 = vsel %vm1173_vm13, 1.0, %v6518_v0  ;;  %v1457_v27 = vmin.f32 %v1429_v57, 0.0  ;;  %v7399_v32 = vsel %vm7361_vm7, 1.0, %v6518_v0 }
 0x550   :  { %v1512_v56 = vsel %vm1442_vm9, %v7298_v36, %v4637_v33  ;;  %v1407_v59 = vadd.f32 %v1371_v24, %v1317_v10  ;;  %vm1449_vm11 = vcmp.gt.f32.partialorder %v7334_v31, 0.0  ;;  %5170 = vpow2.f32 %v1478_v50  ;;  %v5101_v10 = vld [vmem:[#allocation22 + $0x1] ss:$0 sm:$0xff]  ;;  %v5102_v50 = vld [vmem:[#allocation22 + $0x2] ss:$0 sm:$0xff] }
 0x551   :  { %1628 = vmatpush.msra.mxu3 %v1512_v56  ;;  %v1510_v60 = vsel %vm1440_vm10, %v7301_v30, %v4635_v16  ;;  %1558 = vmatpush.msrb.mxu1 %v1512_v56  ;;  %v5167_v36 = vpop.eup %5166  ;;  %v1474_v29 = vmul.f32 1.442695, %v1457_v27  ;;  %v1149_v61 = vadd.s32 16, %v7262_v39  ;;  %vm1447_vm12 = vcmp.gt.f32.partialorder %v7349_v52, 0.0 }
 0x552   :  { %v4644_v20 = vadd.f32 -1.0, %v5167_v36  ;;  %v1427_v30 = vadd.f32 %v7245_v12, %v1407_v59  ;;  %vm1174_vm13 = vcmp.eq.s32.totalorder %v7294_v55, %v1170_v38  ;;  %vm1158_vm14 = vcmp.eq.s32.totalorder %v7294_v55, %v1154_v1  ;;  %v4683_v36 = vld [vmem:[%s8751_s5 + $0x170] sm:$0xff] }
 0x553   :  { %1629 = vmatpush.msra.mxu3 %v1510_v60  ;;  %1559 = vmatpush.msrb.mxu1 %v1510_v60  ;;  %5172 = vpow2.f32 %v1474_v29  ;;  %v5169_v58 = vpop.eup %5168  ;;  %v1155_v21 = vmul.u32 2, %v1149_v61  ;;  %vm1445_vm1 = vcmp.gt.f32.partialorder %v7370_v18, 0.0  ;;  %v7415_v54 = vsel %vm1174_vm13, 1.0, %v6518_v0  ;;  %v4681_v29 = vld [vmem:[%s8751_s5 + $0x160] sm:$0xff]  ;;  %v4680_v61 = vld [vmem:[%s8751_s5 + $0x158] sm:$0xff] }
 0x554   :  { %4660 = vmatmul.msk.f32.vlgmr.msra.gmra.mxu3 %vm1524_vm15, %v7393_v14  ;;  %4650 = vmatmul.msk.f32.vlgmr.msrb.gmra.mxu1 %vm1524_vm15, %v7399_v32  ;;  %v1519_v4 = vsel %vm1449_vm11, %v7334_v31, %v4644_v20  ;;  %v1455_v17 = vmin.f32 %v1427_v30, 0.0  ;;  %v4642_v28 = vadd.f32 -1.0, %v5169_v58  ;;  %vm1443_vm7 = vcmp.gt.f32.partialorder %v1429_v57, 0.0  ;;  %v4678_v20 = vld [vmem:[%s8751_s5 + $0x148] sm:$0xff]  ;;  %v4676_v58 = vld [vmem:[%s8751_s5 + $0x138] sm:$0xff] }
 0x555   :  { %1584 = vmatpush.msra.mxu2 %v1519_v4  ;;  %1654 = vmatpush.msrb.mxu0 %v1519_v4  ;;  %v7418_v40 = vsel %vm1158_vm14, 1.0, %v6518_v0  ;;  %v1171_v25 = vadd.s32 1, %v1155_v21  ;;  %vm1441_vm10 = vcmp.gt.f32.partialorder %v1427_v30, 0.0  ;;  %vm1159_vm11 = vcmp.eq.s32.totalorder %v7294_v55, %v1155_v21  ;;  %v4675_v4 = vld [vmem:[%s8751_s5 + $0x130] sm:$0xff]  ;;  %v4672_v21 = vld [vmem:[%s8751_s5 + $0x118] sm:$0xff] }
 0x556   :  { %v1470_v53 = vmul.f32 1.442695, %v1455_v17  ;;  %v5171_v11 = vpop.eup %5170  ;;  %v1517_v46 = vsel %vm1447_vm12, %v7349_v52, %v4642_v28  ;;  %v7435_v43 = vsel %vm1159_vm11, 1.0, %v6518_v0  ;;  %v1150_v33 = vadd.s32 24, %v7262_v39  ;;  %v4674_v17 = vld [vmem:[%s8751_s5 + $0x128] sm:$0xff]  ;;  %v4673_v28 = vld [vmem:[%s8751_s5 + $0x120] sm:$0xff] }
 0x557   :  { %1585 = vmatpush.msra.mxu2 %v1517_v46  ;;  %1655 = vmatpush.msrb.mxu0 %v1517_v46  ;;  %v4640_v31 = vadd.f32 -1.0, %v5171_v11  ;;  %vm1175_vm9 = vcmp.eq.s32.totalorder %v7294_v55, %v1171_v25  ;;  %v1725_v11 = vld [vmem:[%s8751_s5 + $0x78] sm:$0xff]  ;;  %v1724_v46 = vld [vmem:[%s8751_s5 + $0x70] sm:$0xff]  ;;  %v4669_v25 = vld [vmem:[%s8751_s5 + $0x100] sm:$0xff]  ;;  %vm2243_vm11 = vcmask 171008  }
 0x558   :  { %5174 = vpow2.f32 %v1470_v53  ;;  %v7427_v9 = vsel %vm1175_vm9, 1.0, %v6518_v0  ;;  %v1156_v7 = vmul.u32 2, %v1150_v33  ;;  %v4671_v53 = vld [vmem:[%s8751_s5 + $0x110] sm:$0xff]  ;;  %1849 = vmatpush.msrb.mxu3 %v1725_v11  ;;  %v4710_v33 = vld [vmem:[%s8751_s5 + $0x248] sm:$0xff] }
 0x559   :  { %v5173_v45 = vpop.eup %5172  ;;  %v1515_v13 = vsel %vm1445_vm1, %v7370_v18, %v4640_v31  ;;  %v4670_v31 = vld [vmem:[%s8751_s5 + $0x108] sm:$0xff]  ;;  %vm2038_vm1 = vcmask 1044480  }
 0x55a   :  { %v4638_v42 = vadd.f32 -1.0, %v5173_v45  ;;  %1586 = vmatpush.msra.mxu2 %v1515_v13  ;;  %1656 = vmatpush.msrb.mxu0 %v1515_v13  ;;  %vm1160_vm14 = vcmp.eq.s32.totalorder %v7294_v55, %v1156_v7  ;;  %v1723_v45 = vld [vmem:[%s8751_s5 + $0x68] sm:$0xff]  ;;  %v4716_v13 = vld [vmem:[%s8751_s5 + $0x278] sm:$0xff] }
 0x55b   :  { %v7452_v27 = vsel %vm1160_vm14, 1.0, %v6518_v0  ;;  %1850 = vmatpush.msrb.mxu3 %v1724_v46  ;;  %v4705_v46 = vld [vmem:[%s8751_s5 + $0x220] sm:$0xff]  ;;  %vm2602_vm14 = vcmask 31744  }
 0x55c   :  { %4661 = vmatmul.msk.f32.gmra.mxu3 %vm1524_vm15, %v7415_v54  ;;  %v1513_v52 = vsel %vm1443_vm7, %v1429_v57, %v4638_v42  ;;  %4651 = vmatmul.msk.f32.gmra.mxu1 %vm1524_vm15, %v7418_v40  ;;  %v1172_v57 = vadd.s32 1, %v1156_v7  ;;  %v4715_v42 = vld [vmem:[%s8751_s5 + $0x270] sm:$0xff]  ;;  %v1717_v7 = vld [vmem:[%s8751_s5 + $0x38] sm:$0xff] }
 0x55d   :  { %1587 = vmatpush.msra.mxu2 %v1513_v52  ;;  %1657 = vmatpush.msrb.mxu0 %v1513_v52  ;;  %v1722_v52 = vld [vmem:[%s8751_s5 + $0x60] sm:$0xff] }
 0x55e   :  { %v5175_v26 = vpop.eup %5174  ;;  %vm1176_vm12 = vcmp.eq.s32.totalorder %v7294_v55, %v1172_v57  ;;  %v4684_v55 = vld [vmem:[%s8751_s5 + $0x178] sm:$0xff]  ;;  %1851 = vmatpush.msrb.mxu3 %v1723_v45 }
 0x55f   :  { %v4636_v35 = vadd.f32 -1.0, %v5175_v26  ;;  %v7446_v56 = vsel %vm1176_vm12, 1.0, %v6518_v0  ;;  %1797 = vmatpush.msra.mxu1 %v4684_v55  ;;  %v4682_v0 = vld [vmem:[%s8751_s5 + $0x168] sm:$0xff]  ;;  %v1741_v57 = vld [vmem:[%s8751_s5 + $0xf8] sm:$0xff]  ;;  %vm2525_vm12 = vcmask 1042432  }
 0x560   :  { %v4714_v26 = vld [vmem:[%s8751_s5 + $0x268] sm:$0xff]  ;;  %1852 = vmatpush.msrb.mxu3 %v1722_v52 }
 0x561   :  { %v1511_v18 = vsel %vm1441_vm10, %v1427_v30, %v4636_v35  ;;  %1798 = vmatpush.msra.mxu1 %v4683_v36  ;;  %v4677_v30 = vld [vmem:[%s8751_s5 + $0x140] sm:$0xff]  ;;  %v1721_v35 = vld [vmem:[%s8751_s5 + $0x58] sm:$0xff]  ;;  %v7531_v52 = vld [vmem:[#allocation7 + $0x2] ss:$4 sm:$0x3] }
 0x562   :  { %1588 = vmatpush.msra.mxu2 %v1511_v18  ;;  %1658 = vmatpush.msrb.mxu0 %v1511_v18  ;;  %v1720_v18 = vld [vmem:[%s8751_s5 + $0x50] sm:$0xff]  ;;  %v4708_v36 = vld [vmem:[%s8751_s5 + $0x238] sm:$0xff] }
 0x563   :  { %4655 = vmatmul.msk.f32.vlgmr.msra.gmra.mxu2 %vm1524_vm15, %v7399_v32  ;;  %1799 = vmatpush.msra.mxu1 %v4682_v0  ;;  %v1738_v0 = vld [vmem:[%s8751_s5 + $0xe0] sm:$0xff] }
 0x564   :  { %4662 = vmatmul.msk.f32.gmra.mxu3 %vm1524_vm15, %v7427_v9  ;;  %4652 = vmatmul.msk.f32.gmra.mxu1 %vm1524_vm15, %v7435_v43 }
 0x565   :  { %1800 = vmatpush.msra.mxu1 %v4681_v29  ;;  %1853 = vmatpush.msrb.mxu3 %v1721_v35  ;;  %v1714_v29 = vld [vmem:[%s8751_s5 + $0x20] sm:$0xff] }
 0x566   :  { %v1734_v35 = vld [vmem:[%s8751_s5 + $0xc0] sm:$0xff] }
 0x567   :  { %1801 = vmatpush.msra.mxu1 %v4680_v61  ;;  %1854 = vmatpush.msrb.mxu3 %v1720_v18  ;;  %v4698_v61 = vld [vmem:[%s8751_s5 + $0x1e8] sm:$0xff]  ;;  %v1710_v18 = vld [vmem:[%s8751_s5] sm:$0xff] }
 0x56b   :  { %4656 = vmatmul.msk.f32.gmra.mxu2 %vm1524_vm15, %v7418_v40 }
 0x56c   :  { %4663 = vmatmul.msk.f32.gmra.mxu3 %vm1524_vm15, %v7446_v56  ;;  %4653 = vmatmul.msk.f32.gmra.mxu1 %vm1524_vm15, %v7452_v27 }
 0x573   :  { %4657 = vmatmul.msk.f32.gmra.mxu2 %vm1524_vm15, %v7435_v43 }
 0x57b   :  { %4658 = vmatmul.msk.f32.gmra.mxu2 %vm1524_vm15, %v7452_v27 }
 0x5ac   :  { %v1059_v1 = vpop.f32.mrf.mxu2 }
 0x5ad   :  { %v1060_v22 = vadd.f32 %v5100_v47, %v1059_v1  ;;  %v4713_v47 = vld [vmem:[%s8751_s5 + $0x260] sm:$0xff]  ;;  %v1719_v1 = vld [vmem:[%s8751_s5 + $0x48] sm:$0xff] }
 0x5ae   :  { %1855 = vmatpush.msrb.mxu3 %v1719_v1 }
 0x5af   :  { %v1063_v51 = vmin.f32 %v1060_v22, 0.0  ;;  %vm1062_vm13 = vcmp.gt.f32.partialorder %v1060_v22, 0.0 }
 0x5b1   :  { %v1064_v62 = vmul.f32 1.442695, %v1063_v51  ;;  %v4711_v51 = vld [vmem:[%s8751_s5 + $0x250] sm:$0xff] }
 0x5b3   :  { %5176 = vpow2.f32 %v1064_v62  ;;  %v1718_v62 = vld [vmem:[%s8751_s5 + $0x40] sm:$0xff] }
 0x5b4   :  { %1856 = vmatpush.msrb.mxu3 %v1718_v62 }
 0x5b6   :  { %1857 = vmatpush.msrb.mxu3 %v1717_v7  ;;  %v1733_v7 = vld [vmem:[%s8751_s5 + $0xb8] sm:$0xff] }
 0x5b9   :  { %v5177_v16 = vpop.eup %5176 }
 0x5ba   :  { %v4625_v24 = vadd.f32 -1.0, %v5177_v16  ;;  %v1716_v16 = vld [vmem:[%s8751_s5 + $0x30] sm:$0xff] }
 0x5bb   :  { %1858 = vmatpush.msrb.mxu3 %v1716_v16  ;;  %v4702_v16 = vld [vmem:[%s8751_s5 + $0x208] sm:$0xff] }
 0x5bc   :  { %v1067_v39 = vsel %vm1062_vm13, %v1060_v22, %v4625_v24  ;;  %v4712_v22 = vld [vmem:[%s8751_s5 + $0x258] sm:$0xff]  ;;  %v7503_v24 = vpop.f32.mrf.mxu3 }
 0x5bd   :  { %v1070_v60 = vmul.f32 %v5101_v10, %v1067_v39  ;;  %v1740_v10 = vld [vmem:[%s8751_s5 + $0xf0] sm:$0xff]  ;;  %8752 = vst [vmem:[#allocation108_spill] sm:$0xff] %v7503_v24  ;;  %v4700_v39 = vld [vmem:[%s8751_s5 + $0x1f8] sm:$0xff] }
 0x5be   :  { %1823 = vmatpush.msrb.mxu2 %v4700_v39  ;;  %v4692_v39 = vld [vmem:[%s8751_s5 + $0x1b8] sm:$0xff] }
 0x5bf   :  { %v1073_v38 = vadd.f32 %v5102_v50, %v1070_v60  ;;  %v4709_v50 = vld [vmem:[%s8751_s5 + $0x240] sm:$0xff]  ;;  %v1739_v60 = vld [vmem:[%s8751_s5 + $0xe8] sm:$0xff] }
 0x5c1   :  { %v1074_v59 = vadd.f32 %v1073_v38, %v7070_v41  ;;  %v4679_v41 = vld [vmem:[%s8751_s5 + $0x150] sm:$0xff]  ;;  %v1715_v38 = vld [vmem:[%s8751_s5 + $0x28] sm:$0xff] }
 0x5c2   :  { %1802 = vmatpush.msra.mxu1 %v4679_v41  ;;  %v4707_v41 = vld [vmem:[%s8751_s5 + $0x230] sm:$0xff]  ;;  %1859 = vmatpush.msrb.mxu3 %v1715_v38  ;;  %v4701_v38 = vld [vmem:[%s8751_s5 + $0x200] sm:$0xff] }
 0x5c3   :  { %4626 = vmatmul.msk.f32.vlgmr.msra.gmra.mxu0 %vm1038_vm2, %v1074_v59  ;;  %v4699_v59 = vld [vmem:[%s8751_s5 + $0x1f0] sm:$0xff] }
 0x5c4   :  { %1803 = vmatpush.msra.mxu1 %v4678_v20  ;;  %1875 = vmatpush.msra.mxu0 %v1741_v57  ;;  %v1737_v20 = vld [vmem:[%s8751_s5 + $0xd8] sm:$0xff]  ;;  %v4693_v57 = vld [vmem:[%s8751_s5 + $0x1c0] sm:$0xff] }
 0x5c5   :  { %1824 = vmatpush.msrb.mxu2 %v4699_v59  ;;  %1860 = vmatpush.msrb.mxu3 %v1714_v29  ;;  %v4746_v59 = vld [vmem:[%s8751_s5 + $0x368] sm:$0xff]  ;;  %v4691_v29 = vld [vmem:[%s8751_s5 + $0x1b0] sm:$0xff] }
 0x5c6   :  { %1804 = vmatpush.msra.mxu1 %v4677_v30  ;;  %1876 = vmatpush.msra.mxu0 %v1740_v10  ;;  %v1713_v30 = vld [vmem:[%s8751_s5 + $0x18] sm:$0xff]  ;;  %v4747_v10 = vld [vmem:[%s8751_s5 + $0x370] sm:$0xff] }
 0x5c7   :  { %1825 = vmatpush.msrb.mxu2 %v4698_v61  ;;  %1861 = vmatpush.msrb.mxu3 %v1713_v30  ;;  %v4745_v61 = vld [vmem:[%s8751_s5 + $0x360] sm:$0xff] }
 0x5c8   :  { %1805 = vmatpush.msra.mxu1 %v4676_v58  ;;  %1877 = vmatpush.msra.mxu0 %v1739_v60  ;;  %v4697_v58 = vld [vmem:[%s8751_s5 + $0x1e0] sm:$0xff] }
 0x5c9   :  { %1826 = vmatpush.msrb.mxu2 %v4697_v58 }
 0x5ca   :  { %1806 = vmatpush.msra.mxu1 %v4675_v4  ;;  %1878 = vmatpush.msra.mxu0 %v1738_v0  ;;  %v7518_v4 = vld [vmem:[#allocation7 + $0x1] ss:$4 sm:$0x3] }
 0x5cb   :  { %4665 = vmatmul.msk.f32.vlgmr.msrb.gmra.mxu0 %vm1524_vm15, %v7393_v14  ;;  %v1731_v0 = vld [vmem:[%s8751_s5 + $0xa8] sm:$0xff] }
 0x5cc   :  { %1807 = vmatpush.msra.mxu1 %v4674_v17  ;;  %v4706_v17 = vld [vmem:[%s8751_s5 + $0x228] sm:$0xff]  ;;  %1879 = vmatpush.msra.mxu0 %v1737_v20  ;;  %v1730_v20 = vld [vmem:[%s8751_s5 + $0xa0] sm:$0xff] }
 0x5ce   :  { %1808 = vmatpush.msra.mxu1 %v4673_v28  ;;  %v1736_v28 = vld [vmem:[%s8751_s5 + $0xd0] sm:$0xff] }
 0x5cf   :  { %1880 = vmatpush.msra.mxu0 %v1736_v28 }
 0x5d0   :  { %1809 = vmatpush.msra.mxu1 %v4672_v21  ;;  %v1712_v21 = vld [vmem:[%s8751_s5 + $0x10] sm:$0xff] }
 0x5d1   :  { %v1561_v55 = vpop.f32.mrf.mxu1  ;;  %1862 = vmatpush.msrb.mxu3 %v1712_v21 }
 0x5d2   :  { %1810 = vmatpush.msra.mxu1 %v4671_v53  ;;  %v4696_v53 = vld [vmem:[%s8751_s5 + $0x1d8] sm:$0xff] }
 0x5d3   :  { %4666 = vmatmul.msk.f32.gmra.mxu0 %vm1524_vm15, %v7415_v54  ;;  %1827 = vmatpush.msrb.mxu2 %v4696_v53  ;;  %v4780_v53 = vld [vmem:[%s8751_s5 + $0x478] sm:$0xff] }
 0x5d4   :  { %1811 = vmatpush.msra.mxu1 %v4670_v31  ;;  %v1735_v31 = vld [vmem:[%s8751_s5 + $0xc8] sm:$0xff] }
 0x5d5   :  { %1881 = vmatpush.msra.mxu0 %v1735_v31  ;;  %v4779_v31 = vld [vmem:[%s8751_s5 + $0x470] sm:$0xff] }
 0x5d6   :  { %1812 = vmatpush.msra.mxu1 %v4669_v25  ;;  %v7527_v25 = vperm.slane %v7518_v4, 0 }
 0x5d7   :  { %v1631_v11 = vpop.f32.mrf.mxu3  ;;  %1882 = vmatpush.msra.mxu0 %v1734_v35 }
 0x5d8   :  { %1950 = vmatpush.msrb.mxu1 %v4716_v13  ;;  %v1672_v45 = vmax.f32 %v1561_v55, %v1631_v11  ;;  %v1711_v13 = vld [vmem:[%s8751_s5 + $0x8] sm:$0xff] }
 0x5d9   :  { %v1564_v1 = vpop.f32.mrf.mxu1  ;;  %1863 = vmatpush.msrb.mxu3 %v1711_v13  ;;  %1883 = vmatpush.msra.mxu0 %v1733_v7  ;;  %v4778_v13 = vld [vmem:[%s8751_s5 + $0x468] sm:$0xff]  ;;  %v1729_v7 = vld [vmem:[%s8751_s5 + $0x98] sm:$0xff] }
 0x5da   :  { %1951 = vmatpush.msrb.mxu1 %v4715_v42  ;;  %v4695_v42 = vld [vmem:[%s8751_s5 + $0x1d0] sm:$0xff]  ;;  %v1687_v62 = vmul.f32 %v7527_v25, %v1672_v45 }
 0x5db   :  { %4667 = vmatmul.msk.f32.gmra.mxu0 %vm1524_vm15, %v7427_v9  ;;  %1828 = vmatpush.msrb.mxu2 %v4695_v42 }
 0x5dc   :  { %1952 = vmatpush.msrb.mxu1 %v4714_v26  ;;  %v4704_v26 = vld [vmem:[%s8751_s5 + $0x218] sm:$0xff]  ;;  %1864 = vmatpush.msrb.mxu3 %v1710_v18 }
 0x5de   :  { %1953 = vmatpush.msrb.mxu1 %v4713_v47  ;;  %v4694_v47 = vld [vmem:[%s8751_s5 + $0x1c8] sm:$0xff] }
 0x5df   :  { %1829 = vmatpush.msrb.mxu2 %v4694_v47  ;;  %v1634_v60 = vpop.f32.mrf.mxu3 }
 0x5e0   :  { %1954 = vmatpush.msrb.mxu1 %v4712_v22  ;;  %v4703_v22 = vld [vmem:[%s8751_s5 + $0x210] sm:$0xff] }
 0x5e1   :  { %1830 = vmatpush.msrb.mxu2 %v4693_v57  ;;  %v4776_v57 = vld [vmem:[%s8751_s5 + $0x458] sm:$0xff] }
 0x5e2   :  { %1955 = vmatpush.msrb.mxu1 %v4711_v51  ;;  %v4748_v51 = vld [vmem:[%s8751_s5 + $0x378] sm:$0xff] }
 0x5e3   :  { %4668 = vmatmul.msk.f32.gmra.mxu0 %vm1524_vm15, %v7446_v56  ;;  %2055 = vmatpush.msra.mxu3 %v4748_v51  ;;  %v4744_v51 = vld [vmem:[%s8751_s5 + $0x358] sm:$0xff] }
 0x5e4   :  { %1956 = vmatpush.msrb.mxu1 %v4710_v33  ;;  %v7541_v33 = vperm.slane %v7531_v52, 0  ;;  %1831 = vmatpush.msrb.mxu2 %v4692_v39  ;;  %v4775_v39 = vld [vmem:[%s8751_s5 + $0x450] sm:$0xff] }
 0x5e5   :  { %2056 = vmatpush.msra.mxu3 %v4747_v10  ;;  %v4689_v10 = vld [vmem:[%s8751_s5 + $0x1a0] sm:$0xff] }
 0x5e6   :  { %1957 = vmatpush.msrb.mxu1 %v4709_v50  ;;  %8753 = vst [vmem:[#allocation109_spill] sm:$0xff] %v7541_v33  ;;  %v1732_v50 = vld [vmem:[%s8751_s5 + $0xb0] sm:$0xff]  ;;  %v7552_v55 = vadd.f32 %v7541_v33, %v1687_v62  ;;  %1832 = vmatpush.msrb.mxu2 %v4691_v29  ;;  %v4690_v62 = vld [vmem:[%s8751_s5 + $0x1a8] sm:$0xff] }
 0x5e7   :  { %1884 = vmatpush.msra.mxu0 %v1732_v50  ;;  %2057 = vmatpush.msra.mxu3 %v4746_v59  ;;  %v1637_v21 = vpop.f32.mrf.mxu3  ;;  %v1728_v50 = vld [vmem:[%s8751_s5 + $0x90] sm:$0xff]  ;;  %v1727_v59 = vld [vmem:[%s8751_s5 + $0x88] sm:$0xff] }
 0x5e8   :  { %1958 = vmatpush.msrb.mxu1 %v4708_v36  ;;  %v1674_v36 = vmax.f32 %v1564_v1, %v1634_v60  ;;  %v1781_v58 = vrot.slane %v7552_v55, 1  ;;  %1865 = vmatmul.f32.vlgmr.msrb.gmra.mxu3 %v7552_v55  ;;  %v1934_v47 = vrot.slane %v7552_v55, 2  ;;  %v4742_v60 = vld [vmem:[%s8751_s5 + $0x348] sm:$0xff]  ;;  %v4687_v29 = vld [vmem:[%s8751_s5 + $0x190] sm:$0xff] }
 0x5e9   :  { %1885 = vmatpush.msra.mxu0 %v1731_v0  ;;  %2058 = vmatpush.msra.mxu3 %v4745_v61  ;;  %v4741_v0 = vld [vmem:[%s8751_s5 + $0x340] sm:$0xff] }
 0x5ea   :  { %1959 = vmatpush.msrb.mxu1 %v4707_v41  ;;  %v1689_v41 = vmul.f32 %v7527_v25, %v1674_v36  ;;  %1833 = vmatpush.msrb.mxu2 %v4690_v62  ;;  %v4774_v36 = vld [vmem:[%s8751_s5 + $0x448] sm:$0xff]  ;;  %v1726_v61 = vld [vmem:[%s8751_s5 + $0x80] sm:$0xff] }
 0x5eb   :  { %1886 = vmatpush.msra.mxu0 %v1730_v20  ;;  %2059 = vmatpush.msra.mxu3 %v4744_v51  ;;  %v4769_v51 = vld [vmem:[%s8751_s5 + $0x420] sm:$0xff]  ;;  %v4730_v62 = vld [vmem:[%s8751_s5 + $0x2e8] sm:$0xff] }
 0x5ec   :  { %1960 = vmatpush.msrb.mxu1 %v4706_v17  ;;  %v7560_v30 = vadd.f32 %v7541_v33, %v1689_v41  ;;  %v1567_v17 = vpop.f32.mrf.mxu1  ;;  %1834 = vmatpush.msrb.mxu2 %v4689_v10  ;;  %v4773_v41 = vld [vmem:[%s8751_s5 + $0x440] sm:$0xff] }
 0x5ed   :  { %v1676_v11 = vmax.f32 %v1567_v17, %v1637_v21  ;;  %1887 = vmatpush.msra.mxu0 %v1729_v7  ;;  %v4740_v17 = vld [vmem:[%s8751_s5 + $0x338] sm:$0xff]  ;;  %v4686_v21 = vld [vmem:[%s8751_s5 + $0x188] sm:$0xff]  ;;  %v4729_v10 = vld [vmem:[%s8751_s5 + $0x2e0] sm:$0xff] }
 0x5ee   :  { %1961 = vmatpush.msrb.mxu1 %v4705_v46  ;;  %v1782_v28 = vrot.slane %v7560_v30, 1  ;;  %v1935_v1 = vrot.slane %v7560_v30, 2  ;;  %v4736_v7 = vld [vmem:[%s8751_s5 + $0x318] sm:$0xff] }
 0x5ef   :  { %v1691_v45 = vmul.f32 %v7527_v25, %v1676_v11  ;;  %1888 = vmatpush.msra.mxu0 %v1728_v50  ;;  %v4739_v11 = vld [vmem:[%s8751_s5 + $0x330] sm:$0xff] }
 0x5f0   :  { %1962 = vmatpush.msrb.mxu1 %v4704_v26  ;;  %v1783_v46 = vsel %vm1275_vm4, %v1781_v58, %v1782_v28  ;;  %v4777_v26 = vld [vmem:[%s8751_s5 + $0x460] sm:$0xff]  ;;  %1868 = vmatmul.f32.gmra.mxu3 %v7560_v30  ;;  %v4735_v50 = vld [vmem:[%s8751_s5 + $0x310] sm:$0xff] }
 0x5f1   :  { %1813 = vmatmul.f32.vlgmr.msra.gmra.mxu1 %v1783_v46  ;;  %v7571_v42 = vadd.f32 %v7541_v33, %v1691_v45  ;;  %1889 = vmatpush.msra.mxu0 %v1727_v59  ;;  %v4763_v46 = vld [vmem:[%s8751_s5 + $0x3f0] sm:$0xff]  ;;  %v4734_v59 = vld [vmem:[%s8751_s5 + $0x308] sm:$0xff] }
 0x5f2   :  { %1963 = vmatpush.msrb.mxu1 %v4703_v22  ;;  %v1936_v22 = vsel %vm1365_vm5, %v1934_v47, %v1935_v1  ;;  %v4771_v45 = vld [vmem:[%s8751_s5 + $0x430] sm:$0xff] }
 0x5f3   :  { %v1787_v35 = vrot.slane %v7571_v42, 1  ;;  %v1940_v20 = vrot.slane %v7571_v42, 2  ;;  %1890 = vmatpush.msra.mxu0 %v1726_v61  ;;  %v4731_v47 = vld [vmem:[%s8751_s5 + $0x2f0] sm:$0xff]  ;;  %v2040_v61 = vrot.slane %v7560_v30, 3 }
 0x5f4   :  { %1964 = vmatpush.msrb.mxu1 %v4702_v16  ;;  %v4743_v16 = vld [vmem:[%s8751_s5 + $0x350] sm:$0xff] }
 0x5f5   :  { %v1788_v18 = vsel %vm1275_vm4, %v1782_v28, %v1787_v35  ;;  %2060 = vmatpush.msra.mxu3 %v4743_v16  ;;  %v1941_v58 = vsel %vm1365_vm5, %v1935_v1, %v1940_v20  ;;  %v4764_v28 = vld [vmem:[%s8751_s5 + $0x3f8] sm:$0xff]  ;;  %v4737_v1 = vld [vmem:[%s8751_s5 + $0x320] sm:$0xff] }
 0x5f6   :  { %1965 = vmatpush.msrb.mxu1 %v4701_v38  ;;  %v4688_v38 = vld [vmem:[%s8751_s5 + $0x198] sm:$0xff]  ;;  %2081 = vmatpush.msrb.mxu0 %v4764_v28  ;;  %v2146_v28 = vrot.slane %v7560_v30, 4  ;;  %v4725_v30 = vld [vmem:[%s8751_s5 + $0x2c0] sm:$0xff] }
 0x5f7   :  { %2061 = vmatpush.msra.mxu3 %v4742_v60  ;;  %1835 = vmatpush.msrb.mxu2 %v4688_v38  ;;  %v4768_v16 = vld [vmem:[%s8751_s5 + $0x418] sm:$0xff]  ;;  %v4767_v60 = vld [vmem:[%s8751_s5 + $0x410] sm:$0xff] }
 0x5f8   :  { %2165 = vmatpush.msra.mxu1 %v4780_v53  ;;  %1871 = vmatmul.f32.gmra.mxu3 %v7571_v42  ;;  %v4772_v53 = vld [vmem:[%s8751_s5 + $0x438] sm:$0xff] }
 0x5f9   :  { %1816 = vmatmul.f32.gmra.mxu1 %v1788_v18  ;;  %2062 = vmatpush.msra.mxu3 %v4741_v0  ;;  %v4770_v18 = vld [vmem:[%s8751_s5 + $0x428] sm:$0xff]  ;;  %v4728_v38 = vld [vmem:[%s8751_s5 + $0x2d8] sm:$0xff] }
 0x5fa   :  { %2166 = vmatpush.msra.mxu1 %v4779_v31  ;;  %1836 = vmatpush.msrb.mxu2 %v4687_v29  ;;  %v4685_v31 = vld [vmem:[%s8751_s5 + $0x180] sm:$0xff]  ;;  %v4766_v0 = vld [vmem:[%s8751_s5 + $0x408] sm:$0xff]  ;;  %v2039_v29 = vrot.slane %v7552_v55, 3 }
 0x5fb   :  { %2063 = vmatpush.msra.mxu3 %v4740_v17  ;;  %2082 = vmatpush.msrb.mxu0 %v4763_v46  ;;  %v2145_v17 = vrot.slane %v7552_v55, 4  ;;  %v4756_v46 = vld [vmem:[%s8751_s5 + $0x3b8] sm:$0xff] }
 0x5fc   :  { %2167 = vmatpush.msra.mxu1 %v4778_v13  ;;  %1837 = vmatpush.msrb.mxu2 %v4686_v21  ;;  %v4732_v13 = vld [vmem:[%s8751_s5 + $0x2f8] sm:$0xff]  ;;  %v2041_v21 = vsel %vm2038_vm1, %v2039_v29, %v2040_v61  ;;  %v4749_v29 = vld [vmem:[%s8751_s5 + $0x380] sm:$0xff] }
 0x5fd   :  { %2064 = vmatpush.msra.mxu3 %v4739_v11  ;;  %v4726_v11 = vld [vmem:[%s8751_s5 + $0x2c8] sm:$0xff]  ;;  %v2147_v55 = vsel %vm707_vm0, %v2145_v17, %v2146_v28 }
 0x5fe   :  { %2168 = vmatpush.msra.mxu1 %v4777_v26  ;;  %v4738_v26 = vld [vmem:[%s8751_s5 + $0x328] sm:$0xff]  ;;  %1838 = vmatpush.msrb.mxu2 %v4685_v31  ;;  %v4755_v31 = vld [vmem:[%s8751_s5 + $0x3b0] sm:$0xff] }
 0x5ff   :  { %2065 = vmatpush.msra.mxu3 %v4738_v26  ;;  %v2045_v26 = vrot.slane %v7571_v42, 3 }
 0x600   :  { %2169 = vmatpush.msra.mxu1 %v4776_v57  ;;  %1976 = vmatpush.msra.mxu2 %v4732_v13  ;;  %v4760_v57 = vld [vmem:[%s8751_s5 + $0x3d8] sm:$0xff]  ;;  %v4754_v13 = vld [vmem:[%s8751_s5 + $0x3a8] sm:$0xff] }
 0x601   :  { %1819 = vmatmul.f32.gmra.mxu1 %v1787_v35  ;;  %v4762_v35 = vld [vmem:[%s8751_s5 + $0x3e8] sm:$0xff]  ;;  %2066 = vmatpush.msra.mxu3 %v4737_v1  ;;  %v2151_v1 = vrot.slane %v7571_v42, 4 }
 0x602   :  { %2170 = vmatpush.msra.mxu1 %v4775_v39  ;;  %2083 = vmatpush.msrb.mxu0 %v4762_v35  ;;  %v4759_v39 = vld [vmem:[%s8751_s5 + $0x3d0] sm:$0xff]  ;;  %v1570_v35 = vpop.f32.mrf.mxu1 }
 0x603   :  { %1977 = vmatpush.msra.mxu2 %v4731_v47  ;;  %2067 = vmatpush.msra.mxu3 %v4736_v7  ;;  %v4753_v47 = vld [vmem:[%s8751_s5 + $0x3a0] sm:$0xff]  ;;  %v4722_v7 = vld [vmem:[%s8751_s5 + $0x2a8] sm:$0xff] }
 0x604   :  { %2171 = vmatpush.msra.mxu1 %v4774_v36  ;;  %v4758_v36 = vld [vmem:[%s8751_s5 + $0x3c8] sm:$0xff] }
 0x605   :  { %1978 = vmatpush.msra.mxu2 %v4730_v62  ;;  %2068 = vmatpush.msra.mxu3 %v4735_v50  ;;  %v4721_v50 = vld [vmem:[%s8751_s5 + $0x2a0] sm:$0xff] }
 0x606   :  { %2172 = vmatpush.msra.mxu1 %v4773_v41  ;;  %v4727_v41 = vld [vmem:[%s8751_s5 + $0x2d0] sm:$0xff] }
 0x607   :  { %1979 = vmatpush.msra.mxu2 %v4729_v10  ;;  %2069 = vmatpush.msra.mxu3 %v4734_v59  ;;  %v2152_v10 = vsel %vm707_vm0, %v2146_v28, %v2151_v1  ;;  %v4750_v59 = vld [vmem:[%s8751_s5 + $0x388] sm:$0xff] }
 0x608   :  { %2173 = vmatpush.msra.mxu1 %v4772_v53  ;;  %v4765_v53 = vld [vmem:[%s8751_s5 + $0x400] sm:$0xff] }
 0x609   :  { %1966 = vmatmul.f32.vlgmr.msrb.gmra.mxu1 %v1936_v22  ;;  %v4761_v22 = vld [vmem:[%s8751_s5 + $0x3e0] sm:$0xff]  ;;  %1980 = vmatpush.msra.mxu2 %v4728_v38  ;;  %v4720_v38 = vld [vmem:[%s8751_s5 + $0x298] sm:$0xff] }
 0x60a   :  { %2174 = vmatpush.msra.mxu1 %v4771_v45  ;;  %2084 = vmatpush.msrb.mxu0 %v4761_v22  ;;  %v4724_v45 = vld [vmem:[%s8751_s5 + $0x2b8] sm:$0xff]  ;;  %v1640_v22 = vpop.f32.mrf.mxu3 }
 0x60b   :  { %1981 = vmatpush.msra.mxu2 %v4727_v41  ;;  %v1678_v62 = vmax.f32 %v1570_v35, %v1640_v22  ;;  %v7662_v41 = vperm.slane %v7518_v4, 1  ;;  %v4795_v22 = vld [vmem:[%s8751_s5 + $0x4f0] sm:$0xff] }
 0x60c   :  { %2175 = vmatpush.msra.mxu1 %v4770_v18  ;;  %2085 = vmatpush.msrb.mxu0 %v4760_v57  ;;  %v4723_v18 = vld [vmem:[%s8751_s5 + $0x2b0] sm:$0xff]  ;;  %v4752_v57 = vld [vmem:[%s8751_s5 + $0x398] sm:$0xff] }
 0x60d   :  { %1982 = vmatpush.msra.mxu2 %v4726_v11  ;;  %v1693_v42 = vmul.f32 %v7527_v25, %v1678_v62  ;;  %8755 = vst [vmem:[#allocation111_spill] sm:$0xff] %v7662_v41  ;;  %v4794_v62 = vld [vmem:[%s8751_s5 + $0x4e8] sm:$0xff] }
 0x60e   :  { %2176 = vmatpush.msra.mxu1 %v4769_v51  ;;  %2086 = vmatpush.msrb.mxu0 %v4759_v39  ;;  %v2046_v51 = vsel %vm2038_vm1, %v2040_v61, %v2045_v26  ;;  %v4751_v39 = vld [vmem:[%s8751_s5 + $0x390] sm:$0xff] }
 0x60f   :  { %1983 = vmatpush.msra.mxu2 %v4725_v30 }
 0x610   :  { %2177 = vmatpush.msra.mxu1 %v4768_v16  ;;  %2087 = vmatpush.msrb.mxu0 %v4758_v36  ;;  %v1708_v36 = vadd.f32 %v7541_v33, %v1693_v42  ;;  %v4792_v42 = vld [vmem:[%s8751_s5 + $0x4d8] sm:$0xff] }
 0x611   :  { %1969 = vmatmul.f32.gmra.mxu1 %v1941_v58  ;;  %v4757_v58 = vld [vmem:[%s8751_s5 + $0x3c0] sm:$0xff]  ;;  %1984 = vmatpush.msra.mxu2 %v4724_v45 }
 0x612   :  { %2178 = vmatpush.msra.mxu1 %v4767_v60  ;;  %2088 = vmatpush.msrb.mxu0 %v4757_v58  ;;  %v1590_v60 = vpop.f32.mrf.mxu2  ;;  %v2155_v61 = vrot.slane %v1708_v36, 4 }
 0x613   :  { %1985 = vmatpush.msra.mxu2 %v4723_v18  ;;  %v4796_v18 = vld [vmem:[%s8751_s5 + $0x4f8] sm:$0xff] }
 0x614   :  { %2179 = vmatpush.msra.mxu1 %v4766_v0  ;;  %2089 = vmatpush.msrb.mxu0 %v4756_v46  ;;  %v4719_v0 = vld [vmem:[%s8751_s5 + $0x290] sm:$0xff]  ;;  %v2156_v17 = vsel %vm707_vm0, %v2151_v1, %v2155_v61 }
 0x615   :  { %1986 = vmatpush.msra.mxu2 %v4722_v7 }
 0x616   :  { %2180 = vmatpush.msra.mxu1 %v4765_v53  ;;  %2090 = vmatpush.msrb.mxu0 %v4755_v31  ;;  %v4717_v53 = vld [vmem:[%s8751_s5 + $0x280] sm:$0xff] }
 0x617   :  { %1987 = vmatpush.msra.mxu2 %v4721_v50 }
 0x618   :  { %2091 = vmatpush.msrb.mxu0 %v4754_v13 }
 0x619   :  { %1972 = vmatmul.f32.gmra.mxu1 %v1940_v20  ;;  %v4733_v20 = vld [vmem:[%s8751_s5 + $0x300] sm:$0xff]  ;;  %1988 = vmatpush.msra.mxu2 %v4720_v38 }
 0x61a   :  { %2070 = vmatpush.msra.mxu3 %v4733_v20  ;;  %2092 = vmatpush.msrb.mxu0 %v4753_v47  ;;  %v4718_v20 = vld [vmem:[%s8751_s5 + $0x288] sm:$0xff]  ;;  %v1593_v46 = vpop.f32.mrf.mxu2 }
 0x61b   :  { %2071 = vmatmul.f32.vlgmr.msra.gmra.mxu3 %v2041_v21  ;;  %1989 = vmatpush.msra.mxu2 %v4719_v0  ;;  %v7667_v21 = vperm.slane %v7531_v52, 1  ;;  %v4789_v0 = vld [vmem:[%s8751_s5 + $0x4c0] sm:$0xff] }
 0x61c   :  { %2093 = vmatpush.msrb.mxu0 %v4752_v57  ;;  %v4793_v57 = vld [vmem:[%s8751_s5 + $0x4e0] sm:$0xff] }
 0x61d   :  { %8756 = vst [vmem:[#allocation112_spill] sm:$0xff] %v7667_v21  ;;  %1990 = vmatpush.msra.mxu2 %v4718_v20  ;;  %v4787_v20 = vld [vmem:[%s8751_s5 + $0x4b0] sm:$0xff] }
 0x61e   :  { %2094 = vmatpush.msrb.mxu0 %v4751_v39 }
 0x61f   :  { %1991 = vmatpush.msra.mxu2 %v4717_v53  ;;  %v4785_v53 = vld [vmem:[%s8751_s5 + $0x4a0] sm:$0xff] }
 0x620   :  { %2095 = vmatpush.msrb.mxu0 %v4750_v59  ;;  %v4790_v59 = vld [vmem:[%s8751_s5 + $0x4c8] sm:$0xff] }
 0x621   :  { %2181 = vmatmul.f32.vlgmr.msra.gmra.mxu1 %v2147_v55 }
 0x622   :  { %2096 = vmatpush.msrb.mxu0 %v4749_v29  ;;  %v1596_v45 = vpop.f32.mrf.mxu2  ;;  %v4788_v29 = vld [vmem:[%s8751_s5 + $0x4b8] sm:$0xff] }
 0x623   :  { %2074 = vmatmul.f32.gmra.mxu3 %v2046_v51 }
 0x629   :  { %2184 = vmatmul.f32.gmra.mxu1 %v2152_v10 }
 0x62b   :  { %2077 = vmatmul.f32.gmra.mxu3 %v2045_v26 }
 0x631   :  { %2187 = vmatmul.f32.gmra.mxu1 %v2156_v17 }
 0x640   :  { %v7650_v16 = vpop.f32.mrf.mxu0 }
 0x641   :  { %8754 = vst [vmem:[#allocation110_spill] sm:$0xff] %v7650_v16 }
 0x648   :  { %v1660_v58 = vpop.f32.mrf.mxu0 }
 0x649   :  { %v1673_v28 = vmax.f32 %v1590_v60, %v1660_v58  ;;  %v4791_v60 = vld [vmem:[%s8751_s5 + $0x4d0] sm:$0xff]  ;;  %v4786_v58 = vld [vmem:[%s8751_s5 + $0x4a8] sm:$0xff] }
 0x64b   :  { %v1688_v11 = vmul.f32 %v7662_v41, %v1673_v28 }
 0x64d   :  { %v7672_v4 = vadd.f32 %v7667_v21, %v1688_v11 }
 0x64f   :  { %1891 = vmatmul.f32.vlgmr.msra.gmra.mxu0 %v7672_v4  ;;  %v1784_v13 = vrot.slane %v7672_v4, 1  ;;  %v2042_v38 = vrot.slane %v7672_v4, 3  ;;  %v1937_v11 = vrot.slane %v7672_v4, 2 }
 0x650   :  { %v1663_v55 = vpop.f32.mrf.mxu0 }
 0x651   :  { %v1675_v30 = vmax.f32 %v1593_v46, %v1663_v55  ;;  %v4784_v46 = vld [vmem:[%s8751_s5 + $0x498] sm:$0xff] }
 0x653   :  { %v1690_v52 = vmul.f32 %v7662_v41, %v1675_v30  ;;  %v4783_v30 = vld [vmem:[%s8751_s5 + $0x490] sm:$0xff] }
 0x655   :  { %v7677_v31 = vadd.f32 %v7667_v21, %v1690_v52  ;;  %v4782_v52 = vld [vmem:[%s8751_s5 + $0x488] sm:$0xff] }
 0x657   :  { %1894 = vmatmul.f32.gmra.mxu0 %v7677_v31  ;;  %v1785_v26 = vrot.slane %v7677_v31, 1  ;;  %v2043_v39 = vrot.slane %v7677_v31, 3  ;;  %v1938_v17 = vrot.slane %v7677_v31, 2 }
 0x658   :  { %v1666_v35 = vpop.f32.mrf.mxu0 }
 0x659   :  { %v1677_v47 = vmax.f32 %v1596_v45, %v1666_v35  ;;  %v1786_v1 = vsel %vm1275_vm4, %v1784_v13, %v1785_v26  ;;  %v2044_v36 = vsel %vm2038_vm1, %v2042_v38, %v2043_v39  ;;  %v1939_v55 = vsel %vm1365_vm5, %v1937_v11, %v1938_v17  ;;  %v4781_v13 = vld [vmem:[%s8751_s5 + $0x480] sm:$0xff] }
 0x65a   :  { %1839 = vmatmul.f32.vlgmr.msrb.gmra.mxu2 %v1786_v1  ;;  %v2149_v35 = vrot.slane %v7677_v31, 4  ;;  %v2148_v1 = vrot.slane %v7672_v4, 4 }
 0x65b   :  { %v1692_v51 = vmul.f32 %v7662_v41, %v1677_v47  ;;  %2191 = vmatpush.msrb.mxu2 %v4796_v18  ;;  %v1599_v18 = vpop.f32.mrf.mxu2 }
 0x65d   :  { %v7688_v7 = vadd.f32 %v7667_v21, %v1692_v51  ;;  %2192 = vmatpush.msrb.mxu2 %v4795_v22  ;;  %v2150_v51 = vsel %vm707_vm0, %v2148_v1, %v2149_v35 }
 0x65f   :  { %1897 = vmatmul.f32.gmra.mxu0 %v7688_v7  ;;  %v1789_v10 = vrot.slane %v7688_v7, 1  ;;  %2193 = vmatpush.msrb.mxu2 %v4794_v62  ;;  %v2047_v61 = vrot.slane %v7688_v7, 3  ;;  %v1942_v45 = vrot.slane %v7688_v7, 2 }
 0x660   :  { %v1669_v47 = vpop.f32.mrf.mxu0 }
 0x661   :  { %v1790_v50 = vsel %vm1275_vm4, %v1785_v26, %v1789_v10  ;;  %2194 = vmatpush.msrb.mxu2 %v4793_v57  ;;  %v2048_v28 = vsel %vm2038_vm1, %v2043_v39, %v2047_v61  ;;  %v1943_v26 = vsel %vm1365_vm5, %v1938_v17, %v1942_v45  ;;  %v1679_v22 = vmax.f32 %v1599_v18, %v1669_v47 }
 0x662   :  { %1842 = vmatmul.f32.gmra.mxu2 %v1790_v50  ;;  %v2153_v57 = vrot.slane %v7688_v7, 4 }
 0x663   :  { %2195 = vmatpush.msrb.mxu2 %v4792_v42  ;;  %v1694_v62 = vmul.f32 %v7662_v41, %v1679_v22 }
 0x665   :  { %2196 = vmatpush.msrb.mxu2 %v4791_v60  ;;  %v1709_v42 = vadd.f32 %v7667_v21, %v1694_v62 }
 0x667   :  { %2097 = vmatmul.f32.vlgmr.msrb.gmra.mxu0 %v2044_v36  ;;  %2197 = vmatpush.msrb.mxu2 %v4790_v59  ;;  %v2157_v50 = vrot.slane %v1709_v42, 4 }
 0x669   :  { %2198 = vmatpush.msrb.mxu2 %v4789_v0  ;;  %v2158_v31 = vsel %vm707_vm0, %v2153_v57, %v2157_v50 }
 0x66a   :  { %1845 = vmatmul.f32.gmra.mxu2 %v1789_v10  ;;  %v2154_v10 = vsel %vm707_vm0, %v2149_v35, %v2153_v57 }
 0x66b   :  { %2199 = vmatpush.msrb.mxu2 %v4788_v29  ;;  %v1866_v0 = vpop.f32.mrf.mxu3 }
 0x66d   :  { %2200 = vmatpush.msrb.mxu2 %v4787_v20 }
 0x66e   :  { %v1814_v39 = vpop.f32.mrf.mxu1 }
 0x66f   :  { %2100 = vmatmul.f32.gmra.mxu0 %v2048_v28  ;;  %2201 = vmatpush.msrb.mxu2 %v4786_v58 }
 0x671   :  { %2202 = vmatpush.msrb.mxu2 %v4785_v53 }
 0x672   :  { %1992 = vmatmul.f32.vlgmr.msra.gmra.mxu2 %v1939_v55 }
 0x673   :  { %2203 = vmatpush.msrb.mxu2 %v4784_v46  ;;  %v1869_v7 = vpop.f32.mrf.mxu3 }
 0x675   :  { %2204 = vmatpush.msrb.mxu2 %v4783_v30 }
 0x676   :  { %v1817_v60 = vpop.f32.mrf.mxu1 }
 0x677   :  { %2103 = vmatmul.f32.gmra.mxu0 %v2047_v61  ;;  %2205 = vmatpush.msrb.mxu2 %v4782_v52 }
 0x679   :  { %2206 = vmatpush.msrb.mxu2 %v4781_v13 }
 0x67a   :  { %1995 = vmatmul.f32.gmra.mxu2 %v1943_v26 }
 0x67b   :  { %v1872_v53 = vpop.f32.mrf.mxu3 }
 0x67e   :  { %v1820_v38 = vpop.f32.mrf.mxu1 }
 0x682   :  { %1998 = vmatmul.f32.gmra.mxu2 %v1942_v45 }
 0x686   :  { %v1967_v29 = vpop.f32.mrf.mxu1 }
 0x68a   :  { %2207 = vmatmul.f32.vlgmr.msrb.gmra.mxu2 %v2150_v51 }
 0x68e   :  { %v1970_v58 = vpop.f32.mrf.mxu1 }
 0x692   :  { %2210 = vmatmul.f32.gmra.mxu2 %v2154_v10 }
 0x696   :  { %v1973_v46 = vpop.f32.mrf.mxu1 }
 0x69a   :  { %2213 = vmatmul.f32.gmra.mxu2 %v2158_v31 }
 0x69e   :  { %v2072_v52 = vpop.f32.mrf.mxu3  ;;  %v2182_v26 = vpop.f32.mrf.mxu1 }
 0x6a6   :  { %v2075_v42 = vpop.f32.mrf.mxu3  ;;  %v2185_v24 = vpop.f32.mrf.mxu1 }
 0x6cc   :  { %v1892_v36 = vpop.f32.mrf.mxu0 }
 0x6d4   :  { %v1895_v20 = vpop.f32.mrf.mxu0 }
 0x6dc   :  { %v1898_v28 = vpop.f32.mrf.mxu0 }
 0x6dd   :  { %v1840_v4 = vpop.f32.mrf.mxu2 }
 0x6de   :  { %v1841_v45 = vadd.f32 %v1840_v4, %v1814_v39 }
 0x6e0   :  { %v1867_v35 = vadd.f32 %v1866_v0, %v1841_v45 }
 0x6e2   :  { %v1893_v62 = vadd.f32 %v1892_v36, %v1867_v35  ;;  %v4834_v35 = vld [vmem:[%s8757_s11 + $0x160] sm:$0xff] }
 0x6e4   :  { %v2098_v55 = vpop.f32.mrf.mxu0 }
 0x6e5   :  { %v1843_v59 = vpop.f32.mrf.mxu2  ;;  %v2099_v16 = vadd.f32 %v2098_v55, %v2072_v52 }
 0x6e6   :  { %v1844_v13 = vadd.f32 %v1843_v59, %v1817_v60 }
 0x6e8   :  { %v1870_v18 = vadd.f32 %v1869_v7, %v1844_v13  ;;  %v5104_v7 = vld [vmem:[#allocation8] ss:$0 sm:$0xff] }
 0x6ea   :  { %v1896_v10 = vadd.f32 %v1895_v20, %v1870_v18 }
 0x6ec   :  { %v2101_v51 = vpop.f32.mrf.mxu0 }
 0x6ed   :  { %v1846_v61 = vpop.f32.mrf.mxu2  ;;  %v2102_v33 = vadd.f32 %v2101_v51, %v2075_v42  ;;  %v4831_v51 = vld [vmem:[%s8757_s11 + $0x148] sm:$0xff]  ;;  %v4829_v42 = vld [vmem:[%s8757_s11 + $0x138] sm:$0xff] }
 0x6ee   :  { %v1847_v57 = vadd.f32 %v1846_v61, %v1820_v38 }
 0x6f0   :  { %v1873_v41 = vadd.f32 %v1872_v53, %v1847_v57  ;;  %v2188_v53 = vpop.f32.mrf.mxu1 }
 0x6f4   :  { %v2104_v38 = vpop.f32.mrf.mxu0 }
 0x6f5   :  { %v1993_v17 = vpop.f32.mrf.mxu2 }
 0x6f6   :  { %v1994_v47 = vadd.f32 %v1993_v17, %v1967_v29  ;;  %v2078_v17 = vpop.f32.mrf.mxu3 }
 0x6f7   :  { %v2105_v55 = vadd.f32 %v2104_v38, %v2078_v17  ;;  %v4850_v38 = vld [vmem:[%s8757_s11 + $0x1e0] sm:$0xff]  ;;  %v4821_v17 = vld [vmem:[%s8757_s11 + $0xf8] sm:$0xff] }
 0x6f8   :  { %v2002_v50 = vadd.f32 %v1994_v47, %v1893_v62  ;;  %v4833_v47 = vld [vmem:[%s8757_s11 + $0x158] sm:$0xff]  ;;  %v4830_v62 = vld [vmem:[%s8757_s11 + $0x140] sm:$0xff] }
 0x6fa   :  { %v2107_v39 = vadd.f32 %v2099_v16, %v2002_v50 }
 0x6fd   :  { %v1996_v11 = vpop.f32.mrf.mxu2 }
 0x6fe   :  { %v1997_v22 = vadd.f32 %v1996_v11, %v1970_v58  ;;  %v1899_v58 = vadd.f32 %v1898_v28, %v1873_v41  ;;  %v4836_v41 = vld [vmem:[%s8757_s11 + $0x170] sm:$0xff]  ;;  %v4835_v28 = vld [vmem:[%s8757_s11 + $0x168] sm:$0xff] }
 0x700   :  { %v2003_v31 = vadd.f32 %v1997_v22, %v1896_v10  ;;  %v4832_v22 = vld [vmem:[%s8757_s11 + $0x150] sm:$0xff] }
 0x702   :  { %v2108_v59 = vadd.f32 %v2102_v33, %v2003_v31  ;;  %v4853_v31 = vld [vmem:[%s8757_s11 + $0x1f8] sm:$0xff] }
 0x703   :  { %2446 = vmatpush.msra.mxu2 %v4853_v31  ;;  %v4900_v31 = vld [vmem:[%s8757_s11 + $0x370] sm:$0xff] }
 0x705   :  { %v1999_v30 = vpop.f32.mrf.mxu2 }
 0x706   :  { %v2000_v4 = vadd.f32 %v1999_v30, %v1973_v46  ;;  %v4837_v46 = vld [vmem:[%s8757_s11 + $0x178] sm:$0xff] }
 0x707   :  { %2406 = vmatpush.msrb.mxu1 %v4837_v46  ;;  %v4824_v46 = vld [vmem:[%s8757_s11 + $0x110] sm:$0xff] }
 0x708   :  { %v2004_v61 = vadd.f32 %v2000_v4, %v1899_v58  ;;  %v4828_v4 = vld [vmem:[%s8757_s11 + $0x130] sm:$0xff]  ;;  %v4851_v58 = vld [vmem:[%s8757_s11 + $0x1e8] sm:$0xff] }
 0x709   :  { %2407 = vmatpush.msrb.mxu1 %v4836_v41  ;;  %v4818_v41 = vld [vmem:[%s8757_s11 + $0xe0] sm:$0xff] }
 0x70a   :  { %v2109_v52 = vadd.f32 %v2105_v55, %v2004_v61  ;;  %v2326_v55 = vld [vmem:[%s8757_s11 + $0x78] sm:$0xff] }
 0x70b   :  { %2408 = vmatpush.msrb.mxu1 %v4835_v28  ;;  %v2323_v28 = vld [vmem:[%s8757_s11 + $0x60] sm:$0xff] }
 0x70d   :  { %v2208_v1 = vpop.f32.mrf.mxu2  ;;  %2409 = vmatpush.msrb.mxu1 %v4834_v35  ;;  %v4846_v35 = vld [vmem:[%s8757_s11 + $0x1c0] sm:$0xff] }
 0x70e   :  { %v2209_v21 = vadd.f32 %v2208_v1, %v2182_v26 }
 0x70f   :  { %2410 = vmatpush.msrb.mxu1 %v4833_v47  ;;  %v2321_v47 = vld [vmem:[%s8757_s11 + $0x50] sm:$0xff] }
 0x710   :  { %v2217_v29 = vadd.f32 %v2209_v21, %v2107_v39 }
 0x711   :  { %2411 = vmatpush.msrb.mxu1 %v4832_v22  ;;  %v4845_v22 = vld [vmem:[%s8757_s11 + $0x1b8] sm:$0xff] }
 0x712   :  { %v2222_v11 = vadd.f32 %v5104_v7, %v2217_v29 }
 0x713   :  { %2412 = vmatpush.msrb.mxu1 %v4831_v51  ;;  %v4815_v51 = vld [vmem:[%s8757_s11 + $0xc8] sm:$0xff] }
 0x714   :  { %v2228_v21 = vmin.f32 %v2222_v11, 0.0  ;;  %vm2225_vm10 = vcmp.gt.f32.partialorder %v2222_v11, 0.0 }
 0x715   :  { %v2211_v60 = vpop.f32.mrf.mxu2  ;;  %2413 = vmatpush.msrb.mxu1 %v4830_v62  ;;  %v2320_v62 = vld [vmem:[%s8757_s11 + $0x48] sm:$0xff] }
 0x716   :  { %v2212_v0 = vadd.f32 %v2211_v60, %v2185_v24  ;;  %v2231_v26 = vmul.f32 1.442695, %v2228_v21  ;;  %v2324_v21 = vld [vmem:[%s8757_s11 + $0x68] sm:$0xff] }
 0x717   :  { %2414 = vmatpush.msrb.mxu1 %v4829_v42  ;;  %v4814_v42 = vld [vmem:[%s8757_s11 + $0xc0] sm:$0xff] }
 0x718   :  { %v2218_v36 = vadd.f32 %v2212_v0, %v2108_v59  ;;  %v4852_v59 = vld [vmem:[%s8757_s11 + $0x1f0] sm:$0xff] }
 0x719   :  { %2447 = vmatpush.msra.mxu2 %v4852_v59  ;;  %2415 = vmatpush.msrb.mxu1 %v4828_v4  ;;  %v2318_v4 = vld [vmem:[%s8757_s11 + $0x38] sm:$0xff]  ;;  %v4899_v59 = vld [vmem:[%s8757_s11 + $0x368] sm:$0xff] }
 0x71a   :  { %v2223_v20 = vadd.f32 %v5104_v7, %v2218_v36 }
 0x71b   :  { %2448 = vmatpush.msra.mxu2 %v4851_v58  ;;  %v4811_v58 = vld [vmem:[%s8757_s11 + $0xa8] sm:$0xff] }
 0x71c   :  { %v2229_v24 = vmin.f32 %v2223_v20, 0.0  ;;  %vm2226_vm9 = vcmp.gt.f32.partialorder %v2223_v20, 0.0 }
 0x71d   :  { %v2214_v16 = vpop.f32.mrf.mxu2  ;;  %2449 = vmatpush.msra.mxu2 %v4850_v38  ;;  %v4897_v38 = vld [vmem:[%s8757_s11 + $0x358] sm:$0xff] }
 0x71e   :  { %v2215_v33 = vadd.f32 %v2214_v16, %v2188_v53  ;;  %v2233_v13 = vmul.f32 1.442695, %v2229_v24  ;;  %v4849_v53 = vld [vmem:[%s8757_s11 + $0x1d8] sm:$0xff]  ;;  %v2325_v16 = vld [vmem:[%s8757_s11 + $0x70] sm:$0xff]  ;;  %v4819_v24 = vld [vmem:[%s8757_s11 + $0xe8] sm:$0xff] }
 0x71f   :  { %2450 = vmatpush.msra.mxu2 %v4849_v53  ;;  %v2314_v53 = vld [vmem:[%s8757_s11 + $0x18] sm:$0xff] }
 0x720   :  { %v2219_v30 = vadd.f32 %v2215_v33, %v2109_v52  ;;  %5178 = vpow2.f32 %v2233_v13  ;;  %v4825_v52 = vld [vmem:[%s8757_s11 + $0x118] sm:$0xff]  ;;  %v4848_v33 = vld [vmem:[%s8757_s11 + $0x1d0] sm:$0xff] }
 0x721   :  { %5180 = vpow2.f32 %v2231_v26  ;;  %2451 = vmatpush.msra.mxu2 %v4848_v33  ;;  %v2322_v13 = vld [vmem:[%s8757_s11 + $0x58] sm:$0xff]  ;;  %v4823_v26 = vld [vmem:[%s8757_s11 + $0x108] sm:$0xff] }
 0x722   :  { %v2224_v45 = vadd.f32 %v5104_v7, %v2219_v30  ;;  %v4827_v7 = vld [vmem:[%s8757_s11 + $0x128] sm:$0xff] }
 0x723   :  { %2416 = vmatpush.msrb.mxu1 %v4827_v7  ;;  %v4847_v30 = vld [vmem:[%s8757_s11 + $0x1c8] sm:$0xff]  ;;  %v4898_v7 = vld [vmem:[%s8757_s11 + $0x360] sm:$0xff] }
 0x724   :  { %v2230_v18 = vmin.f32 %v2224_v45, 0.0  ;;  %vm2227_vm7 = vcmp.gt.f32.partialorder %v2224_v45, 0.0  ;;  %2452 = vmatpush.msra.mxu2 %v4847_v30  ;;  %v4807_v33 = vld [vmem:[%s8757_s11 + $0x88] sm:$0xff]  ;;  %v4869_v30 = vld [vmem:[%s8757_s11 + $0x278] sm:$0xff] }
 0x726   :  { %v2235_v1 = vmul.f32 1.442695, %v2230_v18  ;;  %v5179_v57 = vpop.eup %5178  ;;  %v4816_v18 = vld [vmem:[%s8757_s11 + $0xd0] sm:$0xff]  ;;  %2453 = vmatpush.msra.mxu2 %v4846_v35  ;;  %v4866_v35 = vld [vmem:[%s8757_s11 + $0x260] sm:$0xff] }
 0x727   :  { %v5181_v10 = vpop.eup %5180  ;;  %v4798_v60 = vadd.f32 -1.0, %v5179_v57  ;;  %v4901_v57 = vld [vmem:[%s8757_s11 + $0x378] sm:$0xff] }
 0x728   :  { %5182 = vpow2.f32 %v2235_v1  ;;  %v4797_v29 = vadd.f32 -1.0, %v5181_v10  ;;  %v4822_v1 = vld [vmem:[%s8757_s11 + $0x100] sm:$0xff]  ;;  %v4844_v10 = vld [vmem:[%s8757_s11 + $0x1b0] sm:$0xff]  ;;  %2454 = vmatpush.msra.mxu2 %v4845_v22 }
 0x729   :  { %v2241_v36 = vsel %vm2226_vm9, %v2223_v20, %v4798_v60  ;;  %v4826_v20 = vld [vmem:[%s8757_s11 + $0x120] sm:$0xff]  ;;  %v4813_v60 = vld [vmem:[%s8757_s11 + $0xb8] sm:$0xff]  ;;  %v4864_v22 = vld [vmem:[%s8757_s11 + $0x250] sm:$0xff] }
 0x72a   :  { %v2240_v61 = vsel %vm2225_vm10, %v2222_v11, %v4797_v29  ;;  %v4820_v11 = vld [vmem:[%s8757_s11 + $0xf0] sm:$0xff]  ;;  %2417 = vmatpush.msrb.mxu1 %v4826_v20  ;;  %2455 = vmatpush.msra.mxu2 %v4844_v10  ;;  %v4809_v20 = vld [vmem:[%s8757_s11 + $0x98] sm:$0xff]  ;;  %v4842_v10 = vld [vmem:[%s8757_s11 + $0x1a0] sm:$0xff] }
 0x72b   :  { %v2317_v29 = vld [vmem:[%s8757_s11 + $0x30] sm:$0xff] }
 0x72c   :  { %2418 = vmatpush.msrb.mxu1 %v4825_v52  ;;  %v2313_v52 = vld [vmem:[%s8757_s11 + $0x10] sm:$0xff] }
 0x72e   :  { %v5183_v50 = vpop.eup %5182  ;;  %2419 = vmatpush.msrb.mxu1 %v4824_v46  ;;  %v2311_v46 = vld [vmem:[%s8757_s11] sm:$0xff] }
 0x72f   :  { %v4799_v39 = vadd.f32 -1.0, %v5183_v50  ;;  %v2319_v50 = vld [vmem:[%s8757_s11 + $0x40] sm:$0xff] }
 0x730   :  { %2420 = vmatpush.msrb.mxu1 %v4823_v26  ;;  %v4883_v26 = vld [vmem:[%s8757_s11 + $0x2e8] sm:$0xff] }
 0x731   :  { %v2242_v0 = vsel %vm2227_vm7, %v2224_v45, %v4799_v39  ;;  %v4817_v45 = vld [vmem:[%s8757_s11 + $0xd8] sm:$0xff]  ;;  %v4843_v39 = vld [vmem:[%s8757_s11 + $0x1a8] sm:$0xff] }
 0x732   :  { %4800 = vmatpush.msk.msrb.mxu3 %vm2038_vm1, %v2242_v0  ;;  %4803 = vmatpush.msk.msra.mxu0 %vm2038_vm1, %v2242_v0  ;;  %v4812_v0 = vld [vmem:[%s8757_s11 + $0xb0] sm:$0xff] }
 0x733   :  { %2421 = vmatpush.msrb.mxu1 %v4822_v1  ;;  %2456 = vmatpush.msra.mxu2 %v4843_v39  ;;  %v4881_v1 = vld [vmem:[%s8757_s11 + $0x2d8] sm:$0xff] }
 0x734   :  { %2265 = vmatpush.msrb.mxu3 %v2241_v36  ;;  %2292 = vmatpush.msra.mxu0 %v2241_v36  ;;  %v2316_v36 = vld [vmem:[%s8757_s11 + $0x28] sm:$0xff]  ;;  %v4841_v39 = vld [vmem:[%s8757_s11 + $0x198] sm:$0xff] }
 0x735   :  { %2572 = vmatpush.msra.mxu1 %v4901_v57  ;;  %v4879_v57 = vld [vmem:[%s8757_s11 + $0x2c8] sm:$0xff]  ;;  %2457 = vmatpush.msra.mxu2 %v4842_v10 }
 0x736   :  { %2266 = vmatpush.msrb.mxu3 %v2240_v61  ;;  %2293 = vmatpush.msra.mxu0 %v2240_v61  ;;  %v4810_v61 = vld [vmem:[%s8757_s11 + $0xa0] sm:$0xff] }
 0x737   :  { %4801 = vmatmul.msk.f32.vlgmr.msrb.gmra.mxu3 %vm2243_vm11, %v7399_v32  ;;  %4804 = vmatmul.msk.f32.vlgmr.msra.gmra.mxu0 %vm2243_vm11, %v7393_v14 }
 0x738   :  { %2347 = vmatpush.msra.mxu3 %v4821_v17  ;;  %2367 = vmatpush.msrb.mxu0 %v2326_v55  ;;  %v2315_v17 = vld [vmem:[%s8757_s11 + $0x20] sm:$0xff]  ;;  %v4896_v55 = vld [vmem:[%s8757_s11 + $0x350] sm:$0xff] }
 0x739   :  { %2573 = vmatpush.msra.mxu1 %v4900_v31  ;;  %v4894_v31 = vld [vmem:[%s8757_s11 + $0x340] sm:$0xff]  ;;  %2458 = vmatpush.msra.mxu2 %v4841_v39 }
 0x73a   :  { %2348 = vmatpush.msra.mxu3 %v4820_v11  ;;  %2368 = vmatpush.msrb.mxu0 %v2325_v16  ;;  %v4895_v11 = vld [vmem:[%s8757_s11 + $0x348] sm:$0xff]  ;;  %v4808_v16 = vld [vmem:[%s8757_s11 + $0x90] sm:$0xff] }
 0x73b   :  { %2574 = vmatpush.msra.mxu1 %v4899_v59  ;;  %v4893_v59 = vld [vmem:[%s8757_s11 + $0x338] sm:$0xff] }
 0x73c   :  { %2349 = vmatpush.msra.mxu3 %v4819_v24  ;;  %2369 = vmatpush.msrb.mxu0 %v2324_v21  ;;  %v2312_v24 = vld [vmem:[%s8757_s11 + $0x8] sm:$0xff]  ;;  %v4806_v21 = vld [vmem:[%s8757_s11 + $0x80] sm:$0xff] }
 0x73d   :  { %2575 = vmatpush.msra.mxu1 %v4898_v7  ;;  %v4876_v7 = vld [vmem:[%s8757_s11 + $0x2b0] sm:$0xff] }
 0x73e   :  { %2350 = vmatpush.msra.mxu3 %v4818_v41  ;;  %2370 = vmatpush.msrb.mxu0 %v2323_v28  ;;  %v4885_v41 = vld [vmem:[%s8757_s11 + $0x2f8] sm:$0xff]  ;;  %v4868_v28 = vld [vmem:[%s8757_s11 + $0x270] sm:$0xff] }
 0x73f   :  { %4802 = vmatmul.msk.f32.gmra.mxu3 %vm2243_vm11, %v7418_v40  ;;  %4805 = vmatmul.msk.f32.gmra.mxu0 %vm2243_vm11, %v7415_v54 }
 0x740   :  { %2351 = vmatpush.msra.mxu3 %v4817_v45  ;;  %2371 = vmatpush.msrb.mxu0 %v2322_v13  ;;  %v4884_v45 = vld [vmem:[%s8757_s11 + $0x2f0] sm:$0xff]  ;;  %v4867_v13 = vld [vmem:[%s8757_s11 + $0x268] sm:$0xff] }
 0x741   :  { %2576 = vmatpush.msra.mxu1 %v4897_v38  ;;  %v4859_v38 = vld [vmem:[%s8757_s11 + $0x228] sm:$0xff] }
 0x742   :  { %2352 = vmatpush.msra.mxu3 %v4816_v18  ;;  %2372 = vmatpush.msrb.mxu0 %v2321_v47  ;;  %v4882_v18 = vld [vmem:[%s8757_s11 + $0x2e0] sm:$0xff]  ;;  %v4865_v47 = vld [vmem:[%s8757_s11 + $0x258] sm:$0xff] }
 0x743   :  { %2577 = vmatpush.msra.mxu1 %v4896_v55  ;;  %v4838_v55 = vld [vmem:[%s8757_s11 + $0x180] sm:$0xff] }
 0x744   :  { %2353 = vmatpush.msra.mxu3 %v4815_v51  ;;  %2373 = vmatpush.msrb.mxu0 %v2320_v62  ;;  %v4880_v51 = vld [vmem:[%s8757_s11 + $0x2d0] sm:$0xff]  ;;  %v4863_v62 = vld [vmem:[%s8757_s11 + $0x248] sm:$0xff] }
 0x745   :  { %2578 = vmatpush.msra.mxu1 %v4895_v11  ;;  %v4890_v11 = vld [vmem:[%s8757_s11 + $0x320] sm:$0xff] }
 0x746   :  { %2354 = vmatpush.msra.mxu3 %v4814_v42  ;;  %2374 = vmatpush.msrb.mxu0 %v2319_v50  ;;  %v4862_v42 = vld [vmem:[%s8757_s11 + $0x240] sm:$0xff] }
 0x747   :  { %v4878_v50 = vld [vmem:[%s8757_s11 + $0x2c0] sm:$0xff]  ;;  %2579 = vmatpush.msra.mxu1 %v4894_v31 }
 0x748   :  { %2355 = vmatpush.msra.mxu3 %v4813_v60  ;;  %2375 = vmatpush.msrb.mxu0 %v2318_v4  ;;  %v4861_v60 = vld [vmem:[%s8757_s11 + $0x238] sm:$0xff] }
 0x749   :  { %v4877_v4 = vld [vmem:[%s8757_s11 + $0x2b8] sm:$0xff]  ;;  %2580 = vmatpush.msra.mxu1 %v4893_v59 }
 0x74a   :  { %2356 = vmatpush.msra.mxu3 %v4812_v0  ;;  %2376 = vmatpush.msrb.mxu0 %v2317_v29  ;;  %v4840_v0 = vld [vmem:[%s8757_s11 + $0x190] sm:$0xff] }
 0x74b   :  { %v4860_v29 = vld [vmem:[%s8757_s11 + $0x230] sm:$0xff]  ;;  %2459 = vmatpush.msra.mxu2 %v4840_v0 }
 0x74c   :  { %2357 = vmatpush.msra.mxu3 %v4811_v58  ;;  %2377 = vmatpush.msrb.mxu0 %v2316_v36  ;;  %v4892_v58 = vld [vmem:[%s8757_s11 + $0x330] sm:$0xff]  ;;  %v4839_v36 = vld [vmem:[%s8757_s11 + $0x188] sm:$0xff] }
 0x74d   :  { %2581 = vmatpush.msra.mxu1 %v4892_v58  ;;  %2460 = vmatpush.msra.mxu2 %v4839_v36 }
 0x74e   :  { %2358 = vmatpush.msra.mxu3 %v4810_v61  ;;  %2378 = vmatpush.msrb.mxu0 %v2315_v17  ;;  %v4875_v61 = vld [vmem:[%s8757_s11 + $0x2a8] sm:$0xff] }
 0x74f   :  { %v4891_v17 = vld [vmem:[%s8757_s11 + $0x328] sm:$0xff]  ;;  %2461 = vmatpush.msra.mxu2 %v4838_v55 }
 0x750   :  { %2359 = vmatpush.msra.mxu3 %v4809_v20  ;;  %2379 = vmatpush.msrb.mxu0 %v2314_v53  ;;  %v4858_v20 = vld [vmem:[%s8757_s11 + $0x220] sm:$0xff] }
 0x751   :  { %2582 = vmatpush.msra.mxu1 %v4891_v17  ;;  %v4874_v53 = vld [vmem:[%s8757_s11 + $0x2a0] sm:$0xff] }
 0x752   :  { %2360 = vmatpush.msra.mxu3 %v4808_v16  ;;  %2380 = vmatpush.msrb.mxu0 %v2313_v52  ;;  %v4857_v16 = vld [vmem:[%s8757_s11 + $0x218] sm:$0xff] }
 0x753   :  { %2583 = vmatpush.msra.mxu1 %v4890_v11  ;;  %v4873_v52 = vld [vmem:[%s8757_s11 + $0x298] sm:$0xff] }
 0x754   :  { %2361 = vmatpush.msra.mxu3 %v4807_v33  ;;  %2381 = vmatpush.msrb.mxu0 %v2312_v24  ;;  %v4889_v33 = vld [vmem:[%s8757_s11 + $0x318] sm:$0xff]  ;;  %v4856_v24 = vld [vmem:[%s8757_s11 + $0x210] sm:$0xff] }
 0x755   :  { %2584 = vmatpush.msra.mxu1 %v4889_v33 }
 0x756   :  { %2362 = vmatpush.msra.mxu3 %v4806_v21  ;;  %2382 = vmatpush.msrb.mxu0 %v2311_v46  ;;  %v4872_v21 = vld [vmem:[%s8757_s11 + $0x290] sm:$0xff] }
 0x757   :  { %v4888_v46 = vld [vmem:[%s8757_s11 + $0x310] sm:$0xff] }
 0x758   :  { %2486 = vmatpush.msrb.mxu3 %v4869_v30  ;;  %2530 = vmatpush.msra.mxu0 %v4885_v41  ;;  %v4855_v30 = vld [vmem:[%s8757_s11 + $0x208] sm:$0xff] }
 0x759   :  { %2585 = vmatpush.msra.mxu1 %v4888_v46  ;;  %v4871_v41 = vld [vmem:[%s8757_s11 + $0x288] sm:$0xff] }
 0x75a   :  { %2487 = vmatpush.msrb.mxu3 %v4868_v28  ;;  %2531 = vmatpush.msra.mxu0 %v4884_v45  ;;  %v4887_v28 = vld [vmem:[%s8757_s11 + $0x308] sm:$0xff]  ;;  %v4854_v45 = vld [vmem:[%s8757_s11 + $0x200] sm:$0xff] }
 0x75b   :  { %2586 = vmatpush.msra.mxu1 %v4887_v28 }
 0x75c   :  { %2488 = vmatpush.msrb.mxu3 %v4867_v13  ;;  %2532 = vmatpush.msra.mxu0 %v4883_v26  ;;  %v4870_v13 = vld [vmem:[%s8757_s11 + $0x280] sm:$0xff] }
 0x75d   :  { %v4886_v26 = vld [vmem:[%s8757_s11 + $0x300] sm:$0xff] }
 0x75e   :  { %2489 = vmatpush.msrb.mxu3 %v4866_v35  ;;  %2533 = vmatpush.msra.mxu0 %v4882_v18  ;;  %v5105_v18 = vld [vmem:[#allocation8 + $0x1] ss:$0 sm:$0xff] }
 0x75f   :  { %2587 = vmatpush.msra.mxu1 %v4886_v26  ;;  %v2688_v26 = vld [vmem:[#allocation28 + $0x78] sm:$0xff] }
 0x760   :  { %2490 = vmatpush.msrb.mxu3 %v4865_v47  ;;  %2534 = vmatpush.msra.mxu0 %v4881_v1 }
 0x762   :  { %2491 = vmatpush.msrb.mxu3 %v4864_v22  ;;  %2535 = vmatpush.msra.mxu0 %v4880_v51  ;;  %v5106_v22 = vld [vmem:[#allocation8 + $0x2] ss:$0 sm:$0xff] }
 0x764   :  { %2492 = vmatpush.msrb.mxu3 %v4863_v62  ;;  %2536 = vmatpush.msra.mxu0 %v4879_v57 }
 0x766   :  { %2493 = vmatpush.msrb.mxu3 %v4862_v42  ;;  %2537 = vmatpush.msra.mxu0 %v4878_v50 }
 0x768   :  { %2494 = vmatpush.msrb.mxu3 %v4861_v60  ;;  %2538 = vmatpush.msra.mxu0 %v4877_v4 }
 0x76a   :  { %2495 = vmatpush.msrb.mxu3 %v4860_v29  ;;  %2539 = vmatpush.msra.mxu0 %v4876_v7 }
 0x76c   :  { %2496 = vmatpush.msrb.mxu3 %v4859_v38  ;;  %2540 = vmatpush.msra.mxu0 %v4875_v61  ;;  %v6519_v61 = vmov 1  }
 0x76d   :  { %5075 = vset.pattern.permute.xlu1 %v6519_v61  ;;  %5077 = vset.pattern.permute.xlu0 %v6519_v61 }
 0x76e   :  { %2497 = vmatpush.msrb.mxu3 %v4858_v20  ;;  %2541 = vmatpush.msra.mxu0 %v4874_v53 }
 0x76f   :  { %2800 = vperm.xlu1 %5075, %v7033_v2   ;;  %2792 = vperm.xlu0 %5077, %v7035_v3  }
 0x770   :  { %2498 = vmatpush.msrb.mxu3 %v4857_v16  ;;  %2542 = vmatpush.msra.mxu0 %v4873_v52 }
 0x771   :  { %5076 = vset.pattern.permute.xlu2 %v6519_v61 }
 0x772   :  { %2499 = vmatpush.msrb.mxu3 %v4856_v24  ;;  %2543 = vmatpush.msra.mxu0 %v4872_v21 }
 0x773   :  { %2796 = vperm.xlu2 %5076, %v7039_v63   ;;  %v5107_v63 = vld [vmem:[#allocation10] ss:$0 sm:$0xff] }
 0x774   :  { %2500 = vmatpush.msrb.mxu3 %v4855_v30  ;;  %2544 = vmatpush.msra.mxu0 %v4871_v41 }
 0x776   :  { %2501 = vmatpush.msrb.mxu3 %v4854_v45  ;;  %2545 = vmatpush.msra.mxu0 %v4870_v13  ;;  %v2687_v13 = vld [vmem:[#allocation28 + $0x70] sm:$0xff] }
 0x777   :  { %2788 = vperm.xlu1 %5075, %v7042_v5  }
 0x77b   :  { %2784 = vperm.xlu2 %5076, %v7052_v8  }
 0x77f   :  { %2780 = vperm.xlu1 %5075, %v7060_v15  }
 0x783   :  { %2776 = vperm.xlu2 %5076, %v7047_v6  }
 0x7b4   :  { %v2295_v35 = vpop.f32.mrf.mxu0 }
 0x7ba   :  { %v2268_v47 = vpop.f32.mrf.mxu3 }
 0x7bb   :  { %v2301_v1 = vmax.f32 %v2268_v47, %v2295_v35  ;;  %v2671_v35 = vld [vmem:[#allocation26 + $0x70] sm:$0xff]  ;;  %v2685_v47 = vld [vmem:[#allocation28 + $0x60] sm:$0xff] }
 0x7bc   :  { %v2298_v57 = vpop.f32.mrf.mxu0 }
 0x7bd   :  { %v2305_v51 = vmul.f32 %v5105_v18, %v2301_v1  ;;  %v2686_v1 = vld [vmem:[#allocation28 + $0x68] sm:$0xff] }
 0x7bf   :  { %v2309_v62 = vadd.f32 %v5106_v22, %v2305_v51  ;;  %v2670_v51 = vld [vmem:[#allocation26 + $0x68] sm:$0xff] }
 0x7c1   :  { %2383 = vmatmul.f32.vlgmr.msrb.gmra.mxu0 %v2309_v62  ;;  %v2345_v10 = vrot.slane %v2309_v62, 1  ;;  %v2404_v42 = vrot.slane %v2309_v62, 2  ;;  %v2444_v50 = vrot.slane %v2309_v62, 3  ;;  %v2484_v59 = vrot.slane %v2309_v62, 4 }
 0x7c2   :  { %v2271_v31 = vpop.f32.mrf.mxu3  ;;  %v2526_v7 = vrot.slane %v2309_v62, 5  ;;  %v2568_v58 = vrot.slane %v2309_v62, 6  ;;  %2743 = vmatpush.msrb.mxu0 %v2671_v35  ;;  %v2683_v62 = vld [vmem:[#allocation28 + $0x50] sm:$0xff] }
 0x7c3   :  { %v2302_v39 = vmax.f32 %v2271_v31, %v2298_v57  ;;  %2363 = vmatmul.f32.vlgmr.msra.gmra.mxu3 %v2345_v10  ;;  %2422 = vmatmul.f32.vlgmr.msrb.gmra.mxu1 %v2404_v42  ;;  %v2684_v57 = vld [vmem:[#allocation28 + $0x58] sm:$0xff]  ;;  %v2667_v10 = vld [vmem:[#allocation26 + $0x50] sm:$0xff] }
 0x7c4   :  { %2462 = vmatmul.f32.vlgmr.msra.gmra.mxu2 %v2444_v50  ;;  %2721 = vmatpush.msra.mxu3 %v2688_v26  ;;  %v2668_v42 = vld [vmem:[#allocation26 + $0x58] sm:$0xff]  ;;  %v2681_v50 = vld [vmem:[#allocation28 + $0x40] sm:$0xff]  ;;  %v2658_v26 = vld [vmem:[#allocation26 + $0x8] sm:$0xff] }
 0x7c5   :  { %v2306_v60 = vmul.f32 %v5105_v18, %v2302_v39  ;;  %v2672_v18 = vld [vmem:[#allocation26 + $0x78] sm:$0xff] }
 0x7c6   :  { %2763 = vmatpush.msrb.mxu1 %v2672_v18  ;;  %2722 = vmatpush.msra.mxu3 %v2686_v1 }
 0x7c7   :  { %v2310_v4 = vadd.f32 %v5106_v22, %v2306_v60  ;;  %v2669_v22 = vld [vmem:[#allocation26 + $0x60] sm:$0xff] }
 0x7c8   :  { %2744 = vmatpush.msrb.mxu0 %v2669_v22  ;;  %2764 = vmatpush.msrb.mxu1 %v2670_v51  ;;  %v2676_v22 = vld [vmem:[#allocation28 + $0x18] sm:$0xff]  ;;  %v2659_v51 = vld [vmem:[#allocation26 + $0x10] sm:$0xff] }
 0x7c9   :  { %v2527_v0 = vrot.slane %v2310_v4, 5  ;;  %v2569_v29 = vrot.slane %v2310_v4, 6  ;;  %2723 = vmatpush.msra.mxu3 %v2684_v57  ;;  %v2682_v4 = vld [vmem:[#allocation28 + $0x48] sm:$0xff] }
 0x7ca   :  { %2745 = vmatpush.msrb.mxu0 %v2667_v10  ;;  %2765 = vmatpush.msrb.mxu1 %v2668_v42 }
 0x7cb   :  { %2502 = vmatmul.f32.vlgmr.msrb.gmra.mxu3 %v2484_v59  ;;  %v2528_v36 = vsel %vm2525_vm12, %v2526_v7, %v2527_v0  ;;  %v2570_v38 = vsel %vm1537_vm8, %v2568_v58, %v2569_v29  ;;  %v2665_v59 = vld [vmem:[#allocation26 + $0x40] sm:$0xff]  ;;  %v2666_v29 = vld [vmem:[#allocation26 + $0x48] sm:$0xff]  ;;  %v2679_v7 = vld [vmem:[#allocation28 + $0x30] sm:$0xff] }
 0x7cc   :  { %2546 = vmatmul.f32.vlgmr.msra.gmra.mxu0 %v2528_v36  ;;  %2588 = vmatmul.f32.vlgmr.msra.gmra.mxu1 %v2570_v38 }
 0x7cd   :  { %v2797_v28 = vpop.permute.xlu2 %2796  ;;  %2724 = vmatpush.msra.mxu3 %v2682_v4  ;;  %2746 = vmatpush.msrb.mxu0 %v2665_v59  ;;  %v2673_v4 = vld [vmem:[#allocation28] sm:$0xff] }
 0x7ce   :  { %v7862_v31 = vmul.f32 %v2797_v28, %v7076_v44  ;;  %v7865_v39 = vmul.f32 %v2797_v28, %v7125_v23  ;;  %v7868_v60 = vmul.f32 %v2797_v28, %v7082_v49  ;;  %v7871_v0 = vmul.f32 %v2797_v28, %v7139_v37  ;;  %2766 = vmatpush.msrb.mxu1 %v2666_v29 }
 0x7d5   :  { %v2785_v45 = vpop.permute.xlu2 %2784 }
 0x7d6   :  { %v7874_v58 = vmul.f32 %v2785_v45, %v7076_v44  ;;  %v7877_v36 = vmul.f32 %v2785_v45, %v7125_v23  ;;  %v7880_v38 = vmul.f32 %v2785_v45, %v7082_v49 }
 0x7dd   :  { %v2777_v61 = vpop.permute.xlu2 %2776 }
 0x7de   :  { %v7912_v18 = vmul.f32 %v2777_v61, %v7080_v48  ;;  %v7918_v1 = vmul.f32 %v2777_v61, %v7082_v49 }
 0x7e1   :  { %v2793_v35 = vpop.permute.xlu0 %2792 }
 0x83e   :  { %v2384_v17 = vpop.f32.mrf.mxu0 }
 0x840   :  { %v2423_v53 = vpop.f32.mrf.mxu1 }
 0x846   :  { %v2364_v55 = vpop.f32.mrf.mxu3 }
 0x847   :  { %v2385_v20 = vadd.f32 %v2384_v17, %v2364_v55  ;;  %v2463_v16 = vpop.f32.mrf.mxu2  ;;  %v2680_v17 = vld [vmem:[#allocation28 + $0x38] sm:$0xff]  ;;  %v2663_v55 = vld [vmem:[#allocation26 + $0x30] sm:$0xff] }
 0x848   :  { %2725 = vmatpush.msra.mxu3 %v2680_v17  ;;  %2747 = vmatpush.msrb.mxu0 %v2663_v55  ;;  %v7928_v17 = vmul.f32 %v2777_v61, %v7139_v37  ;;  %v2674_v55 = vld [vmem:[#allocation28 + $0x8] sm:$0xff] }
 0x849   :  { %v2426_v11 = vadd.f32 %v2423_v53, %v2385_v20  ;;  %v2547_v33 = vpop.f32.mrf.mxu0  ;;  %v2589_v21 = vpop.f32.mrf.mxu1  ;;  %v7883_v20 = vmul.f32 %v2797_v28, %v7080_v48  ;;  %v7886_v53 = vmul.f32 %v2785_v45, %v7139_v37 }
 0x84b   :  { %v2466_v2 = vadd.f32 %v2463_v16, %v2426_v11  ;;  %v2664_v11 = vld [vmem:[#allocation26 + $0x38] sm:$0xff]  ;;  %v2677_v16 = vld [vmem:[#allocation28 + $0x20] sm:$0xff] }
 0x84c   :  { %2767 = vmatpush.msrb.mxu1 %v2664_v11  ;;  %v2657_v11 = vld [vmem:[#allocation26] sm:$0xff] }
 0x84e   :  { %v2503_v52 = vpop.f32.mrf.mxu3 }
 0x84f   :  { %v2506_v3 = vadd.f32 %v2503_v52, %v2466_v2  ;;  %v7889_v2 = vmul.f32 %v2797_v28, %v7137_v34  ;;  %v2863_v52 = vrot.slane %v7862_v31, 1  ;;  %v7908_v28 = vmul.f32 %v2777_v61, %v7125_v23 }
 0x851   :  { %v2550_v24 = vadd.f32 %v2547_v33, %v2506_v3  ;;  %v2865_v3 = vrot.slane %v7865_v39, 1  ;;  %v2945_v33 = vrot.slane %v7868_v60, 2 }
 0x853   :  { %v2592_v5 = vadd.f32 %v2589_v21, %v2550_v24  ;;  %v2678_v24 = vld [vmem:[#allocation28 + $0x28] sm:$0xff]  ;;  %v2947_v21 = vrot.slane %v7871_v0, 2 }
 0x854   :  { %2726 = vmatpush.msra.mxu3 %v2678_v24 }
 0x855   :  { %v2595_v46 = vadd.f32 %v5107_v63, %v2592_v5  ;;  %v2661_v63 = vld [vmem:[#allocation26 + $0x20] sm:$0xff]  ;;  %v7896_v5 = vmul.f32 %v2785_v45, %v7080_v48 }
 0x856   :  { %2748 = vmatpush.msrb.mxu0 %v2661_v63  ;;  %v7931_v63 = vmul.f32 %v2793_v35, %v7076_v44  ;;  %2727 = vmatpush.msra.mxu3 %v2676_v22  ;;  %v2811_v22 = vmul.f32 %v2793_v35, %v7080_v48 }
 0x857   :  { %v2597_v8 = vmin.f32 %v2595_v46, 0.0  ;;  %vm2596_vm13 = vcmp.gt.f32.partialorder %v2595_v46, 0.0 }
 0x858   :  { %2749 = vmatpush.msrb.mxu0 %v2659_v51  ;;  %2728 = vmatpush.msra.mxu3 %v2674_v55  ;;  %v8687_v51 = vrot.slane %v7931_v63, 1 }
 0x859   :  { %v2598_v30 = vmul.f32 1.442695, %v2597_v8  ;;  %v7902_v8 = vmul.f32 %v2777_v61, %v7076_v44 }
 0x85a   :  { %2750 = vmatpush.msrb.mxu0 %v2657_v11  ;;  %v2812_v11 = vmul.f32 %v2793_v35, %v7137_v34 }
 0x85b   :  { %5184 = vpow2.f32 %v2598_v30  ;;  %v2662_v30 = vld [vmem:[#allocation26 + $0x28] sm:$0xff] }
 0x85c   :  { %2768 = vmatpush.msrb.mxu1 %v2662_v30 }
 0x861   :  { %v5185_v15 = vpop.eup %5184 }
 0x862   :  { %v4902_v6 = vadd.f32 -1.0, %v5185_v15 }
 0x864   :  { %v2601_v41 = vsel %vm2596_vm13, %v2595_v46, %v4902_v6  ;;  %v7899_v46 = vmul.f32 %v2785_v45, %v7137_v34  ;;  %v2801_v45 = vpop.permute.xlu1 %2800 }
 0x865   :  { %4903 = vmatpush.msk.msrb.mxu2 %vm707_vm0, %v2601_v41  ;;  %v2816_v57 = vmul.f32 %v2801_v45, %v7137_v34  ;;  %v2829_v10 = vmul.f32 %v2801_v45, %v7076_v44  ;;  %v2830_v42 = vmul.f32 %v2801_v45, %v7125_v23  ;;  %v2911_v59 = vmul.f32 %v2801_v45, %v7082_v49 }
 0x866   :  { %4904 = vmatmul.msk.f32.vlgmr.msrb.gmra.mxu2 %vm2602_vm14, %v7399_v32  ;;  %v2912_v29 = vmul.f32 %v2801_v45, %v7139_v37 }
 0x867   :  { %4905 = vmatpush.msk.msra.mxu2 %vm707_vm0, %v2601_v41  ;;  %v2869_v24 = vrot.slane %v2830_v42, 1  ;;  %v2949_v6 = vrot.slane %v2911_v59, 2  ;;  %v7941_v42 = vmul.f32 %v2793_v35, %v7139_v37 }
 0x869   :  { %2701 = vmatpush.msrb.mxu2 %v2687_v13  ;;  %v2675_v13 = vld [vmem:[#allocation28 + $0x10] sm:$0xff]  ;;  %v2950_v30 = vsel %vm1365_vm5, %v2945_v33, %v2949_v6 }
 0x86b   :  { %2702 = vmatpush.msrb.mxu2 %v2685_v47  ;;  %v7915_v47 = vmul.f32 %v2777_v61, %v7137_v34  ;;  %v7938_v61 = vmul.f32 %v2793_v35, %v7082_v49 }
 0x86c   :  { %v2789_v55 = vpop.permute.xlu1 %2788 }
 0x86d   :  { %2703 = vmatpush.msrb.mxu2 %v2683_v62  ;;  %v2815_v62 = vmul.f32 %v2801_v45, %v7080_v48  ;;  %v2951_v45 = vrot.slane %v2912_v29, 2  ;;  %v8686_v59 = vrot.slane %v7938_v61, 2  ;;  %v2870_v29 = vsel %vm1275_vm4, %v2865_v3, %v2869_v24 }
 0x86e   :  { %4906 = vmatmul.msk.f32.vlgmr.msra.gmra.mxu2 %vm2602_vm14, %v7393_v14 }
 0x86f   :  { %2704 = vmatpush.msrb.mxu2 %v2681_v50  ;;  %v2660_v50 = vld [vmem:[#allocation26 + $0x18] sm:$0xff] }
 0x870   :  { %2769 = vmatpush.msrb.mxu1 %v2660_v50 }
 0x871   :  { %2705 = vmatpush.msrb.mxu2 %v2679_v7  ;;  %v7935_v7 = vmul.f32 %v2793_v35, %v7125_v23  ;;  %v2943_v35 = vrot.slane %v7941_v42, 2 }
 0x872   :  { %2770 = vmatpush.msrb.mxu1 %v2658_v26  ;;  %v2896_v26 = vadd.f32 %v2870_v29, %v7889_v2  ;;  %v2810_v29 = vmul.f32 %v2789_v55, %v7137_v34 }
 0x873   :  { %2706 = vmatpush.msrb.mxu2 %v2677_v16  ;;  %v2867_v16 = vrot.slane %v2829_v10, 1  ;;  %v2898_v10 = vadd.f32 %v2869_v24, %v2816_v57  ;;  %v2861_v24 = vrot.slane %v7935_v7, 1 }
 0x875   :  { %2707 = vmatpush.msrb.mxu2 %v2675_v13  ;;  %v2897_v13 = vadd.f32 %v2867_v16, %v2815_v62  ;;  %v2868_v50 = vsel %vm1275_vm4, %v2863_v52, %v2867_v16  ;;  %v2980_v57 = vadd.f32 %v2951_v45, %v2898_v10  ;;  %v2952_v16 = vsel %vm1365_vm5, %v2947_v21, %v2951_v45 }
 0x876   :  { %v7971_v10 = vmul.f32 %v2789_v55, %v7082_v49  ;;  %v2864_v45 = vsel %vm1275_vm4, %v8687_v51, %v2863_v52  ;;  %v2978_v42 = vadd.f32 %v2952_v16, %v2896_v26 }
 0x877   :  { %2708 = vmatpush.msrb.mxu2 %v2673_v4  ;;  %v2979_v62 = vadd.f32 %v2949_v6, %v2897_v13  ;;  %v2895_v4 = vadd.f32 %v2868_v50, %v7883_v20  ;;  %v7963_v13 = vmul.f32 %v2789_v55, %v7076_v44  ;;  %v7966_v20 = vmul.f32 %v2789_v55, %v7125_v23 }
 0x878   :  { %v7977_v2 = vadd.f32 %v2980_v57, %v7245_v12  ;;  %v7985_v50 = vmul.f32 %v2789_v55, %v7139_v37  ;;  %v2809_v57 = vmul.f32 %v2789_v55, %v7080_v48  ;;  %v8002_v60 = vadd.f32 %v2978_v42, %v7245_v12 }
 0x879   :  { %v7974_v6 = vadd.f32 %v2979_v62, %v7121_v19  ;;  %v2977_v7 = vadd.f32 %v2950_v30, %v2895_v4  ;;  %v2946_v62 = vsel %vm1365_vm5, %v8686_v59, %v2945_v33  ;;  %v2855_v31 = vrot.slane %v7963_v13, 1 }
 0x87a   :  { %v3022_v15 = vmin.f32 %v7977_v2, 0.0  ;;  %v2937_v33 = vrot.slane %v7971_v10, 2  ;;  %v2893_v26 = vadd.f32 %v2864_v45, %v2811_v22  ;;  %v2866_v55 = vsel %vm1275_vm4, %v2861_v24, %v2865_v3 }
 0x87b   :  { %v3021_v41 = vmin.f32 %v7974_v6, 0.0  ;;  %v7999_v30 = vadd.f32 %v2977_v7, %v7121_v19  ;;  %v2939_v16 = vrot.slane %v7985_v50, 2  ;;  %vm3007_vm7 = vcmp.gt.f32.partialorder %v7974_v6, 0.0  ;;  %v2781_v7 = vpop.permute.xlu1 %2780 }
 0x87c   :  { %v3049_v13 = vmul.f32 1.442695, %v3022_v15  ;;  %v3020_v42 = vmin.f32 %v8002_v60, 0.0  ;;  %v2975_v59 = vadd.f32 %v2946_v62, %v2893_v26  ;;  %v2894_v51 = vadd.f32 %v2866_v55, %v2812_v11 }
 0x87d   :  { %v3047_v4 = vmul.f32 1.442695, %v3021_v41  ;;  %v3019_v52 = vmin.f32 %v7999_v30, 0.0  ;;  %v8013_v41 = vmul.f32 %v2781_v7, %v7076_v44  ;;  %v8016_v39 = vmul.f32 %v2781_v7, %v7125_v23 }
 0x87e   :  { %vm3008_vm9 = vcmp.gt.f32.partialorder %v7977_v2, 0.0  ;;  %v2948_v3 = vsel %vm1365_vm5, %v2943_v35, %v2947_v21  ;;  %v8023_v15 = vmul.f32 %v2781_v7, %v7080_v48  ;;  %vm3005_vm10 = vcmp.gt.f32.partialorder %v7999_v30, 0.0 }
 0x87f   :  { %5186 = vpow2.f32 %v3047_v4  ;;  %v3043_v22 = vmul.f32 1.442695, %v3019_v52  ;;  %v8027_v11 = vmul.f32 %v2781_v7, %v7137_v34  ;;  %v8030_v44 = vmul.f32 %v2781_v7, %v7082_v49 }
 0x880   :  { %5188 = vpow2.f32 %v3049_v13  ;;  %vm3006_vm13 = vcmp.gt.f32.partialorder %v8002_v60, 0.0  ;;  %v3045_v23 = vmul.f32 1.442695, %v3020_v42  ;;  %v8034_v0 = vadd.f32 %v2975_v59, %v7121_v19 }
 0x881   :  { %v2846_v21 = vrot.slane %v8013_v41, 1  ;;  %v8038_v48 = vmul.f32 %v2781_v7, %v7139_v37  ;;  %5190 = vpow2.f32 %v3043_v22  ;;  %v2976_v10 = vadd.f32 %v2948_v3, %v2894_v51 }
 0x882   :  { %v2849_v45 = vrot.slane %v8016_v39, 1  ;;  %5192 = vpow2.f32 %v3045_v23  ;;  %v3017_v34 = vmin.f32 %v8034_v0, 0.0  ;;  %v8758_v49 = vrot.slane %v7931_v63, 1 }
 0x883   :  { %v8046_v59 = vadd.f32 %v2976_v10, %v7245_v12  ;;  %v8759_v26 = vrot.slane %v7938_v61, 2  ;;  %v8760_v51 = vrot.slane %v7966_v20, 1  ;;  %v2944_v63 = vsel %vm1365_vm5, %v2939_v16, %v2943_v35 }
 0x884   :  { %v2860_v62 = vsel %vm1275_vm4, %v2855_v31, %v8758_v49  ;;  %v3039_v7 = vmul.f32 1.442695, %v3017_v34  ;;  %v2928_v22 = vrot.slane %v8030_v44, 2  ;;  %v8761_v61 = vrot.slane %v7874_v58, 1 }
 0x885   :  { %v5187_v52 = vpop.eup %5186  ;;  %v2891_v4 = vadd.f32 %v2860_v62, %v2809_v57  ;;  %v2942_v37 = vsel %vm1365_vm5, %v2937_v33, %v8759_v26  ;;  %v2862_v55 = vsel %vm1275_vm4, %v8760_v51, %v2861_v24  ;;  %v3018_v57 = vmin.f32 %v8046_v59, 0.0 }
 0x886   :  { %v4923_v13 = vadd.f32 -1.0, %v5187_v52  ;;  %v2892_v42 = vadd.f32 %v2862_v55, %v2810_v29  ;;  %v5189_v3 = vpop.eup %5188  ;;  %v2856_v10 = vsel %vm1275_vm4, %v8761_v61, %v2855_v31  ;;  %5194 = vpow2.f32 %v3039_v7 }
 0x887   :  { %v2973_v23 = vadd.f32 %v2942_v37, %v2891_v4  ;;  %v4924_v34 = vadd.f32 -1.0, %v5189_v3  ;;  %v5191_v49 = vpop.eup %5190  ;;  %v3041_v35 = vmul.f32 1.442695, %v3018_v57  ;;  %v2889_v52 = vadd.f32 %v2856_v10, %v7896_v5 }
 0x888   :  { %v3077_v24 = vsel %vm3007_vm7, %v7974_v6, %v4923_v13  ;;  %v2974_v29 = vadd.f32 %v2944_v63, %v2892_v42  ;;  %v8762_v31 = vrot.slane %v7880_v38, 2  ;;  %v5193_v26 = vpop.eup %5192  ;;  %v4921_v37 = vadd.f32 -1.0, %v5191_v49 }
 0x889   :  { %4925 = vmatpush.msk.msra.mxu2 %vm1537_vm8, %v3077_v24  ;;  %4935 = vmatpush.msk.msra.mxu0 %vm1537_vm8, %v3077_v24  ;;  %v8068_v62 = vadd.f32 %v2973_v23, %v7121_v19  ;;  %v3078_v6 = vsel %vm3008_vm9, %v7977_v2, %v4924_v34  ;;  %v8763_v55 = vrot.slane %v7966_v20, 1  ;;  %v8764_v13 = vrot.slane %v7877_v36, 1 }
 0x88a   :  { %v2938_v4 = vsel %vm1365_vm5, %v8762_v31, %v2937_v33  ;;  %v8078_v51 = vadd.f32 %v2974_v29, %v7245_v12  ;;  %v2931_v5 = vrot.slane %v8038_v48, 2  ;;  %4930 = vmatpush.msk.msrb.mxu3 %vm1537_vm8, %v3078_v6  ;;  %4940 = vmatpush.msk.msra.mxu1 %vm1537_vm8, %v3078_v6  ;;  %v4922_v33 = vadd.f32 -1.0, %v5193_v26 }
 0x88b   :  { %v2858_v7 = vsel %vm1275_vm4, %v8764_v13, %v8763_v55  ;;  %5196 = vpow2.f32 %v3041_v35  ;;  %v3015_v2 = vmin.f32 %v8068_v62, 0.0  ;;  %v3075_v42 = vsel %vm3005_vm10, %v7999_v30, %v4921_v37 }
 0x88c   :  { %vm3003_vm7 = vcmp.gt.f32.partialorder %v8034_v0, 0.0  ;;  %v3016_v20 = vmin.f32 %v8078_v51, 0.0  ;;  %v2971_v63 = vadd.f32 %v2938_v4, %v2889_v52  ;;  %3095 = vmatpush.msra.mxu2 %v3075_v42  ;;  %v3076_v3 = vsel %vm3006_vm13, %v8002_v60, %v4922_v33  ;;  %3153 = vmatpush.msra.mxu0 %v3075_v42  ;;  %v5195_v10 = vpop.eup %5194 }
 0x88d   :  { %v3035_v57 = vmul.f32 1.442695, %v3015_v2  ;;  %v2890_v23 = vadd.f32 %v2858_v7, %v7899_v46  ;;  %v8765_v61 = vrot.slane %v7886_v53, 2  ;;  %3124 = vmatpush.msrb.mxu3 %v3076_v3  ;;  %3182 = vmatpush.msra.mxu1 %v3076_v3  ;;  %v8766_v29 = vrot.slane %v7874_v58, 1 }
 0x88e   :  { %v3037_v24 = vmul.f32 1.442695, %v3016_v20  ;;  %v8104_v34 = vadd.f32 %v2971_v63, %v7121_v19  ;;  %v8767_v46 = vmov %v8762_v31  ;;  %vm3004_vm9 = vcmp.gt.f32.partialorder %v8046_v59, 0.0 }
 0x88f   :  { %v2940_v30 = vsel %vm1365_vm5, %v8765_v61, %v2939_v16  ;;  %v2852_v60 = vsel %vm1275_vm4, %v2846_v21, %v8766_v29  ;;  %v2934_v50 = vsel %vm1365_vm5, %v2928_v22, %v8767_v46  ;;  %v4919_v16 = vadd.f32 -1.0, %v5195_v10 }
 0x890   :  { %5198 = vpow2.f32 %v3035_v57  ;;  %v2972_v49 = vadd.f32 %v2940_v30, %v2890_v23  ;;  %v2887_v35 = vadd.f32 %v2852_v60, %v8023_v15  ;;  %v3013_v58 = vmin.f32 %v8104_v34, 0.0 }
 0x891   :  { %5200 = vpow2.f32 %v3037_v24  ;;  %v8768_v52 = vmov %v8764_v13  ;;  %v5197_v31 = vpop.eup %5196  ;;  %v3073_v4 = vsel %vm3003_vm7, %v8034_v0, %v4919_v16  ;;  %v8769_v36 = vmov %v8765_v61 }
 0x892   :  { %v2854_v38 = vsel %vm1275_vm4, %v2849_v45, %v8768_v52  ;;  %v8128_v26 = vadd.f32 %v2972_v49, %v7245_v12  ;;  %v2969_v15 = vadd.f32 %v2934_v50, %v2887_v35  ;;  %3096 = vmatpush.msra.mxu2 %v3073_v4  ;;  %v4920_v37 = vadd.f32 -1.0, %v5197_v31  ;;  %3154 = vmatpush.msra.mxu0 %v3073_v4 }
 0x893   :  { %v2888_v6 = vadd.f32 %v2854_v38, %v8027_v11  ;;  %v3031_v55 = vmul.f32 1.442695, %v3013_v58  ;;  %v2936_v13 = vsel %vm1365_vm5, %v2931_v5, %v8769_v36  ;;  %v8770_v0 = vrot.slane %v7902_v8, 1  ;;  %v5108_v36 = vld [vmem:[#allocation10 + $0x1] ss:$0 sm:$0xff] }
 0x894   :  { %v2930_v33 = vrot.slane %v7928_v17, 2  ;;  %v3014_v11 = vmin.f32 %v8128_v26, 0.0  ;;  %v2983_v2 = vadd.f32 %v2969_v15, %v7121_v19  ;;  %v3074_v53 = vsel %vm3004_vm9, %v8046_v59, %v4920_v37 }
 0x895   :  { %v2847_v7 = vsel %vm1275_vm4, %v8770_v0, %v2846_v21  ;;  %v2970_v42 = vadd.f32 %v2936_v13, %v2888_v6  ;;  %5202 = vpow2.f32 %v3031_v55  ;;  %v8771_v8 = vrot.slane %v7918_v1, 2  ;;  %3125 = vmatpush.msrb.mxu3 %v3074_v53  ;;  %3183 = vmatpush.msra.mxu1 %v3074_v53  ;;  %v5241_v53 = vld [vmem:[%s8751_s5 + $0xf8] sm:$0xff] }
 0x896   :  { %v2885_v20 = vadd.f32 %v2847_v7, %v7912_v18  ;;  %v5199_v21 = vpop.eup %5198  ;;  %vm3001_vm10 = vcmp.gt.f32.partialorder %v8068_v62, 0.0  ;;  %v3033_v17 = vmul.f32 1.442695, %v3014_v11  ;;  %v3011_v63 = vmin.f32 %v2983_v2, 0.0  ;;  %v5109_v7 = vld [vmem:[#allocation10 + $0x2] ss:$0 sm:$0xff] }
 0x897   :  { %v2929_v41 = vsel %vm1365_vm5, %v8771_v8, %v2928_v22  ;;  %v2984_v3 = vadd.f32 %v2970_v42, %v7245_v12  ;;  %v5201_v57 = vpop.eup %5200  ;;  %v4917_v59 = vadd.f32 -1.0, %v5199_v21  ;;  %vm3002_vm13 = vcmp.gt.f32.partialorder %v8078_v51, 0.0  ;;  %v5240_v42 = vld [vmem:[%s8751_s5 + $0x78] sm:$0xff]  ;;  %v5243_v8 = vld [vmem:[%s8751_s5 + $0xf0] sm:$0xff] }
 0x898   :  { %v2967_v18 = vadd.f32 %v2929_v41, %v2885_v20  ;;  %v8772_v1 = vrot.slane %v7908_v28, 1  ;;  %v4918_v22 = vadd.f32 -1.0, %v5201_v57  ;;  %5204 = vpow2.f32 %v3033_v17  ;;  %v5242_v20 = vld [vmem:[%s8751_s5 + $0x70] sm:$0xff]  ;;  %v5244_v41 = vld [vmem:[%s8751_s5 + $0x178] sm:$0xff]  ;;  %v5246_v17 = vld [vmem:[%s8751_s5 + $0x68] sm:$0xff] }
 0x899   :  { %v3027_v23 = vmul.f32 1.442695, %v3011_v63  ;;  %v2932_v61 = vsel %vm1365_vm5, %v2930_v33, %v2931_v5  ;;  %v3071_v30 = vsel %vm3001_vm10, %v8068_v62, %v4917_v59  ;;  %v3012_v10 = vmin.f32 %v2984_v3, 0.0  ;;  %v5245_v21 = vld [vmem:[%s8751_s5 + $0x1f8] sm:$0xff]  ;;  %v5247_v63 = vld [vmem:[%s8751_s5 + $0xe8] sm:$0xff]  ;;  %v5249_v57 = vld [vmem:[%s8751_s5 + $0x1f0] sm:$0xff] }
 0x89a   :  { %v2850_v44 = vsel %vm1275_vm4, %v8772_v1, %v2849_v45  ;;  %v2981_v24 = vadd.f32 %v2967_v18, %v7121_v19  ;;  %3097 = vmatpush.msra.mxu2 %v3071_v30  ;;  %v3072_v39 = vsel %vm3002_vm13, %v8078_v51, %v4918_v22  ;;  %3155 = vmatpush.msra.mxu0 %v3071_v30  ;;  %vm2999_vm7 = vcmp.gt.f32.partialorder %v8104_v34, 0.0  ;;  %v5250_v59 = vld [vmem:[%s8751_s5 + $0x60] sm:$0xff]  ;;  %v5252_v1 = vld [vmem:[%s8751_s5 + $0x168] sm:$0xff]  ;;  %v5254_v22 = vld [vmem:[%s8751_s5 + $0x58] sm:$0xff] }
 0x89b   :  { %v2886_v29 = vadd.f32 %v2850_v44, %v7915_v47  ;;  %5206 = vpow2.f32 %v3027_v23  ;;  %v5203_v28 = vpop.eup %5202  ;;  %3126 = vmatpush.msrb.mxu3 %v3072_v39  ;;  %3184 = vmatpush.msra.mxu1 %v3072_v39  ;;  %v3029_v48 = vmul.f32 1.442695, %v3012_v10  ;;  %vm3000_vm9 = vcmp.gt.f32.partialorder %v8128_v26, 0.0  ;;  %v5251_v18 = vld [vmem:[%s8751_s5 + $0xe0] sm:$0xff]  ;;  %v5253_v44 = vld [vmem:[%s8751_s5 + $0x1e8] sm:$0xff]  ;;  %v5255_v23 = vld [vmem:[%s8751_s5 + $0xd8] sm:$0xff] }
 0x89c   :  { %v3009_v45 = vmin.f32 %v2981_v24, 0.0  ;;  %v4915_v60 = vadd.f32 -1.0, %v5203_v28  ;;  %vm2997_vm10 = vcmp.gt.f32.partialorder %v2983_v2, 0.0  ;;  %vm2998_vm13 = vcmp.gt.f32.partialorder %v2984_v3, 0.0  ;;  %v5257_v30 = vld [vmem:[%s8751_s5 + $0x1e0] sm:$0xff]  ;;  %v5258_v10 = vld [vmem:[%s8751_s5 + $0x50] sm:$0xff] }
 0x89d   :  { %v2968_v5 = vadd.f32 %v2932_v61, %v2886_v29  ;;  %5208 = vpow2.f32 %v3029_v48  ;;  %v5256_v61 = vld [vmem:[%s8751_s5 + $0x160] sm:$0xff]  ;;  %v5260_v29 = vld [vmem:[%s8751_s5 + $0x158] sm:$0xff]  ;;  %v5262_v28 = vld [vmem:[%s8751_s5 + $0x48] sm:$0xff] }
 0x89e   :  { %v3023_v62 = vmul.f32 1.442695, %v3009_v45  ;;  %v5205_v46 = vpop.eup %5204  ;;  %v3069_v47 = vsel %vm2999_vm7, %v8104_v34, %v4915_v60  ;;  %vm2995_vm7 = vcmp.gt.f32.partialorder %v2981_v24, 0.0  ;;  %v5261_v39 = vld [vmem:[%s8751_s5 + $0x1d8] sm:$0xff]  ;;  %v5263_v48 = vld [vmem:[%s8751_s5 + $0xc8] sm:$0xff]  ;;  %v5264_v45 = vld [vmem:[%s8751_s5 + $0x150] sm:$0xff] }
 0x89f   :  { %v2982_v19 = vadd.f32 %v2968_v5, %v7245_v12  ;;  %3098 = vmatpush.msra.mxu2 %v3069_v47  ;;  %v4916_v51 = vadd.f32 -1.0, %v5205_v46  ;;  %3156 = vmatpush.msra.mxu0 %v3069_v47  ;;  %v5265_v5 = vld [vmem:[%s8751_s5 + $0x1d0] sm:$0xff]  ;;  %v5266_v60 = vld [vmem:[%s8751_s5 + $0x40] sm:$0xff]  ;;  %v5269_v46 = vld [vmem:[%s8751_s5 + $0x1c8] sm:$0xff] }
 0x8a0   :  { %5210 = vpow2.f32 %v3023_v62  ;;  %v5267_v62 = vld [vmem:[%s8751_s5 + $0xc0] sm:$0xff]  ;;  %v5270_v47 = vld [vmem:[%s8751_s5 + $0x38] sm:$0xff] }
 0x8a1   :  { %v3010_v50 = vmin.f32 %v2982_v19, 0.0  ;;  %v5207_v16 = vpop.eup %5206  ;;  %v3070_v49 = vsel %vm3000_vm9, %v8128_v26, %v4916_v51  ;;  %vm2996_vm9 = vcmp.gt.f32.partialorder %v2982_v19, 0.0  ;;  %v5271_v51 = vld [vmem:[%s8751_s5 + $0xb8] sm:$0xff] }
 0x8a2   :  { %v4913_v35 = vadd.f32 -1.0, %v5207_v16  ;;  %3127 = vmatpush.msrb.mxu3 %v3070_v49  ;;  %3185 = vmatpush.msra.mxu1 %v3070_v49  ;;  %v5273_v16 = vld [vmem:[%s8751_s5 + $0x1c0] sm:$0xff]  ;;  %v5274_v49 = vld [vmem:[%s8751_s5 + $0x30] sm:$0xff] }
 0x8a3   :  { %v3025_v58 = vmul.f32 1.442695, %v3010_v50  ;;  %v5209_v52 = vpop.eup %5208  ;;  %v5272_v50 = vld [vmem:[%s8751_s5 + $0x140] sm:$0xff] }
 0x8a4   :  { %v3067_v12 = vsel %vm2997_vm10, %v2983_v2, %v4913_v35  ;;  %v4914_v34 = vadd.f32 -1.0, %v5209_v52  ;;  %v5275_v35 = vld [vmem:[%s8751_s5 + $0xb0] sm:$0xff]  ;;  %v5277_v52 = vld [vmem:[%s8751_s5 + $0x1b8] sm:$0xff] }
 0x8a5   :  { %5212 = vpow2.f32 %v3025_v58  ;;  %3099 = vmatpush.msra.mxu2 %v3067_v12  ;;  %3157 = vmatpush.msra.mxu0 %v3067_v12  ;;  %v5276_v58 = vld [vmem:[%s8751_s5 + $0x138] sm:$0xff]  ;;  %v5278_v12 = vld [vmem:[%s8751_s5 + $0x28] sm:$0xff] }
 0x8a6   :  { %v5211_v38 = vpop.eup %5210  ;;  %v3068_v31 = vsel %vm2998_vm13, %v2984_v3, %v4914_v34  ;;  %v5248_v3 = vld [vmem:[%s8751_s5 + $0x170] sm:$0xff]  ;;  %v5279_v34 = vld [vmem:[%s8751_s5 + $0xa8] sm:$0xff] }
 0x8a7   :  { %v4911_v4 = vadd.f32 -1.0, %v5211_v38  ;;  %3128 = vmatpush.msrb.mxu3 %v3068_v31  ;;  %3186 = vmatpush.msra.mxu1 %v3068_v31  ;;  %v5281_v38 = vld [vmem:[%s8751_s5 + $0x1b0] sm:$0xff]  ;;  %v5282_v31 = vld [vmem:[%s8751_s5 + $0x20] sm:$0xff] }
 0x8a9   :  { %v3065_v15 = vsel %vm2995_vm7, %v2981_v24, %v4911_v4  ;;  %v5259_v24 = vld [vmem:[%s8751_s5 + $0xd0] sm:$0xff]  ;;  %v5283_v4 = vld [vmem:[%s8751_s5 + $0xa0] sm:$0xff]  ;;  %vm4521_vm7 = vcmask 517120  }
 0x8aa   :  { %3100 = vmatpush.msra.mxu2 %v3065_v15  ;;  %3158 = vmatpush.msra.mxu0 %v3065_v15  ;;  %v5284_v15 = vld [vmem:[%s8751_s5 + $0x128] sm:$0xff] }
 0x8ab   :  { %v5213_v6 = vpop.eup %5212 }
 0x8ac   :  { %v4912_v26 = vadd.f32 -1.0, %v5213_v6  ;;  %v5286_v6 = vld [vmem:[%s8751_s5 + $0x18] sm:$0xff] }
 0x8ae   :  { %v3066_v37 = vsel %vm2996_vm9, %v2982_v19, %v4912_v26  ;;  %v5268_v19 = vld [vmem:[%s8751_s5 + $0x148] sm:$0xff]  ;;  %v5287_v26 = vld [vmem:[%s8751_s5 + $0x98] sm:$0xff] }
 0x8af   :  { %3129 = vmatpush.msrb.mxu3 %v3066_v37  ;;  %3187 = vmatpush.msra.mxu1 %v3066_v37  ;;  %v5288_v37 = vld [vmem:[%s8751_s5 + $0x120] sm:$0xff] }
 0x8e9   :  { %v2625_v55 = vpop.f32.mrf.mxu2 }
 0x8f1   :  { %v2647_v13 = vpop.f32.mrf.mxu2 }
 0x8f2   :  { %v2650_v0 = vmax.f32 %v2625_v55, %v2647_v13  ;;  %v5289_v55 = vld [vmem:[%s8751_s5 + $0x1a0] sm:$0xff]  ;;  %v5291_v13 = vld [vmem:[%s8751_s5 + $0x90] sm:$0xff] }
 0x8f4   :  { %v2653_v33 = vmul.f32 %v5108_v36, %v2650_v0  ;;  %v5290_v36 = vld [vmem:[%s8751_s5 + $0x10] sm:$0xff]  ;;  %v5293_v0 = vld [vmem:[%s8751_s5 + $0x198] sm:$0xff] }
 0x8f6   :  { %v2656_v11 = vadd.f32 %v5109_v7, %v2653_v33  ;;  %v5294_v7 = vld [vmem:[%s8751_s5 + $0x8] sm:$0xff] }
 0x8f7   :  { %v5295_v33 = vld [vmem:[%s8751_s5 + $0x88] sm:$0xff] }
 0x8f8   :  { %v2690_v2 = vrot.slane %v2656_v11, 1  ;;  %4909 = vmatmul.msk.f32.vlgmr.msrb.gmra.mxu0 %vm753_vm3, %v2656_v11  ;;  %4910 = vmatmul.msk.f32.vlgmr.msrb.gmra.mxu1 %vm753_vm3, %v2656_v11  ;;  %v5296_v11 = vld [vmem:[%s8751_s5 + $0x110] sm:$0xff] }
 0x8f9   :  { %3299 = vmatpush.msrb.mxu0 %v5240_v42  ;;  %3325 = vmatpush.msrb.mxu1 %v5241_v53  ;;  %v5299_v42 = vld [vmem:[%s8751_s5 + $0x80] sm:$0xff]  ;;  %v5300_v53 = vld [vmem:[%s8751_s5 + $0x378] sm:$0xff] }
 0x8fa   :  { %4907 = vmatmul.msk.f32.vlgmr.msrb.gmra.mxu2 %vm753_vm3, %v2690_v2  ;;  %4908 = vmatmul.msk.f32.vlgmr.msra.gmra.mxu3 %vm753_vm3, %v2690_v2  ;;  %v5298_v2 = vld [vmem:[%s8751_s5] sm:$0xff] }
 0x8fb   :  { %3300 = vmatpush.msrb.mxu0 %v5242_v20  ;;  %3326 = vmatpush.msrb.mxu1 %v5243_v8  ;;  %v5301_v20 = vld [vmem:[%s8751_s5 + $0x3f8] sm:$0xff]  ;;  %v5302_v8 = vld [vmem:[%s8751_s5 + $0x108] sm:$0xff] }
 0x8fc   :  { %3247 = vmatpush.msrb.mxu2 %v5244_v41  ;;  %3273 = vmatpush.msra.mxu3 %v5245_v21  ;;  %v5303_v41 = vld [vmem:[%s8751_s5 + $0x188] sm:$0xff]  ;;  %v5304_v21 = vld [vmem:[%s8751_s5 + $0x370] sm:$0xff] }
 0x8fd   :  { %3301 = vmatpush.msrb.mxu0 %v5246_v17  ;;  %3327 = vmatpush.msrb.mxu1 %v5247_v63  ;;  %v5305_v17 = vld [vmem:[%s8751_s5 + $0x3f0] sm:$0xff]  ;;  %v5306_v63 = vld [vmem:[%s8751_s5 + $0x100] sm:$0xff] }
 0x8fe   :  { %3248 = vmatpush.msrb.mxu2 %v5248_v3  ;;  %3274 = vmatpush.msra.mxu3 %v5249_v57  ;;  %v5307_v3 = vld [vmem:[%s8751_s5 + $0x180] sm:$0xff]  ;;  %v5308_v57 = vld [vmem:[%s8751_s5 + $0x278] sm:$0xff] }
 0x8ff   :  { %3302 = vmatpush.msrb.mxu0 %v5250_v59  ;;  %3328 = vmatpush.msrb.mxu1 %v5251_v18  ;;  %v5309_v59 = vld [vmem:[%s8751_s5 + $0x2f8] sm:$0xff]  ;;  %v5310_v18 = vld [vmem:[%s8751_s5 + $0x368] sm:$0xff] }
 0x900   :  { %4936 = vmatmul.msk.f32.vlgmr.msra.gmra.mxu0 %vm1524_vm15, %v7393_v14  ;;  %4941 = vmatmul.msk.f32.vlgmr.msra.gmra.mxu1 %vm1524_vm15, %v7393_v14 }
 0x901   :  { %3249 = vmatpush.msrb.mxu2 %v5252_v1  ;;  %3275 = vmatpush.msra.mxu3 %v5253_v44  ;;  %v5311_v1 = vld [vmem:[%s8751_s5 + $0x3e8] sm:$0xff]  ;;  %v5312_v44 = vld [vmem:[%s8751_s5 + $0x270] sm:$0xff] }
 0x902   :  { %4926 = vmatmul.msk.f32.vlgmr.msra.gmra.mxu2 %vm1524_vm15, %v7399_v32  ;;  %4931 = vmatmul.msk.f32.vlgmr.msrb.gmra.mxu3 %vm1524_vm15, %v7399_v32 }
 0x903   :  { %3303 = vmatpush.msrb.mxu0 %v5254_v22  ;;  %3329 = vmatpush.msrb.mxu1 %v5255_v23  ;;  %v5313_v22 = vld [vmem:[%s8751_s5 + $0x2f0] sm:$0xff]  ;;  %v5314_v23 = vld [vmem:[%s8751_s5 + $0x360] sm:$0xff] }
 0x904   :  { %3250 = vmatpush.msrb.mxu2 %v5256_v61  ;;  %3276 = vmatpush.msra.mxu3 %v5257_v30  ;;  %v5315_v61 = vld [vmem:[%s8751_s5 + $0x3e0] sm:$0xff]  ;;  %v5316_v30 = vld [vmem:[%s8751_s5 + $0x268] sm:$0xff] }
 0x905   :  { %3304 = vmatpush.msrb.mxu0 %v5258_v10  ;;  %3330 = vmatpush.msrb.mxu1 %v5259_v24  ;;  %v5317_v10 = vld [vmem:[%s8751_s5 + $0x2e8] sm:$0xff]  ;;  %v5318_v24 = vld [vmem:[%s8751_s5 + $0x358] sm:$0xff] }
 0x906   :  { %3251 = vmatpush.msrb.mxu2 %v5260_v29  ;;  %3277 = vmatpush.msra.mxu3 %v5261_v39  ;;  %v5319_v29 = vld [vmem:[%s8751_s5 + $0x3d8] sm:$0xff]  ;;  %v5320_v39 = vld [vmem:[%s8751_s5 + $0x260] sm:$0xff] }
 0x907   :  { %3305 = vmatpush.msrb.mxu0 %v5262_v28  ;;  %3331 = vmatpush.msrb.mxu1 %v5263_v48  ;;  %v5321_v28 = vld [vmem:[%s8751_s5 + $0x2e0] sm:$0xff]  ;;  %v5322_v48 = vld [vmem:[%s8751_s5 + $0x350] sm:$0xff] }
 0x908   :  { %4937 = vmatmul.msk.f32.gmra.mxu0 %vm1524_vm15, %v7415_v54  ;;  %4942 = vmatmul.msk.f32.gmra.mxu1 %vm1524_vm15, %v7415_v54 }
 0x909   :  { %3252 = vmatpush.msrb.mxu2 %v5264_v45  ;;  %3278 = vmatpush.msra.mxu3 %v5265_v5  ;;  %v5323_v45 = vld [vmem:[%s8751_s5 + $0x3d0] sm:$0xff]  ;;  %v5324_v5 = vld [vmem:[%s8751_s5 + $0x258] sm:$0xff] }
 0x90a   :  { %4927 = vmatmul.msk.f32.gmra.mxu2 %vm1524_vm15, %v7418_v40  ;;  %4932 = vmatmul.msk.f32.gmra.mxu3 %vm1524_vm15, %v7418_v40 }
 0x90b   :  { %3306 = vmatpush.msrb.mxu0 %v5266_v60  ;;  %3332 = vmatpush.msrb.mxu1 %v5267_v62  ;;  %v5325_v60 = vld [vmem:[%s8751_s5 + $0x2d8] sm:$0xff]  ;;  %v5326_v62 = vld [vmem:[%s8751_s5 + $0x348] sm:$0xff] }
 0x90c   :  { %3253 = vmatpush.msrb.mxu2 %v5268_v19  ;;  %3279 = vmatpush.msra.mxu3 %v5269_v46  ;;  %v5327_v19 = vld [vmem:[%s8751_s5 + $0x3c8] sm:$0xff]  ;;  %v5328_v46 = vld [vmem:[%s8751_s5 + $0x250] sm:$0xff] }
 0x90d   :  { %3307 = vmatpush.msrb.mxu0 %v5270_v47  ;;  %3333 = vmatpush.msrb.mxu1 %v5271_v51  ;;  %v5329_v47 = vld [vmem:[%s8751_s5 + $0x2d0] sm:$0xff]  ;;  %v5330_v51 = vld [vmem:[%s8751_s5 + $0x340] sm:$0xff] }
 0x90e   :  { %3254 = vmatpush.msrb.mxu2 %v5272_v50  ;;  %3280 = vmatpush.msra.mxu3 %v5273_v16  ;;  %v5331_v50 = vld [vmem:[%s8751_s5 + $0x3c0] sm:$0xff]  ;;  %v5332_v16 = vld [vmem:[%s8751_s5 + $0x248] sm:$0xff] }
 0x90f   :  { %3308 = vmatpush.msrb.mxu0 %v5274_v49  ;;  %3334 = vmatpush.msrb.mxu1 %v5275_v35  ;;  %v5333_v49 = vld [vmem:[%s8751_s5 + $0x2c8] sm:$0xff]  ;;  %v5334_v35 = vld [vmem:[%s8751_s5 + $0x338] sm:$0xff] }
 0x910   :  { %4938 = vmatmul.msk.f32.gmra.mxu0 %vm1524_vm15, %v7427_v9  ;;  %4943 = vmatmul.msk.f32.gmra.mxu1 %vm1524_vm15, %v7427_v9  ;;  %v5280_v9 = vld [vmem:[%s8751_s5 + $0x130] sm:$0xff] }
 0x911   :  { %3255 = vmatpush.msrb.mxu2 %v5276_v58  ;;  %3281 = vmatpush.msra.mxu3 %v5277_v52  ;;  %v5335_v58 = vld [vmem:[%s8751_s5 + $0x3b8] sm:$0xff]  ;;  %v5336_v52 = vld [vmem:[%s8751_s5 + $0x240] sm:$0xff] }
 0x912   :  { %4928 = vmatmul.msk.f32.gmra.mxu2 %vm1524_vm15, %v7435_v43  ;;  %4933 = vmatmul.msk.f32.gmra.mxu3 %vm1524_vm15, %v7435_v43  ;;  %v5285_v43 = vld [vmem:[%s8751_s5 + $0x1a8] sm:$0xff] }
 0x913   :  { %3309 = vmatpush.msrb.mxu0 %v5278_v12  ;;  %3335 = vmatpush.msrb.mxu1 %v5279_v34  ;;  %v5337_v12 = vld [vmem:[%s8751_s5 + $0x2c0] sm:$0xff]  ;;  %v5338_v34 = vld [vmem:[%s8751_s5 + $0x330] sm:$0xff] }
 0x914   :  { %3256 = vmatpush.msrb.mxu2 %v5280_v9  ;;  %3282 = vmatpush.msra.mxu3 %v5281_v38  ;;  %v5339_v9 = vld [vmem:[%s8751_s5 + $0x3b0] sm:$0xff]  ;;  %v5340_v38 = vld [vmem:[%s8751_s5 + $0x238] sm:$0xff] }
 0x915   :  { %3310 = vmatpush.msrb.mxu0 %v5282_v31  ;;  %3336 = vmatpush.msrb.mxu1 %v5283_v4  ;;  %v5341_v31 = vld [vmem:[%s8751_s5 + $0x2b8] sm:$0xff]  ;;  %v5342_v4 = vld [vmem:[%s8751_s5 + $0x328] sm:$0xff] }
 0x916   :  { %3257 = vmatpush.msrb.mxu2 %v5284_v15  ;;  %3283 = vmatpush.msra.mxu3 %v5285_v43  ;;  %v5343_v15 = vld [vmem:[%s8751_s5 + $0x3a8] sm:$0xff]  ;;  %v5344_v43 = vld [vmem:[%s8751_s5 + $0x230] sm:$0xff] }
 0x917   :  { %3311 = vmatpush.msrb.mxu0 %v5286_v6  ;;  %3337 = vmatpush.msrb.mxu1 %v5287_v26  ;;  %v5345_v6 = vld [vmem:[%s8751_s5 + $0x2b0] sm:$0xff]  ;;  %v5346_v26 = vld [vmem:[%s8751_s5 + $0x320] sm:$0xff] }
 0x918   :  { %4939 = vmatmul.msk.f32.gmra.mxu0 %vm1524_vm15, %v7446_v56  ;;  %4944 = vmatmul.msk.f32.gmra.mxu1 %vm1524_vm15, %v7446_v56  ;;  %v5292_v56 = vld [vmem:[%s8751_s5 + $0x118] sm:$0xff] }
 0x919   :  { %3258 = vmatpush.msrb.mxu2 %v5288_v37  ;;  %3284 = vmatpush.msra.mxu3 %v5289_v55  ;;  %v5347_v37 = vld [vmem:[%s8751_s5 + $0x3a0] sm:$0xff]  ;;  %v5348_v55 = vld [vmem:[%s8751_s5 + $0x228] sm:$0xff] }
 0x91a   :  { %4929 = vmatmul.msk.f32.gmra.mxu2 %vm1524_vm15, %v7452_v27  ;;  %4934 = vmatmul.msk.f32.gmra.mxu3 %vm1524_vm15, %v7452_v27  ;;  %v5297_v27 = vld [vmem:[%s8751_s5 + $0x190] sm:$0xff] }
 0x91b   :  { %3312 = vmatpush.msrb.mxu0 %v5290_v36  ;;  %3338 = vmatpush.msrb.mxu1 %v5291_v13  ;;  %v5349_v36 = vld [vmem:[%s8751_s5 + $0x2a8] sm:$0xff]  ;;  %v5350_v13 = vld [vmem:[%s8751_s5 + $0x318] sm:$0xff] }
 0x91c   :  { %3259 = vmatpush.msrb.mxu2 %v5292_v56  ;;  %3285 = vmatpush.msra.mxu3 %v5293_v0  ;;  %v5351_v56 = vld [vmem:[%s8751_s5 + $0x398] sm:$0xff]  ;;  %v5352_v0 = vld [vmem:[%s8751_s5 + $0x220] sm:$0xff] }
 0x91d   :  { %3313 = vmatpush.msrb.mxu0 %v5294_v7  ;;  %3339 = vmatpush.msrb.mxu1 %v5295_v33  ;;  %v5353_v7 = vld [vmem:[%s8751_s5 + $0x2a0] sm:$0xff]  ;;  %v5354_v33 = vld [vmem:[%s8751_s5 + $0x310] sm:$0xff] }
 0x91e   :  { %3260 = vmatpush.msrb.mxu2 %v5296_v11  ;;  %3286 = vmatpush.msra.mxu3 %v5297_v27  ;;  %v5355_v11 = vld [vmem:[%s8751_s5 + $0x390] sm:$0xff]  ;;  %v5356_v27 = vld [vmem:[%s8751_s5 + $0x218] sm:$0xff] }
 0x91f   :  { %3314 = vmatpush.msrb.mxu0 %v5298_v2  ;;  %3340 = vmatpush.msrb.mxu1 %v5299_v42  ;;  %v5357_v2 = vld [vmem:[%s8751_s5 + $0x298] sm:$0xff]  ;;  %v5358_v42 = vld [vmem:[%s8751_s5 + $0x308] sm:$0xff] }
 0x920   :  { %3261 = vmatpush.msrb.mxu2 %v5302_v8  ;;  %3287 = vmatpush.msra.mxu3 %v5303_v41  ;;  %v5361_v8 = vld [vmem:[%s8751_s5 + $0x290] sm:$0xff]  ;;  %v5362_v41 = vld [vmem:[%s8751_s5 + $0x300] sm:$0xff] }
 0x921   :  { %3438 = vmatpush.msra.mxu0 %v5300_v53  ;;  %3464 = vmatpush.msra.mxu1 %v5301_v20  ;;  %v5359_v53 = vld [vmem:[%s8751_s5 + $0x388] sm:$0xff]  ;;  %v5360_v20 = vld [vmem:[%s8751_s5 + $0x210] sm:$0xff] }
 0x922   :  { %3262 = vmatpush.msrb.mxu2 %v5306_v63  ;;  %3288 = vmatpush.msra.mxu3 %v5307_v3  ;;  %v5365_v63 = vld [vmem:[%s8751_s5 + $0x288] sm:$0xff]  ;;  %v5366_v3 = vld [vmem:[%s8751_s5 + $0x200] sm:$0xff] }
 0x923   :  { %3439 = vmatpush.msra.mxu0 %v5304_v21  ;;  %3465 = vmatpush.msra.mxu1 %v5305_v17  ;;  %v5363_v21 = vld [vmem:[%s8751_s5 + $0x380] sm:$0xff]  ;;  %v5364_v17 = vld [vmem:[%s8751_s5 + $0x208] sm:$0xff] }
 0x924   :  { %3367 = vmatpush.msra.mxu2 %v5308_v57  ;;  %3393 = vmatpush.msrb.mxu3 %v5309_v59  ;;  %v5367_v57 = vld [vmem:[%s8751_s5 + $0x280] sm:$0xff] }
 0x925   :  { %3440 = vmatpush.msra.mxu0 %v5310_v18  ;;  %3466 = vmatpush.msra.mxu1 %v5311_v1 }
 0x926   :  { %3368 = vmatpush.msra.mxu2 %v5312_v44  ;;  %3394 = vmatpush.msrb.mxu3 %v5313_v22 }
 0x927   :  { %3441 = vmatpush.msra.mxu0 %v5314_v23  ;;  %3467 = vmatpush.msra.mxu1 %v5315_v61 }
 0x928   :  { %3369 = vmatpush.msra.mxu2 %v5316_v30  ;;  %3395 = vmatpush.msrb.mxu3 %v5317_v10 }
 0x929   :  { %3442 = vmatpush.msra.mxu0 %v5318_v24  ;;  %3468 = vmatpush.msra.mxu1 %v5319_v29 }
 0x92a   :  { %3370 = vmatpush.msra.mxu2 %v5320_v39  ;;  %3396 = vmatpush.msrb.mxu3 %v5321_v28 }
 0x92b   :  { %3443 = vmatpush.msra.mxu0 %v5322_v48  ;;  %3469 = vmatpush.msra.mxu1 %v5323_v45  ;;  %v8773_v48 = vld [vmem:[#allocation111_spill] sm:$0xff] }
 0x92c   :  { %3371 = vmatpush.msra.mxu2 %v5324_v5  ;;  %3397 = vmatpush.msrb.mxu3 %v5325_v60 }
 0x92d   :  { %3444 = vmatpush.msra.mxu0 %v5326_v62  ;;  %3470 = vmatpush.msra.mxu1 %v5327_v19  ;;  %v8774_v62 = vld [vmem:[#allocation109_spill] sm:$0xff] }
 0x92e   :  { %3372 = vmatpush.msra.mxu2 %v5328_v46  ;;  %3398 = vmatpush.msrb.mxu3 %v5329_v47  ;;  %v8775_v46 = vld [vmem:[#allocation112_spill] sm:$0xff] }
 0x92f   :  { %3445 = vmatpush.msra.mxu0 %v5330_v51  ;;  %3471 = vmatpush.msra.mxu1 %v5331_v50 }
 0x930   :  { %3373 = vmatpush.msra.mxu2 %v5332_v16  ;;  %3399 = vmatpush.msrb.mxu3 %v5333_v49 }
 0x931   :  { %3446 = vmatpush.msra.mxu0 %v5334_v35  ;;  %3472 = vmatpush.msra.mxu1 %v5335_v58 }
 0x932   :  { %3374 = vmatpush.msra.mxu2 %v5336_v52  ;;  %3400 = vmatpush.msrb.mxu3 %v5337_v12 }
 0x933   :  { %3447 = vmatpush.msra.mxu0 %v5338_v34  ;;  %3473 = vmatpush.msra.mxu1 %v5339_v9 }
 0x934   :  { %3375 = vmatpush.msra.mxu2 %v5340_v38  ;;  %3401 = vmatpush.msrb.mxu3 %v5341_v31 }
 0x935   :  { %3448 = vmatpush.msra.mxu0 %v5342_v4  ;;  %3474 = vmatpush.msra.mxu1 %v5343_v15 }
 0x936   :  { %3376 = vmatpush.msra.mxu2 %v5344_v43  ;;  %3402 = vmatpush.msrb.mxu3 %v5345_v6 }
 0x937   :  { %3449 = vmatpush.msra.mxu0 %v5346_v26  ;;  %3475 = vmatpush.msra.mxu1 %v5347_v37 }
 0x938   :  { %3377 = vmatpush.msra.mxu2 %v5348_v55  ;;  %3403 = vmatpush.msrb.mxu3 %v5349_v36 }
 0x939   :  { %3450 = vmatpush.msra.mxu0 %v5350_v13  ;;  %3476 = vmatpush.msra.mxu1 %v5351_v56 }
 0x93a   :  { %3378 = vmatpush.msra.mxu2 %v5352_v0  ;;  %3404 = vmatpush.msrb.mxu3 %v5353_v7  ;;  %v5368_v0 = vld [vmem:[%s8751_s5 + $0x478] sm:$0xff] }
 0x93b   :  { %3451 = vmatpush.msra.mxu0 %v5354_v33  ;;  %3477 = vmatpush.msra.mxu1 %v5355_v11  ;;  %v5369_v7 = vld [vmem:[%s8751_s5 + $0x4f8] sm:$0xff] }
 0x93c   :  { %3379 = vmatpush.msra.mxu2 %v5356_v27  ;;  %3405 = vmatpush.msrb.mxu3 %v5357_v2  ;;  %v5370_v27 = vld [vmem:[%s8751_s5 + $0x470] sm:$0xff] }
 0x93d   :  { %3452 = vmatpush.msra.mxu0 %v5358_v42  ;;  %3478 = vmatpush.msra.mxu1 %v5359_v53  ;;  %v5371_v2 = vld [vmem:[%s8751_s5 + $0x4f0] sm:$0xff] }
 0x93e   :  { %3380 = vmatpush.msra.mxu2 %v5360_v20  ;;  %3406 = vmatpush.msrb.mxu3 %v5361_v8  ;;  %v5372_v20 = vld [vmem:[%s8751_s5 + $0x468] sm:$0xff] }
 0x93f   :  { %3453 = vmatpush.msra.mxu0 %v5362_v41  ;;  %3479 = vmatpush.msra.mxu1 %v5363_v21  ;;  %v5373_v8 = vld [vmem:[%s8751_s5 + $0x4e8] sm:$0xff] }
 0x940   :  { %3381 = vmatpush.msra.mxu2 %v5364_v17  ;;  %3407 = vmatpush.msrb.mxu3 %v5365_v63 }
 0x942   :  { %3382 = vmatpush.msra.mxu2 %v5366_v3  ;;  %3408 = vmatpush.msrb.mxu3 %v5367_v57  ;;  %v5374_v3 = vld [vmem:[%s8751_s5 + $0x460] sm:$0xff] }
 0x943   :  { %v5375_v57 = vld [vmem:[%s8751_s5 + $0x4e0] sm:$0xff] }
 0x975   :  { %v2752_v59 = vpop.f32.mrf.mxu0  ;;  %v2772_v18 = vpop.f32.mrf.mxu1 }
 0x97d   :  { %v2710_v1 = vpop.f32.mrf.mxu2  ;;  %v2730_v44 = vpop.f32.mrf.mxu3 }
 0x97e   :  { %v8337_v22 = vadd.f32 %v2752_v59, %v2710_v1  ;;  %v8339_v23 = vadd.f32 %v2772_v18, %v2730_v44  ;;  %v3160_v61 = vpop.f32.mrf.mxu0  ;;  %v3189_v30 = vpop.f32.mrf.mxu1  ;;  %v5376_v1 = vld [vmem:[%s8751_s5 + $0x458] sm:$0xff] }
 0x97f   :  { %v5377_v44 = vld [vmem:[%s8751_s5 + $0x4d8] sm:$0xff] }
 0x985   :  { %v3102_v10 = vpop.f32.mrf.mxu2  ;;  %v3131_v24 = vpop.f32.mrf.mxu3 }
 0x986   :  { %v3201_v29 = vmax.f32 %v3102_v10, %v3160_v61  ;;  %v3202_v39 = vmax.f32 %v3131_v24, %v3189_v30  ;;  %v3163_v5 = vpop.f32.mrf.mxu0  ;;  %v3192_v60 = vpop.f32.mrf.mxu1  ;;  %v5378_v10 = vld [vmem:[%s8751_s5 + $0x450] sm:$0xff] }
 0x987   :  { %v5379_v24 = vld [vmem:[%s8751_s5 + $0x4d0] sm:$0xff] }
 0x988   :  { %v3209_v28 = vmul.f32 %v3201_v29, %v7527_v25  ;;  %v3210_v45 = vmul.f32 %v3202_v39, %v8773_v48 }
 0x98a   :  { %v8344_v19 = vadd.f32 %v3209_v28, %v8774_v62  ;;  %v8347_v47 = vadd.f32 %v3210_v45, %v8775_v46  ;;  %v5380_v28 = vld [vmem:[%s8751_s5 + $0x448] sm:$0xff] }
 0x98b   :  { %v5381_v45 = vld [vmem:[%s8751_s5 + $0x4c8] sm:$0xff] }
 0x98c   :  { %3315 = vmatmul.f32.vlgmr.msrb.gmra.mxu0 %v8344_v19  ;;  %3341 = vmatmul.f32.vlgmr.msrb.gmra.mxu1 %v8347_v47  ;;  %v3231_v38 = vrot.slane %v8344_v19, 1  ;;  %v3234_v4 = vrot.slane %v8347_v47, 1  ;;  %v3422_v59 = vrot.slane %v8344_v19, 3  ;;  %v3425_v18 = vrot.slane %v8347_v47, 3 }
 0x98d   :  { %v3105_v51 = vpop.f32.mrf.mxu2  ;;  %v3134_v50 = vpop.f32.mrf.mxu3 }
 0x98e   :  { %v3203_v16 = vmax.f32 %v3105_v51, %v3163_v5  ;;  %v3204_v49 = vmax.f32 %v3134_v50, %v3192_v60  ;;  %v3166_v34 = vpop.f32.mrf.mxu0  ;;  %v3195_v9 = vpop.f32.mrf.mxu1  ;;  %v5382_v51 = vld [vmem:[%s8751_s5 + $0x440] sm:$0xff] }
 0x98f   :  { %v5383_v50 = vld [vmem:[%s8751_s5 + $0x4c0] sm:$0xff] }
 0x990   :  { %v3211_v35 = vmul.f32 %v3203_v16, %v7527_v25  ;;  %v3212_v58 = vmul.f32 %v3204_v49, %v8773_v48 }
 0x992   :  { %v8354_v52 = vadd.f32 %v3211_v35, %v8774_v62  ;;  %v8357_v12 = vadd.f32 %v3212_v58, %v8775_v46  ;;  %v3351_v35 = vrot.slane %v8344_v19, 2  ;;  %v3354_v58 = vrot.slane %v8347_v47, 2 }
 0x994   :  { %3318 = vmatmul.f32.gmra.mxu0 %v8354_v52  ;;  %3344 = vmatmul.f32.gmra.mxu1 %v8357_v12  ;;  %v3232_v31 = vrot.slane %v8354_v52, 1  ;;  %v3235_v15 = vrot.slane %v8357_v12, 1  ;;  %v3423_v17 = vrot.slane %v8354_v52, 3  ;;  %v3426_v63 = vrot.slane %v8357_v12, 3 }
 0x995   :  { %v3108_v43 = vpop.f32.mrf.mxu2  ;;  %v3137_v6 = vpop.f32.mrf.mxu3  ;;  %v3352_v5 = vrot.slane %v8354_v52, 2  ;;  %v3355_v60 = vrot.slane %v8357_v12, 2 }
 0x996   :  { %v3205_v26 = vmax.f32 %v3108_v43, %v3166_v34  ;;  %v3206_v37 = vmax.f32 %v3137_v6, %v3195_v9  ;;  %v3233_v55 = vsel %vm1275_vm4, %v3231_v38, %v3232_v31  ;;  %v3236_v36 = vsel %vm1275_vm4, %v3234_v4, %v3235_v15  ;;  %v5384_v34 = vld [vmem:[%s8751_s5 + $0x438] sm:$0xff]  ;;  %v5386_v4 = vld [vmem:[%s8751_s5 + $0x430] sm:$0xff] }
 0x997   :  { %3263 = vmatmul.f32.vlgmr.msrb.gmra.mxu2 %v3233_v55  ;;  %3289 = vmatmul.f32.vlgmr.msra.gmra.mxu3 %v3236_v36  ;;  %v3424_v61 = vsel %vm2038_vm1, %v3422_v59, %v3423_v17  ;;  %v3427_v30 = vsel %vm2038_vm1, %v3425_v18, %v3426_v63  ;;  %v5385_v9 = vld [vmem:[%s8751_s5 + $0x4b8] sm:$0xff]  ;;  %v3353_v38 = vsel %vm1365_vm5, %v3351_v35, %v3352_v5  ;;  %v5390_v55 = vld [vmem:[%s8751_s5 + $0x420] sm:$0xff]  ;;  %v5402_v59 = vld [vmem:[%s8757_s11 + $0xf0] sm:$0xff] }
 0x998   :  { %v3213_v13 = vmul.f32 %v3205_v26, %v7527_v25  ;;  %v3214_v56 = vmul.f32 %v3206_v37, %v8773_v48  ;;  %3515 = vmatpush.msrb.mxu2 %v5368_v0  ;;  %3541 = vmatpush.msra.mxu3 %v5369_v7  ;;  %v5388_v26 = vld [vmem:[%s8751_s5 + $0x428] sm:$0xff]  ;;  %v5391_v36 = vld [vmem:[%s8751_s5 + $0x4a0] sm:$0xff]  ;;  %v5392_v0 = vld [vmem:[%s8751_s5 + $0x418] sm:$0xff] }
 0x999   :  { %v5389_v37 = vld [vmem:[%s8751_s5 + $0x4a8] sm:$0xff]  ;;  %v5393_v7 = vld [vmem:[%s8751_s5 + $0x498] sm:$0xff]  ;;  %v5403_v18 = vld [vmem:[%s8757_s11 + $0x1f0] sm:$0xff] }
 0x99a   :  { %v8372_v33 = vadd.f32 %v3213_v13, %v8774_v62  ;;  %v8375_v11 = vadd.f32 %v3214_v56, %v8775_v46  ;;  %3516 = vmatpush.msrb.mxu2 %v5370_v27  ;;  %3542 = vmatpush.msra.mxu3 %v5371_v2  ;;  %v5394_v27 = vld [vmem:[%s8751_s5 + $0x410] sm:$0xff]  ;;  %v5412_v35 = vld [vmem:[%s8757_s11 + $0xc8] sm:$0xff] }
 0x99b   :  { %v5395_v2 = vld [vmem:[%s8751_s5 + $0x490] sm:$0xff] }
 0x99c   :  { %3321 = vmatmul.f32.gmra.mxu0 %v8372_v33  ;;  %3347 = vmatmul.f32.gmra.mxu1 %v8375_v11  ;;  %v3237_v42 = vrot.slane %v8372_v33, 1  ;;  %v3239_v53 = vrot.slane %v8375_v11, 1  ;;  %v3428_v29 = vrot.slane %v8372_v33, 3  ;;  %v3430_v39 = vrot.slane %v8375_v11, 3 }
 0x99d   :  { %3517 = vmatpush.msrb.mxu2 %v5372_v20  ;;  %3543 = vmatpush.msra.mxu3 %v5373_v8  ;;  %v3357_v43 = vrot.slane %v8372_v33, 2  ;;  %v3359_v6 = vrot.slane %v8375_v11, 2  ;;  %v5398_v20 = vld [vmem:[%s8751_s5 + $0x400] sm:$0xff] }
 0x99e   :  { %v3238_v41 = vsel %vm1275_vm4, %v3232_v31, %v3237_v42  ;;  %v3240_v21 = vsel %vm1275_vm4, %v3235_v15, %v3239_v53  ;;  %v3429_v16 = vsel %vm2038_vm1, %v3423_v17, %v3428_v29  ;;  %v3431_v49 = vsel %vm2038_vm1, %v3426_v63, %v3430_v39  ;;  %v5387_v15 = vld [vmem:[%s8751_s5 + $0x4b0] sm:$0xff]  ;;  %v5399_v8 = vld [vmem:[%s8751_s5 + $0x480] sm:$0xff]  ;;  %v3169_v63 = vpop.f32.mrf.mxu0 }
 0x99f   :  { %3266 = vmatmul.f32.gmra.mxu2 %v3238_v41  ;;  %3292 = vmatmul.f32.gmra.mxu3 %v3240_v21  ;;  %v3356_v31 = vsel %vm1365_vm5, %v3354_v58, %v3355_v60  ;;  %v3358_v13 = vsel %vm1365_vm5, %v3352_v5, %v3357_v43  ;;  %v3360_v56 = vsel %vm1365_vm5, %v3355_v60, %v3359_v6  ;;  %v5400_v41 = vld [vmem:[%s8757_s11 + $0xf8] sm:$0xff]  ;;  %v3496_v17 = vrot.slane %v8354_v52, 4  ;;  %v5405_v52 = vld [vmem:[%s8757_s11 + $0x1e8] sm:$0xff] }
 0x9a0   :  { %3518 = vmatpush.msrb.mxu2 %v5374_v3  ;;  %3544 = vmatpush.msra.mxu3 %v5375_v57  ;;  %v5401_v21 = vld [vmem:[%s8757_s11 + $0x1f8] sm:$0xff]  ;;  %v3198_v3 = vpop.f32.mrf.mxu1  ;;  %v3499_v57 = vrot.slane %v8357_v12, 4  ;;  %v3501_v5 = vrot.slane %v8372_v33, 4  ;;  %v5413_v58 = vld [vmem:[%s8757_s11 + $0x1c8] sm:$0xff] }
 0x9a2   :  { %3519 = vmatpush.msrb.mxu2 %v5376_v1  ;;  %3545 = vmatpush.msra.mxu3 %v5377_v44  ;;  %v3111_v1 = vpop.f32.mrf.mxu2  ;;  %v3140_v44 = vpop.f32.mrf.mxu3  ;;  %v3502_v33 = vsel %vm707_vm0, %v3496_v17, %v3501_v5 }
 0x9a4   :  { %3454 = vmatmul.f32.vlgmr.msra.gmra.mxu0 %v3424_v61  ;;  %3480 = vmatmul.f32.vlgmr.msra.gmra.mxu1 %v3427_v30  ;;  %v3495_v61 = vrot.slane %v8344_v19, 4  ;;  %v3498_v30 = vrot.slane %v8347_v47, 4  ;;  %v5408_v19 = vld [vmem:[%s8757_s11 + $0xd8] sm:$0xff] }
 0x9a5   :  { %3520 = vmatpush.msrb.mxu2 %v5378_v10  ;;  %3546 = vmatpush.msra.mxu3 %v5379_v24  ;;  %v5404_v10 = vld [vmem:[%s8757_s11 + $0xe8] sm:$0xff]  ;;  %v3207_v24 = vmax.f32 %v3111_v1, %v3169_v63  ;;  %v5409_v47 = vld [vmem:[%s8757_s11 + $0x1d8] sm:$0xff]  ;;  %v5437_v63 = vld [vmem:[%s8757_s11 + $0x250] sm:$0xff] }
 0x9a6   :  { %v3497_v12 = vsel %vm707_vm0, %v3495_v61, %v3496_v17  ;;  %v5436_v17 = vld [vmem:[%s8757_s11 + $0x258] sm:$0xff]  ;;  %v5442_v1 = vld [vmem:[%s8757_s11 + $0x228] sm:$0xff] }
 0x9a7   :  { %3269 = vmatmul.f32.gmra.mxu2 %v3237_v42  ;;  %3295 = vmatmul.f32.gmra.mxu3 %v3239_v53  ;;  %v5396_v42 = vld [vmem:[%s8751_s5 + $0x408] sm:$0xff]  ;;  %v3215_v60 = vmul.f32 %v3207_v24, %v7527_v25  ;;  %v5444_v61 = vld [vmem:[%s8757_s11 + $0x218] sm:$0xff] }
 0x9a8   :  { %3521 = vmatpush.msrb.mxu2 %v5380_v28  ;;  %3547 = vmatpush.msra.mxu3 %v5381_v45  ;;  %v5397_v53 = vld [vmem:[%s8751_s5 + $0x488] sm:$0xff]  ;;  %v5406_v28 = vld [vmem:[%s8757_s11 + $0xe0] sm:$0xff] }
 0x9a9   :  { %v5407_v45 = vld [vmem:[%s8757_s11 + $0x1e0] sm:$0xff]  ;;  %v3223_v25 = vadd.f32 %v3215_v60, %v8774_v62 }
 0x9aa   :  { %3522 = vmatpush.msrb.mxu2 %v5382_v51  ;;  %3548 = vmatpush.msra.mxu3 %v5383_v50  ;;  %v3503_v50 = vrot.slane %v8375_v11, 4 }
 0x9ab   :  { %v3505_v62 = vrot.slane %v3223_v25, 4 }
 0x9ac   :  { %3457 = vmatmul.f32.gmra.mxu0 %v3429_v16  ;;  %3483 = vmatmul.f32.gmra.mxu1 %v3431_v49  ;;  %v5410_v16 = vld [vmem:[%s8757_s11 + $0xd0] sm:$0xff]  ;;  %v3504_v11 = vsel %vm707_vm0, %v3499_v57, %v3503_v50 }
 0x9ad   :  { %3523 = vmatpush.msrb.mxu2 %v5384_v34  ;;  %3549 = vmatpush.msra.mxu3 %v5385_v9  ;;  %v5411_v49 = vld [vmem:[%s8757_s11 + $0x1d0] sm:$0xff]  ;;  %v5414_v34 = vld [vmem:[%s8757_s11 + $0xc0] sm:$0xff] }
 0x9ae   :  { %v5415_v9 = vld [vmem:[%s8757_s11 + $0x1c0] sm:$0xff] }
 0x9af   :  { %3383 = vmatmul.f32.vlgmr.msra.gmra.mxu2 %v3353_v38  ;;  %3409 = vmatmul.f32.vlgmr.msrb.gmra.mxu3 %v3356_v31  ;;  %v5416_v38 = vld [vmem:[%s8757_s11 + $0xb8] sm:$0xff] }
 0x9b0   :  { %3524 = vmatpush.msrb.mxu2 %v5386_v4  ;;  %3550 = vmatpush.msra.mxu3 %v5387_v15  ;;  %v5417_v31 = vld [vmem:[%s8757_s11 + $0x1b8] sm:$0xff]  ;;  %v5419_v15 = vld [vmem:[%s8757_s11 + $0x1b0] sm:$0xff] }
 0x9b2   :  { %3525 = vmatpush.msrb.mxu2 %v5388_v26  ;;  %3551 = vmatpush.msra.mxu3 %v5389_v37  ;;  %v3506_v26 = vsel %vm707_vm0, %v3501_v5, %v3505_v62 }
 0x9b4   :  { %3460 = vmatmul.f32.gmra.mxu0 %v3428_v29  ;;  %3486 = vmatmul.f32.gmra.mxu1 %v3430_v39  ;;  %v3208_v29 = vmax.f32 %v3140_v44, %v3198_v3  ;;  %v3500_v39 = vsel %vm707_vm0, %v3498_v30, %v3499_v57  ;;  %v5438_v3 = vld [vmem:[%s8757_s11 + $0x248] sm:$0xff]  ;;  %v5439_v57 = vld [vmem:[%s8757_s11 + $0x240] sm:$0xff]  ;;  %v5445_v30 = vld [vmem:[%s8757_s11 + $0x210] sm:$0xff] }
 0x9b5   :  { %3526 = vmatpush.msrb.mxu2 %v5390_v55  ;;  %3552 = vmatpush.msra.mxu3 %v5391_v36  ;;  %v5422_v55 = vld [vmem:[%s8757_s11 + $0xa0] sm:$0xff] }
 0x9b6   :  { %v3216_v51 = vmul.f32 %v3208_v29, %v8773_v48  ;;  %v5423_v36 = vld [vmem:[%s8757_s11 + $0x1a0] sm:$0xff] }
 0x9b7   :  { %3386 = vmatmul.f32.gmra.mxu2 %v3358_v13  ;;  %3412 = vmatmul.f32.gmra.mxu3 %v3360_v56  ;;  %v5424_v13 = vld [vmem:[%s8757_s11 + $0x98] sm:$0xff]  ;;  %v5443_v44 = vld [vmem:[%s8757_s11 + $0x220] sm:$0xff] }
 0x9b8   :  { %3527 = vmatpush.msrb.mxu2 %v5392_v0  ;;  %3553 = vmatpush.msra.mxu3 %v5393_v7  ;;  %v3224_v48 = vadd.f32 %v3216_v51, %v8775_v46  ;;  %v5418_v46 = vld [vmem:[%s8757_s11 + $0xb0] sm:$0xff]  ;;  %v5425_v56 = vld [vmem:[%s8757_s11 + $0x198] sm:$0xff] }
 0x9b9   :  { %v5426_v0 = vld [vmem:[%s8757_s11 + $0x90] sm:$0xff] }
 0x9ba   :  { %3528 = vmatpush.msrb.mxu2 %v5394_v27  ;;  %3554 = vmatpush.msra.mxu3 %v5395_v2  ;;  %v3507_v4 = vrot.slane %v3224_v48, 4  ;;  %v5427_v7 = vld [vmem:[%s8757_s11 + $0x190] sm:$0xff]  ;;  %v5428_v27 = vld [vmem:[%s8757_s11 + $0x88] sm:$0xff] }
 0x9bb   :  { %v5429_v2 = vld [vmem:[%s8757_s11 + $0x188] sm:$0xff] }
 0x9bc   :  { %3529 = vmatpush.msrb.mxu2 %v5396_v42  ;;  %3555 = vmatpush.msra.mxu3 %v5397_v53  ;;  %v3508_v37 = vsel %vm707_vm0, %v3503_v50, %v3507_v4  ;;  %v5430_v42 = vld [vmem:[%s8757_s11 + $0x80] sm:$0xff] }
 0x9bd   :  { %v5431_v53 = vld [vmem:[%s8757_s11 + $0x180] sm:$0xff] }
 0x9be   :  { %3530 = vmatpush.msrb.mxu2 %v5398_v20  ;;  %3556 = vmatpush.msra.mxu3 %v5399_v8  ;;  %v5432_v20 = vld [vmem:[%s8757_s11 + $0x278] sm:$0xff]  ;;  %v5433_v8 = vld [vmem:[%s8757_s11 + $0x270] sm:$0xff] }
 0x9bf   :  { %3389 = vmatmul.f32.gmra.mxu2 %v3357_v43  ;;  %3415 = vmatmul.f32.gmra.mxu3 %v3359_v6  ;;  %v5420_v43 = vld [vmem:[%s8757_s11 + $0xa8] sm:$0xff] }
 0x9c0   :  { %3649 = vmatpush.msra.mxu2 %v5400_v41  ;;  %3714 = vmatpush.msrb.mxu3 %v5401_v21  ;;  %v5421_v6 = vld [vmem:[%s8757_s11 + $0x1a8] sm:$0xff]  ;;  %v5435_v21 = vld [vmem:[%s8757_s11 + $0x260] sm:$0xff] }
 0x9c1   :  { %v5434_v41 = vld [vmem:[%s8757_s11 + $0x268] sm:$0xff] }
 0x9c2   :  { %3650 = vmatpush.msra.mxu2 %v5402_v59  ;;  %3715 = vmatpush.msrb.mxu3 %v5403_v18  ;;  %v5440_v59 = vld [vmem:[%s8757_s11 + $0x238] sm:$0xff]  ;;  %v5441_v18 = vld [vmem:[%s8757_s11 + $0x230] sm:$0xff] }
 0x9c4   :  { %3651 = vmatpush.msra.mxu2 %v5404_v10  ;;  %3716 = vmatpush.msrb.mxu3 %v5405_v52  ;;  %v5446_v10 = vld [vmem:[%s8757_s11 + $0x208] sm:$0xff]  ;;  %v5447_v52 = vld [vmem:[%s8757_s11 + $0x200] sm:$0xff] }
 0x9c6   :  { %3652 = vmatpush.msra.mxu2 %v5406_v28  ;;  %3717 = vmatpush.msrb.mxu3 %v5407_v45 }
 0x9c7   :  { %3531 = vmatmul.f32.vlgmr.msrb.gmra.mxu2 %v3497_v12  ;;  %3557 = vmatmul.f32.vlgmr.msra.gmra.mxu3 %v3500_v39 }
 0x9c8   :  { %3653 = vmatpush.msra.mxu2 %v5408_v19  ;;  %3718 = vmatpush.msrb.mxu3 %v5409_v47 }
 0x9ca   :  { %3654 = vmatpush.msra.mxu2 %v5410_v16  ;;  %3719 = vmatpush.msrb.mxu3 %v5411_v49 }
 0x9cc   :  { %3655 = vmatpush.msra.mxu2 %v5412_v35  ;;  %3720 = vmatpush.msrb.mxu3 %v5413_v58 }
 0x9ce   :  { %3656 = vmatpush.msra.mxu2 %v5414_v34  ;;  %3721 = vmatpush.msrb.mxu3 %v5415_v9 }
 0x9cf   :  { %3534 = vmatmul.f32.gmra.mxu2 %v3502_v33  ;;  %3560 = vmatmul.f32.gmra.mxu3 %v3504_v11 }
 0x9d0   :  { %3657 = vmatpush.msra.mxu2 %v5416_v38  ;;  %3722 = vmatpush.msrb.mxu3 %v5417_v31 }
 0x9d2   :  { %3658 = vmatpush.msra.mxu2 %v5418_v46  ;;  %3723 = vmatpush.msrb.mxu3 %v5419_v15 }
 0x9d4   :  { %3659 = vmatpush.msra.mxu2 %v5420_v43  ;;  %3724 = vmatpush.msrb.mxu3 %v5421_v6 }
 0x9d6   :  { %3660 = vmatpush.msra.mxu2 %v5422_v55  ;;  %3725 = vmatpush.msrb.mxu3 %v5423_v36 }
 0x9d7   :  { %3537 = vmatmul.f32.gmra.mxu2 %v3506_v26  ;;  %3563 = vmatmul.f32.gmra.mxu3 %v3508_v37 }
 0x9d8   :  { %3661 = vmatpush.msra.mxu2 %v5424_v13  ;;  %3726 = vmatpush.msrb.mxu3 %v5425_v56 }
 0x9da   :  { %3662 = vmatpush.msra.mxu2 %v5426_v0  ;;  %3727 = vmatpush.msrb.mxu3 %v5427_v7 }
 0x9dc   :  { %3663 = vmatpush.msra.mxu2 %v5428_v27  ;;  %3728 = vmatpush.msrb.mxu3 %v5429_v2 }
 0x9de   :  { %3664 = vmatpush.msra.mxu2 %v5430_v42  ;;  %3729 = vmatpush.msrb.mxu3 %v5431_v53 }
 0x9e0   :  { %3737 = vmatpush.msrb.mxu2 %v5432_v20 }
 0x9e2   :  { %3738 = vmatpush.msrb.mxu2 %v5433_v8 }
 0x9e4   :  { %3739 = vmatpush.msrb.mxu2 %v5434_v41 }
 0x9e6   :  { %3740 = vmatpush.msrb.mxu2 %v5435_v21 }
 0x9e8   :  { %3741 = vmatpush.msrb.mxu2 %v5436_v17 }
 0x9ea   :  { %3742 = vmatpush.msrb.mxu2 %v5437_v63 }
 0x9ec   :  { %3743 = vmatpush.msrb.mxu2 %v5438_v3 }
 0x9ee   :  { %3744 = vmatpush.msrb.mxu2 %v5439_v57 }
 0x9f0   :  { %3745 = vmatpush.msrb.mxu2 %v5440_v59 }
 0x9f2   :  { %3746 = vmatpush.msrb.mxu2 %v5441_v18  ;;  %v5448_v18 = vld [vmem:[#allocation8] ss:$0 sm:$0xff] }
 0x9f4   :  { %3747 = vmatpush.msrb.mxu2 %v5442_v1 }
 0x9f6   :  { %3748 = vmatpush.msrb.mxu2 %v5443_v44 }
 0x9f8   :  { %3749 = vmatpush.msrb.mxu2 %v5444_v61 }
 0x9fa   :  { %3750 = vmatpush.msrb.mxu2 %v5445_v30 }
 0x9fc   :  { %3751 = vmatpush.msrb.mxu2 %v5446_v10 }
 0x9fe   :  { %3752 = vmatpush.msrb.mxu2 %v5447_v52 }
 0xa09   :  { %v3316_v28 = vpop.f32.mrf.mxu0  ;;  %v3342_v45 = vpop.f32.mrf.mxu1 }
 0xa11   :  { %v3319_v5 = vpop.f32.mrf.mxu0  ;;  %v3345_v60 = vpop.f32.mrf.mxu1 }
 0xa19   :  { %v3322_v16 = vpop.f32.mrf.mxu0  ;;  %v3348_v49 = vpop.f32.mrf.mxu1 }
 0xa1a   :  { %v3264_v12 = vpop.f32.mrf.mxu2  ;;  %v3290_v24 = vpop.f32.mrf.mxu3 }
 0xa1b   :  { %v3291_v34 = vadd.f32 %v3290_v24, %v3264_v12 }
 0xa1d   :  { %v3317_v38 = vadd.f32 %v3316_v28, %v3291_v34  ;;  %v5451_v34 = vld [vmem:[%s8757_s11 + $0x70] sm:$0xff] }
 0xa1f   :  { %v3343_v26 = vadd.f32 %v3342_v45, %v3317_v38  ;;  %v5453_v38 = vld [vmem:[%s8757_s11 + $0x68] sm:$0xff] }
 0xa21   :  { %v3455_v33 = vpop.f32.mrf.mxu0  ;;  %v3481_v25 = vpop.f32.mrf.mxu1 }
 0xa22   :  { %v3267_v29 = vpop.f32.mrf.mxu2  ;;  %v3293_v39 = vpop.f32.mrf.mxu3  ;;  %v3482_v56 = vadd.f32 %v3481_v25, %v3455_v33 }
 0xa23   :  { %v3294_v9 = vadd.f32 %v3293_v39, %v3267_v29 }
 0xa25   :  { %v3320_v31 = vadd.f32 %v3319_v5, %v3294_v9  ;;  %v5452_v9 = vld [vmem:[%s8757_s11 + $0x170] sm:$0xff] }
 0xa27   :  { %v3346_v55 = vadd.f32 %v3345_v60, %v3320_v31  ;;  %v5454_v31 = vld [vmem:[%s8757_s11 + $0x168] sm:$0xff] }
 0xa29   :  { %v3458_v43 = vpop.f32.mrf.mxu0  ;;  %v3484_v6 = vpop.f32.mrf.mxu1 }
 0xa2a   :  { %v3270_v19 = vpop.f32.mrf.mxu2  ;;  %v3296_v47 = vpop.f32.mrf.mxu3  ;;  %v3485_v7 = vadd.f32 %v3484_v6, %v3458_v43  ;;  %v5459_v43 = vld [vmem:[%s8757_s11 + $0x50] sm:$0xff] }
 0xa2b   :  { %v3297_v37 = vadd.f32 %v3296_v47, %v3270_v19  ;;  %v5460_v6 = vld [vmem:[%s8757_s11 + $0x150] sm:$0xff] }
 0xa2d   :  { %v3323_v27 = vadd.f32 %v3322_v16, %v3297_v37  ;;  %v5463_v37 = vld [vmem:[%s8757_s11 + $0x40] sm:$0xff] }
 0xa2f   :  { %v3349_v17 = vadd.f32 %v3348_v49, %v3323_v27  ;;  %v5471_v27 = vld [vmem:[%s8757_s11 + $0x20] sm:$0xff] }
 0xa31   :  { %v3461_v3 = vpop.f32.mrf.mxu0  ;;  %v3487_v57 = vpop.f32.mrf.mxu1 }
 0xa32   :  { %v3384_v51 = vpop.f32.mrf.mxu2  ;;  %v3410_v50 = vpop.f32.mrf.mxu3  ;;  %v3488_v61 = vadd.f32 %v3487_v57, %v3461_v3  ;;  %v5481_v3 = vld [vmem:[%s8757_s11 + $0x2f8] sm:$0xff] }
 0xa33   :  { %v3411_v62 = vadd.f32 %v3410_v50, %v3384_v51  ;;  %v5482_v57 = vld [vmem:[%s8757_s11 + $0x378] sm:$0xff] }
 0xa35   :  { %v3419_v36 = vadd.f32 %v3411_v62, %v3343_v26  ;;  %v5455_v62 = vld [vmem:[%s8757_s11 + $0x60] sm:$0xff]  ;;  %v5461_v26 = vld [vmem:[%s8757_s11 + $0x48] sm:$0xff] }
 0xa37   :  { %v3490_v2 = vadd.f32 %v3482_v56, %v3419_v36  ;;  %v5466_v36 = vld [vmem:[%s8757_s11 + $0x138] sm:$0xff]  ;;  %v5468_v56 = vld [vmem:[%s8757_s11 + $0x130] sm:$0xff] }
 0xa3a   :  { %v3387_v35 = vpop.f32.mrf.mxu2  ;;  %v3413_v58 = vpop.f32.mrf.mxu3 }
 0xa3b   :  { %v3414_v15 = vadd.f32 %v3413_v58, %v3387_v35 }
 0xa3d   :  { %v3420_v13 = vadd.f32 %v3414_v15, %v3346_v55  ;;  %v5458_v15 = vld [vmem:[%s8757_s11 + $0x158] sm:$0xff] }
 0xa3e   :  { %v5465_v55 = vld [vmem:[%s8757_s11 + $0x38] sm:$0xff] }
 0xa3f   :  { %v3491_v8 = vadd.f32 %v3485_v7, %v3420_v13  ;;  %v5467_v13 = vld [vmem:[%s8757_s11 + $0x30] sm:$0xff]  ;;  %v5470_v7 = vld [vmem:[%s8757_s11 + $0x128] sm:$0xff] }
 0xa42   :  { %v3390_v48 = vpop.f32.mrf.mxu2  ;;  %v3416_v11 = vpop.f32.mrf.mxu3 }
 0xa43   :  { %v3417_v20 = vadd.f32 %v3416_v11, %v3390_v48  ;;  %v5449_v48 = vld [vmem:[%s8757_s11 + $0x78] sm:$0xff] }
 0xa44   :  { %v5450_v11 = vld [vmem:[%s8757_s11 + $0x178] sm:$0xff] }
 0xa45   :  { %v3421_v59 = vadd.f32 %v3417_v20, %v3349_v17  ;;  %v5475_v20 = vld [vmem:[%s8757_s11 + $0x10] sm:$0xff]  ;;  %v5479_v17 = vld [vmem:[%s8757_s11] sm:$0xff] }
 0xa47   :  { %v3492_v52 = vadd.f32 %v3488_v61, %v3421_v59  ;;  %v5483_v59 = vld [vmem:[%s8757_s11 + $0x2f0] sm:$0xff]  ;;  %v5487_v61 = vld [vmem:[%s8757_s11 + $0x2e0] sm:$0xff] }
 0xa4a   :  { %v3532_v4 = vpop.f32.mrf.mxu2  ;;  %v3558_v46 = vpop.f32.mrf.mxu3 }
 0xa4b   :  { %v3559_v0 = vadd.f32 %v3558_v46, %v3532_v4  ;;  %v5456_v4 = vld [vmem:[%s8757_s11 + $0x160] sm:$0xff]  ;;  %v5457_v46 = vld [vmem:[%s8757_s11 + $0x58] sm:$0xff] }
 0xa4d   :  { %v3567_v21 = vadd.f32 %v3559_v0, %v3490_v2  ;;  %v5469_v0 = vld [vmem:[%s8757_s11 + $0x28] sm:$0xff]  ;;  %v5472_v2 = vld [vmem:[%s8757_s11 + $0x120] sm:$0xff] }
 0xa4f   :  { %v3570_v44 = vadd.f32 %v5448_v18, %v3567_v21  ;;  %v5478_v21 = vld [vmem:[%s8757_s11 + $0x108] sm:$0xff] }
 0xa51   :  { %v3576_v29 = vmin.f32 %v3570_v44, 0.0  ;;  %vm3573_vm15 = vcmp.gt.f32.partialorder %v3570_v44, 0.0 }
 0xa52   :  { %v3535_v42 = vpop.f32.mrf.mxu2  ;;  %v3561_v53 = vpop.f32.mrf.mxu3 }
 0xa53   :  { %v3562_v41 = vadd.f32 %v3561_v53, %v3535_v42  ;;  %v3579_v19 = vmul.f32 1.442695, %v3576_v29  ;;  %v5473_v42 = vld [vmem:[%s8757_s11 + $0x18] sm:$0xff]  ;;  %v5493_v29 = vld [vmem:[%s8757_s11 + $0x2c8] sm:$0xff] }
 0xa54   :  { %v5474_v53 = vld [vmem:[%s8757_s11 + $0x118] sm:$0xff] }
 0xa55   :  { %v3568_v63 = vadd.f32 %v3562_v41, %v3491_v8  ;;  %v5476_v8 = vld [vmem:[%s8757_s11 + $0x110] sm:$0xff]  ;;  %v5477_v41 = vld [vmem:[%s8757_s11 + $0x8] sm:$0xff] }
 0xa57   :  { %v3571_v1 = vadd.f32 %v5448_v18, %v3568_v63  ;;  %v5480_v63 = vld [vmem:[%s8757_s11 + $0x100] sm:$0xff] }
 0xa59   :  { %v3577_v24 = vmin.f32 %v3571_v1, 0.0  ;;  %vm3574_vm5 = vcmp.gt.f32.partialorder %v3571_v1, 0.0 }
 0xa5a   :  { %v3538_v30 = vpop.f32.mrf.mxu2  ;;  %v3564_v10 = vpop.f32.mrf.mxu3 }
 0xa5b   :  { %v3565_v12 = vadd.f32 %v3564_v10, %v3538_v30  ;;  %v3581_v45 = vmul.f32 1.442695, %v3577_v24  ;;  %v5488_v30 = vld [vmem:[%s8757_s11 + $0x360] sm:$0xff]  ;;  %v5489_v10 = vld [vmem:[%s8757_s11 + $0x2d8] sm:$0xff]  ;;  %v5492_v24 = vld [vmem:[%s8757_s11 + $0x350] sm:$0xff] }
 0xa5d   :  { %v3569_v39 = vadd.f32 %v3565_v12, %v3492_v52  ;;  %5214 = vpow2.f32 %v3581_v45  ;;  %v5490_v52 = vld [vmem:[%s8757_s11 + $0x358] sm:$0xff]  ;;  %v5491_v12 = vld [vmem:[%s8757_s11 + $0x2d0] sm:$0xff]  ;;  %v5496_v45 = vld [vmem:[%s8757_s11 + $0x340] sm:$0xff] }
 0xa5e   :  { %5216 = vpow2.f32 %v3579_v19  ;;  %v5497_v19 = vld [vmem:[%s8757_s11 + $0x2b8] sm:$0xff] }
 0xa5f   :  { %v3572_v28 = vadd.f32 %v5448_v18, %v3569_v39  ;;  %v5484_v18 = vld [vmem:[%s8757_s11 + $0x370] sm:$0xff]  ;;  %v5494_v39 = vld [vmem:[%s8757_s11 + $0x348] sm:$0xff] }
 0xa61   :  { %v3578_v47 = vmin.f32 %v3572_v28, 0.0  ;;  %vm3575_vm4 = vcmp.gt.f32.partialorder %v3572_v28, 0.0 }
 0xa63   :  { %v3583_v5 = vmul.f32 1.442695, %v3578_v47  ;;  %v5215_v60 = vpop.eup %5214  ;;  %v5498_v47 = vld [vmem:[%s8757_s11 + $0x338] sm:$0xff] }
 0xa64   :  { %v5217_v51 = vpop.eup %5216  ;;  %v4946_v49 = vadd.f32 -1.0, %v5215_v60  ;;  %v5500_v60 = vld [vmem:[%s8757_s11 + $0x330] sm:$0xff] }
 0xa65   :  { %5218 = vpow2.f32 %v3583_v5  ;;  %v4945_v58 = vadd.f32 -1.0, %v5217_v51  ;;  %v5499_v5 = vld [vmem:[%s8757_s11 + $0x2b0] sm:$0xff]  ;;  %v5501_v51 = vld [vmem:[%s8757_s11 + $0x2a8] sm:$0xff] }
 0xa66   :  { %v3589_v33 = vsel %vm3574_vm5, %v3571_v1, %v4946_v49  ;;  %v5485_v1 = vld [vmem:[%s8757_s11 + $0x2e8] sm:$0xff]  ;;  %v5504_v49 = vld [vmem:[%s8757_s11 + $0x320] sm:$0xff] }
 0xa67   :  { %v3588_v25 = vsel %vm3573_vm15, %v3570_v44, %v4945_v58  ;;  %v5486_v44 = vld [vmem:[%s8757_s11 + $0x368] sm:$0xff]  ;;  %v5506_v58 = vld [vmem:[%s8757_s11 + $0x318] sm:$0xff] }
 0xa6b   :  { %v5219_v50 = vpop.eup %5218 }
 0xa6c   :  { %v4947_v16 = vadd.f32 -1.0, %v5219_v50  ;;  %v5502_v50 = vld [vmem:[%s8757_s11 + $0x328] sm:$0xff] }
 0xa6e   :  { %v3590_v35 = vsel %vm3575_vm4, %v3572_v28, %v4947_v16  ;;  %v5495_v28 = vld [vmem:[%s8757_s11 + $0x2c0] sm:$0xff] }
 0xa6f   :  { %4948 = vmatpush.msk.msrb.mxu0 %vm2038_vm1, %v3590_v35  ;;  %4951 = vmatpush.msk.msrb.mxu1 %vm2038_vm1, %v3590_v35  ;;  %v5503_v16 = vld [vmem:[%s8757_s11 + $0x2a0] sm:$0xff]  ;;  %v5505_v35 = vld [vmem:[%s8757_s11 + $0x298] sm:$0xff] }
 0xa71   :  { %3608 = vmatpush.msrb.mxu0 %v3589_v33  ;;  %3631 = vmatpush.msrb.mxu1 %v3589_v33  ;;  %v5507_v33 = vld [vmem:[%s8757_s11 + $0x290] sm:$0xff] }
 0xa73   :  { %3609 = vmatpush.msrb.mxu0 %v3588_v25  ;;  %3632 = vmatpush.msrb.mxu1 %v3588_v25  ;;  %v5508_v25 = vld [vmem:[%s8757_s11 + $0x310] sm:$0xff] }
 0xa74   :  { %4949 = vmatmul.msk.f32.vlgmr.msrb.gmra.mxu0 %vm2243_vm11, %v7399_v32  ;;  %4952 = vmatmul.msk.f32.vlgmr.msrb.gmra.mxu1 %vm2243_vm11, %v7393_v14 }
 0xa75   :  { %3669 = vmatpush.msra.mxu0 %v5449_v48  ;;  %3691 = vmatpush.msra.mxu1 %v5450_v11  ;;  %v5509_v48 = vld [vmem:[%s8757_s11 + $0x288] sm:$0xff] }
 0xa76   :  { %v5510_v11 = vld [vmem:[%s8757_s11 + $0x308] sm:$0xff] }
 0xa77   :  { %3670 = vmatpush.msra.mxu0 %v5451_v34  ;;  %3692 = vmatpush.msra.mxu1 %v5452_v9  ;;  %v5511_v34 = vld [vmem:[%s8757_s11 + $0x280] sm:$0xff] }
 0xa78   :  { %v5512_v9 = vld [vmem:[%s8757_s11 + $0x300] sm:$0xff] }
 0xa79   :  { %3671 = vmatpush.msra.mxu0 %v5453_v38  ;;  %3693 = vmatpush.msra.mxu1 %v5454_v31 }
 0xa7b   :  { %3672 = vmatpush.msra.mxu0 %v5455_v62  ;;  %3694 = vmatpush.msra.mxu1 %v5456_v4  ;;  %v5513_v4 = vld [vmem:[#allocation8 + $0x1] ss:$0 sm:$0xff] }
 0xa7c   :  { %4950 = vmatmul.msk.f32.gmra.mxu0 %vm2243_vm11, %v7418_v40  ;;  %4953 = vmatmul.msk.f32.gmra.mxu1 %vm2243_vm11, %v7415_v54  ;;  %v5462_v40 = vld [vmem:[%s8757_s11 + $0x148] sm:$0xff]  ;;  %v5464_v54 = vld [vmem:[%s8757_s11 + $0x140] sm:$0xff] }
 0xa7d   :  { %3673 = vmatpush.msra.mxu0 %v5457_v46  ;;  %3695 = vmatpush.msra.mxu1 %v5458_v15  ;;  %v5514_v15 = vld [vmem:[#allocation8 + $0x2] ss:$0 sm:$0xff] }
 0xa7f   :  { %3674 = vmatpush.msra.mxu0 %v5459_v43  ;;  %3696 = vmatpush.msra.mxu1 %v5460_v6 }
 0xa81   :  { %3675 = vmatpush.msra.mxu0 %v5461_v26  ;;  %3697 = vmatpush.msra.mxu1 %v5462_v40 }
 0xa83   :  { %3676 = vmatpush.msra.mxu0 %v5463_v37  ;;  %3698 = vmatpush.msra.mxu1 %v5464_v54 }
 0xa85   :  { %3677 = vmatpush.msra.mxu0 %v5465_v55  ;;  %3699 = vmatpush.msra.mxu1 %v5466_v36  ;;  %v5515_v55 = vld [vmem:[#allocation26 + $0x70] sm:$0xff] }
 0xa87   :  { %3678 = vmatpush.msra.mxu0 %v5467_v13  ;;  %3700 = vmatpush.msra.mxu1 %v5468_v56  ;;  %v5516_v13 = vld [vmem:[#allocation28 + $0x78] sm:$0xff] }
 0xa89   :  { %3679 = vmatpush.msra.mxu0 %v5469_v0  ;;  %3701 = vmatpush.msra.mxu1 %v5470_v7  ;;  %v5517_v0 = vld [vmem:[#allocation26 + $0x78] sm:$0xff]  ;;  %v5518_v7 = vld [vmem:[#allocation26 + $0x60] sm:$0xff] }
 0xa8b   :  { %3680 = vmatpush.msra.mxu0 %v5471_v27  ;;  %3702 = vmatpush.msra.mxu1 %v5472_v2  ;;  %v5519_v27 = vld [vmem:[#allocation28 + $0x68] sm:$0xff] }
 0xa8d   :  { %3681 = vmatpush.msra.mxu0 %v5473_v42  ;;  %3703 = vmatpush.msra.mxu1 %v5474_v53  ;;  %v5520_v42 = vld [vmem:[#allocation26 + $0x68] sm:$0xff]  ;;  %v5521_v53 = vld [vmem:[#allocation26 + $0x50] sm:$0xff] }
 0xa8f   :  { %3682 = vmatpush.msra.mxu0 %v5475_v20  ;;  %3704 = vmatpush.msra.mxu1 %v5476_v8  ;;  %v5522_v8 = vld [vmem:[#allocation28 + $0x58] sm:$0xff] }
 0xa91   :  { %3683 = vmatpush.msra.mxu0 %v5477_v41  ;;  %3705 = vmatpush.msra.mxu1 %v5478_v21 }
 0xa93   :  { %3684 = vmatpush.msra.mxu0 %v5479_v17  ;;  %3706 = vmatpush.msra.mxu1 %v5480_v63 }
 0xa95   :  { %3763 = vmatpush.msrb.mxu0 %v5481_v3  ;;  %3788 = vmatpush.msrb.mxu1 %v5482_v57  ;;  %v5523_v3 = vld [vmem:[#allocation26 + $0x58] sm:$0xff]  ;;  %v5524_v57 = vld [vmem:[#allocation26 + $0x40] sm:$0xff] }
 0xa97   :  { %3764 = vmatpush.msrb.mxu0 %v5483_v59  ;;  %3789 = vmatpush.msrb.mxu1 %v5484_v18  ;;  %v5525_v59 = vld [vmem:[#allocation28 + $0x48] sm:$0xff] }
 0xa99   :  { %3765 = vmatpush.msrb.mxu0 %v5485_v1  ;;  %3790 = vmatpush.msrb.mxu1 %v5486_v44  ;;  %v5526_v44 = vld [vmem:[#allocation26 + $0x48] sm:$0xff] }
 0xa9b   :  { %3766 = vmatpush.msrb.mxu0 %v5487_v61  ;;  %3791 = vmatpush.msrb.mxu1 %v5488_v30  ;;  %v5527_v61 = vld [vmem:[#allocation28 + $0x38] sm:$0xff]  ;;  %v5528_v30 = vld [vmem:[#allocation26 + $0x30] sm:$0xff] }
 0xa9d   :  { %3767 = vmatpush.msrb.mxu0 %v5489_v10  ;;  %3792 = vmatpush.msrb.mxu1 %v5490_v52  ;;  %v5529_v10 = vld [vmem:[#allocation26 + $0x38] sm:$0xff]  ;;  %v5530_v52 = vld [vmem:[#allocation28 + $0x28] sm:$0xff] }
 0xa9f   :  { %3768 = vmatpush.msrb.mxu0 %v5491_v12  ;;  %3793 = vmatpush.msrb.mxu1 %v5492_v24  ;;  %v5531_v12 = vld [vmem:[#allocation26 + $0x20] sm:$0xff]  ;;  %v5532_v24 = vld [vmem:[#allocation26 + $0x28] sm:$0xff] }
 0xaa1   :  { %3769 = vmatpush.msrb.mxu0 %v5493_v29  ;;  %3794 = vmatpush.msrb.mxu1 %v5494_v39  ;;  %v5533_v29 = vld [vmem:[#allocation28 + $0x18] sm:$0xff]  ;;  %v5534_v39 = vld [vmem:[#allocation26 + $0x10] sm:$0xff] }
 0xaa3   :  { %3770 = vmatpush.msrb.mxu0 %v5495_v28  ;;  %3795 = vmatpush.msrb.mxu1 %v5496_v45  ;;  %v5535_v28 = vld [vmem:[#allocation26 + $0x18] sm:$0xff]  ;;  %v5536_v45 = vld [vmem:[#allocation28 + $0x8] sm:$0xff] }
 0xaa5   :  { %3771 = vmatpush.msrb.mxu0 %v5497_v19  ;;  %3796 = vmatpush.msrb.mxu1 %v5498_v47  ;;  %v5537_v19 = vld [vmem:[#allocation26] sm:$0xff]  ;;  %v5538_v47 = vld [vmem:[#allocation26 + $0x8] sm:$0xff] }
 0xaa7   :  { %3772 = vmatpush.msrb.mxu0 %v5499_v5  ;;  %3797 = vmatpush.msrb.mxu1 %v5500_v60 }
 0xaa9   :  { %3773 = vmatpush.msrb.mxu0 %v5501_v51  ;;  %3798 = vmatpush.msrb.mxu1 %v5502_v50 }
 0xaab   :  { %3774 = vmatpush.msrb.mxu0 %v5503_v16  ;;  %3799 = vmatpush.msrb.mxu1 %v5504_v49 }
 0xaad   :  { %3775 = vmatpush.msrb.mxu0 %v5505_v35  ;;  %3800 = vmatpush.msrb.mxu1 %v5506_v58 }
 0xaaf   :  { %3776 = vmatpush.msrb.mxu0 %v5507_v33  ;;  %3801 = vmatpush.msrb.mxu1 %v5508_v25 }
 0xab1   :  { %3777 = vmatpush.msrb.mxu0 %v5509_v48  ;;  %3802 = vmatpush.msrb.mxu1 %v5510_v11 }
 0xab3   :  { %3778 = vmatpush.msrb.mxu0 %v5511_v34  ;;  %3803 = vmatpush.msrb.mxu1 %v5512_v9  ;;  %v5539_v9 = vld [vmem:[#allocation10] ss:$0 sm:$0xff] }
 0xaf1   :  { %v3611_v38 = vpop.f32.mrf.mxu0  ;;  %v3634_v31 = vpop.f32.mrf.mxu1 }
 0xaf2   :  { %v3640_v62 = vmax.f32 %v3611_v38, %v3634_v31 }
 0xaf4   :  { %v3642_v46 = vmul.f32 %v5513_v4, %v3640_v62  ;;  %v3987_v62 = vld [vmem:[%s8776_s6 + $0xf8] sm:$0xff] }
 0xaf6   :  { %v3644_v43 = vadd.f32 %v5514_v15, %v3642_v46  ;;  %v3985_v46 = vld [vmem:[%s8776_s6 + $0xe8] sm:$0xff] }
 0xaf8   :  { %v3647_v6 = vrot.slane %v3644_v43, 1  ;;  %3685 = vmatmul.f32.vlgmr.msra.gmra.mxu0 %v3644_v43  ;;  %v3689_v26 = vrot.slane %v3644_v43, 2  ;;  %v3712_v40 = vrot.slane %v3644_v43, 3  ;;  %v3735_v20 = vrot.slane %v3644_v43, 4 }
 0xaf9   :  { %v3614_v37 = vpop.f32.mrf.mxu0  ;;  %v3637_v54 = vpop.f32.mrf.mxu1  ;;  %3916 = vmatpush.msra.mxu0 %v5515_v55  ;;  %v3759_v17 = vrot.slane %v3644_v43, 5  ;;  %v3784_v63 = vrot.slane %v3644_v43, 6  ;;  %v5543_v55 = vld [vmem:[#allocation28 + $0x40] sm:$0xff] }
 0xafa   :  { %3665 = vmatmul.f32.vlgmr.msra.gmra.mxu2 %v3647_v6  ;;  %v3641_v36 = vmax.f32 %v3614_v37, %v3637_v54  ;;  %3707 = vmatmul.f32.vlgmr.msra.gmra.mxu1 %v3689_v26  ;;  %v5541_v37 = vld [vmem:[#allocation28 + $0x60] sm:$0xff]  ;;  %v5542_v54 = vld [vmem:[#allocation28 + $0x50] sm:$0xff] }
 0xafb   :  { %3730 = vmatmul.f32.vlgmr.msrb.gmra.mxu3 %v3712_v40  ;;  %3894 = vmatpush.msra.mxu2 %v5516_v13  ;;  %v5540_v40 = vld [vmem:[#allocation28 + $0x70] sm:$0xff] }
 0xafc   :  { %v3643_v56 = vmul.f32 %v5513_v4, %v3641_v36  ;;  %3936 = vmatpush.msra.mxu1 %v5517_v0  ;;  %3917 = vmatpush.msra.mxu0 %v5518_v7  ;;  %v5544_v36 = vld [vmem:[#allocation28 + $0x30] sm:$0xff]  ;;  %v5547_v0 = vld [vmem:[#allocation28] sm:$0xff] }
 0xafd   :  { %3895 = vmatpush.msra.mxu2 %v5519_v27  ;;  %v5546_v13 = vld [vmem:[#allocation28 + $0x10] sm:$0xff]  ;;  %v3984_v7 = vld [vmem:[%s8776_s6 + $0xe0] sm:$0xff] }
 0xafe   :  { %v3645_v2 = vadd.f32 %v5514_v15, %v3643_v56  ;;  %3937 = vmatpush.msra.mxu1 %v5520_v42  ;;  %3918 = vmatpush.msra.mxu0 %v5521_v53  ;;  %v3983_v15 = vld [vmem:[%s8776_s6 + $0xd8] sm:$0xff]  ;;  %v3986_v56 = vld [vmem:[%s8776_s6 + $0xf0] sm:$0xff]  ;;  %v3980_v27 = vld [vmem:[%s8776_s6 + $0xc0] sm:$0xff] }
 0xaff   :  { %3896 = vmatpush.msra.mxu2 %v5522_v8  ;;  %v3978_v42 = vld [vmem:[%s8776_s6 + $0xb0] sm:$0xff]  ;;  %v3979_v53 = vld [vmem:[%s8776_s6 + $0xb8] sm:$0xff]  ;;  %v3977_v8 = vld [vmem:[%s8776_s6 + $0xa8] sm:$0xff] }
 0xb00   :  { %v3760_v41 = vrot.slane %v3645_v2, 5  ;;  %v3785_v21 = vrot.slane %v3645_v2, 6  ;;  %3938 = vmatpush.msra.mxu1 %v5523_v3  ;;  %3919 = vmatpush.msra.mxu0 %v5524_v57  ;;  %v3981_v2 = vld [vmem:[%s8776_s6 + $0xc8] sm:$0xff]  ;;  %v3970_v3 = vld [vmem:[%s8776_s6 + $0x70] sm:$0xff]  ;;  %v3971_v57 = vld [vmem:[%s8776_s6 + $0x78] sm:$0xff] }
 0xb01   :  { %3897 = vmatpush.msra.mxu2 %v5525_v59  ;;  %v3968_v59 = vld [vmem:[%s8776_s6 + $0x60] sm:$0xff] }
 0xb02   :  { %3753 = vmatmul.f32.vlgmr.msrb.gmra.mxu2 %v3735_v20  ;;  %v3761_v18 = vsel %vm2525_vm12, %v3759_v17, %v3760_v41  ;;  %v3786_v1 = vsel %vm1537_vm8, %v3784_v63, %v3785_v21  ;;  %3939 = vmatpush.msra.mxu1 %v5526_v44  ;;  %v3976_v20 = vld [vmem:[%s8776_s6 + $0xa0] sm:$0xff]  ;;  %v3974_v41 = vld [vmem:[%s8776_s6 + $0x90] sm:$0xff]  ;;  %v3975_v21 = vld [vmem:[%s8776_s6 + $0x98] sm:$0xff] }
 0xb03   :  { %3779 = vmatmul.f32.vlgmr.msrb.gmra.mxu0 %v3761_v18  ;;  %3804 = vmatmul.f32.vlgmr.msrb.gmra.mxu1 %v3786_v1  ;;  %v3972_v17 = vld [vmem:[%s8776_s6 + $0x80] sm:$0xff]  ;;  %v3973_v63 = vld [vmem:[%s8776_s6 + $0x88] sm:$0xff]  ;;  %v3966_v1 = vld [vmem:[%s8776_s6 + $0x50] sm:$0xff] }
 0xb04   :  { %3898 = vmatpush.msra.mxu2 %v5527_v61  ;;  %3920 = vmatpush.msra.mxu0 %v5528_v30  ;;  %v3969_v18 = vld [vmem:[%s8776_s6 + $0x68] sm:$0xff]  ;;  %v3967_v44 = vld [vmem:[%s8776_s6 + $0x58] sm:$0xff]  ;;  %v3964_v61 = vld [vmem:[%s8776_s6 + $0x40] sm:$0xff] }
 0xb05   :  { %3940 = vmatpush.msra.mxu1 %v5529_v10  ;;  %v3965_v30 = vld [vmem:[%s8776_s6 + $0x48] sm:$0xff]  ;;  %v3962_v10 = vld [vmem:[%s8776_s6 + $0x30] sm:$0xff] }
 0xb06   :  { %3899 = vmatpush.msra.mxu2 %v5530_v52  ;;  %3921 = vmatpush.msra.mxu0 %v5531_v12  ;;  %v3963_v52 = vld [vmem:[%s8776_s6 + $0x38] sm:$0xff]  ;;  %v4030_v12 = vld [vmem:[#allocation29] sm:$0xff] }
 0xb07   :  { %3941 = vmatpush.msra.mxu1 %v5532_v24  ;;  %v4031_v24 = vld [vmem:[#allocation29 + $0x8] sm:$0xff] }
 0xb08   :  { %3900 = vmatpush.msra.mxu2 %v5533_v29  ;;  %3922 = vmatpush.msra.mxu0 %v5534_v39  ;;  %v3960_v29 = vld [vmem:[%s8776_s6 + $0x20] sm:$0xff]  ;;  %v3961_v39 = vld [vmem:[%s8776_s6 + $0x28] sm:$0xff] }
 0xb09   :  { %3942 = vmatpush.msra.mxu1 %v5535_v28  ;;  %v3958_v28 = vld [vmem:[%s8776_s6 + $0x10] sm:$0xff] }
 0xb0a   :  { %3901 = vmatpush.msra.mxu2 %v5536_v45  ;;  %3923 = vmatpush.msra.mxu0 %v5537_v19  ;;  %v3959_v45 = vld [vmem:[%s8776_s6 + $0x18] sm:$0xff]  ;;  %v3956_v19 = vld [vmem:[%s8776_s6] sm:$0xff] }
 0xb0b   :  { %3943 = vmatpush.msra.mxu1 %v5538_v47  ;;  %v3957_v47 = vld [vmem:[%s8776_s6 + $0x8] sm:$0xff] }
 0xb0c   :  { %4008 = vmatpush.msrb.mxu2 %v3987_v62  ;;  %4050 = vmatpush.msrb.mxu0 %v4030_v12  ;;  %v4129_v62 = vld [vmem:[#allocation32 + $0x70] sm:$0xff] }
 0xb0d   :  { %4070 = vmatpush.msrb.mxu1 %v4031_v24 }
 0xb0e   :  { %4009 = vmatpush.msrb.mxu2 %v3985_v46  ;;  %v4128_v46 = vld [vmem:[#allocation32 + $0x68] sm:$0xff] }
 0xb10   :  { %4010 = vmatpush.msrb.mxu2 %v3983_v15  ;;  %v4144_v15 = vld [vmem:[#allocation32 + $0xe8] sm:$0xff] }
 0xb12   :  { %4011 = vmatpush.msrb.mxu2 %v3981_v2  ;;  %v4136_v2 = vld [vmem:[#allocation32 + $0xa8] sm:$0xff] }
 0xb14   :  { %4012 = vmatpush.msrb.mxu2 %v3979_v53  ;;  %v4135_v53 = vld [vmem:[#allocation32 + $0xa0] sm:$0xff] }
 0xb16   :  { %4013 = vmatpush.msrb.mxu2 %v3977_v8  ;;  %v4134_v8 = vld [vmem:[#allocation32 + $0x98] sm:$0xff] }
 0xb18   :  { %4014 = vmatpush.msrb.mxu2 %v3975_v21  ;;  %v4133_v21 = vld [vmem:[#allocation32 + $0x90] sm:$0xff] }
 0xb1a   :  { %4015 = vmatpush.msrb.mxu2 %v3973_v63 }
 0xb1c   :  { %4016 = vmatpush.msrb.mxu2 %v3971_v57  ;;  %v4132_v57 = vld [vmem:[#allocation32 + $0x88] sm:$0xff] }
 0xb1e   :  { %4017 = vmatpush.msrb.mxu2 %v3969_v18 }
 0xb20   :  { %4018 = vmatpush.msrb.mxu2 %v3967_v44  ;;  %v4131_v44 = vld [vmem:[#allocation32 + $0x80] sm:$0xff] }
 0xb22   :  { %4019 = vmatpush.msrb.mxu2 %v3965_v30 }
 0xb24   :  { %4020 = vmatpush.msrb.mxu2 %v3963_v52  ;;  %v4215_v52 = vld [vmem:[#allocation35 + $0x70] sm:$0xff] }
 0xb26   :  { %4021 = vmatpush.msrb.mxu2 %v3961_v39  ;;  %v4077_v39 = vld [vmem:[#allocation31] ss:$4 sm:$0x3] }
 0xb28   :  { %4022 = vmatpush.msrb.mxu2 %v3959_v45 }
 0xb2a   :  { %4023 = vmatpush.msrb.mxu2 %v3957_v47 }
 0xb75   :  { %v3686_v5 = vpop.f32.mrf.mxu0 }
 0xb77   :  { %v3708_v50 = vpop.f32.mrf.mxu1 }
 0xb7d   :  { %v3666_v60 = vpop.f32.mrf.mxu2 }
 0xb7e   :  { %v3687_v51 = vadd.f32 %v3686_v5, %v3666_v60  ;;  %v3731_v49 = vpop.f32.mrf.mxu3 }
 0xb80   :  { %v3711_v16 = vadd.f32 %v3708_v50, %v3687_v51  ;;  %v3780_v25 = vpop.f32.mrf.mxu0  ;;  %v3805_v11 = vpop.f32.mrf.mxu1  ;;  %v5548_v50 = vld [vmem:[#allocation10 + $0x1] ss:$0 sm:$0xff] }
 0xb82   :  { %v3734_v35 = vadd.f32 %v3731_v49, %v3711_v16  ;;  %v5549_v49 = vld [vmem:[#allocation10 + $0x2] ss:$0 sm:$0xff] }
 0xb85   :  { %v3754_v58 = vpop.f32.mrf.mxu2 }
 0xb86   :  { %v3757_v33 = vadd.f32 %v3754_v58, %v3734_v35 }
 0xb88   :  { %v3783_v48 = vadd.f32 %v3780_v25, %v3757_v33  ;;  %v5103_v33 = vld [vmem:[#allocation25] ss:$0 sm:$0xff]  ;;  %v5099_v25 = vld [vmem:[%s8777_s12] ss:$0 sm:$0xff] }
 0xb8a   :  { %v3808_v34 = vadd.f32 %v3805_v11, %v3783_v48  ;;  %v8778_v48 = vld [vmem:[#allocation110_spill] sm:$0xff] }
 0xb8b   :  { %v1101_v11 = vadd.f32 %v5103_v33, %v8778_v48 }
 0xb8c   :  { %v3809_v38 = vadd.f32 %v5539_v9, %v3808_v34  ;;  %v8779_v34 = vld [vmem:[#allocation108_spill] sm:$0xff] }
 0xb8d   :  { %v948_v9 = vadd.f32 %v5099_v25, %v8779_v34 }
 0xb8e   :  { %v3811_v31 = vmin.f32 %v3809_v38, 0.0  ;;  %vm3810_vm8 = vcmp.gt.f32.partialorder %v3809_v38, 0.0 }
 0xb90   :  { %v3812_v4 = vmul.f32 1.442695, %v3811_v31  ;;  %v4146_v31 = vld [vmem:[#allocation32 + $0xf8] sm:$0xff] }
 0xb92   :  { %5220 = vpow2.f32 %v3812_v4  ;;  %v4145_v4 = vld [vmem:[#allocation32 + $0xf0] sm:$0xff] }
 0xb98   :  { %v5221_v43 = vpop.eup %5220 }
 0xb99   :  { %v4954_v6 = vadd.f32 -1.0, %v5221_v43  ;;  %v4127_v43 = vld [vmem:[#allocation32 + $0x60] sm:$0xff] }
 0xb9b   :  { %v3815_v26 = vsel %vm3810_vm8, %v3809_v38, %v4954_v6  ;;  %v4130_v38 = vld [vmem:[#allocation32 + $0x78] sm:$0xff]  ;;  %v4143_v6 = vld [vmem:[#allocation32 + $0xe0] sm:$0xff] }
 0xb9c   :  { %4955 = vmatpush.msk.msra.mxu3 %vm707_vm0, %v3815_v26 }
 0xb9d   :  { %4956 = vmatmul.msk.f32.vlgmr.msra.gmra.mxu3 %vm2602_vm14, %v7399_v32  ;;  %v5545_v32 = vld [vmem:[#allocation28 + $0x20] sm:$0xff] }
 0xb9e   :  { %4957 = vmatpush.msk.msrb.mxu3 %vm707_vm0, %v3815_v26  ;;  %v4126_v26 = vld [vmem:[#allocation32 + $0x58] sm:$0xff] }
 0xba0   :  { %3874 = vmatpush.msra.mxu3 %v5540_v40  ;;  %v4142_v40 = vld [vmem:[#allocation32 + $0xd8] sm:$0xff] }
 0xba2   :  { %3875 = vmatpush.msra.mxu3 %v5541_v37  ;;  %v4125_v37 = vld [vmem:[#allocation32 + $0x50] sm:$0xff] }
 0xba4   :  { %3876 = vmatpush.msra.mxu3 %v5542_v54  ;;  %v4141_v54 = vld [vmem:[#allocation32 + $0xd0] sm:$0xff] }
 0xba5   :  { %4958 = vmatmul.msk.f32.vlgmr.msrb.gmra.mxu3 %vm2602_vm14, %v7393_v14  ;;  %v3982_v14 = vld [vmem:[%s8776_s6 + $0xd0] sm:$0xff] }
 0xba6   :  { %3877 = vmatpush.msra.mxu3 %v5543_v55  ;;  %v4124_v55 = vld [vmem:[#allocation32 + $0x48] sm:$0xff] }
 0xba8   :  { %3878 = vmatpush.msra.mxu3 %v5544_v36  ;;  %v4140_v36 = vld [vmem:[#allocation32 + $0xc8] sm:$0xff] }
 0xbaa   :  { %3879 = vmatpush.msra.mxu3 %v5545_v32  ;;  %v4123_v32 = vld [vmem:[#allocation32 + $0x40] sm:$0xff] }
 0xbac   :  { %3880 = vmatpush.msra.mxu3 %v5546_v13  ;;  %v4139_v13 = vld [vmem:[#allocation32 + $0xc0] sm:$0xff] }
 0xbae   :  { %3881 = vmatpush.msra.mxu3 %v5547_v0  ;;  %v4138_v0 = vld [vmem:[#allocation32 + $0xb8] sm:$0xff] }
 0xbb0   :  { %3988 = vmatpush.msrb.mxu3 %v3986_v56  ;;  %v4122_v56 = vld [vmem:[#allocation32 + $0x38] sm:$0xff] }
 0xbb2   :  { %3989 = vmatpush.msrb.mxu3 %v3984_v7  ;;  %v4121_v7 = vld [vmem:[#allocation32 + $0x30] sm:$0xff] }
 0xbb4   :  { %3990 = vmatpush.msrb.mxu3 %v3982_v14  ;;  %v4137_v14 = vld [vmem:[#allocation32 + $0xb0] sm:$0xff] }
 0xbb6   :  { %3991 = vmatpush.msrb.mxu3 %v3980_v27  ;;  %v4120_v27 = vld [vmem:[#allocation32 + $0x28] sm:$0xff] }
 0xbb8   :  { %3992 = vmatpush.msrb.mxu3 %v3978_v42  ;;  %v4119_v42 = vld [vmem:[#allocation32 + $0x20] sm:$0xff] }
 0xbba   :  { %3993 = vmatpush.msrb.mxu3 %v3976_v20  ;;  %v4118_v20 = vld [vmem:[#allocation32 + $0x18] sm:$0xff] }
 0xbbc   :  { %3994 = vmatpush.msrb.mxu3 %v3974_v41  ;;  %v4117_v41 = vld [vmem:[#allocation32 + $0x10] sm:$0xff] }
 0xbbe   :  { %3995 = vmatpush.msrb.mxu3 %v3972_v17  ;;  %v4116_v17 = vld [vmem:[#allocation32 + $0x8] sm:$0xff] }
 0xbc0   :  { %3996 = vmatpush.msrb.mxu3 %v3970_v3 }
 0xbc2   :  { %3997 = vmatpush.msrb.mxu3 %v3968_v59 }
 0xbc4   :  { %3998 = vmatpush.msrb.mxu3 %v3966_v1  ;;  %v4115_v1 = vld [vmem:[#allocation32] sm:$0xff] }
 0xbc6   :  { %3999 = vmatpush.msrb.mxu3 %v3964_v61 }
 0xbc8   :  { %4000 = vmatpush.msrb.mxu3 %v3962_v10  ;;  %v4216_v10 = vld [vmem:[#allocation35 + $0x78] sm:$0xff] }
 0xbca   :  { %4001 = vmatpush.msrb.mxu3 %v3960_v29  ;;  %v4214_v29 = vld [vmem:[#allocation35 + $0x68] sm:$0xff] }
 0xbcc   :  { %4002 = vmatpush.msrb.mxu3 %v3958_v28  ;;  %v4213_v28 = vld [vmem:[#allocation35 + $0x60] sm:$0xff] }
 0xbce   :  { %4003 = vmatpush.msrb.mxu3 %v3956_v19 }
 0xc20   :  { %v3836_v5 = vpop.f32.mrf.mxu3 }
 0xc28   :  { %v3856_v60 = vpop.f32.mrf.mxu3 }
 0xc29   :  { %v3859_v51 = vmax.f32 %v3836_v5, %v3856_v60 }
 0xc2b   :  { %v3860_v16 = vmul.f32 %v5548_v50, %v3859_v51  ;;  %v4079_v51 = vperm.slane %v4077_v39, 0 }
 0xc2d   :  { %v3861_v35 = vadd.f32 %v5549_v49, %v3860_v16  ;;  %v4080_v16 = vperm.slane %v4077_v39, 1 }
 0xc2f   :  { %v3863_v58 = vrot.slane %v3861_v35, 1  ;;  %4961 = vmatmul.msk.f32.vlgmr.msra.gmra.mxu0 %vm753_vm3, %v3861_v35  ;;  %4962 = vmatmul.msk.f32.vlgmr.msra.gmra.mxu1 %vm753_vm3, %v3861_v35 }
 0xc30   :  { %4149 = vmatpush.msra.mxu0 %v4130_v38  ;;  %4169 = vmatpush.msra.mxu1 %v4146_v31  ;;  %v4107_v38 = vld [vmem:[#allocation31 + $0x2] ss:$4 sm:$0x3] }
 0xc31   :  { %4959 = vmatmul.msk.f32.vlgmr.msra.gmra.mxu3 %vm753_vm3, %v3863_v58  ;;  %4960 = vmatmul.msk.f32.vlgmr.msra.gmra.mxu2 %vm753_vm3, %v3863_v58 }
 0xc32   :  { %4150 = vmatpush.msra.mxu0 %v4129_v62  ;;  %4170 = vmatpush.msra.mxu1 %v4145_v4 }
 0xc33   :  { %4219 = vmatpush.msra.mxu3 %v4216_v10 }
 0xc34   :  { %4151 = vmatpush.msra.mxu0 %v4128_v46  ;;  %4171 = vmatpush.msra.mxu1 %v4144_v15 }
 0xc35   :  { %4220 = vmatpush.msra.mxu3 %v4215_v52  ;;  %v5111_v52 = vld [vmem:[#allocation34 + $0x1] ss:$0 sm:$0xff] }
 0xc36   :  { %4152 = vmatpush.msra.mxu0 %v4127_v43  ;;  %4172 = vmatpush.msra.mxu1 %v4143_v6  ;;  %v4109_v6 = vperm.slane %v4107_v38, 0 }
 0xc37   :  { %4963 = vmatmul.msk.f32.vlgmr.msrb.gmra.mxu0 %vm1038_vm2, %v1101_v11  ;;  %4964 = vmatmul.msk.f32.vlgmr.msrb.gmra.mxu1 %vm1038_vm2, %v1101_v11 }
 0xc38   :  { %4153 = vmatpush.msra.mxu0 %v4126_v26  ;;  %4173 = vmatpush.msra.mxu1 %v4142_v40  ;;  %v4110_v40 = vperm.slane %v4107_v38, 1 }
 0xc39   :  { %4004 = vmatmul.f32.vlgmr.msrb.gmra.mxu3 %v948_v9  ;;  %4024 = vmatmul.f32.vlgmr.msrb.gmra.mxu2 %v948_v9 }
 0xc3a   :  { %4154 = vmatpush.msra.mxu0 %v4125_v37  ;;  %4174 = vmatpush.msra.mxu1 %v4141_v54 }
 0xc3b   :  { %4221 = vmatpush.msra.mxu3 %v4214_v29 }
 0xc3c   :  { %4155 = vmatpush.msra.mxu0 %v4124_v55  ;;  %4175 = vmatpush.msra.mxu1 %v4140_v36 }
 0xc3d   :  { %4222 = vmatpush.msra.mxu3 %v4213_v28 }
 0xc3e   :  { %4156 = vmatpush.msra.mxu0 %v4123_v32  ;;  %4176 = vmatpush.msra.mxu1 %v4139_v13  ;;  %v4212_v13 = vld [vmem:[#allocation35 + $0x58] sm:$0xff] }
 0xc3f   :  { %4223 = vmatpush.msra.mxu3 %v4212_v13 }
 0xc40   :  { %4157 = vmatpush.msra.mxu0 %v4122_v56  ;;  %4177 = vmatpush.msra.mxu1 %v4138_v0  ;;  %v4211_v56 = vld [vmem:[#allocation35 + $0x50] sm:$0xff]  ;;  %v4210_v0 = vld [vmem:[#allocation35 + $0x48] sm:$0xff] }
 0xc41   :  { %4224 = vmatpush.msra.mxu3 %v4211_v56 }
 0xc42   :  { %4158 = vmatpush.msra.mxu0 %v4121_v7  ;;  %4178 = vmatpush.msra.mxu1 %v4137_v14  ;;  %v4209_v7 = vld [vmem:[#allocation35 + $0x40] sm:$0xff]  ;;  %v4208_v14 = vld [vmem:[#allocation35 + $0x38] sm:$0xff] }
 0xc43   :  { %4225 = vmatpush.msra.mxu3 %v4210_v0 }
 0xc44   :  { %4159 = vmatpush.msra.mxu0 %v4120_v27  ;;  %4179 = vmatpush.msra.mxu1 %v4136_v2  ;;  %v4207_v27 = vld [vmem:[#allocation35 + $0x30] sm:$0xff]  ;;  %v4206_v2 = vld [vmem:[#allocation35 + $0x28] sm:$0xff] }
 0xc45   :  { %4226 = vmatpush.msra.mxu3 %v4209_v7 }
 0xc46   :  { %4160 = vmatpush.msra.mxu0 %v4119_v42  ;;  %4180 = vmatpush.msra.mxu1 %v4135_v53  ;;  %v4205_v42 = vld [vmem:[#allocation35 + $0x20] sm:$0xff]  ;;  %v4204_v53 = vld [vmem:[#allocation35 + $0x18] sm:$0xff] }
 0xc47   :  { %4227 = vmatpush.msra.mxu3 %v4208_v14 }
 0xc48   :  { %4161 = vmatpush.msra.mxu0 %v4118_v20  ;;  %4181 = vmatpush.msra.mxu1 %v4134_v8  ;;  %v4203_v20 = vld [vmem:[#allocation35 + $0x10] sm:$0xff]  ;;  %v4202_v8 = vld [vmem:[#allocation35 + $0x8] sm:$0xff] }
 0xc49   :  { %4228 = vmatpush.msra.mxu3 %v4207_v27  ;;  %v5117_v27 = vld [vmem:[#allocation38 + $0x1] ss:$0 sm:$0xff] }
 0xc4a   :  { %4162 = vmatpush.msra.mxu0 %v4117_v41  ;;  %4182 = vmatpush.msra.mxu1 %v4133_v21  ;;  %v4201_v41 = vld [vmem:[#allocation35] sm:$0xff] }
 0xc4b   :  { %4229 = vmatpush.msra.mxu3 %v4206_v2  ;;  %v4267_v21 = vld [vmem:[%s8780_s13 + $0x78] sm:$0xff] }
 0xc4c   :  { %4163 = vmatpush.msra.mxu0 %v4116_v17  ;;  %4183 = vmatpush.msra.mxu1 %v4132_v57  ;;  %v4266_v17 = vld [vmem:[%s8780_s13 + $0x70] sm:$0xff]  ;;  %v5110_v57 = vld [vmem:[#allocation34] ss:$0 sm:$0xff] }
 0xc4d   :  { %4230 = vmatpush.msra.mxu3 %v4205_v42  ;;  %4270 = vmatpush.msra.mxu2 %v4267_v21  ;;  %v5118_v42 = vld [vmem:[#allocation38 + $0x2] ss:$0 sm:$0xff]  ;;  %v4354_v21 = vld [vmem:[#allocation43 + $0x30] sm:$0xff] }
 0xc4e   :  { %4164 = vmatpush.msra.mxu0 %v4115_v1  ;;  %4184 = vmatpush.msra.mxu1 %v4131_v44 }
 0xc4f   :  { %4231 = vmatpush.msra.mxu3 %v4204_v53  ;;  %4271 = vmatpush.msra.mxu2 %v4266_v17  ;;  %v4353_v17 = vld [vmem:[#allocation43 + $0x28] sm:$0xff] }
 0xc51   :  { %4232 = vmatpush.msra.mxu3 %v4203_v20 }
 0xc53   :  { %4233 = vmatpush.msra.mxu3 %v4202_v8 }
 0xc55   :  { %4234 = vmatpush.msra.mxu3 %v4201_v41  ;;  %v4355_v41 = vld [vmem:[#allocation43 + $0x38] sm:$0xff] }
 0xc56   :  { %4369 = vmatpush.msrb.mxu1 %v4355_v41  ;;  %v4492_v41 = vld [vmem:[#allocation52 + $0x30] sm:$0xff] }
 0xc58   :  { %4370 = vmatpush.msrb.mxu1 %v4354_v21  ;;  %v4491_v21 = vld [vmem:[#allocation52 + $0x28] sm:$0xff] }
 0xc5a   :  { %4371 = vmatpush.msrb.mxu1 %v4353_v17  ;;  %v4490_v17 = vld [vmem:[#allocation52 + $0x20] sm:$0xff] }
 0xcac   :  { %v3925_v63 = vpop.f32.mrf.mxu0  ;;  %v3945_v3 = vpop.f32.mrf.mxu1 }
 0xcb4   :  { %v3883_v59 = vpop.f32.mrf.mxu3  ;;  %v3903_v18 = vpop.f32.mrf.mxu2 }
 0xcb5   :  { %v3926_v61 = vadd.f32 %v3925_v63, %v3883_v59  ;;  %v3946_v30 = vadd.f32 %v3945_v3, %v3903_v18  ;;  %v4052_v49 = vpop.f32.mrf.mxu0  ;;  %v4072_v35 = vpop.f32.mrf.mxu1  ;;  %v4265_v63 = vld [vmem:[%s8780_s13 + $0x68] sm:$0xff]  ;;  %v4264_v3 = vld [vmem:[%s8780_s13 + $0x60] sm:$0xff] }
 0xcb6   :  { %4272 = vmatpush.msra.mxu2 %v4265_v63  ;;  %v4352_v63 = vld [vmem:[#allocation43 + $0x20] sm:$0xff] }
 0xcb7   :  { %v3950_v12 = vrot.slane %v3926_v61, 7  ;;  %v3951_v24 = vrot.slane %v3946_v30, 7  ;;  %4372 = vmatpush.msrb.mxu1 %v4352_v63  ;;  %v4489_v63 = vld [vmem:[#allocation52 + $0x18] sm:$0xff] }
 0xcb8   :  { %4273 = vmatpush.msra.mxu2 %v4264_v3  ;;  %v4351_v3 = vld [vmem:[#allocation43 + $0x18] sm:$0xff] }
 0xcb9   :  { %v3954_v45 = vsel %vm959_vm6, %v8337_v22, %v3950_v12  ;;  %v3955_v47 = vsel %vm959_vm6, %v8339_v23, %v3951_v24  ;;  %v4098_v23 = vld [vmem:[#allocation31 + $0x1] ss:$4 sm:$0x3]  ;;  %v5112_v24 = vld [vmem:[#allocation34 + $0x2] ss:$0 sm:$0xff]  ;;  %4373 = vmatpush.msrb.mxu1 %v4351_v3  ;;  %v4488_v3 = vld [vmem:[#allocation52 + $0x10] sm:$0xff] }
 0xcba   :  { %v4100_v62 = vperm.slane %v4098_v23, 0  ;;  %v4101_v15 = vperm.slane %v4098_v23, 1  ;;  %v5114_v23 = vld [vmem:[#allocation37 + $0x1] ss:$0 sm:$0xff] }
 0xcbc   :  { %v4005_v19 = vpop.f32.mrf.mxu3  ;;  %v4025_v5 = vpop.f32.mrf.mxu2 }
 0xcbd   :  { %v4028_v60 = vadd.f32 %v4005_v19, %v3954_v45  ;;  %v4029_v50 = vadd.f32 %v4025_v5, %v3955_v47  ;;  %v4263_v45 = vld [vmem:[%s8780_s13 + $0x58] sm:$0xff]  ;;  %v4262_v19 = vld [vmem:[%s8780_s13 + $0x50] sm:$0xff]  ;;  %v4261_v47 = vld [vmem:[%s8780_s13 + $0x48] sm:$0xff] }
 0xcbe   :  { %4274 = vmatpush.msra.mxu2 %v4263_v45  ;;  %v4260_v5 = vld [vmem:[%s8780_s13 + $0x40] sm:$0xff] }
 0xcbf   :  { %v4075_v58 = vadd.f32 %v4052_v49, %v4028_v60  ;;  %v4076_v33 = vadd.f32 %v4072_v35, %v4029_v50  ;;  %v4259_v60 = vld [vmem:[%s8780_s13 + $0x38] sm:$0xff]  ;;  %v4257_v50 = vld [vmem:[%s8780_s13 + $0x28] sm:$0xff]  ;;  %v4254_v35 = vld [vmem:[%s8780_s13 + $0x10] sm:$0xff] }
 0xcc0   :  { %4275 = vmatpush.msra.mxu2 %v4262_v19  ;;  %v4255_v49 = vld [vmem:[%s8780_s13 + $0x18] sm:$0xff] }
 0xcc1   :  { %v4083_v25 = vadd.f32 %v4079_v51, %v4075_v58  ;;  %v4084_v48 = vadd.f32 %v4080_v16, %v4076_v33  ;;  %v4258_v51 = vld [vmem:[%s8780_s13 + $0x30] sm:$0xff]  ;;  %v4256_v16 = vld [vmem:[%s8780_s13 + $0x20] sm:$0xff]  ;;  %v4253_v58 = vld [vmem:[%s8780_s13 + $0x8] sm:$0xff] }
 0xcc2   :  { %4276 = vmatpush.msra.mxu2 %v4261_v47  ;;  %v4252_v33 = vld [vmem:[%s8780_s13] sm:$0xff] }
 0xcc3   :  { %v4087_v11 = vmin.f32 %v4083_v25, 0.0  ;;  %v4088_v34 = vmin.f32 %v4084_v48, 0.0  ;;  %vm4085_vm0 = vcmp.gt.f32.partialorder %v4083_v25, 0.0  ;;  %vm4086_vm6 = vcmp.gt.f32.partialorder %v4084_v48, 0.0  ;;  %v4401_v47 = vld [vmem:[#allocation46 + $0x38] sm:$0xff] }
 0xcc4   :  { %4277 = vmatpush.msra.mxu2 %v4260_v5  ;;  %4415 = vmatpush.msrb.mxu3 %v4401_v47  ;;  %v4400_v5 = vld [vmem:[#allocation46 + $0x30] sm:$0xff] }
 0xcc5   :  { %v4089_v22 = vmul.f32 1.442695, %v4087_v11  ;;  %v4091_v9 = vmul.f32 1.442695, %v4088_v34 }
 0xcc6   :  { %4278 = vmatpush.msra.mxu2 %v4259_v60  ;;  %4416 = vmatpush.msrb.mxu3 %v4400_v5  ;;  %v4399_v60 = vld [vmem:[#allocation46 + $0x28] sm:$0xff] }
 0xcc7   :  { %5222 = vpow2.f32 %v4089_v22 }
 0xcc8   :  { %5224 = vpow2.f32 %v4091_v9  ;;  %4279 = vmatpush.msra.mxu2 %v4258_v51  ;;  %4417 = vmatpush.msrb.mxu3 %v4399_v60  ;;  %v4398_v51 = vld [vmem:[#allocation46 + $0x20] sm:$0xff] }
 0xcca   :  { %4280 = vmatpush.msra.mxu2 %v4257_v50  ;;  %4418 = vmatpush.msrb.mxu3 %v4398_v51  ;;  %v4397_v50 = vld [vmem:[#allocation46 + $0x18] sm:$0xff] }
 0xccc   :  { %4281 = vmatpush.msra.mxu2 %v4256_v16  ;;  %4419 = vmatpush.msrb.mxu3 %v4397_v50  ;;  %v4396_v16 = vld [vmem:[#allocation46 + $0x10] sm:$0xff] }
 0xccd   :  { %v5223_v31 = vpop.eup %5222 }
 0xcce   :  { %v5225_v4 = vpop.eup %5224  ;;  %v4965_v46 = vadd.f32 -1.0, %v5223_v31  ;;  %4282 = vmatpush.msra.mxu2 %v4255_v49  ;;  %v5115_v31 = vld [vmem:[#allocation37 + $0x2] ss:$0 sm:$0xff]  ;;  %4420 = vmatpush.msrb.mxu3 %v4396_v16  ;;  %v4395_v49 = vld [vmem:[#allocation46 + $0x8] sm:$0xff] }
 0xccf   :  { %v4966_v43 = vadd.f32 -1.0, %v5225_v4 }
 0xcd0   :  { %v4095_v26 = vsel %vm4085_vm0, %v4083_v25, %v4965_v46  ;;  %4283 = vmatpush.msra.mxu2 %v4254_v35  ;;  %v5113_v25 = vld [vmem:[#allocation37] ss:$0 sm:$0xff]  ;;  %v4394_v35 = vld [vmem:[#allocation46] sm:$0xff]  ;;  %4421 = vmatpush.msrb.mxu3 %v4395_v49 }
 0xcd1   :  { %v4104_v37 = vmul.f32 %v4100_v62, %v4095_v26  ;;  %v4096_v54 = vsel %vm4086_vm6, %v4084_v48, %v4966_v43  ;;  %v4309_v43 = vld [vmem:[#allocation40 + $0x38] sm:$0xff]  ;;  %v4307_v26 = vld [vmem:[#allocation40 + $0x28] sm:$0xff] }
 0xcd2   :  { %v4105_v55 = vmul.f32 %v4101_v15, %v4096_v54  ;;  %4284 = vmatpush.msra.mxu2 %v4253_v58  ;;  %4323 = vmatpush.msrb.mxu0 %v4309_v43  ;;  %v4304_v54 = vld [vmem:[#allocation40 + $0x10] sm:$0xff]  ;;  %v5122_v58 = vld [vmem:[#allocation44] ss:$0 sm:$0xff] }
 0xcd3   :  { %v4113_v36 = vadd.f32 %v4109_v6, %v4104_v37  ;;  %v4308_v6 = vld [vmem:[#allocation40 + $0x30] sm:$0xff]  ;;  %v4305_v37 = vld [vmem:[#allocation40 + $0x18] sm:$0xff]  ;;  %4422 = vmatpush.msrb.mxu3 %v4394_v35 }
 0xcd4   :  { %v4114_v32 = vadd.f32 %v4110_v40, %v4105_v55  ;;  %4285 = vmatpush.msra.mxu2 %v4252_v33  ;;  %4324 = vmatpush.msrb.mxu0 %v4308_v6  ;;  %v4306_v40 = vld [vmem:[#allocation40 + $0x20] sm:$0xff]  ;;  %v4303_v55 = vld [vmem:[#allocation40 + $0x8] sm:$0xff]  ;;  %v4445_v43 = vld [vmem:[#allocation49 + $0x28] sm:$0xff] }
 0xcd5   :  { %4165 = vmatmul.f32.vlgmr.msra.gmra.mxu0 %v4113_v36  ;;  %v4302_v36 = vld [vmem:[#allocation40] sm:$0xff]  ;;  %v4444_v6 = vld [vmem:[#allocation49 + $0x20] sm:$0xff] }
 0xcd6   :  { %4185 = vmatmul.f32.vlgmr.msra.gmra.mxu1 %v4114_v32  ;;  %4325 = vmatpush.msrb.mxu0 %v4307_v26  ;;  %v5116_v32 = vld [vmem:[#allocation38] ss:$0 sm:$0xff]  ;;  %v4443_v26 = vld [vmem:[#allocation49 + $0x18] sm:$0xff] }
 0xcd8   :  { %4326 = vmatpush.msrb.mxu0 %v4306_v40  ;;  %v4442_v40 = vld [vmem:[#allocation49 + $0x10] sm:$0xff] }
 0xcda   :  { %4327 = vmatpush.msrb.mxu0 %v4305_v37  ;;  %v4441_v37 = vld [vmem:[#allocation49 + $0x8] sm:$0xff] }
 0xcdc   :  { %4328 = vmatpush.msrb.mxu0 %v4304_v54  ;;  %v4440_v54 = vld [vmem:[#allocation49] sm:$0xff] }
 0xcde   :  { %4329 = vmatpush.msrb.mxu0 %v4303_v55  ;;  %v5125_v55 = vld [vmem:[#allocation47] ss:$0 sm:$0xff] }
 0xce0   :  { %4330 = vmatpush.msrb.mxu0 %v4302_v36 }
 0xd52   :  { %v4166_v59 = vpop.f32.mrf.mxu0 }
 0xd53   :  { %v4167_v18 = vadd.f32 %v5110_v57, %v4166_v59  ;;  %v4186_v1 = vpop.f32.mrf.mxu1  ;;  %v4350_v57 = vld [vmem:[#allocation43 + $0x10] sm:$0xff]  ;;  %v4349_v59 = vld [vmem:[#allocation43 + $0x8] sm:$0xff] }
 0xd54   :  { %4374 = vmatpush.msrb.mxu1 %v4350_v57  ;;  %v4487_v57 = vld [vmem:[#allocation52 + $0x8] sm:$0xff] }
 0xd55   :  { %v4187_v44 = vadd.f32 %v4186_v1, %v4167_v18  ;;  %v4348_v18 = vld [vmem:[#allocation43] sm:$0xff]  ;;  %v5119_v1 = vld [vmem:[#allocation41] ss:$0 sm:$0xff] }
 0xd56   :  { %4375 = vmatpush.msrb.mxu1 %v4349_v59  ;;  %v4486_v59 = vld [vmem:[#allocation52] sm:$0xff] }
 0xd57   :  { %v4190_v61 = vmin.f32 %v4187_v44, 0.0  ;;  %vm4189_vm2 = vcmp.gt.f32.partialorder %v4187_v44, 0.0 }
 0xd58   :  { %4376 = vmatpush.msrb.mxu1 %v4348_v18  ;;  %v5128_v18 = vld [vmem:[#allocation50] ss:$0 sm:$0xff] }
 0xd59   :  { %v4191_v30 = vmul.f32 1.442695, %v4190_v61 }
 0xd5b   :  { %5226 = vpow2.f32 %v4191_v30 }
 0xd61   :  { %v5227_v10 = vpop.eup %5226 }
 0xd62   :  { %v4967_v12 = vadd.f32 -1.0, %v5227_v10 }
 0xd64   :  { %v4194_v29 = vsel %vm4189_vm2, %v4187_v44, %v4967_v12  ;;  %v5120_v12 = vld [vmem:[#allocation41 + $0x1] ss:$0 sm:$0xff] }
 0xd65   :  { %v4197_v39 = vmul.f32 %v5111_v52, %v4194_v29  ;;  %v5121_v29 = vld [vmem:[#allocation41 + $0x2] ss:$0 sm:$0xff] }
 0xd67   :  { %v4200_v28 = vadd.f32 %v5112_v24, %v4197_v39 }
 0xd69   :  { %4235 = vmatmul.f32.vlgmr.msra.gmra.mxu3 %v4200_v28 }
 0xdec   :  { %v4236_v48 = vpop.f32.mrf.mxu3 }
 0xded   :  { %v4237_v11 = vadd.f32 %v5113_v25, %v4236_v48 }
 0xdef   :  { %v4240_v34 = vmin.f32 %v4237_v11, 0.0  ;;  %vm4239_vm1 = vcmp.gt.f32.partialorder %v4237_v11, 0.0 }
 0xdf1   :  { %v4241_v22 = vmul.f32 1.442695, %v4240_v34 }
 0xdf3   :  { %5228 = vpow2.f32 %v4241_v22  ;;  %v5123_v22 = vld [vmem:[#allocation44 + $0x1] ss:$0 sm:$0xff] }
 0xdf9   :  { %v5229_v9 = vpop.eup %5228 }
 0xdfa   :  { %v4968_v38 = vadd.f32 -1.0, %v5229_v9 }
 0xdfc   :  { %v4244_v62 = vsel %vm4239_vm1, %v4237_v11, %v4968_v38 }
 0xdfd   :  { %v4247_v4 = vmul.f32 %v5114_v23, %v4244_v62  ;;  %v5124_v23 = vld [vmem:[#allocation44 + $0x2] ss:$0 sm:$0xff] }
 0xdff   :  { %v4250_v46 = vadd.f32 %v5115_v31, %v4247_v4 }
 0xe01   :  { %v4251_v15 = vadd.f32 %v4250_v46, %v4200_v28  ;;  %v4447_v46 = vld [vmem:[#allocation49 + $0x38] sm:$0xff] }
 0xe02   :  { %4461 = vmatpush.msra.mxu0 %v4447_v46 }
 0xe03   :  { %4286 = vmatmul.f32.vlgmr.msra.gmra.mxu2 %v4251_v15  ;;  %v4446_v15 = vld [vmem:[#allocation49 + $0x30] sm:$0xff] }
 0xe04   :  { %4462 = vmatpush.msra.mxu0 %v4446_v15 }
 0xe06   :  { %4463 = vmatpush.msra.mxu0 %v4445_v43 }
 0xe08   :  { %4464 = vmatpush.msra.mxu0 %v4444_v6 }
 0xe0a   :  { %4465 = vmatpush.msra.mxu0 %v4443_v26 }
 0xe0c   :  { %4466 = vmatpush.msra.mxu0 %v4442_v40 }
 0xe0e   :  { %4467 = vmatpush.msra.mxu0 %v4441_v37 }
 0xe10   :  { %4468 = vmatpush.msra.mxu0 %v4440_v54 }
 0xe86   :  { %v4287_v13 = vpop.f32.mrf.mxu2 }
 0xe87   :  { %v4288_v56 = vadd.f32 %v5116_v32, %v4287_v13 }
 0xe89   :  { %v4291_v0 = vmin.f32 %v4288_v56, 0.0  ;;  %vm4290_vm11 = vcmp.gt.f32.partialorder %v4288_v56, 0.0 }
 0xe8b   :  { %v4292_v7 = vmul.f32 1.442695, %v4291_v0 }
 0xe8d   :  { %5230 = vpow2.f32 %v4292_v7  ;;  %v5126_v7 = vld [vmem:[#allocation47 + $0x1] ss:$0 sm:$0xff] }
 0xe93   :  { %v5231_v14 = vpop.eup %5230 }
 0xe94   :  { %v4969_v2 = vadd.f32 -1.0, %v5231_v14 }
 0xe96   :  { %v4295_v53 = vsel %vm4290_vm11, %v4288_v56, %v4969_v2 }
 0xe97   :  { %v4298_v20 = vmul.f32 %v5117_v27, %v4295_v53  ;;  %v5127_v27 = vld [vmem:[#allocation47 + $0x2] ss:$0 sm:$0xff] }
 0xe99   :  { %v4301_v8 = vadd.f32 %v5118_v42, %v4298_v20 }
 0xe9b   :  { %4970 = vmatmul.msk.f32.vlgmr.msrb.gmra.mxu0 %vm753_vm3, %v4301_v8 }
 0xf18   :  { %v4332_v44 = vpop.f32.mrf.mxu0 }
 0xf19   :  { %v4333_v61 = vadd.f32 %v5119_v1, %v4332_v44 }
 0xf1b   :  { %v4336_v30 = vmin.f32 %v4333_v61, 0.0  ;;  %vm4335_vm12 = vcmp.gt.f32.partialorder %v4333_v61, 0.0 }
 0xf1d   :  { %v4337_v10 = vmul.f32 1.442695, %v4336_v30 }
 0xf1f   :  { %5232 = vpow2.f32 %v4337_v10 }
 0xf25   :  { %v5233_v52 = vpop.eup %5232 }
 0xf26   :  { %v4971_v24 = vadd.f32 -1.0, %v5233_v52  ;;  %v5129_v52 = vld [vmem:[#allocation50 + $0x1] ss:$0 sm:$0xff] }
 0xf28   :  { %v4340_v39 = vsel %vm4335_vm12, %v4333_v61, %v4971_v24  ;;  %v5130_v24 = vld [vmem:[#allocation50 + $0x2] ss:$0 sm:$0xff] }
 0xf29   :  { %v4343_v28 = vmul.f32 %v5120_v12, %v4340_v39 }
 0xf2b   :  { %v4346_v45 = vadd.f32 %v5121_v29, %v4343_v28 }
 0xf2d   :  { %v4347_v19 = vadd.f32 %v4346_v45, %v4301_v8  ;;  %v4493_v8 = vld [vmem:[#allocation52 + $0x38] sm:$0xff] }
 0xf2e   :  { %4509 = vmatpush.msra.mxu1 %v4493_v8 }
 0xf2f   :  { %4972 = vmatmul.msk.f32.vlgmr.msrb.gmra.mxu1 %vm753_vm3, %v4347_v19 }
 0xf30   :  { %4510 = vmatpush.msra.mxu1 %v4492_v41 }
 0xf32   :  { %4511 = vmatpush.msra.mxu1 %v4491_v21 }
 0xf34   :  { %4512 = vmatpush.msra.mxu1 %v4490_v17 }
 0xf36   :  { %4513 = vmatpush.msra.mxu1 %v4489_v63 }
 0xf38   :  { %4514 = vmatpush.msra.mxu1 %v4488_v3 }
 0xf3a   :  { %4515 = vmatpush.msra.mxu1 %v4487_v57 }
 0xf3c   :  { %4516 = vmatpush.msra.mxu1 %v4486_v59 }
 0xfac   :  { %v4378_v33 = vpop.f32.mrf.mxu1 }
 0xfad   :  { %v4379_v25 = vadd.f32 %v5122_v58, %v4378_v33 }
 0xfaf   :  { %v4382_v48 = vmin.f32 %v4379_v25, 0.0  ;;  %vm4381_vm14 = vcmp.gt.f32.partialorder %v4379_v25, 0.0 }
 0xfb1   :  { %v4383_v11 = vmul.f32 1.442695, %v4382_v48 }
 0xfb3   :  { %5234 = vpow2.f32 %v4383_v11 }
 0xfb9   :  { %v5235_v34 = vpop.eup %5234 }
 0xfba   :  { %v4973_v9 = vadd.f32 -1.0, %v5235_v34 }
 0xfbc   :  { %v4386_v38 = vsel %vm4381_vm14, %v4379_v25, %v4973_v9 }
 0xfbd   :  { %v4389_v31 = vmul.f32 %v5123_v22, %v4386_v38 }
 0xfbf   :  { %v4392_v62 = vadd.f32 %v5124_v23, %v4389_v31 }
 0xfc1   :  { %v4393_v4 = vadd.f32 %v4392_v62, %v4347_v19  ;;  %v5131_v19 = vld [vmem:[#allocation53] ss:$0 sm:$0xff] }
 0xfc3   :  { %4974 = vmatmul.msk.f32.vlgmr.msrb.gmra.mxu3 %vm753_vm3, %v4393_v4 }
0x1046   :  { %v4424_v36 = vpop.f32.mrf.mxu3 }
0x1047   :  { %v4425_v32 = vadd.f32 %v5125_v55, %v4424_v36 }
0x1049   :  { %v4428_v13 = vmin.f32 %v4425_v32, 0.0  ;;  %vm4427_vm10 = vcmp.gt.f32.partialorder %v4425_v32, 0.0 }
0x104b   :  { %v4429_v56 = vmul.f32 1.442695, %v4428_v13 }
0x104d   :  { %5236 = vpow2.f32 %v4429_v56 }
0x1053   :  { %v5237_v0 = vpop.eup %5236 }
0x1054   :  { %v4975_v14 = vadd.f32 -1.0, %v5237_v0 }
0x1056   :  { %v4432_v2 = vsel %vm4427_vm10, %v4425_v32, %v4975_v14 }
0x1057   :  { %v4435_v42 = vmul.f32 %v5126_v7, %v4432_v2 }
0x1059   :  { %v4438_v53 = vadd.f32 %v5127_v27, %v4435_v42 }
0x105b   :  { %v4439_v20 = vadd.f32 %v4438_v53, %v4393_v4 }
0x105d   :  { %4976 = vmatmul.msk.f32.vlgmr.msra.gmra.mxu0 %vm753_vm3, %v4439_v20 }
0x10da   :  { %v4470_v1 = vpop.f32.mrf.mxu0 }
0x10db   :  { %v4471_v44 = vadd.f32 %v5128_v18, %v4470_v1 }
0x10dd   :  { %v4474_v61 = vmin.f32 %v4471_v44, 0.0  ;;  %vm4473_vm13 = vcmp.gt.f32.partialorder %v4471_v44, 0.0 }
0x10df   :  { %v4475_v30 = vmul.f32 1.442695, %v4474_v61 }
0x10e1   :  { %5238 = vpow2.f32 %v4475_v30 }
0x10e7   :  { %v5239_v10 = vpop.eup %5238 }
0x10e8   :  { %v4977_v12 = vadd.f32 -1.0, %v5239_v10 }
0x10ea   :  { %v4478_v29 = vsel %vm4473_vm13, %v4471_v44, %v4977_v12 }
0x10eb   :  { %v4481_v39 = vmul.f32 %v5129_v52, %v4478_v29 }
0x10ed   :  { %v4484_v28 = vadd.f32 %v5130_v24, %v4481_v39 }
0x10ef   :  { %v4485_v45 = vadd.f32 %v4484_v28, %v4439_v20 }
0x10f1   :  { %4978 = vmatmul.msk.f32.vlgmr.msra.gmra.mxu1 %vm753_vm3, %v4485_v45 }
0x116e   :  { %v4518_v47 = vpop.f32.mrf.mxu1 }
0x116f   :  { %v4519_v5 = vadd.f32 %v5131_v19, %v4518_v47 }
0x1171   :  { %4522 = vst.msk [vmem:[#allocation55] sm:$0x3] %vm4521_vm7, %v4519_v5 }
0x1172   :  { %6389 = shalt.err (!%p6386_p6)
}
0x1173   :  { %4533 = dma.vmem_to_hbm [thread:$0]  %s4529_s0, 32, %s4531_s16, [#allocation4]  }
0x1174   :  { %6426 = dma.done.wait [#allocation4], 32  }
0x1175   :  { %6427 = vsyncadd [#allocation4], 4294967264 }
0x1176   :  { %4538 = vsyncpa [#allocation3], 1 }
0x1177   :  { %4539 = vsyncpa [#allocation6], 1 }
0x1178   :  { %4540 = vsyncpa [#allocation9], 1 }
0x1179   :  { %4541 = vsyncpa [#allocation12], 1 }
0x117a   :  { %4542 = vsyncpa [#allocation15], 1 }
0x117b   :  { %4543 = vsyncpa [#allocation18], 1 }
0x117c   :  { %4544 = vsyncpa [#allocation21], 1 }
0x117d   :  { %4545 = vsyncpa [#allocation24], 1 }
0x117e   :  { %4546 = vsyncpa [#allocation27], 1 }
0x117f   :  { %4547 = vsyncpa [#allocation30], 1 }
0x1180   :  { %4548 = vsyncpa [#allocation33], 1 }
0x1181   :  { %4549 = vsyncpa [#allocation36], 1 }
0x1182   :  { %4550 = vsyncpa [#allocation39], 1 }
0x1183   :  { %4551 = vsyncpa [#allocation42], 1 }
0x1184   :  { %4552 = vsyncpa [#allocation45], 1 }
0x1185   :  { %4553 = vsyncpa [#allocation48], 1 }
0x1186   :  { %4554 = vsyncpa [#allocation51], 1 }
0x1187   :  { %4555 = vsyncpa [#allocation54], 1 }
0x1188   :  { %4556 = vsyncpa [#allocation4], 1 }

</bundles_post_ra>
